<compile_context>
chip_gen: v7x
topology: tpu7x:2x2x1
jax: 0.10.0
libtpu: 0.0.40
codegen_flags: <defaults>
</compile_context>

<pallas_src>
import functools
import math

import jax
import jax.numpy as jnp
from jax import lax
from jax.experimental import pallas as pl
from jax.experimental.pallas import tpu as pltpu

LEAKY_SLOPE = 0.2

# Half-pixel bilinear 2x weights per output parity for pre-grid taps (r-p) in {0,1}.
_BWT = ((0.25, 0.75), (0.75, 0.25))

# For output parity p: which original 3x3 kernel rows hit pre-grid tap r when the
# nearest-exact 2x upsample is folded into the conv.
_TAPS = (
    ((0,), (1, 2), ()),    # parity 0
    ((), (0, 1), (2,)),    # parity 1
)


def _bilinear_tap_coefs(r, c):
    """Per-phase scalar coefficient of pre-grid tap (r, c) in the 2x bilinear."""
    vals = []
    for py in range(2):
        for px in range(2):
            a, b = r - py, c - px
            v = _BWT[py][a] * _BWT[px][b] if (0 <= a <= 1 and 0 <= b <= 1) else 0.0
            vals.append(float(v))
    return vals


# ----------------------------------------------------------------------------
# Fused decoder-block kernel
# ----------------------------------------------------------------------------
def _block_kernel(*refs, H, W, TH, Cin, Cout, D, slope, first):
    """One decoder block, H-tiled.  Grid = (batch, H // TH).

    Inputs (per batch element, full height, fetched once per image):
      feat   : (1, H, W, Cin)  bf16   pre-upsample features
      [first]  w0 (Cin, D) bf16, b0 (1, D) f32   -- fused skip_convs[0]
      [else]   oprev (1, H, W, D) f32            -- running output
      wbig   : (9*Cin, 4*Cout) bf16   upsample-folded conv weights
      bbig   : (1, 4*Cout)     f32
      wskip  : (4*Cout, 4*D)   bf16   block-diagonal 1x1 skip conv
      bskip  : (1, 4*D)        f32
    Outputs (per H-tile, phase packed along lanes [p00|p01|p10|p11]):
      feat_out : (1, TH, W, 4*Cout) bf16
      out      : (1, TH, W, 4*D)    f32
    Scratch (per image, built at tile 0):
      fcol  : (H+2, W, 3*Cin)   bf16
      opad4 : (H+2, W+2, 4*D)   f32
    """
    if first:
        (feat_ref, w0_ref, b0_ref, wbig_ref, bbig_ref, wskip_ref, bskip_ref,
         feat_out_ref, out_ref, fcol_ref, opad4_ref) = refs
    else:
        (feat_ref, oprev_ref, wbig_ref, bbig_ref, wskip_ref, bskip_ref,
         feat_out_ref, out_ref, fcol_ref, opad4_ref) = refs

    t = pl.program_id(1)

    # ---- once per image: column-expanded zero-padded features and the
    # ---- edge-padded, phase-tiled previous output, both resident in VMEM.
    @pl.when(t == 0)
    def _build_scratch():
        # fcol[y, x, c*Cin:(c+1)*Cin] = zero_pad(feat)[y, x + c]
        fcol_ref[...] = jnp.zeros((H + 2, W, 3 * Cin), jnp.bfloat16)
        fcol_ref[1:H + 1, 1:W, 0:Cin] = feat_ref[0, :, 0:W - 1, :]
        fcol_ref[1:H + 1, :, Cin:2 * Cin] = feat_ref[0]
        fcol_ref[1:H + 1, 0:W - 1, 2 * Cin:3 * Cin] = feat_ref[0, :, 1:W, :]

        if first:
            # First block: previous output = skip_convs[0](inp), fused here.
            x2 = feat_ref[0].reshape(H * W, Cin)
            o = (jnp.dot(x2, w0_ref[...], preferred_element_type=jnp.float32)
                 + b0_ref[...]).reshape(H, W, D)
        else:
            o = oprev_ref[0]
        o4 = jnp.concatenate([o, o, o, o], axis=-1)            # (H, W, 4*D)
        opad4_ref[1:H + 1, 1:W + 1, :] = o4
        opad4_ref[0:1, 1:W + 1, :] = o4[0:1]                   # edge pad rows
        opad4_ref[H + 1:H + 2, 1:W + 1, :] = o4[H - 1:H]
        opad4_ref[:, 0:1, :] = opad4_ref[:, 1:2, :]            # edge pad cols
        opad4_ref[:, W + 1:W + 2, :] = opad4_ref[:, W:W + 1, :]

    r0 = t * TH

    # ---- upsample-folded 3x3 conv: three K = 3*Cin MXU dots (one per row tap).
    acc = jnp.zeros((TH * W, 4 * Cout), jnp.float32)
    for r in range(3):
        lhs = fcol_ref[pl.ds(r0 + r, TH)].reshape(TH * W, 3 * Cin)
        acc = acc + jnp.dot(lhs, wbig_ref[3 * Cin * r:3 * Cin * (r + 1), :],
                            preferred_element_type=jnp.float32)
    acc = acc + bbig_ref[...]
    acc = jnp.where(acc > 0, acc, slope * acc)                 # leaky relu
    acc_bf = acc.astype(jnp.bfloat16)                          # single cast, reused
    feat_out_ref[0] = acc_bf.reshape(TH, W, 4 * Cout)          # 128-lane dense store

    # ---- 1x1 skip conv (block-diagonal over the 4 phases).
    skip = (jnp.dot(acc_bf, wskip_ref[...], preferred_element_type=jnp.float32)
            + bskip_ref[...])

    # ---- bilinear 2x of the previous output (compile-time coefficients).
    # TODO(synk): this path is only 4*D/128 lane-dense; folding W into the lane
    # dim (or the 9 taps into a tiny MXU matmul) would raise VPU/store density.
    up = jnp.zeros((TH, W, 4 * D), jnp.float32)
    for r in range(3):
        row_slab = opad4_ref[pl.ds(r0 + r, TH)]                # (TH, W+2, 4*D)
        for c in range(3):
            coefs = _bilinear_tap_coefs(r, c)
            cv = jnp.concatenate(
                [jnp.full((1, 1, D), v, jnp.float32) for v in coefs], axis=-1)
            up = up + cv * row_slab[:, c:c + W, :]

    out_ref[0] = up + skip.reshape(TH, W, 4 * D)


# ----------------------------------------------------------------------------
# VMEM sizing helpers
# ----------------------------------------------------------------------------
def _vmem_cap_bytes():
    try:
        return int(pltpu.get_tpu_info().vmem_capacity_bytes)
    except Exception:
        return 64 * 1024 * 1024


def _lane_pad(c):
    return ((int(c) + 127) // 128) * 128


def _block_vmem_estimate(H, W, Cin, Cout, D, TH):
    resident = (
        (H + 2) * W * _lane_pad(3 * Cin) * 2           # fcol scratch (bf16)
        + (H + 2) * (W + 2) * _lane_pad(4 * D) * 4     # opad4 scratch (f32)
        + 2 * H * W * _lane_pad(Cin) * 2               # feat input (double-buffered)
        + 2 * H * W * _lane_pad(D) * 4                 # prev-output input
        + 2 * 9 * Cin * _lane_pad(4 * Cout) * 2        # wbig
        + 2 * 4 * Cout * _lane_pad(4 * D) * 2          # wskip (+ small biases)
    )
    m = TH * W
    tile = (
        2 * m * _lane_pad(4 * Cout) * 2                # packed feature tile out
        + 2 * m * _lane_pad(4 * D) * 4                 # packed output tile out
        + m * 4 * Cout * 4                             # f32 accumulator
        + 2 * m * 3 * Cin * 2                          # live lhs slabs
    )
    return resident, tile


def _pick_tile_h(H, W, Cin, Cout, D, budget):
    th = H
    while th > 8 and th % 2 == 0:
        _, tile = _block_vmem_estimate(H, W, Cin, Cout, D, th)
        if tile <= budget:
            return th
        th //= 2
    return th


# ----------------------------------------------------------------------------
# pallas_call wrapper for one decoder block
# ----------------------------------------------------------------------------
def fused_block_pallas(feat, out_prev, blk, *, D, first, skip0=None, tile_h=None,
                       slope=LEAKY_SLOPE):
    N, H, W, Cin = feat.shape
    Cout = int(blk["wbig"].shape[1]) // 4

    cap = _vmem_cap_bytes()
    if tile_h is None:
        tile_h = _pick_tile_h(H, W, Cin, Cout, D, budget=int(cap * 0.35))
    assert H % tile_h == 0, (H, tile_h)
    nt = H // tile_h

    resident, tile = _block_vmem_estimate(H, W, Cin, Cout, D, tile_h)
    vmem_limit = int(min(max((resident + tile) * 3 // 2 + (4 << 20), 32 << 20),
                         int(cap * 0.9)))

    kernel = functools.partial(_block_kernel, H=H, W=W, TH=tile_h, Cin=Cin,
                               Cout=Cout, D=D, slope=slope, first=first)

    in_specs = [pl.BlockSpec((1, H, W, Cin), lambda b, t: (b, 0, 0, 0))]
    inputs = [feat]
    if first:
        w0, b0 = skip0
        in_specs += [pl.BlockSpec((Cin, D), lambda b, t: (0, 0)),
                     pl.BlockSpec((1, D), lambda b, t: (0, 0))]
        inputs += [w0, b0]
    else:
        in_specs += [pl.BlockSpec((1, H, W, D), lambda b, t: (b, 0, 0, 0))]
        inputs += [out_prev]
    # TODO(synk): weights never change across the grid; pl.Buffered(1) on these
    # specs would single-buffer them (halves their VMEM footprint on v7x).
    in_specs += [pl.BlockSpec((9 * Cin, 4 * Cout), lambda b, t: (0, 0)),
                 pl.BlockSpec((1, 4 * Cout), lambda b, t: (0, 0)),
                 pl.BlockSpec((4 * Cout, 4 * D), lambda b, t: (0, 0)),
                 pl.BlockSpec((1, 4 * D), lambda b, t: (0, 0))]
    inputs += [blk["wbig"], blk["bbig"], blk["wskip"], blk["bskip"]]

    return pl.pallas_call(
        kernel,
        out_shape=(jax.ShapeDtypeStruct((N, H, W, 4 * Cout), jnp.bfloat16),
                   jax.ShapeDtypeStruct((N, H, W, 4 * D), jnp.float32)),
        grid=(N, nt),
        in_specs=in_specs,
        out_specs=(
            pl.BlockSpec((1, tile_h, W, 4 * Cout), lambda b, t: (b, t, 0, 0)),
            pl.BlockSpec((1, tile_h, W, 4 * D), lambda b, t: (b, t, 0, 0)),
        ),
        scratch_shapes=[pltpu.VMEM((H + 2, W, 3 * Cin), jnp.bfloat16),
                        pltpu.VMEM((H + 2, W + 2, 4 * D), jnp.float32)],
        compiler_params=pltpu.CompilerParams(
            # H-tile axis must stay sequential per image: tile 0 builds the
            # per-image VMEM scratches that the remaining tiles reuse.
            dimension_semantics=("parallel", "arbitrary"),
            vmem_limit_bytes=vmem_limit),
    )(*inputs)


# ----------------------------------------------------------------------------
# Parameter folding (one-time, outside the kernels)
# ----------------------------------------------------------------------------
def pack_decoder_params(params):
    D = int(params["skip_w"][0].shape[1])
    packed = dict(
        output_dim=D,
        skip0_w=params["skip_w"][0].astype(jnp.bfloat16),
        skip0_b=params["skip_b"][0].reshape(1, D).astype(jnp.float32),
        blocks=[],
    )
    for blk in range(params["n_blocks"]):
        w = params["conv_w"][blk]            # (3, 3, Cin, Cout) HWIO
        b = params["conv_b"][blk]
        sw = params["skip_w"][blk + 1]       # (Cout, D)
        sb = params["skip_b"][blk + 1]
        Cin, Cout = int(w.shape[2]), int(w.shape[3])

        # Fold nearest-exact 2x into the conv: per phase (py,px), the 3x3 conv on
        # the pixel-replicated image is a 2x2-tap conv on the pre-upsample grid.
        rows = []
        for r in range(3):
            for c in range(3):
                phase_mats = []
                for py in range(2):
                    for px in range(2):
                        m = jnp.zeros((Cin, Cout), jnp.float32)
                        for ky in _TAPS[py][r]:
                            for kx in _TAPS[px][c]:
                                m = m + w[ky, kx]
                        phase_mats.append(m)
                rows.append(jnp.concatenate(phase_mats, axis=1))   # (Cin, 4*Cout)
        wbig = jnp.concatenate(rows, axis=0)                       # (9*Cin, 4*Cout)

        # Block-diagonal 1x1 skip conv so one matmul covers all 4 phases.
        wskip = jnp.zeros((4 * Cout, 4 * D), jnp.float32)
        for ph in range(4):
            wskip = wskip.at[ph * Cout:(ph + 1) * Cout, ph * D:(ph + 1) * D].set(sw)

        packed["blocks"].append(dict(
            wbig=wbig.astype(jnp.bfloat16),
            bbig=jnp.tile(b, 4).reshape(1, 4 * Cout).astype(jnp.float32),
            wskip=wskip.astype(jnp.bfloat16),
            bskip=jnp.tile(sb, 4).reshape(1, 4 * D).astype(jnp.float32),
        ))
    return packed


# ----------------------------------------------------------------------------
# Layout glue (pure data movement, left to XLA)
# ----------------------------------------------------------------------------
def _deinterleave_phases(x, C):
    # (N, H, W, 4*C) phase-packed [p00|p01|p10|p11] -> (N, 2H, 2W, C)
    N, H, W, _ = x.shape
    x = x.reshape(N, H, W, 2, 2, C)
    x = jnp.transpose(x, (0, 1, 3, 2, 4, 5))
    return x.reshape(N, 2 * H, 2 * W, C)


# ----------------------------------------------------------------------------
# Parameters (deterministic synthetic init; shapes follow the PyTorch __init__)
# ----------------------------------------------------------------------------
def init_params(key, object_feature_dim, output_dim, min_features, input_size, output_size):
    n_blocks = int(math.log2(output_size) - math.log2(input_size))
    keys = iter(jax.random.split(key, 4 * (n_blocks + 1)))
    conv_w, conv_b, skip_w, skip_b = [], [], [], []
    cur = object_feature_dim
    for _ in range(n_blocks):
        nxt = max(cur // 2, min_features)
        conv_w.append(0.05 * jax.random.normal(next(keys), (3, 3, cur, nxt), jnp.float32))
        conv_b.append(0.05 * jax.random.normal(next(keys), (nxt,), jnp.float32))
        cur = nxt
    cur = object_feature_dim
    for i in range(n_blocks + 1):
        skip_w.append(0.05 * jax.random.normal(next(keys), (cur, output_dim), jnp.float32))
        if i == n_blocks:
            skip_b.append(jnp.zeros((output_dim,), jnp.float32))   # nn.init.zeros_
        else:
            skip_b.append(0.05 * jax.random.normal(next(keys), (output_dim,), jnp.float32))
        cur = max(cur // 2, min_features)
    return dict(conv_w=conv_w, conv_b=conv_b, skip_w=skip_w, skip_b=skip_b, n_blocks=n_blocks)


# ----------------------------------------------------------------------------
# Forward pass (mirrors StyleGANv2Decoder.forward)
# ----------------------------------------------------------------------------
def stylegan_v2_decoder_forward(x_nchw, packed, tile_h=None):
    x = jnp.transpose(x_nchw, (0, 2, 3, 1))                      # NCHW -> NHWC
    D = packed["output_dim"]
    feat = x.astype(jnp.bfloat16)
    out = None

    # TODO(synk): carrying feat/out phase-packed between blocks (folding this
    # de-interleave into the next block's weight folding) would remove these
    # XLA-side transposes from the HBM critical path.
    for i, blk in enumerate(packed["blocks"]):
        Cout = int(blk["wbig"].shape[1]) // 4
        feat_pk, out_pk = fused_block_pallas(
            feat, out, blk, D=D, first=(i == 0),
            skip0=(packed["skip0_w"], packed["skip0_b"]) if i == 0 else None,
            tile_h=tile_h)
        feat = _deinterleave_phases(feat_pk, Cout)     # (N, 2H, 2W, Cout) bf16
        out = _deinterleave_phases(out_pk, D)          # (N, 2H, 2W, D)    f32

    if out is None:   # n_blocks == 0: output = skip_convs[0](inp)
        out = jnp.einsum("nhwc,cd->nhwd", x,
                         packed["skip0_w"].astype(jnp.float32)) + packed["skip0_b"]

    return jnp.transpose(out, (0, 3, 1, 2))                      # NHWC -> NCHW


# ----------------------------------------------------------------------------
# Pure-JAX reference (checks the Pallas kernels)
# ----------------------------------------------------------------------------
def reference_forward(x_nchw, params):
    x = jnp.transpose(x_nchw, (0, 2, 3, 1)).astype(jnp.float32)

    def conv1x1(v, w, b):
        return jnp.einsum("nhwc,cd->nhwd", v, w) + b

    def conv3x3(v, w, b):
        return lax.conv_general_dilated(v, w, (1, 1), "SAME",
                                        dimension_numbers=("NHWC", "HWIO", "NHWC")) + b

    def nearest2x(v):
        return jnp.repeat(jnp.repeat(v, 2, axis=1), 2, axis=2)

    def bilin_up(v):
        N, H, W, D = v.shape
        vp = jnp.pad(v, ((0, 0), (1, 1), (1, 1), (0, 0)), mode="edge")
        A, B, C = vp[:, 0:H], vp[:, 1:H + 1], vp[:, 2:H + 2]

        def split(m):
            return m[:, :, 0:W], m[:, :, 1:W + 1], m[:, :, 2:W + 2]

        AL, AM, AR = split(A); BL, BM, BR = split(B); CL, CM, CR = split(C)
        p00 = 0.0625 * AL + 0.1875 * AM + 0.1875 * BL + 0.5625 * BM
        p01 = 0.1875 * AM + 0.0625 * AR + 0.5625 * BM + 0.1875 * BR
        p10 = 0.1875 * BL + 0.5625 * BM + 0.0625 * CL + 0.1875 * CM
        p11 = 0.5625 * BM + 0.1875 * BR + 0.1875 * CM + 0.0625 * CR
        ph = jnp.stack([p00, p01, p10, p11], axis=1).reshape(N, 2, 2, H, W, D)
        return jnp.transpose(ph, (0, 3, 1, 4, 2, 5)).reshape(N, 2 * H, 2 * W, D)

    out = conv1x1(x, params["skip_w"][0], params["skip_b"][0])
    feat = x
    for blk in range(params["n_blocks"]):
        feat = nearest2x(feat)
        feat = conv3x3(feat, params["conv_w"][blk], params["conv_b"][blk])
        feat = jnp.where(feat > 0, feat, LEAKY_SLOPE * feat)
        out = bilin_up(out) + conv1x1(feat, params["skip_w"][blk + 1], params["skip_b"][blk + 1])
    return jnp.transpose(out, (0, 3, 1, 2))


# ----------------------------------------------------------------------------
if __name__ == "__main__":
    key = jax.random.PRNGKey(0)
    kx, kp = jax.random.split(key)

    # Small shapes consistent with the module: 8x8 -> 32x32 (2 upsample blocks)
    batch = 2
    object_feature_dim = 64
    output_dim = 4
    min_features = 32
    input_size = 8
    output_size = 32

    params = init_params(kp, object_feature_dim, output_dim, min_features,
                         input_size, output_size)
    packed = pack_decoder_params(params)
    x = jax.random.normal(kx, (batch, object_feature_dim, input_size, input_size),
                          jnp.float32)   # NCHW, like the PyTorch module input

    ref = reference_forward(x, params)

    # Auto tile-height selection (whole image per tile at these shapes).
    fwd = jax.jit(lambda v: stylegan_v2_decoder_forward(v, packed))
    out = jax.block_until_ready(fwd(x))
    assert out.shape == (batch, output_dim, output_size, output_size), out.shape
    assert bool(jnp.all(jnp.isfinite(out)))
    err = float(jnp.max(jnp.abs(out - ref)))
    assert err < 5e-2, f"max abs err vs reference (auto tiling): {err}"

    # Force small H-tiles to exercise the multi-tile grid path as well.
    fwd_t = jax.jit(lambda v: stylegan_v2_decoder_forward(v, packed, tile_h=4))
    out_t = jax.block_until_ready(fwd_t(x))
    err_t = float(jnp.max(jnp.abs(out_t - ref)))
    assert err_t < 5e-2, f"max abs err vs reference (tile_h=4): {err_t}"

    print("KERNEL_OK")
</pallas_src>

<mosaic_0001>
module attributes {stable_mosaic.version = 11 : i64} {
  func.func @_block_kernel(%arg0: i32, %arg1: i32, %arg2: memref<1x8x8x64xbf16, #tpu.memory_space<vmem>>, %arg3: memref<64x4xbf16, #tpu.memory_space<vmem>>, %arg4: memref<1x4xf32, #tpu.memory_space<vmem>>, %arg5: memref<576x128xbf16, #tpu.memory_space<vmem>>, %arg6: memref<1x128xf32, #tpu.memory_space<vmem>>, %arg7: memref<128x16xbf16, #tpu.memory_space<vmem>>, %arg8: memref<1x16xf32, #tpu.memory_space<vmem>>, %arg9: memref<1x8x8x128xbf16, #tpu.memory_space<vmem>>, %arg10: memref<1x8x8x16xf32, #tpu.memory_space<vmem>>, %arg11: memref<10x8x192xbf16, #tpu.memory_space<vmem>>, %arg12: memref<10x10x16xf32, #tpu.memory_space<vmem>>) attributes {dimension_semantics = [#tpu.dimension_semantics<parallel>, #tpu.dimension_semantics<arbitrary>], iteration_bounds = array<i64: 2, 1>, scalar_prefetch = 0 : i64, scratch_operands = 2 : i64, tpu.core_type = #tpu.core_type<tc>, window_params = [{transform_indices = @transform_0, window_bounds = array<i64: 1, 8, 8, 64>}, {pipeline_mode = #tpu.pipeline_mode<synchronous>, transform_indices = @transform_1, window_bounds = array<i64: 64, 4>}, {pipeline_mode = #tpu.pipeline_mode<synchronous>, transform_indices = @transform_2, window_bounds = array<i64: 1, 4>}, {pipeline_mode = #tpu.pipeline_mode<synchronous>, transform_indices = @transform_3, window_bounds = array<i64: 576, 128>}, {pipeline_mode = #tpu.pipeline_mode<synchronous>, transform_indices = @transform_4, window_bounds = array<i64: 1, 128>}, {pipeline_mode = #tpu.pipeline_mode<synchronous>, transform_indices = @transform_5, window_bounds = array<i64: 128, 16>}, {pipeline_mode = #tpu.pipeline_mode<synchronous>, transform_indices = @transform_6, window_bounds = array<i64: 1, 16>}, {transform_indices = @transform_7, window_bounds = array<i64: 1, 8, 8, 128>}, {transform_indices = @transform_8, window_bounds = array<i64: 1, 8, 8, 16>}]} {
    %c0_i32 = arith.constant 0 : i32
    %0 = arith.cmpi eq, %arg1, %c0_i32 : i32
    %1 = arith.extui %0 : i1 to i32
    %c0_i32_0 = arith.constant 0 : i32
    %2 = arith.cmpi ne, %1, %c0_i32_0 : i32
    scf.if %2 {
      %cst_77 = arith.constant 0.000000e+00 : bf16
      %140 = vector.broadcast %cst_77 : bf16 to vector<10x8x192xbf16>
      %c0_78 = arith.constant 0 : index
      %c0_79 = arith.constant 0 : index
      %c0_80 = arith.constant 0 : index
      %141 = vector.load %arg11[%c0_78, %c0_79, %c0_80] : memref<10x8x192xbf16, #tpu.memory_space<vmem>>, vector<10x8x192xbf16>
      tpu.vector_store %arg11[%c0_78, %c0_79, %c0_80], %140 {strides = array<i32>} : memref<10x8x192xbf16, #tpu.memory_space<vmem>>, vector<10x8x192xbf16>,
      %c0_81 = arith.constant 0 : index
      %c0_82 = arith.constant 0 : index
      %c0_83 = arith.constant 0 : index
      %c0_84 = arith.constant 0 : index
      %142 = vector.load %arg2[%c0_81, %c0_82, %c0_83, %c0_84] : memref<1x8x8x64xbf16, #tpu.memory_space<vmem>>, vector<1x8x7x64xbf16>
      %143 = vector.shape_cast %142 : vector<1x8x7x64xbf16> to vector<8x7x64xbf16>
      %c1 = arith.constant 1 : index
      %c1_85 = arith.constant 1 : index
      %c0_86 = arith.constant 0 : index
      %144 = vector.load %arg11[%c1, %c1_85, %c0_86] : memref<10x8x192xbf16, #tpu.memory_space<vmem>>, vector<8x7x64xbf16>
      tpu.vector_store %arg11[%c1, %c1_85, %c0_86], %143 {strides = array<i32>} : memref<10x8x192xbf16, #tpu.memory_space<vmem>>, vector<8x7x64xbf16>,
      %c0_87 = arith.constant 0 : index
      %c0_88 = arith.constant 0 : index
      %c0_89 = arith.constant 0 : index
      %c0_90 = arith.constant 0 : index
      %145 = vector.load %arg2[%c0_87, %c0_88, %c0_89, %c0_90] : memref<1x8x8x64xbf16, #tpu.memory_space<vmem>>, vector<1x8x8x64xbf16>
      %146 = vector.shape_cast %145 : vector<1x8x8x64xbf16> to vector<8x8x64xbf16>
      %c1_91 = arith.constant 1 : index
      %c0_92 = arith.constant 0 : index
      %c64 = arith.constant 64 : index
      %147 = vector.load %arg11[%c1_91, %c0_92, %c64] : memref<10x8x192xbf16, #tpu.memory_space<vmem>>, vector<8x8x64xbf16>
      tpu.vector_store %arg11[%c1_91, %c0_92, %c64], %146 {strides = array<i32>} : memref<10x8x192xbf16, #tpu.memory_space<vmem>>, vector<8x8x64xbf16>,
      %c0_93 = arith.constant 0 : index
      %c0_94 = arith.constant 0 : index
      %c1_95 = arith.constant 1 : index
      %c0_96 = arith.constant 0 : index
      %148 = vector.load %arg2[%c0_93, %c0_94, %c1_95, %c0_96] : memref<1x8x8x64xbf16, #tpu.memory_space<vmem>>, vector<1x8x7x64xbf16>
      %149 = vector.shape_cast %148 : vector<1x8x7x64xbf16> to vector<8x7x64xbf16>
      %c1_97 = arith.constant 1 : index
      %c0_98 = arith.constant 0 : index
      %c128 = arith.constant 128 : index
      %150 = vector.load %arg11[%c1_97, %c0_98, %c128] : memref<10x8x192xbf16, #tpu.memory_space<vmem>>, vector<8x7x64xbf16>
      tpu.vector_store %arg11[%c1_97, %c0_98, %c128], %149 {strides = array<i32>} : memref<10x8x192xbf16, #tpu.memory_space<vmem>>, vector<8x7x64xbf16>,
      %c0_99 = arith.constant 0 : index
      %c0_100 = arith.constant 0 : index
      %c0_101 = arith.constant 0 : index
      %c0_102 = arith.constant 0 : index
      %151 = vector.load %arg2[%c0_99, %c0_100, %c0_101, %c0_102] : memref<1x8x8x64xbf16, #tpu.memory_space<vmem>>, vector<1x8x8x64xbf16>
      %152 = vector.shape_cast %151 : vector<1x8x8x64xbf16> to vector<8x8x64xbf16>
      %153 = vector.shape_cast %152 : vector<8x8x64xbf16> to vector<64x64xbf16>
      %c0_103 = arith.constant 0 : index
      %c0_104 = arith.constant 0 : index
      %154 = vector.load %arg3[%c0_103, %c0_104] : memref<64x4xbf16, #tpu.memory_space<vmem>>, vector<64x4xbf16>
      %cst_105 = arith.constant dense<0.000000e+00> : vector<64x4xf32>
      %155 = tpu.matmul %153, %154, %cst_105 {dimension_numbers = #tpu.dot_dimension_numbers<[1], [0], [0], [1], [0, 0, 1, 1], [], []>} : vector<64x64xbf16>, vector<64x4xbf16>, vector<64x4xf32> -> vector<64x4xf32>
      %c0_106 = arith.constant 0 : index
      %c0_107 = arith.constant 0 : index
      %156 = vector.load %arg4[%c0_106, %c0_107] : memref<1x4xf32, #tpu.memory_space<vmem>>, vector<1x4xf32>
      %157 = vector.broadcast %156 : vector<1x4xf32> to vector<64x4xf32>
      %158 = arith.addf %155, %157 : vector<64x4xf32>
      %159 = vector.shape_cast %158 : vector<64x4xf32> to vector<8x8x4xf32>
      %160 = tpu.concatenate %159, %159, %159, %159 in 2 : vector<8x8x4xf32>, vector<8x8x4xf32>, vector<8x8x4xf32>, vector<8x8x4xf32> -> vector<8x8x16xf32>
      %c1_108 = arith.constant 1 : index
      %c1_109 = arith.constant 1 : index
      %c0_110 = arith.constant 0 : index
      %161 = vector.load %arg12[%c1_108, %c1_109, %c0_110] : memref<10x10x16xf32, #tpu.memory_space<vmem>>, vector<8x8x16xf32>
      tpu.vector_store %arg12[%c1_108, %c1_109, %c0_110], %160 {strides = array<i32>} : memref<10x10x16xf32, #tpu.memory_space<vmem>>, vector<8x8x16xf32>,
      %162 = vector.extract_strided_slice %160 {offsets = [0, 0, 0], sizes = [1, 8, 16], strides = [1, 1, 1]} : vector<8x8x16xf32> to vector<1x8x16xf32>
      %c0_111 = arith.constant 0 : index
      %c1_112 = arith.constant 1 : index
      %c0_113 = arith.constant 0 : index
      %163 = vector.load %arg12[%c0_111, %c1_112, %c0_113] : memref<10x10x16xf32, #tpu.memory_space<vmem>>, vector<1x8x16xf32>
      tpu.vector_store %arg12[%c0_111, %c1_112, %c0_113], %162 {strides = array<i32>} : memref<10x10x16xf32, #tpu.memory_space<vmem>>, vector<1x8x16xf32>,
      %164 = vector.extract_strided_slice %160 {offsets = [7, 0, 0], sizes = [1, 8, 16], strides = [1, 1, 1]} : vector<8x8x16xf32> to vector<1x8x16xf32>
      %c9 = arith.constant 9 : index
      %c1_114 = arith.constant 1 : index
      %c0_115 = arith.constant 0 : index
      %165 = vector.load %arg12[%c9, %c1_114, %c0_115] : memref<10x10x16xf32, #tpu.memory_space<vmem>>, vector<1x8x16xf32>
      tpu.vector_store %arg12[%c9, %c1_114, %c0_115], %164 {strides = array<i32>} : memref<10x10x16xf32, #tpu.memory_space<vmem>>, vector<1x8x16xf32>,
      %c0_116 = arith.constant 0 : index
      %c1_117 = arith.constant 1 : index
      %c0_118 = arith.constant 0 : index
      %166 = vector.load %arg12[%c0_116, %c1_117, %c0_118] : memref<10x10x16xf32, #tpu.memory_space<vmem>>, vector<10x1x16xf32>
      %c0_119 = arith.constant 0 : index
      %c0_120 = arith.constant 0 : index
      %c0_121 = arith.constant 0 : index
      %167 = vector.load %arg12[%c0_119, %c0_120, %c0_121] : memref<10x10x16xf32, #tpu.memory_space<vmem>>, vector<10x1x16xf32>
      tpu.vector_store %arg12[%c0_119, %c0_120, %c0_121], %166 {strides = array<i32>} : memref<10x10x16xf32, #tpu.memory_space<vmem>>, vector<10x1x16xf32>,
      %c0_122 = arith.constant 0 : index
      %c8 = arith.constant 8 : index
      %c0_123 = arith.constant 0 : index
      %168 = vector.load %arg12[%c0_122, %c8, %c0_123] : memref<10x10x16xf32, #tpu.memory_space<vmem>>, vector<10x1x16xf32>
      %c0_124 = arith.constant 0 : index
      %c9_125 = arith.constant 9 : index
      %c0_126 = arith.constant 0 : index
      %169 = vector.load %arg12[%c0_124, %c9_125, %c0_126] : memref<10x10x16xf32, #tpu.memory_space<vmem>>, vector<10x1x16xf32>
      tpu.vector_store %arg12[%c0_124, %c9_125, %c0_126], %168 {strides = array<i32>} : memref<10x10x16xf32, #tpu.memory_space<vmem>>, vector<10x1x16xf32>,
    } else {
    }
    %c8_i32 = arith.constant 8 : i32
    %3 = arith.muli %arg1, %c8_i32 : i32
    %cst = arith.constant 0.000000e+00 : f32
    %4 = vector.broadcast %cst : f32 to vector<64x128xf32>
    %c0_i32_1 = arith.constant 0 : i32
    %5 = arith.addi %3, %c0_i32_1 : i32
    %6 = arith.index_cast %5 : i32 to index
    %c0 = arith.constant 0 : index
    %c0_2 = arith.constant 0 : index
    %7 = vector.load %arg11[%6, %c0, %c0_2] : memref<10x8x192xbf16, #tpu.memory_space<vmem>>, vector<8x8x192xbf16>
    %8 = vector.shape_cast %7 : vector<8x8x192xbf16> to vector<64x192xbf16>
    %c0_3 = arith.constant 0 : index
    %c0_4 = arith.constant 0 : index
    %9 = vector.load %arg5[%c0_3, %c0_4] : memref<576x128xbf16, #tpu.memory_space<vmem>>, vector<192x128xbf16>
    %cst_5 = arith.constant dense<0.000000e+00> : vector<64x128xf32>
    %10 = tpu.matmul %8, %9, %cst_5 {dimension_numbers = #tpu.dot_dimension_numbers<[1], [0], [0], [1], [0, 0, 1, 1], [], []>} : vector<64x192xbf16>, vector<192x128xbf16>, vector<64x128xf32> -> vector<64x128xf32>
    %11 = arith.addf %4, %10 : vector<64x128xf32>
    %c1_i32 = arith.constant 1 : i32
    %12 = arith.addi %3, %c1_i32 : i32
    %13 = arith.index_cast %12 : i32 to index
    %c0_6 = arith.constant 0 : index
    %c0_7 = arith.constant 0 : index
    %14 = vector.load %arg11[%13, %c0_6, %c0_7] : memref<10x8x192xbf16, #tpu.memory_space<vmem>>, vector<8x8x192xbf16>
    %15 = vector.shape_cast %14 : vector<8x8x192xbf16> to vector<64x192xbf16>
    %c192 = arith.constant 192 : index
    %c0_8 = arith.constant 0 : index
    %16 = vector.load %arg5[%c192, %c0_8] : memref<576x128xbf16, #tpu.memory_space<vmem>>, vector<192x128xbf16>
    %cst_9 = arith.constant dense<0.000000e+00> : vector<64x128xf32>
    %17 = tpu.matmul %15, %16, %cst_9 {dimension_numbers = #tpu.dot_dimension_numbers<[1], [0], [0], [1], [0, 0, 1, 1], [], []>} : vector<64x192xbf16>, vector<192x128xbf16>, vector<64x128xf32> -> vector<64x128xf32>
    %18 = arith.addf %11, %17 : vector<64x128xf32>
    %c2_i32 = arith.constant 2 : i32
    %19 = arith.addi %3, %c2_i32 : i32
    %20 = arith.index_cast %19 : i32 to index
    %c0_10 = arith.constant 0 : index
    %c0_11 = arith.constant 0 : index
    %21 = vector.load %arg11[%20, %c0_10, %c0_11] : memref<10x8x192xbf16, #tpu.memory_space<vmem>>, vector<8x8x192xbf16>
    %22 = vector.shape_cast %21 : vector<8x8x192xbf16> to vector<64x192xbf16>
    %c384 = arith.constant 384 : index
    %c0_12 = arith.constant 0 : index
    %23 = vector.load %arg5[%c384, %c0_12] : memref<576x128xbf16, #tpu.memory_space<vmem>>, vector<192x128xbf16>
    %cst_13 = arith.constant dense<0.000000e+00> : vector<64x128xf32>
    %24 = tpu.matmul %22, %23, %cst_13 {dimension_numbers = #tpu.dot_dimension_numbers<[1], [0], [0], [1], [0, 0, 1, 1], [], []>} : vector<64x192xbf16>, vector<192x128xbf16>, vector<64x128xf32> -> vector<64x128xf32>
    %25 = arith.addf %18, %24 : vector<64x128xf32>
    %c0_14 = arith.constant 0 : index
    %c0_15 = arith.constant 0 : index
    %26 = vector.load %arg6[%c0_14, %c0_15] : memref<1x128xf32, #tpu.memory_space<vmem>>, vector<1x128xf32>
    %27 = vector.broadcast %26 : vector<1x128xf32> to vector<64x128xf32>
    %28 = arith.addf %25, %27 : vector<64x128xf32>
    %cst_16 = arith.constant 0.000000e+00 : f32
    %29 = vector.broadcast %cst_16 : f32 to vector<64x128xf32>
    %30 = arith.cmpf ogt, %28, %29 : vector<64x128xf32>
    %cst_17 = arith.constant 2.000000e-01 : f32
    %31 = vector.broadcast %cst_17 : f32 to vector<64x128xf32>
    %32 = arith.mulf %31, %28 : vector<64x128xf32>
    %33 = arith.select %30, %28, %32 : vector<64x128xi1>, vector<64x128xf32>
    %34 = arith.truncf %33 : vector<64x128xf32> to vector<64x128xbf16>
    %35 = vector.shape_cast %34 : vector<64x128xbf16> to vector<8x8x128xbf16>
    %c0_18 = arith.constant 0 : index
    %c0_19 = arith.constant 0 : index
    %c0_20 = arith.constant 0 : index
    %c0_21 = arith.constant 0 : index
    %36 = vector.load %arg9[%c0_18, %c0_19, %c0_20, %c0_21] : memref<1x8x8x128xbf16, #tpu.memory_space<vmem>>, vector<1x8x8x128xbf16>
    %37 = vector.shape_cast %36 : vector<1x8x8x128xbf16> to vector<8x8x128xbf16>
    %38 = vector.shape_cast %35 : vector<8x8x128xbf16> to vector<1x8x8x128xbf16>
    tpu.vector_store %arg9[%c0_18, %c0_19, %c0_20, %c0_21], %38 {strides = array<i32>} : memref<1x8x8x128xbf16, #tpu.memory_space<vmem>>, vector<1x8x8x128xbf16>,
    %c0_22 = arith.constant 0 : index
    %c0_23 = arith.constant 0 : index
    %39 = vector.load %arg7[%c0_22, %c0_23] : memref<128x16xbf16, #tpu.memory_space<vmem>>, vector<128x16xbf16>
    %cst_24 = arith.constant dense<0.000000e+00> : vector<64x16xf32>
    %40 = tpu.matmul %34, %39, %cst_24 {dimension_numbers = #tpu.dot_dimension_numbers<[1], [0], [0], [1], [0, 0, 1, 1], [], []>} : vector<64x128xbf16>, vector<128x16xbf16>, vector<64x16xf32> -> vector<64x16xf32>
    %c0_25 = arith.constant 0 : index
    %c0_26 = arith.constant 0 : index
    %41 = vector.load %arg8[%c0_25, %c0_26] : memref<1x16xf32, #tpu.memory_space<vmem>>, vector<1x16xf32>
    %42 = vector.broadcast %41 : vector<1x16xf32> to vector<64x16xf32>
    %43 = arith.addf %40, %42 : vector<64x16xf32>
    %cst_27 = arith.constant 0.000000e+00 : f32
    %44 = vector.broadcast %cst_27 : f32 to vector<8x8x16xf32>
    %c0_i32_28 = arith.constant 0 : i32
    %45 = arith.addi %3, %c0_i32_28 : i32
    %46 = arith.index_cast %45 : i32 to index
    %c0_29 = arith.constant 0 : index
    %c0_30 = arith.constant 0 : index
    %47 = vector.load %arg12[%46, %c0_29, %c0_30] : memref<10x10x16xf32, #tpu.memory_space<vmem>>, vector<8x10x16xf32>
    %cst_31 = arith.constant 6.250000e-02 : f32
    %48 = vector.broadcast %cst_31 : f32 to vector<1x1x4xf32>
    %cst_32 = arith.constant 0.000000e+00 : f32
    %49 = vector.broadcast %cst_32 : f32 to vector<1x1x4xf32>
    %cst_33 = arith.constant 0.000000e+00 : f32
    %50 = vector.broadcast %cst_33 : f32 to vector<1x1x4xf32>
    %cst_34 = arith.constant 0.000000e+00 : f32
    %51 = vector.broadcast %cst_34 : f32 to vector<1x1x4xf32>
    %52 = tpu.concatenate %48, %49, %50, %51 in 2 : vector<1x1x4xf32>, vector<1x1x4xf32>, vector<1x1x4xf32>, vector<1x1x4xf32> -> vector<1x1x16xf32>
    %53 = vector.extract_strided_slice %47 {offsets = [0, 0, 0], sizes = [8, 8, 16], strides = [1, 1, 1]} : vector<8x10x16xf32> to vector<8x8x16xf32>
    %54 = vector.broadcast %52 : vector<1x1x16xf32> to vector<8x8x16xf32>
    %55 = arith.mulf %54, %53 : vector<8x8x16xf32>
    %56 = arith.addf %44, %55 : vector<8x8x16xf32>
    %cst_35 = arith.constant 1.875000e-01 : f32
    %57 = vector.broadcast %cst_35 : f32 to vector<1x1x4xf32>
    %cst_36 = arith.constant 1.875000e-01 : f32
    %58 = vector.broadcast %cst_36 : f32 to vector<1x1x4xf32>
    %cst_37 = arith.constant 0.000000e+00 : f32
    %59 = vector.broadcast %cst_37 : f32 to vector<1x1x4xf32>
    %cst_38 = arith.constant 0.000000e+00 : f32
    %60 = vector.broadcast %cst_38 : f32 to vector<1x1x4xf32>
    %61 = tpu.concatenate %57, %58, %59, %60 in 2 : vector<1x1x4xf32>, vector<1x1x4xf32>, vector<1x1x4xf32>, vector<1x1x4xf32> -> vector<1x1x16xf32>
    %62 = vector.extract_strided_slice %47 {offsets = [0, 1, 0], sizes = [8, 8, 16], strides = [1, 1, 1]} : vector<8x10x16xf32> to vector<8x8x16xf32>
    %63 = vector.broadcast %61 : vector<1x1x16xf32> to vector<8x8x16xf32>
    %64 = arith.mulf %63, %62 : vector<8x8x16xf32>
    %65 = arith.addf %56, %64 : vector<8x8x16xf32>
    %cst_39 = arith.constant 0.000000e+00 : f32
    %66 = vector.broadcast %cst_39 : f32 to vector<1x1x4xf32>
    %cst_40 = arith.constant 6.250000e-02 : f32
    %67 = vector.broadcast %cst_40 : f32 to vector<1x1x4xf32>
    %cst_41 = arith.constant 0.000000e+00 : f32
    %68 = vector.broadcast %cst_41 : f32 to vector<1x1x4xf32>
    %cst_42 = arith.constant 0.000000e+00 : f32
    %69 = vector.broadcast %cst_42 : f32 to vector<1x1x4xf32>
    %70 = tpu.concatenate %66, %67, %68, %69 in 2 : vector<1x1x4xf32>, vector<1x1x4xf32>, vector<1x1x4xf32>, vector<1x1x4xf32> -> vector<1x1x16xf32>
    %71 = vector.extract_strided_slice %47 {offsets = [0, 2, 0], sizes = [8, 8, 16], strides = [1, 1, 1]} : vector<8x10x16xf32> to vector<8x8x16xf32>
    %72 = vector.broadcast %70 : vector<1x1x16xf32> to vector<8x8x16xf32>
    %73 = arith.mulf %72, %71 : vector<8x8x16xf32>
    %74 = arith.addf %65, %73 : vector<8x8x16xf32>
    %c1_i32_43 = arith.constant 1 : i32
    %75 = arith.addi %3, %c1_i32_43 : i32
    %76 = arith.index_cast %75 : i32 to index
    %c0_44 = arith.constant 0 : index
    %c0_45 = arith.constant 0 : index
    %77 = vector.load %arg12[%76, %c0_44, %c0_45] : memref<10x10x16xf32, #tpu.memory_space<vmem>>, vector<8x10x16xf32>
    %cst_46 = arith.constant 1.875000e-01 : f32
    %78 = vector.broadcast %cst_46 : f32 to vector<1x1x4xf32>
    %cst_47 = arith.constant 0.000000e+00 : f32
    %79 = vector.broadcast %cst_47 : f32 to vector<1x1x4xf32>
    %cst_48 = arith.constant 1.875000e-01 : f32
    %80 = vector.broadcast %cst_48 : f32 to vector<1x1x4xf32>
    %cst_49 = arith.constant 0.000000e+00 : f32
    %81 = vector.broadcast %cst_49 : f32 to vector<1x1x4xf32>
    %82 = tpu.concatenate %78, %79, %80, %81 in 2 : vector<1x1x4xf32>, vector<1x1x4xf32>, vector<1x1x4xf32>, vector<1x1x4xf32> -> vector<1x1x16xf32>
    %83 = vector.extract_strided_slice %77 {offsets = [0, 0, 0], sizes = [8, 8, 16], strides = [1, 1, 1]} : vector<8x10x16xf32> to vector<8x8x16xf32>
    %84 = vector.broadcast %82 : vector<1x1x16xf32> to vector<8x8x16xf32>
    %85 = arith.mulf %84, %83 : vector<8x8x16xf32>
    %86 = arith.addf %74, %85 : vector<8x8x16xf32>
    %cst_50 = arith.constant 5.625000e-01 : f32
    %87 = vector.broadcast %cst_50 : f32 to vector<1x1x4xf32>
    %cst_51 = arith.constant 5.625000e-01 : f32
    %88 = vector.broadcast %cst_51 : f32 to vector<1x1x4xf32>
    %cst_52 = arith.constant 5.625000e-01 : f32
    %89 = vector.broadcast %cst_52 : f32 to vector<1x1x4xf32>
    %cst_53 = arith.constant 5.625000e-01 : f32
    %90 = vector.broadcast %cst_53 : f32 to vector<1x1x4xf32>
    %91 = tpu.concatenate %87, %88, %89, %90 in 2 : vector<1x1x4xf32>, vector<1x1x4xf32>, vector<1x1x4xf32>, vector<1x1x4xf32> -> vector<1x1x16xf32>
    %92 = vector.extract_strided_slice %77 {offsets = [0, 1, 0], sizes = [8, 8, 16], strides = [1, 1, 1]} : vector<8x10x16xf32> to vector<8x8x16xf32>
    %93 = vector.broadcast %91 : vector<1x1x16xf32> to vector<8x8x16xf32>
    %94 = arith.mulf %93, %92 : vector<8x8x16xf32>
    %95 = arith.addf %86, %94 : vector<8x8x16xf32>
    %cst_54 = arith.constant 0.000000e+00 : f32
    %96 = vector.broadcast %cst_54 : f32 to vector<1x1x4xf32>
    %cst_55 = arith.constant 1.875000e-01 : f32
    %97 = vector.broadcast %cst_55 : f32 to vector<1x1x4xf32>
    %cst_56 = arith.constant 0.000000e+00 : f32
    %98 = vector.broadcast %cst_56 : f32 to vector<1x1x4xf32>
    %cst_57 = arith.constant 1.875000e-01 : f32
    %99 = vector.broadcast %cst_57 : f32 to vector<1x1x4xf32>
    %100 = tpu.concatenate %96, %97, %98, %99 in 2 : vector<1x1x4xf32>, vector<1x1x4xf32>, vector<1x1x4xf32>, vector<1x1x4xf32> -> vector<1x1x16xf32>
    %101 = vector.extract_strided_slice %77 {offsets = [0, 2, 0], sizes = [8, 8, 16], strides = [1, 1, 1]} : vector<8x10x16xf32> to vector<8x8x16xf32>
    %102 = vector.broadcast %100 : vector<1x1x16xf32> to vector<8x8x16xf32>
    %103 = arith.mulf %102, %101 : vector<8x8x16xf32>
    %104 = arith.addf %95, %103 : vector<8x8x16xf32>
    %c2_i32_58 = arith.constant 2 : i32
    %105 = arith.addi %3, %c2_i32_58 : i32
    %106 = arith.index_cast %105 : i32 to index
    %c0_59 = arith.constant 0 : index
    %c0_60 = arith.constant 0 : index
    %107 = vector.load %arg12[%106, %c0_59, %c0_60] : memref<10x10x16xf32, #tpu.memory_space<vmem>>, vector<8x10x16xf32>
    %cst_61 = arith.constant 0.000000e+00 : f32
    %108 = vector.broadcast %cst_61 : f32 to vector<1x1x4xf32>
    %cst_62 = arith.constant 0.000000e+00 : f32
    %109 = vector.broadcast %cst_62 : f32 to vector<1x1x4xf32>
    %cst_63 = arith.constant 6.250000e-02 : f32
    %110 = vector.broadcast %cst_63 : f32 to vector<1x1x4xf32>
    %cst_64 = arith.constant 0.000000e+00 : f32
    %111 = vector.broadcast %cst_64 : f32 to vector<1x1x4xf32>
    %112 = tpu.concatenate %108, %109, %110, %111 in 2 : vector<1x1x4xf32>, vector<1x1x4xf32>, vector<1x1x4xf32>, vector<1x1x4xf32> -> vector<1x1x16xf32>
    %113 = vector.extract_strided_slice %107 {offsets = [0, 0, 0], sizes = [8, 8, 16], strides = [1, 1, 1]} : vector<8x10x16xf32> to vector<8x8x16xf32>
    %114 = vector.broadcast %112 : vector<1x1x16xf32> to vector<8x8x16xf32>
    %115 = arith.mulf %114, %113 : vector<8x8x16xf32>
    %116 = arith.addf %104, %115 : vector<8x8x16xf32>
    %cst_65 = arith.constant 0.000000e+00 : f32
    %117 = vector.broadcast %cst_65 : f32 to vector<1x1x4xf32>
    %cst_66 = arith.constant 0.000000e+00 : f32
    %118 = vector.broadcast %cst_66 : f32 to vector<1x1x4xf32>
    %cst_67 = arith.constant 1.875000e-01 : f32
    %119 = vector.broadcast %cst_67 : f32 to vector<1x1x4xf32>
    %cst_68 = arith.constant 1.875000e-01 : f32
    %120 = vector.broadcast %cst_68 : f32 to vector<1x1x4xf32>
    %121 = tpu.concatenate %117, %118, %119, %120 in 2 : vector<1x1x4xf32>, vector<1x1x4xf32>, vector<1x1x4xf32>, vector<1x1x4xf32> -> vector<1x1x16xf32>
    %122 = vector.extract_strided_slice %107 {offsets = [0, 1, 0], sizes = [8, 8, 16], strides = [1, 1, 1]} : vector<8x10x16xf32> to vector<8x8x16xf32>
    %123 = vector.broadcast %121 : vector<1x1x16xf32> to vector<8x8x16xf32>
    %124 = arith.mulf %123, %122 : vector<8x8x16xf32>
    %125 = arith.addf %116, %124 : vector<8x8x16xf32>
    %cst_69 = arith.constant 0.000000e+00 : f32
    %126 = vector.broadcast %cst_69 : f32 to vector<1x1x4xf32>
    %cst_70 = arith.constant 0.000000e+00 : f32
    %127 = vector.broadcast %cst_70 : f32 to vector<1x1x4xf32>
    %cst_71 = arith.constant 0.000000e+00 : f32
    %128 = vector.broadcast %cst_71 : f32 to vector<1x1x4xf32>
    %cst_72 = arith.constant 6.250000e-02 : f32
    %129 = vector.broadcast %cst_72 : f32 to vector<1x1x4xf32>
    %130 = tpu.concatenate %126, %127, %128, %129 in 2 : vector<1x1x4xf32>, vector<1x1x4xf32>, vector<1x1x4xf32>, vector<1x1x4xf32> -> vector<1x1x16xf32>
    %131 = vector.extract_strided_slice %107 {offsets = [0, 2, 0], sizes = [8, 8, 16], strides = [1, 1, 1]} : vector<8x10x16xf32> to vector<8x8x16xf32>
    %132 = vector.broadcast %130 : vector<1x1x16xf32> to vector<8x8x16xf32>
    %133 = arith.mulf %132, %131 : vector<8x8x16xf32>
    %134 = arith.addf %125, %133 : vector<8x8x16xf32>
    %135 = vector.shape_cast %43 : vector<64x16xf32> to vector<8x8x16xf32>
    %136 = arith.addf %134, %135 : vector<8x8x16xf32>
    %c0_73 = arith.constant 0 : index
    %c0_74 = arith.constant 0 : index
    %c0_75 = arith.constant 0 : index
    %c0_76 = arith.constant 0 : index
    %137 = vector.load %arg10[%c0_73, %c0_74, %c0_75, %c0_76] : memref<1x8x8x16xf32, #tpu.memory_space<vmem>>, vector<1x8x8x16xf32>
    %138 = vector.shape_cast %137 : vector<1x8x8x16xf32> to vector<8x8x16xf32>
    %139 = vector.shape_cast %136 : vector<8x8x16xf32> to vector<1x8x8x16xf32>
    tpu.vector_store %arg10[%c0_73, %c0_74, %c0_75, %c0_76], %139 {strides = array<i32>} : memref<1x8x8x16xf32, #tpu.memory_space<vmem>>, vector<1x8x8x16xf32>,
    return
  }
  func.func @transform_0(%arg0: i32, %arg1: i32) -> (i32, i32, i32, i32) {
    %c0_i32 = arith.constant 0 : i32
    %c0_i32_0 = arith.constant 0 : i32
    %c0_i32_1 = arith.constant 0 : i32
    %c0_i32_2 = arith.constant 0 : i32
    return %arg0, %c0_i32, %c0_i32_0, %c0_i32_1 : i32, i32, i32, i32
  }
  func.func @transform_1(%arg0: i32, %arg1: i32) -> (i32, i32) {
    %c0_i32 = arith.constant 0 : i32
    %c0_i32_0 = arith.constant 0 : i32
    %c0_i32_1 = arith.constant 0 : i32
    return %c0_i32, %c0_i32_0 : i32, i32
  }
  func.func @transform_2(%arg0: i32, %arg1: i32) -> (i32, i32) {
    %c0_i32 = arith.constant 0 : i32
    %c0_i32_0 = arith.constant 0 : i32
    %c0_i32_1 = arith.constant 0 : i32
    return %c0_i32, %c0_i32_0 : i32, i32
  }
  func.func @transform_3(%arg0: i32, %arg1: i32) -> (i32, i32) {
    %c0_i32 = arith.constant 0 : i32
    %c0_i32_0 = arith.constant 0 : i32
    %c0_i32_1 = arith.constant 0 : i32
    return %c0_i32, %c0_i32_0 : i32, i32
  }
  func.func @transform_4(%arg0: i32, %arg1: i32) -> (i32, i32) {
    %c0_i32 = arith.constant 0 : i32
    %c0_i32_0 = arith.constant 0 : i32
    %c0_i32_1 = arith.constant 0 : i32
    return %c0_i32, %c0_i32_0 : i32, i32
  }
  func.func @transform_5(%arg0: i32, %arg1: i32) -> (i32, i32) {
    %c0_i32 = arith.constant 0 : i32
    %c0_i32_0 = arith.constant 0 : i32
    %c0_i32_1 = arith.constant 0 : i32
    return %c0_i32, %c0_i32_0 : i32, i32
  }
  func.func @transform_6(%arg0: i32, %arg1: i32) -> (i32, i32) {
    %c0_i32 = arith.constant 0 : i32
    %c0_i32_0 = arith.constant 0 : i32
    %c0_i32_1 = arith.constant 0 : i32
    return %c0_i32, %c0_i32_0 : i32, i32
  }
  func.func @transform_7(%arg0: i32, %arg1: i32) -> (i32, i32, i32, i32) {
    %c0_i32 = arith.constant 0 : i32
    %c0_i32_0 = arith.constant 0 : i32
    %c0_i32_1 = arith.constant 0 : i32
    return %arg0, %arg1, %c0_i32, %c0_i32_0 : i32, i32, i32, i32
  }
  func.func @transform_8(%arg0: i32, %arg1: i32) -> (i32, i32, i32, i32) {
    %c0_i32 = arith.constant 0 : i32
    %c0_i32_0 = arith.constant 0 : i32
    %c0_i32_1 = arith.constant 0 : i32
    return %arg0, %arg1, %c0_i32, %c0_i32_0 : i32, i32, i32, i32
  }
}

module attributes {stable_mosaic.version = 11 : i64} {
  func.func @_block_kernel(%arg0: i32, %arg1: i32, %arg2: memref<1x16x16x32xbf16, #tpu.memory_space<vmem>>, %arg3: memref<1x16x16x4xf32, #tpu.memory_space<vmem>>, %arg4: memref<288x128xbf16, #tpu.memory_space<vmem>>, %arg5: memref<1x128xf32, #tpu.memory_space<vmem>>, %arg6: memref<128x16xbf16, #tpu.memory_space<vmem>>, %arg7: memref<1x16xf32, #tpu.memory_space<vmem>>, %arg8: memref<1x16x16x128xbf16, #tpu.memory_space<vmem>>, %arg9: memref<1x16x16x16xf32, #tpu.memory_space<vmem>>, %arg10: memref<18x16x96xbf16, #tpu.memory_space<vmem>>, %arg11: memref<18x18x16xf32, #tpu.memory_space<vmem>>) attributes {dimension_semantics = [#tpu.dimension_semantics<parallel>, #tpu.dimension_semantics<arbitrary>], iteration_bounds = array<i64: 2, 1>, scalar_prefetch = 0 : i64, scratch_operands = 2 : i64, tpu.core_type = #tpu.core_type<tc>, window_params = [{transform_indices = @transform_0, window_bounds = array<i64: 1, 16, 16, 32>}, {transform_indices = @transform_1, window_bounds = array<i64: 1, 16, 16, 4>}, {pipeline_mode = #tpu.pipeline_mode<synchronous>, transform_indices = @transform_2, window_bounds = array<i64: 288, 128>}, {pipeline_mode = #tpu.pipeline_mode<synchronous>, transform_indices = @transform_3, window_bounds = array<i64: 1, 128>}, {pipeline_mode = #tpu.pipeline_mode<synchronous>, transform_indices = @transform_4, window_bounds = array<i64: 128, 16>}, {pipeline_mode = #tpu.pipeline_mode<synchronous>, transform_indices = @transform_5, window_bounds = array<i64: 1, 16>}, {transform_indices = @transform_6, window_bounds = array<i64: 1, 16, 16, 128>}, {transform_indices = @transform_7, window_bounds = array<i64: 1, 16, 16, 16>}]} {
    %c0_i32 = arith.constant 0 : i32
    %0 = arith.cmpi eq, %arg1, %c0_i32 : i32
    %1 = arith.extui %0 : i1 to i32
    %c0_i32_0 = arith.constant 0 : i32
    %2 = arith.cmpi ne, %1, %c0_i32_0 : i32
    scf.if %2 {
      %cst_77 = arith.constant 0.000000e+00 : bf16
      %140 = vector.broadcast %cst_77 : bf16 to vector<18x16x96xbf16>
      %c0_78 = arith.constant 0 : index
      %c0_79 = arith.constant 0 : index
      %c0_80 = arith.constant 0 : index
      %141 = vector.load %arg10[%c0_78, %c0_79, %c0_80] : memref<18x16x96xbf16, #tpu.memory_space<vmem>>, vector<18x16x96xbf16>
      tpu.vector_store %arg10[%c0_78, %c0_79, %c0_80], %140 {strides = array<i32>} : memref<18x16x96xbf16, #tpu.memory_space<vmem>>, vector<18x16x96xbf16>,
      %c0_81 = arith.constant 0 : index
      %c0_82 = arith.constant 0 : index
      %c0_83 = arith.constant 0 : index
      %c0_84 = arith.constant 0 : index
      %142 = vector.load %arg2[%c0_81, %c0_82, %c0_83, %c0_84] : memref<1x16x16x32xbf16, #tpu.memory_space<vmem>>, vector<1x16x15x32xbf16>
      %143 = vector.shape_cast %142 : vector<1x16x15x32xbf16> to vector<16x15x32xbf16>
      %c1 = arith.constant 1 : index
      %c1_85 = arith.constant 1 : index
      %c0_86 = arith.constant 0 : index
      %144 = vector.load %arg10[%c1, %c1_85, %c0_86] : memref<18x16x96xbf16, #tpu.memory_space<vmem>>, vector<16x15x32xbf16>
      tpu.vector_store %arg10[%c1, %c1_85, %c0_86], %143 {strides = array<i32>} : memref<18x16x96xbf16, #tpu.memory_space<vmem>>, vector<16x15x32xbf16>,
      %c0_87 = arith.constant 0 : index
      %c0_88 = arith.constant 0 : index
      %c0_89 = arith.constant 0 : index
      %c0_90 = arith.constant 0 : index
      %145 = vector.load %arg2[%c0_87, %c0_88, %c0_89, %c0_90] : memref<1x16x16x32xbf16, #tpu.memory_space<vmem>>, vector<1x16x16x32xbf16>
      %146 = vector.shape_cast %145 : vector<1x16x16x32xbf16> to vector<16x16x32xbf16>
      %c1_91 = arith.constant 1 : index
      %c0_92 = arith.constant 0 : index
      %c32 = arith.constant 32 : index
      %147 = vector.load %arg10[%c1_91, %c0_92, %c32] : memref<18x16x96xbf16, #tpu.memory_space<vmem>>, vector<16x16x32xbf16>
      tpu.vector_store %arg10[%c1_91, %c0_92, %c32], %146 {strides = array<i32>} : memref<18x16x96xbf16, #tpu.memory_space<vmem>>, vector<16x16x32xbf16>,
      %c0_93 = arith.constant 0 : index
      %c0_94 = arith.constant 0 : index
      %c1_95 = arith.constant 1 : index
      %c0_96 = arith.constant 0 : index
      %148 = vector.load %arg2[%c0_93, %c0_94, %c1_95, %c0_96] : memref<1x16x16x32xbf16, #tpu.memory_space<vmem>>, vector<1x16x15x32xbf16>
      %149 = vector.shape_cast %148 : vector<1x16x15x32xbf16> to vector<16x15x32xbf16>
      %c1_97 = arith.constant 1 : index
      %c0_98 = arith.constant 0 : index
      %c64 = arith.constant 64 : index
      %150 = vector.load %arg10[%c1_97, %c0_98, %c64] : memref<18x16x96xbf16, #tpu.memory_space<vmem>>, vector<16x15x32xbf16>
      tpu.vector_store %arg10[%c1_97, %c0_98, %c64], %149 {strides = array<i32>} : memref<18x16x96xbf16, #tpu.memory_space<vmem>>, vector<16x15x32xbf16>,
      %c0_99 = arith.constant 0 : index
      %c0_100 = arith.constant 0 : index
      %c0_101 = arith.constant 0 : index
      %c0_102 = arith.constant 0 : index
      %151 = vector.load %arg3[%c0_99, %c0_100, %c0_101, %c0_102] : memref<1x16x16x4xf32, #tpu.memory_space<vmem>>, vector<1x16x16x4xf32>
      %152 = vector.shape_cast %151 : vector<1x16x16x4xf32> to vector<16x16x4xf32>
      %153 = tpu.concatenate %152, %152, %152, %152 in 2 : vector<16x16x4xf32>, vector<16x16x4xf32>, vector<16x16x4xf32>, vector<16x16x4xf32> -> vector<16x16x16xf32>
      %c1_103 = arith.constant 1 : index
      %c1_104 = arith.constant 1 : index
      %c0_105 = arith.constant 0 : index
      %154 = vector.load %arg11[%c1_103, %c1_104, %c0_105] : memref<18x18x16xf32, #tpu.memory_space<vmem>>, vector<16x16x16xf32>
      tpu.vector_store %arg11[%c1_103, %c1_104, %c0_105], %153 {strides = array<i32>} : memref<18x18x16xf32, #tpu.memory_space<vmem>>, vector<16x16x16xf32>,
      %155 = vector.extract_strided_slice %153 {offsets = [0, 0, 0], sizes = [1, 16, 16], strides = [1, 1, 1]} : vector<16x16x16xf32> to vector<1x16x16xf32>
      %c0_106 = arith.constant 0 : index
      %c1_107 = arith.constant 1 : index
      %c0_108 = arith.constant 0 : index
      %156 = vector.load %arg11[%c0_106, %c1_107, %c0_108] : memref<18x18x16xf32, #tpu.memory_space<vmem>>, vector<1x16x16xf32>
      tpu.vector_store %arg11[%c0_106, %c1_107, %c0_108], %155 {strides = array<i32>} : memref<18x18x16xf32, #tpu.memory_space<vmem>>, vector<1x16x16xf32>,
      %157 = vector.extract_strided_slice %153 {offsets = [15, 0, 0], sizes = [1, 16, 16], strides = [1, 1, 1]} : vector<16x16x16xf32> to vector<1x16x16xf32>
      %c17 = arith.constant 17 : index
      %c1_109 = arith.constant 1 : index
      %c0_110 = arith.constant 0 : index
      %158 = vector.load %arg11[%c17, %c1_109, %c0_110] : memref<18x18x16xf32, #tpu.memory_space<vmem>>, vector<1x16x16xf32>
      tpu.vector_store %arg11[%c17, %c1_109, %c0_110], %157 {strides = array<i32>} : memref<18x18x16xf32, #tpu.memory_space<vmem>>, vector<1x16x16xf32>,
      %c0_111 = arith.constant 0 : index
      %c1_112 = arith.constant 1 : index
      %c0_113 = arith.constant 0 : index
      %159 = vector.load %arg11[%c0_111, %c1_112, %c0_113] : memref<18x18x16xf32, #tpu.memory_space<vmem>>, vector<18x1x16xf32>
      %c0_114 = arith.constant 0 : index
      %c0_115 = arith.constant 0 : index
      %c0_116 = arith.constant 0 : index
      %160 = vector.load %arg11[%c0_114, %c0_115, %c0_116] : memref<18x18x16xf32, #tpu.memory_space<vmem>>, vector<18x1x16xf32>
      tpu.vector_store %arg11[%c0_114, %c0_115, %c0_116], %159 {strides = array<i32>} : memref<18x18x16xf32, #tpu.memory_space<vmem>>, vector<18x1x16xf32>,
      %c0_117 = arith.constant 0 : index
      %c16 = arith.constant 16 : index
      %c0_118 = arith.constant 0 : index
      %161 = vector.load %arg11[%c0_117, %c16, %c0_118] : memref<18x18x16xf32, #tpu.memory_space<vmem>>, vector<18x1x16xf32>
      %c0_119 = arith.constant 0 : index
      %c17_120 = arith.constant 17 : index
      %c0_121 = arith.constant 0 : index
      %162 = vector.load %arg11[%c0_119, %c17_120, %c0_121] : memref<18x18x16xf32, #tpu.memory_space<vmem>>, vector<18x1x16xf32>
      tpu.vector_store %arg11[%c0_119, %c17_120, %c0_121], %161 {strides = array<i32>} : memref<18x18x16xf32, #tpu.memory_space<vmem>>, vector<18x1x16xf32>,
    } else {
    }
    %c16_i32 = arith.constant 16 : i32
    %3 = arith.muli %arg1, %c16_i32 : i32
    %cst = arith.constant 0.000000e+00 : f32
    %4 = vector.broadcast %cst : f32 to vector<256x128xf32>
    %c0_i32_1 = arith.constant 0 : i32
    %5 = arith.addi %3, %c0_i32_1 : i32
    %6 = arith.index_cast %5 : i32 to index
    %c0 = arith.constant 0 : index
    %c0_2 = arith.constant 0 : index
    %7 = vector.load %arg10[%6, %c0, %c0_2] : memref<18x16x96xbf16, #tpu.memory_space<vmem>>, vector<16x16x96xbf16>
    %8 = vector.shape_cast %7 : vector<16x16x96xbf16> to vector<256x96xbf16>
    %c0_3 = arith.constant 0 : index
    %c0_4 = arith.constant 0 : index
    %9 = vector.load %arg4[%c0_3, %c0_4] : memref<288x128xbf16, #tpu.memory_space<vmem>>, vector<96x128xbf16>
    %cst_5 = arith.constant dense<0.000000e+00> : vector<256x128xf32>
    %10 = tpu.matmul %8, %9, %cst_5 {dimension_numbers = #tpu.dot_dimension_numbers<[1], [0], [0], [1], [0, 0, 1, 1], [], []>} : vector<256x96xbf16>, vector<96x128xbf16>, vector<256x128xf32> -> vector<256x128xf32>
    %11 = arith.addf %4, %10 : vector<256x128xf32>
    %c1_i32 = arith.constant 1 : i32
    %12 = arith.addi %3, %c1_i32 : i32
    %13 = arith.index_cast %12 : i32 to index
    %c0_6 = arith.constant 0 : index
    %c0_7 = arith.constant 0 : index
    %14 = vector.load %arg10[%13, %c0_6, %c0_7] : memref<18x16x96xbf16, #tpu.memory_space<vmem>>, vector<16x16x96xbf16>
    %15 = vector.shape_cast %14 : vector<16x16x96xbf16> to vector<256x96xbf16>
    %c96 = arith.constant 96 : index
    %c0_8 = arith.constant 0 : index
    %16 = vector.load %arg4[%c96, %c0_8] : memref<288x128xbf16, #tpu.memory_space<vmem>>, vector<96x128xbf16>
    %cst_9 = arith.constant dense<0.000000e+00> : vector<256x128xf32>
    %17 = tpu.matmul %15, %16, %cst_9 {dimension_numbers = #tpu.dot_dimension_numbers<[1], [0], [0], [1], [0, 0, 1, 1], [], []>} : vector<256x96xbf16>, vector<96x128xbf16>, vector<256x128xf32> -> vector<256x128xf32>
    %18 = arith.addf %11, %17 : vector<256x128xf32>
    %c2_i32 = arith.constant 2 : i32
    %19 = arith.addi %3, %c2_i32 : i32
    %20 = arith.index_cast %19 : i32 to index
    %c0_10 = arith.constant 0 : index
    %c0_11 = arith.constant 0 : index
    %21 = vector.load %arg10[%20, %c0_10, %c0_11] : memref<18x16x96xbf16, #tpu.memory_space<vmem>>, vector<16x16x96xbf16>
    %22 = vector.shape_cast %21 : vector<16x16x96xbf16> to vector<256x96xbf16>
    %c192 = arith.constant 192 : index
    %c0_12 = arith.constant 0 : index
    %23 = vector.load %arg4[%c192, %c0_12] : memref<288x128xbf16, #tpu.memory_space<vmem>>, vector<96x128xbf16>
    %cst_13 = arith.constant dense<0.000000e+00> : vector<256x128xf32>
    %24 = tpu.matmul %22, %23, %cst_13 {dimension_numbers = #tpu.dot_dimension_numbers<[1], [0], [0], [1], [0, 0, 1, 1], [], []>} : vector<256x96xbf16>, vector<96x128xbf16>, vector<256x128xf32> -> vector<256x128xf32>
    %25 = arith.addf %18, %24 : vector<256x128xf32>
    %c0_14 = arith.constant 0 : index
    %c0_15 = arith.constant 0 : index
    %26 = vector.load %arg5[%c0_14, %c0_15] : memref<1x128xf32, #tpu.memory_space<vmem>>, vector<1x128xf32>
    %27 = vector.broadcast %26 : vector<1x128xf32> to vector<256x128xf32>
    %28 = arith.addf %25, %27 : vector<256x128xf32>
    %cst_16 = arith.constant 0.000000e+00 : f32
    %29 = vector.broadcast %cst_16 : f32 to vector<256x128xf32>
    %30 = arith.cmpf ogt, %28, %29 : vector<256x128xf32>
    %cst_17 = arith.constant 2.000000e-01 : f32
    %31 = vector.broadcast %cst_17 : f32 to vector<256x128xf32>
    %32 = arith.mulf %31, %28 : vector<256x128xf32>
    %33 = arith.select %30, %28, %32 : vector<256x128xi1>, vector<256x128xf32>
    %34 = arith.truncf %33 : vector<256x128xf32> to vector<256x128xbf16>
    %35 = vector.shape_cast %34 : vector<256x128xbf16> to vector<16x16x128xbf16>
    %c0_18 = arith.constant 0 : index
    %c0_19 = arith.constant 0 : index
    %c0_20 = arith.constant 0 : index
    %c0_21 = arith.constant 0 : index
    %36 = vector.load %arg8[%c0_18, %c0_19, %c0_20, %c0_21] : memref<1x16x16x128xbf16, #tpu.memory_space<vmem>>, vector<1x16x16x128xbf16>
    %37 = vector.shape_cast %36 : vector<1x16x16x128xbf16> to vector<16x16x128xbf16>
    %38 = vector.shape_cast %35 : vector<16x16x128xbf16> to vector<1x16x16x128xbf16>
    tpu.vector_store %arg8[%c0_18, %c0_19, %c0_20, %c0_21], %38 {strides = array<i32>} : memref<1x16x16x128xbf16, #tpu.memory_space<vmem>>, vector<1x16x16x128xbf16>,
    %c0_22 = arith.constant 0 : index
    %c0_23 = arith.constant 0 : index
    %39 = vector.load %arg6[%c0_22, %c0_23] : memref<128x16xbf16, #tpu.memory_space<vmem>>, vector<128x16xbf16>
    %cst_24 = arith.constant dense<0.000000e+00> : vector<256x16xf32>
    %40 = tpu.matmul %34, %39, %cst_24 {dimension_numbers = #tpu.dot_dimension_numbers<[1], [0], [0], [1], [0, 0, 1, 1], [], []>} : vector<256x128xbf16>, vector<128x16xbf16>, vector<256x16xf32> -> vector<256x16xf32>
    %c0_25 = arith.constant 0 : index
    %c0_26 = arith.constant 0 : index
    %41 = vector.load %arg7[%c0_25, %c0_26] : memref<1x16xf32, #tpu.memory_space<vmem>>, vector<1x16xf32>
    %42 = vector.broadcast %41 : vector<1x16xf32> to vector<256x16xf32>
    %43 = arith.addf %40, %42 : vector<256x16xf32>
    %cst_27 = arith.constant 0.000000e+00 : f32
    %44 = vector.broadcast %cst_27 : f32 to vector<16x16x16xf32>
    %c0_i32_28 = arith.constant 0 : i32
    %45 = arith.addi %3, %c0_i32_28 : i32
    %46 = arith.index_cast %45 : i32 to index
    %c0_29 = arith.constant 0 : index
    %c0_30 = arith.constant 0 : index
    %47 = vector.load %arg11[%46, %c0_29, %c0_30] : memref<18x18x16xf32, #tpu.memory_space<vmem>>, vector<16x18x16xf32>
    %cst_31 = arith.constant 6.250000e-02 : f32
    %48 = vector.broadcast %cst_31 : f32 to vector<1x1x4xf32>
    %cst_32 = arith.constant 0.000000e+00 : f32
    %49 = vector.broadcast %cst_32 : f32 to vector<1x1x4xf32>
    %cst_33 = arith.constant 0.000000e+00 : f32
    %50 = vector.broadcast %cst_33 : f32 to vector<1x1x4xf32>
    %cst_34 = arith.constant 0.000000e+00 : f32
    %51 = vector.broadcast %cst_34 : f32 to vector<1x1x4xf32>
    %52 = tpu.concatenate %48, %49, %50, %51 in 2 : vector<1x1x4xf32>, vector<1x1x4xf32>, vector<1x1x4xf32>, vector<1x1x4xf32> -> vector<1x1x16xf32>
    %53 = vector.extract_strided_slice %47 {offsets = [0, 0, 0], sizes = [16, 16, 16], strides = [1, 1, 1]} : vector<16x18x16xf32> to vector<16x16x16xf32>
    %54 = vector.broadcast %52 : vector<1x1x16xf32> to vector<16x16x16xf32>
    %55 = arith.mulf %54, %53 : vector<16x16x16xf32>
    %56 = arith.addf %44, %55 : vector<16x16x16xf32>
    %cst_35 = arith.constant 1.875000e-01 : f32
    %57 = vector.broadcast %cst_35 : f32 to vector<1x1x4xf32>
    %cst_36 = arith.constant 1.875000e-01 : f32
    %58 = vector.broadcast %cst_36 : f32 to vector<1x1x4xf32>
    %cst_37 = arith.constant 0.000000e+00 : f32
    %59 = vector.broadcast %cst_37 : f32 to vector<1x1x4xf32>
    %cst_38 = arith.constant 0.000000e+00 : f32
    %60 = vector.broadcast %cst_38 : f32 to vector<1x1x4xf32>
    %61 = tpu.concatenate %57, %58, %59, %60 in 2 : vector<1x1x4xf32>, vector<1x1x4xf32>, vector<1x1x4xf32>, vector<1x1x4xf32> -> vector<1x1x16xf32>
    %62 = vector.extract_strided_slice %47 {offsets = [0, 1, 0], sizes = [16, 16, 16], strides = [1, 1, 1]} : vector<16x18x16xf32> to vector<16x16x16xf32>
    %63 = vector.broadcast %61 : vector<1x1x16xf32> to vector<16x16x16xf32>
    %64 = arith.mulf %63, %62 : vector<16x16x16xf32>
    %65 = arith.addf %56, %64 : vector<16x16x16xf32>
    %cst_39 = arith.constant 0.000000e+00 : f32
    %66 = vector.broadcast %cst_39 : f32 to vector<1x1x4xf32>
    %cst_40 = arith.constant 6.250000e-02 : f32
    %67 = vector.broadcast %cst_40 : f32 to vector<1x1x4xf32>
    %cst_41 = arith.constant 0.000000e+00 : f32
    %68 = vector.broadcast %cst_41 : f32 to vector<1x1x4xf32>
    %cst_42 = arith.constant 0.000000e+00 : f32
    %69 = vector.broadcast %cst_42 : f32 to vector<1x1x4xf32>
    %70 = tpu.concatenate %66, %67, %68, %69 in 2 : vector<1x1x4xf32>, vector<1x1x4xf32>, vector<1x1x4xf32>, vector<1x1x4xf32> -> vector<1x1x16xf32>
    %71 = vector.extract_strided_slice %47 {offsets = [0, 2, 0], sizes = [16, 16, 16], strides = [1, 1, 1]} : vector<16x18x16xf32> to vector<16x16x16xf32>
    %72 = vector.broadcast %70 : vector<1x1x16xf32> to vector<16x16x16xf32>
    %73 = arith.mulf %72, %71 : vector<16x16x16xf32>
    %74 = arith.addf %65, %73 : vector<16x16x16xf32>
    %c1_i32_43 = arith.constant 1 : i32
    %75 = arith.addi %3, %c1_i32_43 : i32
    %76 = arith.index_cast %75 : i32 to index
    %c0_44 = arith.constant 0 : index
    %c0_45 = arith.constant 0 : index
    %77 = vector.load %arg11[%76, %c0_44, %c0_45] : memref<18x18x16xf32, #tpu.memory_space<vmem>>, vector<16x18x16xf32>
    %cst_46 = arith.constant 1.875000e-01 : f32
    %78 = vector.broadcast %cst_46 : f32 to vector<1x1x4xf32>
    %cst_47 = arith.constant 0.000000e+00 : f32
    %79 = vector.broadcast %cst_47 : f32 to vector<1x1x4xf32>
    %cst_48 = arith.constant 1.875000e-01 : f32
    %80 = vector.broadcast %cst_48 : f32 to vector<1x1x4xf32>
    %cst_49 = arith.constant 0.000000e+00 : f32
    %81 = vector.broadcast %cst_49 : f32 to vector<1x1x4xf32>
    %82 = tpu.concatenate %78, %79, %80, %81 in 2 : vector<1x1x4xf32>, vector<1x1x4xf32>, vector<1x1x4xf32>, vector<1x1x4xf32> -> vector<1x1x16xf32>
    %83 = vector.extract_strided_slice %77 {offsets = [0, 0, 0], sizes = [16, 16, 16], strides = [1, 1, 1]} : vector<16x18x16xf32> to vector<16x16x16xf32>
    %84 = vector.broadcast %82 : vector<1x1x16xf32> to vector<16x16x16xf32>
    %85 = arith.mulf %84, %83 : vector<16x16x16xf32>
    %86 = arith.addf %74, %85 : vector<16x16x16xf32>
    %cst_50 = arith.constant 5.625000e-01 : f32
    %87 = vector.broadcast %cst_50 : f32 to vector<1x1x4xf32>
    %cst_51 = arith.constant 5.625000e-01 : f32
    %88 = vector.broadcast %cst_51 : f32 to vector<1x1x4xf32>
    %cst_52 = arith.constant 5.625000e-01 : f32
    %89 = vector.broadcast %cst_52 : f32 to vector<1x1x4xf32>
    %cst_53 = arith.constant 5.625000e-01 : f32
    %90 = vector.broadcast %cst_53 : f32 to vector<1x1x4xf32>
    %91 = tpu.concatenate %87, %88, %89, %90 in 2 : vector<1x1x4xf32>, vector<1x1x4xf32>, vector<1x1x4xf32>, vector<1x1x4xf32> -> vector<1x1x16xf32>
    %92 = vector.extract_strided_slice %77 {offsets = [0, 1, 0], sizes = [16, 16, 16], strides = [1, 1, 1]} : vector<16x18x16xf32> to vector<16x16x16xf32>
    %93 = vector.broadcast %91 : vector<1x1x16xf32> to vector<16x16x16xf32>
    %94 = arith.mulf %93, %92 : vector<16x16x16xf32>
    %95 = arith.addf %86, %94 : vector<16x16x16xf32>
    %cst_54 = arith.constant 0.000000e+00 : f32
    %96 = vector.broadcast %cst_54 : f32 to vector<1x1x4xf32>
    %cst_55 = arith.constant 1.875000e-01 : f32
    %97 = vector.broadcast %cst_55 : f32 to vector<1x1x4xf32>
    %cst_56 = arith.constant 0.000000e+00 : f32
    %98 = vector.broadcast %cst_56 : f32 to vector<1x1x4xf32>
    %cst_57 = arith.constant 1.875000e-01 : f32
    %99 = vector.broadcast %cst_57 : f32 to vector<1x1x4xf32>
    %100 = tpu.concatenate %96, %97, %98, %99 in 2 : vector<1x1x4xf32>, vector<1x1x4xf32>, vector<1x1x4xf32>, vector<1x1x4xf32> -> vector<1x1x16xf32>
    %101 = vector.extract_strided_slice %77 {offsets = [0, 2, 0], sizes = [16, 16, 16], strides = [1, 1, 1]} : vector<16x18x16xf32> to vector<16x16x16xf32>
    %102 = vector.broadcast %100 : vector<1x1x16xf32> to vector<16x16x16xf32>
    %103 = arith.mulf %102, %101 : vector<16x16x16xf32>
    %104 = arith.addf %95, %103 : vector<16x16x16xf32>
    %c2_i32_58 = arith.constant 2 : i32
    %105 = arith.addi %3, %c2_i32_58 : i32
    %106 = arith.index_cast %105 : i32 to index
    %c0_59 = arith.constant 0 : index
    %c0_60 = arith.constant 0 : index
    %107 = vector.load %arg11[%106, %c0_59, %c0_60] : memref<18x18x16xf32, #tpu.memory_space<vmem>>, vector<16x18x16xf32>
    %cst_61 = arith.constant 0.000000e+00 : f32
    %108 = vector.broadcast %cst_61 : f32 to vector<1x1x4xf32>
    %cst_62 = arith.constant 0.000000e+00 : f32
    %109 = vector.broadcast %cst_62 : f32 to vector<1x1x4xf32>
    %cst_63 = arith.constant 6.250000e-02 : f32
    %110 = vector.broadcast %cst_63 : f32 to vector<1x1x4xf32>
    %cst_64 = arith.constant 0.000000e+00 : f32
    %111 = vector.broadcast %cst_64 : f32 to vector<1x1x4xf32>
    %112 = tpu.concatenate %108, %109, %110, %111 in 2 : vector<1x1x4xf32>, vector<1x1x4xf32>, vector<1x1x4xf32>, vector<1x1x4xf32> -> vector<1x1x16xf32>
    %113 = vector.extract_strided_slice %107 {offsets = [0, 0, 0], sizes = [16, 16, 16], strides = [1, 1, 1]} : vector<16x18x16xf32> to vector<16x16x16xf32>
    %114 = vector.broadcast %112 : vector<1x1x16xf32> to vector<16x16x16xf32>
    %115 = arith.mulf %114, %113 : vector<16x16x16xf32>
    %116 = arith.addf %104, %115 : vector<16x16x16xf32>
    %cst_65 = arith.constant 0.000000e+00 : f32
    %117 = vector.broadcast %cst_65 : f32 to vector<1x1x4xf32>
    %cst_66 = arith.constant 0.000000e+00 : f32
    %118 = vector.broadcast %cst_66 : f32 to vector<1x1x4xf32>
    %cst_67 = arith.constant 1.875000e-01 : f32
    %119 = vector.broadcast %cst_67 : f32 to vector<1x1x4xf32>
    %cst_68 = arith.constant 1.875000e-01 : f32
    %120 = vector.broadcast %cst_68 : f32 to vector<1x1x4xf32>
    %121 = tpu.concatenate %117, %118, %119, %120 in 2 : vector<1x1x4xf32>, vector<1x1x4xf32>, vector<1x1x4xf32>, vector<1x1x4xf32> -> vector<1x1x16xf32>
    %122 = vector.extract_strided_slice %107 {offsets = [0, 1, 0], sizes = [16, 16, 16], strides = [1, 1, 1]} : vector<16x18x16xf32> to vector<16x16x16xf32>
    %123 = vector.broadcast %121 : vector<1x1x16xf32> to vector<16x16x16xf32>
    %124 = arith.mulf %123, %122 : vector<16x16x16xf32>
    %125 = arith.addf %116, %124 : vector<16x16x16xf32>
    %cst_69 = arith.constant 0.000000e+00 : f32
    %126 = vector.broadcast %cst_69 : f32 to vector<1x1x4xf32>
    %cst_70 = arith.constant 0.000000e+00 : f32
    %127 = vector.broadcast %cst_70 : f32 to vector<1x1x4xf32>
    %cst_71 = arith.constant 0.000000e+00 : f32
    %128 = vector.broadcast %cst_71 : f32 to vector<1x1x4xf32>
    %cst_72 = arith.constant 6.250000e-02 : f32
    %129 = vector.broadcast %cst_72 : f32 to vector<1x1x4xf32>
    %130 = tpu.concatenate %126, %127, %128, %129 in 2 : vector<1x1x4xf32>, vector<1x1x4xf32>, vector<1x1x4xf32>, vector<1x1x4xf32> -> vector<1x1x16xf32>
    %131 = vector.extract_strided_slice %107 {offsets = [0, 2, 0], sizes = [16, 16, 16], strides = [1, 1, 1]} : vector<16x18x16xf32> to vector<16x16x16xf32>
    %132 = vector.broadcast %130 : vector<1x1x16xf32> to vector<16x16x16xf32>
    %133 = arith.mulf %132, %131 : vector<16x16x16xf32>
    %134 = arith.addf %125, %133 : vector<16x16x16xf32>
    %135 = vector.shape_cast %43 : vector<256x16xf32> to vector<16x16x16xf32>
    %136 = arith.addf %134, %135 : vector<16x16x16xf32>
    %c0_73 = arith.constant 0 : index
    %c0_74 = arith.constant 0 : index
    %c0_75 = arith.constant 0 : index
    %c0_76 = arith.constant 0 : index
    %137 = vector.load %arg9[%c0_73, %c0_74, %c0_75, %c0_76] : memref<1x16x16x16xf32, #tpu.memory_space<vmem>>, vector<1x16x16x16xf32>
    %138 = vector.shape_cast %137 : vector<1x16x16x16xf32> to vector<16x16x16xf32>
    %139 = vector.shape_cast %136 : vector<16x16x16xf32> to vector<1x16x16x16xf32>
    tpu.vector_store %arg9[%c0_73, %c0_74, %c0_75, %c0_76], %139 {strides = array<i32>} : memref<1x16x16x16xf32, #tpu.memory_space<vmem>>, vector<1x16x16x16xf32>,
    return
  }
  func.func @transform_0(%arg0: i32, %arg1: i32) -> (i32, i32, i32, i32) {
    %c0_i32 = arith.constant 0 : i32
    %c0_i32_0 = arith.constant 0 : i32
    %c0_i32_1 = arith.constant 0 : i32
    %c0_i32_2 = arith.constant 0 : i32
    return %arg0, %c0_i32, %c0_i32_0, %c0_i32_1 : i32, i32, i32, i32
  }
  func.func @transform_1(%arg0: i32, %arg1: i32) -> (i32, i32, i32, i32) {
    %c0_i32 = arith.constant 0 : i32
    %c0_i32_0 = arith.constant 0 : i32
    %c0_i32_1 = arith.constant 0 : i32
    %c0_i32_2 = arith.constant 0 : i32
    return %arg0, %c0_i32, %c0_i32_0, %c0_i32_1 : i32, i32, i32, i32
  }
  func.func @transform_2(%arg0: i32, %arg1: i32) -> (i32, i32) {
    %c0_i32 = arith.constant 0 : i32
    %c0_i32_0 = arith.constant 0 : i32
    %c0_i32_1 = arith.constant 0 : i32
    return %c0_i32, %c0_i32_0 : i32, i32
  }
  func.func @transform_3(%arg0: i32, %arg1: i32) -> (i32, i32) {
    %c0_i32 = arith.constant 0 : i32
    %c0_i32_0 = arith.constant 0 : i32
    %c0_i32_1 = arith.constant 0 : i32
    return %c0_i32, %c0_i32_0 : i32, i32
  }
  func.func @transform_4(%arg0: i32, %arg1: i32) -> (i32, i32) {
    %c0_i32 = arith.constant 0 : i32
    %c0_i32_0 = arith.constant 0 : i32
    %c0_i32_1 = arith.constant 0 : i32
    return %c0_i32, %c0_i32_0 : i32, i32
  }
  func.func @transform_5(%arg0: i32, %arg1: i32) -> (i32, i32) {
    %c0_i32 = arith.constant 0 : i32
    %c0_i32_0 = arith.constant 0 : i32
    %c0_i32_1 = arith.constant 0 : i32
    return %c0_i32, %c0_i32_0 : i32, i32
  }
  func.func @transform_6(%arg0: i32, %arg1: i32) -> (i32, i32, i32, i32) {
    %c0_i32 = arith.constant 0 : i32
    %c0_i32_0 = arith.constant 0 : i32
    %c0_i32_1 = arith.constant 0 : i32
    return %arg0, %arg1, %c0_i32, %c0_i32_0 : i32, i32, i32, i32
  }
  func.func @transform_7(%arg0: i32, %arg1: i32) -> (i32, i32, i32, i32) {
    %c0_i32 = arith.constant 0 : i32
    %c0_i32_0 = arith.constant 0 : i32
    %c0_i32_1 = arith.constant 0 : i32
    return %arg0, %arg1, %c0_i32, %c0_i32_0 : i32, i32, i32, i32
  }
}

</mosaic_0001>

<bundles_post_ra>
// kernel: _lambda_.2
= control target key start
LH: loop header
LB: loop body
LE: loop exit
PB: predicated region body
PF: predicated region fallthrough
CT: control target
= control target key end

     0   :  { %14 = vsyncpa [#allocation5], 0  ;;  %s3095_s27 = smov 0   ;;  %s3097_s28 = smov 0   ;;  %s3905_s0 = inlined_call_operand.vmem [shape: bf16[2,8,8,64], index: 0, kind: input, shape index: {}]   ;;  %s3906_s1 = inlined_call_operand.vmem [shape: bf16[64,4], index: 1, kind: input, shape index: {}]   ;;  %s3907_s2 = inlined_call_operand.vmem [shape: f32[1,4], index: 2, kind: input, shape index: {}]   ;;  %s3908_s3 = inlined_call_operand.hbm [shape: bf16[576,128], index: 3, kind: input, shape index: {}]   ;;  %s3909_s4 = inlined_call_operand.vmem [shape: f32[1,128], index: 4, kind: input, shape index: {}]   ;;  %s3910_s5 = inlined_call_operand.vmem [shape: bf16[128,16], index: 5, kind: input, shape index: {}]   ;;  %s3911_s6 = inlined_call_operand.vmem [shape: f32[1,16], index: 6, kind: input, shape index: {}]   ;;  %s3912_s7 = inlined_call_operand.vmem [shape: bf16[2,8,8,128], index: 7, kind: output, shape index: {0}]   ;;  %s3913_s8 = inlined_call_operand.vmem [shape: f32[2,8,8,16], index: 8, kind: output, shape index: {1}]  }
   0x1   :  { %s3099_s29 = smov 0  }
   0x2 LB: > { %s2615_s30 = sadd.s32 4294967295, %s3037_s29   ;;  %s32_s9 = sadd.s32 1, %s3033_s28  ;;  %s3037_s29 = sphi %s3099_s29, %s20_s29   ;;  %s3033_s28 = sphi %s3097_s28, %s3927_s28   ;;  %s3029_s27 = sphi %s3095_s27, %s3926_s27  }
   0x3   : > { %p34_p0 = scmp.ge.s32.totalorder %s32_s9, 2  ;;  %p2617_p1 = scmp.ge.s32.totalorder %s3037_s29, 1 }
   0x4   : > { %p245_p2 = scmp.lt.s32.totalorder %s3037_s29, 3  ;;  %p3120_p4 = scmp.eq.s32.totalorder %s2615_s30, 0 }
   0x5   : > { %s3929_s9 = smov (%p34_p0, %s32_s9), 0  ;;  %s3039_s12 = smov [#allocation4]  }
   0x6   : > { %p3116_p3 = pnand %p2617_p1, %p245_p2  ;;  %s263_s13 = sshll.u32 %s3039_s12, 4  ;;  %s264_s13 = int_to_ptr.vmem [resolvable:$true] %s263_s13 }
   0x7   : > { %s3918_s11 = scalar_select %p3120_p4, 1, 0 }
   0x8   : > { %s3917_s10 = scalar_select %p3116_p3, 1, 0 }
   0x9   : > { %p2879_p5 = pneg %p3116_p3  ;;  %s2983_s17 = scalar_lea.hbm %s3908_s3, 4608 }
   0xa   : > { %p2984_p7 = scmp.ne.s32.totalorder %s3908_s3, %s2983_s17  ;;  %p2990_p11 = scmp.lt.u32.totalorder %s2983_s17, %s3908_s3 }
   0xb   : > { %p3128_p6 = pnand %p3120_p4, %p2879_p5 }
   0xd   : > { %p2985_p8 = pneg %p3128_p6 }
   0xf   : > { %p2986_p9 = pnand %p2985_p8, %p2984_p7 }
  0x11   : > { %p2987_p10 = pneg %p2986_p9 }
  0x13   : > { %p2992_p12 = pnand %p2990_p11, %p2987_p10 }
  0x15   : > { %2995 = shalt.err (!%p2992_p12)
}
  0x16   : > { %s2996_s22 = scalar_lea.vmem %s264_s13, 4608  ;;  %p3004_p2 = scmp.lt.s32.totalorder %s264_s13, %s264_s13 }
  0x17   : > { %p2997_p13 = scmp.ne.s32.totalorder %s264_s13, %s2996_s22  ;;  %p3005_p5 = scmp.lt.s32.totalorder %s2996_s22, %s2996_s22 }
  0x19   : > { %p2999_p0 = pnand %p2997_p13, %p2985_p8  ;;  %p3006_p4 = por %p3005_p5, %p3004_p2 }
  0x1b   : > { %p3000_p1 = pneg %p2999_p0 }
  0x1d   : > { %p3007_p3 = pnand %p3006_p4, %p3000_p1 }
  0x1f   : > { %3010 = shalt.err (!%p3007_p3)
}
  0x20   : > { %s3040_s23 = smov 64   ;;  %s3041_s24 = smov 4  }
  0x21   : > { %2882 = dma.hbm_to_vmem [thread:$0]  (!%p3128_p6), %s3908_s3, 4608, %s264_s13, [#allocation5], %s3040_s23, %s3040_s23, %s3041_s24  }
  0x22   : > { %p3920_p7 = scmp.ne.s32.totalorder %s3917_s10, 0 }
  0x23   : > { %p3921_p9 = scmp.ne.s32.totalorder (!%p3920_p7), %s3918_s11, 0 }
  0x24   : > { %296 = sbr.rel (%p3920_p7) target bundleno = 695 (0x2b7), region = 48 }
  0x2b   : > { %3024 = dma.done.wait (%p3921_p9), [#allocation5], 4608  }
  0x2c   : > { %3026 = vsyncadd (%p3921_p9), [#allocation5], 4294962688  ;;  %p343_p3 = scmp.lt.s32.totalorder %s3029_s27, 1  ;;  %v3042_v0 = vmov 0   ;;  %vm373_vm0 = vcmask 1043456   ;;  %vm374_vm1 = vcmask 523268  }
  0x2d   : > { %1148 = vmatprep.subr.bf16.mxu1 %v3042_v0  ;;  %vm375_vm2 = vmor %vm374_vm1, %vm373_vm0  ;;  %s3043_s13 = smov 64   ;;  %v2920_v2 = vld [vmem:[%s3906_s1] sm:$0xff]   ;;  %v2921_v5 = vld [vmem:[%s3906_s1 + $0x8] sm:$0xff]   ;;  %vm716_vm3 = vcmask 523264   ;;  %vm460_vm4 = vsmask.f32 7938 }
  0x2e   : > { %s3931_s27 = smov (!%p343_p3, %s3029_s27), 1  ;;  %377 = vst.msk [vmem:[#allocation2 + $0x8] sm:$0xff] %vm375_vm2, %v3042_v0  ;;  %376 = vst.msk [vmem:[#allocation2] sm:$0xff] %vm375_vm2, %v3042_v0  ;;  %2835 = vmatprep.subr.bf16.mxu0 %v2920_v2  ;;  %v2922_v7 = vld [vmem:[%s3906_s1 + $0x10] sm:$0xff]   ;;  %v2923_v11 = vld [vmem:[%s3906_s1 + $0x18] sm:$0xff]   ;;  %vm459_vm5 = vcmask 519168  }
  0x2f   : > { %378 = vst.msk [vmem:[#allocation2 + $0x10] sm:$0xff] %vm375_vm2, %v3042_v0  ;;  %379 = vst.msk [vmem:[#allocation2 + $0x18] sm:$0xff] %vm375_vm2, %v3042_v0  ;;  %s2781_s30 = sshll.u32 %s3931_s27, 5  ;;  %2836 = vmatpush3.bf16.msra.mxu0 %v2920_v2  ;;  %v2929_v14 = vld [vmem:[#allocation4 + $0x60] sm:$0xff]   ;;  %v2931_v16 = vld [vmem:[#allocation4 + $0x68] sm:$0xff]   ;;  %vm526_vm9 = vcmask 1043968  }
  0x30   : > { %380 = vst.msk [vmem:[#allocation2 + $0x20] sm:$0xff] %vm375_vm2, %v3042_v0  ;;  %381 = vst.msk [vmem:[#allocation2 + $0x28] sm:$0xff] %vm375_vm2, %v3042_v0  ;;  %s3175_s12 = scalar_lea.vmem %s3905_s0, %s2781_s30  ;;  %2837 = vmatprep.subr.bf16.mxu0 %v2921_v5  ;;  %1149 = vmatpush1.bf16.msra.mxu1 %v2929_v14  ;;  %v2928_v18 = vld [vmem:[#allocation4] sm:$0xff]   ;;  %v2933_v19 = vld [vmem:[#allocation4 + $0x70] sm:$0xff]   ;;  %vm623_vm7 = vsmask.f32 3328 }
  0x31   : > { %382 = vst.msk [vmem:[#allocation2 + $0x30] sm:$0xff] %vm375_vm2, %v3042_v0  ;;  %383 = vst.msk [vmem:[#allocation2 + $0x38] sm:$0xff] %vm375_vm2, %v3042_v0  ;;  %v486_v1 = vld [vmem:[%s3175_s12] sm:$0xf]  ;;  %v488_v3 = vld [vmem:[%s3175_s12 + $0x8] sm:$0xf]  ;;  %1150 = vmatprep.subr.bf16.mxu1 %v3042_v0 }
  0x32   : > { %384 = vst.msk [vmem:[#allocation2 + $0x40] sm:$0xff] %vm375_vm2, %v3042_v0  ;;  %385 = vst.msk [vmem:[#allocation2 + $0x48] sm:$0xff] %vm375_vm2, %v3042_v0  ;;  %502 = vrot.lane.b32.xlu0 %v486_v1, %s3043_s13  ;;  %v487_v4 = vld [vmem:[%s3175_s12 + $0x4] sm:$0xf]  ;;  %506 = vrot.lane.b32.xlu1 %v488_v3, %s3043_s13  ;;  %v489_v6 = vld [vmem:[%s3175_s12 + $0xc] sm:$0xf] }
  0x33   : > { %v2924_v8 = vld [vmem:[%s3175_s12] sm:$0xff]   ;;  %v491_v9 = vld [vmem:[%s3175_s12 + $0x14] sm:$0xf]  ;;  %v490_v10 = vld [vmem:[%s3175_s12 + $0x10] sm:$0xf]  ;;  %2838 = vmatpush3.bf16.msra.mxu0 %v2921_v5  ;;  %s3044_s24 = smov 8  }
  0x34   : > { %2843 = vmatprep.mubr.msk.bf16.mxu0 %vm716_vm3, %v2924_v8  ;;  %2839 = vmatprep.subr.bf16.mxu0 %v2922_v7  ;;  %v492_v12 = vld [vmem:[%s3175_s12 + $0x18] sm:$0xf]  ;;  %v493_v13 = vld [vmem:[%s3175_s12 + $0x1c] sm:$0xf]  ;;  %v2925_v15 = vld [vmem:[%s3175_s12 + $0x8] sm:$0xff]   ;;  %s3045_s25 = smov 4  }
  0x35   : > { %v2926_v17 = vld [vmem:[%s3175_s12 + $0x10] sm:$0xff]   ;;  %1151 = vmatpush1.bf16.msra.mxu1 %v2931_v16  ;;  %v2930_v20 = vld [vmem:[#allocation4 + $0x8] sm:$0xff]   ;;  %v2935_v21 = vld [vmem:[#allocation4 + $0x78] sm:$0xff]   ;;  %s3046_s26 = smov 12   ;;  %vm874_vm10 = vcmask 31744   ;;  %vm883_vm11 = vcmask 64512  }
  0x36   : > { %504 = vrot.lane.b32.xlu0 %v487_v4, %s3043_s13  ;;  %508 = vrot.lane.b32.xlu1 %v489_v6, %s3043_s13  ;;  %v2927_v22 = vld [vmem:[%s3175_s12 + $0x18] sm:$0xff]   ;;  %v2932_v23 = vld [vmem:[#allocation4 + $0x10] sm:$0xff]   ;;  %v2937_v24 = vld [vmem:[#allocation4 + $0x80] sm:$0xff]   ;;  %vm892_vm12 = vcmask 97280   ;;  %vm902_vm13 = vcmask 130048   ;;  %vm924_vm14 = vcmask 122880  }
  0x37   : > { %2840 = vmatpush3.bf16.msra.mxu0 %v2922_v7  ;;  %1152 = vmatprep.subr.bf16.mxu1 %v3042_v0  ;;  %v2934_v25 = vld [vmem:[#allocation4 + $0x18] sm:$0xff]   ;;  %v535_v26 = vld [vmem:[%s3175_s12] sm:$0xf]  ;;  %v2939_v30 = vld [vmem:[#allocation4 + $0x88] sm:$0xff]   ;;  %s2783_s15 = sshll.u32 %s3931_s27, 6 }
  0x38   : > { %2841 = vmatprep.subr.bf16.mxu0 %v2923_v11  ;;  %v544_v27 = vshrl.u32 %v535_v26, 16  ;;  %v547_v28 = vshll.u32 %v535_v26, 16  ;;  %v386_v29 = vld [vmem:[%s3175_s12] sm:$0xf]  ;;  %vm3225_vm6 = vmand %vm459_vm5, %vm460_vm4  ;;  %v2936_v36 = vld [vmem:[#allocation4 + $0x20] sm:$0xff]   ;;  %s3831_s17 = scalar_lea.vmem %s3913_s8, %s2783_s15 }
  0x39   : > { %1153 = vmatpush1.bf16.msra.mxu1 %v2933_v19  ;;  %v395_v31 = vshrl.u32 %v386_v29, 16  ;;  %v398_v32 = vshll.u32 %v386_v29, 16  ;;  %v462_v39 = vld [vmem:[#allocation2 + $0x8] sm:$0xf]  ;;  %v2941_v42 = vld [vmem:[#allocation4 + $0x90] sm:$0xff]   ;;  %vm3233_vm8 = vmand %vm459_vm5, %vm623_vm7  ;;  %vm1924_vm7 = vcmask 1046528  }
  0x3a   : > { %510 = vrot.lane.b32.xlu0 %v490_v10, %s3043_s13  ;;  %512 = vrot.lane.b32.xlu1 %v491_v9, %s3043_s13  ;;  %v546_v34 = vrot.slane %v544_v27, 4  ;;  %v549_v35 = vrot.slane %v547_v28, 5  ;;  %v537_v40 = vld [vmem:[%s3175_s12 + $0x8] sm:$0xf]  ;;  %v625_v45 = vld [vmem:[#allocation2 + $0xc] sm:$0xf] }
  0x3b   : > { %2842 = vmatpush3.bf16.msra.mxu0 %v2923_v11  ;;  %1154 = vmatprep.subr.bf16.mxu1 %v3042_v0  ;;  %v397_v37 = vrot.slane %v395_v31, 7  ;;  %v388_v41 = vld [vmem:[%s3175_s12 + $0x8] sm:$0xf]  ;;  %v562_v46 = vshrl.u32 %v537_v40, 16  ;;  %v565_v47 = vshll.u32 %v537_v40, 16  ;;  %v2938_v53 = vld [vmem:[#allocation4 + $0x28] sm:$0xff]  }
  0x3c   : > { %1333 = vmatprep.subr.bf16.mxu0 %v3042_v0  ;;  %v550_v38 = vor.u32 %v549_v35, %v546_v34  ;;  %v409_v48 = vshrl.u32 %v388_v41, 16  ;;  %v412_v50 = vshll.u32 %v388_v41, 16  ;;  %v536_v51 = vld [vmem:[%s3175_s12 + $0x4] sm:$0xf]  ;;  %v468_v58 = vld [vmem:[#allocation2 + $0x18] sm:$0xf] }
  0x3d   : > { %1155 = vmatpush1.bf16.msra.mxu1 %v2935_v21  ;;  %v400_v44 = vor.u32 %v398_v32, %v397_v37  ;;  %v387_v52 = vld [vmem:[%s3175_s12 + $0x4] sm:$0xf]  ;;  %v564_v55 = vrot.slane %v562_v46, 4  ;;  %v567_v56 = vrot.slane %v565_v47, 5  ;;  %v631_v60 = vld [vmem:[#allocation2 + $0x1c] sm:$0xf] }
  0x3e   : > { %514 = vrot.lane.b32.xlu0 %v492_v12, %s3043_s13  ;;  %516 = vrot.lane.b32.xlu1 %v493_v13, %s3043_s13  ;;  %v551_v49 = vrot.slane %v550_v38, 4  ;;  %v411_v57 = vrot.slane %v409_v48, 7  ;;  %v553_v61 = vshrl.u32 %v536_v51, 16  ;;  %v556_v62 = vshll.u32 %v536_v51, 16  ;;  %v2943_v1 = vld [vmem:[#allocation4 + $0x98] sm:$0xff]   ;;  %v2940_v6 = vld [vmem:[#allocation4 + $0x30] sm:$0xff]   ;;  %s3506_s13 = scalar_lea.vmem %s3912_s7, %s2781_s30 }
  0x3f   : > { %2844 = vmatmul.mubr.msk.bf16.vlgmr.msra.gmra.mrb[0].mxu0 %vm716_vm3, %v2925_v15  ;;  %1156 = vmatprep.subr.bf16.mxu1 %v3042_v0  ;;  %v463_v54 = vsel %vm3225_vm6, %v400_v44, %v462_v39  ;;  %v402_v63 = vshrl.u32 %v387_v52, 16  ;;  %v568_v2 = vor.u32 %v567_v56, %v564_v55  ;;  %v405_v4 = vshll.u32 %v387_v52, 16  ;;  %v465_v5 = vld [vmem:[#allocation2 + $0x10] sm:$0xf]  ;;  %v628_v16 = vld [vmem:[#allocation2 + $0x14] sm:$0xf] }
  0x40   : > { %2847 = vmatprep.mubr.msk.bf16.mxu0 %vm716_vm3, %v2926_v17  ;;  %1334 = vmatpush1.bf16.msra.mxu0 %v2928_v18  ;;  %464 = vst [vmem:[#allocation2 + $0x8] sm:$0xf] %v463_v54  ;;  %v626_v59 = vsel %vm3233_vm8, %v551_v49, %v625_v45  ;;  %v414_v3 = vor.u32 %v412_v50, %v411_v57  ;;  %v555_v7 = vrot.slane %v553_v61, 4  ;;  %v558_v8 = vrot.slane %v556_v62, 5  ;;  %v2945_v10 = vld [vmem:[#allocation4 + $0xa0] sm:$0xff]   ;;  %v2942_v19 = vld [vmem:[#allocation4 + $0x38] sm:$0xff]  }
  0x41   : > { %1335 = vmatprep.subr.bf16.mxu0 %v3042_v0  ;;  %1157 = vmatpush1.bf16.msra.mxu1 %v2937_v24  ;;  %627 = vst [vmem:[#allocation2 + $0xc] sm:$0xf] %v626_v59  ;;  %v404_v9 = vrot.slane %v402_v63, 7  ;;  %v569_v11 = vrot.slane %v568_v2, 4  ;;  %v538_v17 = vld [vmem:[%s3175_s12 + $0xc] sm:$0xf] }
  0x42   : > { %1158 = vmatprep.subr.bf16.mxu1 %v3042_v0  ;;  %v469_v12 = vsel %vm3225_vm6, %v414_v3, %v468_v58  ;;  %v559_v13 = vor.u32 %v558_v8, %v555_v7  ;;  %v389_v18 = vld [vmem:[%s3175_s12 + $0xc] sm:$0xf]  ;;  %v2947_v24 = vld [vmem:[#allocation4 + $0xa8] sm:$0xff]   ;;  %v540_v31 = vld [vmem:[%s3175_s12 + $0x14] sm:$0xf] }
  0x43   : > { %470 = vst [vmem:[#allocation2 + $0x18] sm:$0xf] %v469_v12  ;;  %v407_v14 = vor.u32 %v405_v4, %v404_v9  ;;  %v632_v15 = vsel %vm3233_vm8, %v569_v11, %v631_v60  ;;  %v419_v26 = vshll.u32 %v389_v18, 16  ;;  %v391_v32 = vld [vmem:[%s3175_s12 + $0x14] sm:$0xf]  ;;  %v592_v37 = vshll.u32 %v540_v31, 16 }
  0x44   : > { %1336 = vmatpush1.bf16.msra.mxu0 %v2930_v20  ;;  %633 = vst [vmem:[#allocation2 + $0x1c] sm:$0xf] %v632_v15  ;;  %v560_v20 = vrot.slane %v559_v13, 4  ;;  %v634_v35 = vld [vmem:[#allocation2 + $0x24] sm:$0xf]  ;;  %v430_v38 = vshrl.u32 %v391_v32, 16 }
  0x45   : > { %1337 = vmatprep.subr.bf16.mxu0 %v3042_v0  ;;  %1159 = vmatpush1.bf16.msra.mxu1 %v2939_v30  ;;  %v466_v21 = vsel %vm3225_vm6, %v407_v14, %v465_v5  ;;  %v471_v30 = vld [vmem:[#allocation2 + $0x20] sm:$0xf]  ;;  %v433_v40 = vshll.u32 %v391_v32, 16  ;;  %v477_v41 = vld [vmem:[#allocation2 + $0x30] sm:$0xf]  ;;  %v594_v47 = vrot.slane %v592_v37, 5 }
  0x46   : > { %1160 = vmatprep.subr.bf16.mxu1 %v3042_v0  ;;  %467 = vst [vmem:[#allocation2 + $0x10] sm:$0xf] %v466_v21  ;;  %v629_v27 = vsel %vm3233_vm8, %v560_v20, %v628_v16  ;;  %v2944_v44 = vld [vmem:[#allocation4 + $0x40] sm:$0xff]   ;;  %v432_v48 = vrot.slane %v430_v38, 7  ;;  %v2949_v55 = vld [vmem:[#allocation4 + $0xb0] sm:$0xff]   ;;  %v2946_v2 = vld [vmem:[#allocation4 + $0x48] sm:$0xff]  }
  0x47   : > { %2848 = vmatmul.mubr.msk.bf16.gmra.mrb[4].mxu0 %vm716_vm3, %v2927_v22  ;;  %v571_v22 = vshrl.u32 %v538_v17, 16  ;;  %630 = vst [vmem:[#allocation2 + $0x14] sm:$0xf] %v629_v27  ;;  %v390_v49 = vld [vmem:[%s3175_s12 + $0x10] sm:$0xf]  ;;  %v2948_v9 = vld [vmem:[#allocation4 + $0x50] sm:$0xff]  }
  0x48   : > { %1338 = vmatpush1.bf16.msra.mxu0 %v2932_v23  ;;  %v574_v23 = vshll.u32 %v538_v17, 16  ;;  %v640_v51 = vld [vmem:[#allocation2 + $0x34] sm:$0xf]  ;;  %v423_v54 = vshrl.u32 %v390_v49, 16  ;;  %v435_v58 = vor.u32 %v433_v40, %v432_v48  ;;  %v426_v59 = vshll.u32 %v390_v49, 16  ;;  %v2950_v38 = vld [vmem:[#allocation4 + $0x58] sm:$0xff]  }
  0x49   : > { %1339 = vmatprep.subr.bf16.mxu0 %v3042_v0  ;;  %1161 = vmatpush1.bf16.msra.mxu1 %v2941_v42  ;;  %v573_v28 = vrot.slane %v571_v22, 4  ;;  %v539_v42 = vld [vmem:[%s3175_s12 + $0x10] sm:$0xf]  ;;  %v474_v60 = vld [vmem:[#allocation2 + $0x28] sm:$0xf] }
  0x4a   : > { %1162 = vmatprep.subr.bf16.mxu1 %v3042_v0  ;;  %v576_v29 = vrot.slane %v574_v23, 5  ;;  %v580_v52 = vshrl.u32 %v539_v42, 16  ;;  %v478_v4 = vsel %vm3225_vm6, %v435_v58, %v477_v41  ;;  %v542_v7 = vld [vmem:[%s3175_s12 + $0x1c] sm:$0xf]  ;;  %v637_v12 = vld [vmem:[#allocation2 + $0x2c] sm:$0xf] }
  0x4b   : > { %479 = vst [vmem:[#allocation2 + $0x30] sm:$0xf] %v478_v4  ;;  %v393_v8 = vld [vmem:[%s3175_s12 + $0x1c] sm:$0xf]  ;;  %v607_v13 = vshrl.u32 %v542_v7, 16  ;;  %v610_v14 = vshll.u32 %v542_v7, 16 }
  0x4c   : > { %1340 = vmatpush1.bf16.msra.mxu0 %v2934_v25  ;;  %v416_v25 = vshrl.u32 %v389_v18, 16  ;;  %v577_v39 = vor.u32 %v576_v29, %v573_v28  ;;  %v582_v62 = vrot.slane %v580_v52, 4  ;;  %v444_v15 = vshrl.u32 %v393_v8, 16  ;;  %v392_v20 = vld [vmem:[%s3175_s12 + $0x18] sm:$0xf] }
  0x4d   : > { %1341 = vmatprep.subr.bf16.mxu0 %v3042_v0  ;;  %1163 = vmatpush1.bf16.msra.mxu1 %v2943_v1  ;;  %v425_v1 = vrot.slane %v423_v54, 7  ;;  %v447_v18 = vshll.u32 %v393_v8, 16  ;;  %v609_v21 = vrot.slane %v607_v13, 4  ;;  %v612_v22 = vrot.slane %v610_v14, 5  ;;  %v646_v27 = vld [vmem:[#allocation2 + $0x44] sm:$0xf] }
  0x4e   : > { %1164 = vmatprep.subr.bf16.mxu1 %v3042_v0  ;;  %v418_v34 = vrot.slane %v416_v25, 7  ;;  %v578_v50 = vrot.slane %v577_v39, 4  ;;  %v446_v23 = vrot.slane %v444_v15, 7  ;;  %v437_v29 = vshrl.u32 %v392_v20, 16  ;;  %v643_v41 = vld [vmem:[#allocation2 + $0x3c] sm:$0xf] }
  0x4f   : > { %v2958_v14 = vld [vmem:[#allocation4 + $0xd8] sm:$0xff]  }
  0x50   : > { %1342 = vmatpush1.bf16.msra.mxu0 %v2936_v36  ;;  %v589_v36 = vshrl.u32 %v540_v31, 16  ;;  %v421_v45 = vor.u32 %v419_v26, %v418_v34  ;;  %v635_v61 = vsel %vm3233_vm8, %v578_v50, %v634_v35  ;;  %v613_v31 = vor.u32 %v612_v22, %v609_v21  ;;  %v480_v35 = vld [vmem:[#allocation2 + $0x38] sm:$0xf] }
  0x51   : > { %1343 = vmatprep.subr.bf16.mxu0 %v3042_v0  ;;  %1165 = vmatpush1.bf16.msra.mxu1 %v2945_v10  ;;  %636 = vst [vmem:[#allocation2 + $0x24] sm:$0xf] %v635_v61  ;;  %v2953_v10 = vld [vmem:[#allocation4 + $0xb8] sm:$0xff]   ;;  %v449_v32 = vor.u32 %v447_v18, %v446_v23  ;;  %v439_v37 = vrot.slane %v437_v29, 7  ;;  %v2961_v18 = vld [vmem:[#allocation4 + $0xe0] sm:$0xff]   ;;  %v2962_v21 = vld [vmem:[#allocation4 + $0xe8] sm:$0xff]  }
  0x52   : > { %1166 = vmatprep.subr.bf16.mxu1 %v3042_v0  ;;  %v591_v46 = vrot.slane %v589_v36, 4  ;;  %v472_v56 = vsel %vm3225_vm6, %v421_v45, %v471_v30  ;;  %v440_v30 = vshll.u32 %v392_v20, 16  ;;  %v614_v39 = vrot.slane %v613_v31, 4  ;;  %v2965_v23 = vld [vmem:[#allocation4 + $0xf0] sm:$0xff]   ;;  %v2704_v29 = vld [vmem:[#allocation2 + $0x48] sm:$0xff] }
  0x53   : > { %473 = vst [vmem:[#allocation2 + $0x20] sm:$0xf] %v472_v56 }
  0x54   : > { %1344 = vmatpush1.bf16.msra.mxu0 %v2938_v53  ;;  %v583_v53 = vshll.u32 %v539_v42, 16  ;;  %v595_v57 = vor.u32 %v594_v47, %v591_v46  ;;  %v647_v45 = vsel %vm3233_vm8, %v614_v39, %v646_v27  ;;  %v2971_v27 = vld [vmem:[#allocation4 + $0x110] sm:$0xff]  }
  0x55   : > { %1345 = vmatprep.subr.bf16.mxu0 %v3042_v0  ;;  %1167 = vmatpush1.bf16.msra.mxu1 %v2947_v24  ;;  %v483_v24 = vld [vmem:[#allocation2 + $0x40] sm:$0xf]  ;;  %648 = vst [vmem:[#allocation2 + $0x44] sm:$0xf] %v647_v45 }
  0x56   : > { %1168 = vmatprep.subr.bf16.mxu1 %v3042_v0  ;;  %v585_v63 = vrot.slane %v583_v53, 5  ;;  %v596_v3 = vrot.slane %v595_v57, 4  ;;  %v484_v40 = vsel %vm3225_vm6, %v449_v32, %v483_v24  ;;  %v959_v53 = vld [vmem:[#allocation2] sm:$0xff]  ;;  %v2968_v24 = vld [vmem:[#allocation4 + $0xf8] sm:$0xff]  }
  0x57   : > { %485 = vst [vmem:[#allocation2 + $0x40] sm:$0xf] %v484_v40  ;;  %v2628_v32 = vld [vmem:[%s3907_s2] ss:$0 sm:$0xff] }
  0x58   : > { %1346 = vmatpush1.bf16.msra.mxu0 %v2940_v6  ;;  %v586_v5 = vor.u32 %v585_v63, %v582_v62  ;;  %v428_v6 = vor.u32 %v426_v59, %v425_v1  ;;  %v641_v11 = vsel %vm3233_vm8, %v596_v3, %v640_v51  ;;  %v2955_v63 = vld [vmem:[#allocation4 + $0xc0] sm:$0xff]  }
  0x59   : > { %1347 = vmatprep.subr.bf16.mxu0 %v3042_v0  ;;  %1169 = vmatpush1.bf16.msra.mxu1 %v2949_v55  ;;  %642 = vst [vmem:[#allocation2 + $0x34] sm:$0xf] %v641_v11 }
  0x5a   : > { %1170 = vmatprep.subr.bf16.mxu1 %v3042_v0  ;;  %v587_v16 = vrot.slane %v586_v5, 4  ;;  %v475_v17 = vsel %vm3225_vm6, %v428_v6, %v474_v60  ;;  %v2956_v5 = vld [vmem:[#allocation4 + $0xc8] sm:$0xff]  }
  0x5b   : > { %476 = vst [vmem:[#allocation2 + $0x28] sm:$0xf] %v475_v17 }
  0x5c   : > { %1348 = vmatpush1.bf16.msra.mxu0 %v2942_v19  ;;  %v541_v19 = vld [vmem:[%s3175_s12 + $0x18] sm:$0xf]  ;;  %v638_v26 = vsel %vm3233_vm8, %v587_v16, %v637_v12 }
  0x5d   : > { %1349 = vmatprep.subr.bf16.mxu0 %v3042_v0  ;;  %v598_v25 = vshrl.u32 %v541_v19, 16  ;;  %v601_v28 = vshll.u32 %v541_v19, 16  ;;  %1171 = vmatpush1.bf16.msra.mxu1 %v2953_v10  ;;  %639 = vst [vmem:[#allocation2 + $0x2c] sm:$0xf] %v638_v26  ;;  %v2957_v10 = vld [vmem:[#allocation4 + $0xd0] sm:$0xff]   ;;  %v2970_v26 = vld [vmem:[#allocation4 + $0x108] sm:$0xff]  }
  0x5e   : > { %1554 = vmatprep.subr.bf16.mxu1 %v3042_v0 }
  0x5f   : > { %v600_v34 = vrot.slane %v598_v25, 4  ;;  %v603_v36 = vrot.slane %v601_v28, 5  ;;  %v2969_v25 = vld [vmem:[#allocation4 + $0x100] sm:$0xff]   ;;  %v2972_v28 = vld [vmem:[#allocation4 + $0x118] sm:$0xff]  }
  0x60   : > { %1350 = vmatpush1.bf16.msra.mxu0 %v2944_v44  ;;  %v442_v44 = vor.u32 %v440_v30, %v439_v37 }
  0x61   : > { %1351 = vmatprep.subr.bf16.mxu0 %v3042_v0  ;;  %v604_v42 = vor.u32 %v603_v36, %v600_v34 }
  0x62   : > { %v481_v47 = vsel %vm3225_vm6, %v442_v44, %v480_v35 }
  0x63   : > { %v605_v46 = vrot.slane %v604_v42, 4  ;;  %482 = vst [vmem:[#allocation2 + $0x38] sm:$0xf] %v481_v47 }
  0x64   : > { %1352 = vmatpush1.bf16.msra.mxu0 %v2946_v2 }
  0x65   : > { %1353 = vmatprep.subr.bf16.mxu0 %v3042_v0  ;;  %v644_v48 = vsel %vm3233_vm8, %v605_v46, %v643_v41  ;;  %v2975_v46 = vld [vmem:[%s3910_s5] sm:$0xff]   ;;  %vm2004_vm8 = vcmask 1045504  }
  0x66   : > { %645 = vst [vmem:[#allocation2 + $0x3c] sm:$0xf] %v644_v48  ;;  %v2976_v48 = vld [vmem:[%s3910_s5 + $0x8] sm:$0xff]  }
  0x68   : > { %1354 = vmatpush1.bf16.msra.mxu0 %v2948_v9 }
  0x69   : > { %1355 = vmatprep.subr.bf16.mxu0 %v3042_v0 }
  0x6c   : > { %1356 = vmatpush1.bf16.msra.mxu0 %v2950_v38 }
  0x6d   : > { %2851 = vmatprep.subr.bf16.mxu0 %v2975_v46 }
  0xa4   : > { %v503_v49 = vpop.permute.xlu0 %502  ;;  %v507_v50 = vpop.permute.xlu1 %506 }
  0xa5   : > { %527 = vst.msk [vmem:[#allocation2 + $0x8] sm:$0xf] %vm526_vm9, %v503_v49  ;;  %529 = vst.msk [vmem:[#allocation2 + $0x18] sm:$0xf] %vm526_vm9, %v507_v50  ;;  %v2977_v50 = vld [vmem:[%s3910_s5 + $0x10] sm:$0xff]  }
  0xa8   : > { %v505_v51 = vpop.permute.xlu0 %504  ;;  %v509_v52 = vpop.permute.xlu1 %508 }
  0xa9   : > { %528 = vst.msk [vmem:[#allocation2 + $0x10] sm:$0xf] %vm526_vm9, %v505_v51  ;;  %530 = vst.msk [vmem:[#allocation2 + $0x20] sm:$0xf] %vm526_vm9, %v509_v52  ;;  %v2978_v52 = vld [vmem:[%s3910_s5 + $0x18] sm:$0xff]  }
  0xac   : > { %v960_v33 = vld [vmem:[#allocation2 + $0x8] sm:$0xff]  ;;  %v511_v54 = vpop.permute.xlu0 %510  ;;  %v513_v56 = vpop.permute.xlu1 %512  ;;  %v962_v57 = vld [vmem:[#allocation2 + $0x18] sm:$0xff] }
  0xad   : > { %v2673_v55 = vcombine.low %v959_v53, %v960_v33  ;;  %v2674_v43 = vcombine.high %v959_v53, %v960_v33  ;;  %531 = vst.msk [vmem:[#allocation2 + $0x28] sm:$0xf] %vm526_vm9, %v511_v54  ;;  %532 = vst.msk [vmem:[#allocation2 + $0x30] sm:$0xf] %vm526_vm9, %v513_v56  ;;  %v2979_v53 = vld [vmem:[%s3910_s5 + $0x20] sm:$0xff]   ;;  %v2980_v54 = vld [vmem:[%s3910_s5 + $0x28] sm:$0xff]  }
  0xaf   : > { %2693 = vmatprep.mubr.msk.bf16.mxu0 %vm716_vm3, %v2674_v43  ;;  %v2982_v43 = vld [vmem:[%s3910_s5 + $0x38] sm:$0xff]  }
  0xb0   : > { %1366 = vmatmul.mubr.bf16.vlgmr.msra.gmra.mrb[8].mxu0 %v2673_v55  ;;  %v2642_v58 = vld [vmem:[#allocation2 + $0x10] sm:$0xff]  ;;  %v515_v59 = vpop.permute.xlu0 %514  ;;  %v2644_v1 = vld [vmem:[#allocation2 + $0x20] sm:$0xff]  ;;  %v517_v2 = vpop.permute.xlu1 %516 }
  0xb1   : > { %v2649_v60 = vcombine.low %v960_v33, %v2642_v58  ;;  %v2650_v61 = vcombine.high %v960_v33, %v2642_v58  ;;  %v2676_v62 = vcombine.high %v2642_v58, %v962_v57  ;;  %533 = vst.msk [vmem:[#allocation2 + $0x38] sm:$0xf] %vm526_vm9, %v515_v59  ;;  %v2652_v3 = vcombine.high %v962_v57, %v2644_v1  ;;  %v2981_v55 = vld [vmem:[%s3910_s5 + $0x30] sm:$0xff]  }
  0xb2   : > { %534 = vst.msk [vmem:[#allocation2 + $0x40] sm:$0xf] %vm526_vm9, %v517_v2  ;;  %v2675_v7 = vcombine.low %v2642_v58, %v962_v57  ;;  %v2651_v9 = vcombine.low %v962_v57, %v2644_v1  ;;  %2852 = vmatpush3.bf16.msra.mxu0 %v2975_v46 }
  0xb3   : > { %2669 = vmatprep.mubr.msk.bf16.mxu1 %vm716_vm3, %v2650_v61  ;;  %2694 = vmatprep.mubr.msk.bf16.mxu0 %vm716_vm3, %v2676_v62 }
  0xb4   : > { %1181 = vmatmul.mubr.bf16.vlgmr.msra.gmra.mrb[0].mxu1 %v2649_v60  ;;  %v2645_v4 = vld [vmem:[#allocation2 + $0x28] sm:$0xff]  ;;  %v2646_v8 = vld [vmem:[#allocation2 + $0x30] sm:$0xff]  ;;  %2853 = vmatprep.subr.bf16.mxu0 %v2976_v48 }
  0xb5   : > { %1555 = vmatpush1.bf16.msra.mxu1 %v2955_v63  ;;  %2670 = vmatprep.mubr.msk.bf16.mxu1 %vm716_vm3, %v2652_v3  ;;  %v2678_v6 = vcombine.high %v2644_v1, %v2645_v4  ;;  %v2654_v11 = vcombine.high %v2645_v4, %v2646_v8  ;;  %v2677_v12 = vcombine.low %v2644_v1, %v2645_v4 }
  0xb6   : > { %1556 = vmatprep.subr.bf16.mxu1 %v3042_v0  ;;  %v2653_v17 = vcombine.low %v2645_v4, %v2646_v8  ;;  %2854 = vmatpush3.bf16.msra.mxu0 %v2976_v48 }
  0xb7   : > { %2855 = vmatprep.subr.bf16.mxu0 %v2977_v50 }
  0xb8   : > { %1374 = vmatmul.mubr.bf16.gmra.mrb[12].mxu0 %v2675_v7  ;;  %v2647_v13 = vld [vmem:[#allocation2 + $0x38] sm:$0xff] }
  0xb9   : > { %1557 = vmatpush1.bf16.msra.mxu1 %v2956_v5  ;;  %2695 = vmatprep.mubr.msk.bf16.mxu0 %vm716_vm3, %v2678_v6  ;;  %v2680_v15 = vcombine.high %v2646_v8, %v2647_v13  ;;  %v2648_v16 = vld [vmem:[#allocation2 + $0x40] sm:$0xff]  ;;  %v2679_v20 = vcombine.low %v2646_v8, %v2647_v13 }
  0xba   : > { %1558 = vmatprep.subr.bf16.mxu1 %v3042_v0  ;;  %v2656_v19 = vcombine.high %v2647_v13, %v2648_v16  ;;  %v2655_v22 = vcombine.low %v2647_v13, %v2648_v16  ;;  %v2712_v30 = vcombine.high %v2648_v16, %v2704_v29  ;;  %v2711_v31 = vcombine.low %v2648_v16, %v2704_v29 }
  0xbb   : > { %2856 = vmatpush3.bf16.msra.mxu0 %v2977_v50 }
  0xbc   : > { %1189 = vmatmul.mubr.bf16.gmra.mrb[4].mxu1 %v2651_v9  ;;  %2857 = vmatprep.subr.bf16.mxu0 %v2978_v52 }
  0xbd   : > { %1559 = vmatpush1.bf16.msra.mxu1 %v2957_v10  ;;  %2671 = vmatprep.mubr.msk.bf16.mxu1 %vm716_vm3, %v2654_v11 }
  0xbe   : > { %1560 = vmatprep.subr.bf16.mxu1 %v3042_v0 }
  0xbf   : > { %2858 = vmatpush3.bf16.msra.mxu0 %v2978_v52 }
  0xc0   : > { %1382 = vmatmul.mubr.bf16.gmra.mrb[16].mxu0 %v2677_v12  ;;  %2859 = vmatprep.subr.bf16.mxu0 %v2979_v53 }
  0xc1   : > { %1561 = vmatpush1.bf16.msra.mxu1 %v2958_v14  ;;  %2696 = vmatprep.mubr.msk.bf16.mxu0 %vm716_vm3, %v2680_v15 }
  0xc2   : > { %1562 = vmatprep.subr.bf16.mxu1 %v3042_v0 }
  0xc3   : > { %2860 = vmatpush3.bf16.msra.mxu0 %v2979_v53 }
  0xc4   : > { %1197 = vmatmul.mubr.bf16.gmra.mrb[8].mxu1 %v2653_v17  ;;  %2861 = vmatprep.subr.bf16.mxu0 %v2980_v54 }
  0xc5   : > { %1563 = vmatpush1.bf16.msra.mxu1 %v2961_v18  ;;  %2672 = vmatprep.mubr.msk.bf16.mxu1 %vm716_vm3, %v2656_v19 }
  0xc6   : > { %1564 = vmatprep.subr.bf16.mxu1 %v3042_v0 }
  0xc7   : > { %2862 = vmatpush3.bf16.msra.mxu0 %v2980_v54 }
  0xc8   : > { %1390 = vmatmul.mubr.bf16.gmra.mrb[20].mxu0 %v2679_v20  ;;  %2863 = vmatprep.subr.bf16.mxu0 %v2981_v55 }
  0xc9   : > { %1565 = vmatpush1.bf16.msra.mxu1 %v2962_v21 }
  0xca   : > { %1566 = vmatprep.subr.bf16.mxu1 %v3042_v0 }
  0xcb   : > { %2864 = vmatpush3.bf16.msra.mxu0 %v2981_v55 }
  0xcc   : > { %1205 = vmatmul.mubr.bf16.gmra.mrb[12].mxu1 %v2655_v22  ;;  %2865 = vmatprep.subr.bf16.mxu0 %v2982_v43 }
  0xcd   : > { %1567 = vmatpush1.bf16.msra.mxu1 %v2965_v23  ;;  %2725 = vmatprep.mubr.msk.bf16.mxu1 %vm716_vm3, %v2676_v62 }
  0xce   : > { %1568 = vmatprep.subr.bf16.mxu1 %v3042_v0 }
  0xcf   : > { %2866 = vmatpush3.bf16.msra.mxu0 %v2982_v43 }
  0xd1   : > { %1569 = vmatpush1.bf16.msra.mxu1 %v2968_v24 }
  0xd2   : > { %1570 = vmatprep.subr.bf16.mxu1 %v3042_v0 }
  0xd5   : > { %1571 = vmatpush1.bf16.msra.mxu1 %v2969_v25 }
  0xd6   : > { %1572 = vmatprep.subr.bf16.mxu1 %v3042_v0 }
  0xd9   : > { %1573 = vmatpush1.bf16.msra.mxu1 %v2970_v26 }
  0xda   : > { %1574 = vmatprep.subr.bf16.mxu1 %v3042_v0 }
  0xdd   : > { %1575 = vmatpush1.bf16.msra.mxu1 %v2971_v27 }
  0xde   : > { %1576 = vmatprep.subr.bf16.mxu1 %v3042_v0 }
  0xe1   : > { %1577 = vmatpush1.bf16.msra.mxu1 %v2972_v28 }
  0xe4   : > { %1587 = vmatmul.mubr.bf16.vlgmr.msra.gmra.mrb[16].mxu1 %v2675_v7 }
  0xe5   : > { %2726 = vmatprep.mubr.msk.bf16.mxu1 %vm716_vm3, %v2678_v6 }
  0xec   : > { %1595 = vmatmul.mubr.bf16.gmra.mrb[20].mxu1 %v2677_v12 }
  0xed   : > { %2727 = vmatprep.mubr.msk.bf16.mxu1 %vm716_vm3, %v2680_v15 }
  0xf4   : > { %1603 = vmatmul.mubr.bf16.gmra.mrb[24].mxu1 %v2679_v20 }
  0xf5   : > { %2728 = vmatprep.mubr.msk.bf16.mxu1 %vm716_vm3, %v2712_v30 }
  0xfc   : > { %1611 = vmatmul.mubr.bf16.gmra.mrb[28].mxu1 %v2711_v31 }
 0x112   : > { %v2845_v34 = vpop.f32.mrb[0].mxu0 }
 0x113   : > { %v3329_v0 = vadd.f32 %v2845_v34, %v2628_v32  ;;  %v763_v35 = vpop.f32.mrb[1].mxu0 }
 0x114   : > { %v2846_v36 = vpop.f32.mrb[2].mxu0  ;;  %v3335_v37 = vadd.f32 %v2628_v32, %v763_v35 }
 0x115   : > { %830 = vrot.lane.b32.xlu1 %v3329_v0, %s3044_s24  ;;  %806 = vrot.lane.b32.xlu0 %v3329_v0, %s3045_s25  ;;  %v766_v38 = vpop.f32.mrb[3].mxu0  ;;  %v3341_v39 = vadd.f32 %v2846_v36, %v2628_v32 }
 0x116   : > { %v3351_v45 = vadd.f32 %v2628_v32, %v766_v38 }
 0x119   : > { %826 = vrot.lane.b32.xlu1 %v3335_v37, %s3044_s24  ;;  %854 = vrot.lane.b32.xlu0 %v3329_v0, %s3046_s26 }
 0x11a   : > { %v2849_v40 = vpop.f32.mrb[4].mxu0 }
 0x11b   : > { %v779_v41 = vpop.f32.mrb[5].mxu0  ;;  %v3364_v47 = vadd.f32 %v2849_v40, %v2628_v32 }
 0x11c   : > { %v2850_v42 = vpop.f32.mrb[6].mxu0  ;;  %v3373_v49 = vadd.f32 %v2628_v32, %v779_v41 }
 0x11d   : > { %808 = vrot.lane.b32.xlu1 %v3341_v39, %s3045_s25  ;;  %802 = vrot.lane.b32.xlu0 %v3335_v37, %s3045_s25  ;;  %v782_v44 = vpop.f32.mrb[7].mxu0  ;;  %v3394_v33 = vadd.f32 %v2850_v42, %v2628_v32 }
 0x11e   : > { %v3382_v51 = vadd.f32 %v2628_v32, %v782_v44 }
 0x121   : > { %856 = vrot.lane.b32.xlu1 %v3341_v39, %s3046_s26  ;;  %850 = vrot.lane.b32.xlu0 %v3335_v37, %s3046_s26 }
 0x125   : > { %804 = vrot.lane.b32.xlu1 %v3351_v45, %s3045_s25  ;;  %832 = vrot.lane.b32.xlu0 %v3341_v39, %s3044_s24 }
 0x129   : > { %852 = vrot.lane.b32.xlu1 %v3351_v45, %s3046_s26  ;;  %828 = vrot.lane.b32.xlu0 %v3351_v45, %s3044_s24 }
 0x12d   : > { %838 = vrot.lane.b32.xlu1 %v3364_v47, %s3044_s24  ;;  %814 = vrot.lane.b32.xlu0 %v3364_v47, %s3045_s25 }
 0x131   : > { %834 = vrot.lane.b32.xlu1 %v3373_v49, %s3044_s24  ;;  %810 = vrot.lane.b32.xlu0 %v3373_v49, %s3045_s25 }
 0x135   : > { %812 = vrot.lane.b32.xlu1 %v3382_v51, %s3045_s25  ;;  %858 = vrot.lane.b32.xlu0 %v3373_v49, %s3046_s26 }
 0x139   : > { %860 = vrot.lane.b32.xlu1 %v3382_v51, %s3046_s26  ;;  %836 = vrot.lane.b32.xlu0 %v3382_v51, %s3044_s24 }
 0x13d   : > { %816 = vrot.lane.b32.xlu1 %v3394_v33, %s3045_s25  ;;  %862 = vrot.lane.b32.xlu0 %v3364_v47, %s3046_s26 }
 0x141   : > { %840 = vrot.lane.b32.xlu0 %v3394_v33, %s3044_s24  ;;  %864 = vrot.lane.b32.xlu1 %v3394_v33, %s3046_s26 }
 0x183   : > { %v1367_v56 = vpop.f32.mrb[8].mxu0 }
 0x184   : > { %v1369_v57 = vpop.f32.mrb[9].mxu0 }
 0x185   : > { %v1370_v58 = vpop.f32.mrb[10].mxu0 }
 0x186   : > { %v1372_v59 = vpop.f32.mrb[11].mxu0 }
 0x187   : > { %v1182_v60 = vpop.f32.mrb[0].mxu1  ;;  %v831_v4 = vpop.permute.xlu1 %830 }
 0x188   : > { %v3417_v61 = vadd.f32 %v1367_v56, %v1182_v60  ;;  %v1184_v62 = vpop.f32.mrb[1].mxu1  ;;  %v807_v5 = vpop.permute.xlu0 %806 }
 0x189   : > { %v1185_v63 = vpop.f32.mrb[2].mxu1  ;;  %v877_v6 = vsel %vm874_vm10, %v3329_v0, %v807_v5 }
 0x18a   : > { %v3419_v1 = vadd.f32 %v1370_v58, %v1185_v63  ;;  %v1187_v2 = vpop.f32.mrb[3].mxu1  ;;  %v886_v13 = vsel %vm883_vm11, %v877_v6, %v831_v4 }
 0x18b   : > { %v1375_v3 = vpop.f32.mrb[12].mxu0  ;;  %v827_v12 = vpop.permute.xlu1 %826 }
 0x18c   : > { %v1377_v7 = vpop.f32.mrb[13].mxu0  ;;  %v855_v14 = vpop.permute.xlu0 %854 }
 0x18d   : > { %v1378_v8 = vpop.f32.mrb[14].mxu0  ;;  %v895_v15 = vsel %vm892_vm12, %v886_v13, %v855_v14 }
 0x18e   : > { %v1380_v9 = vpop.f32.mrb[15].mxu0  ;;  %905 = vst.msk [vmem:[#allocation3 + $0x31] sm:$0xff] %vm902_vm13, %v895_v15 }
 0x18f   : > { %v1190_v10 = vpop.f32.mrb[4].mxu1  ;;  %v809_v21 = vpop.permute.xlu1 %808 }
 0x190   : > { %v3423_v11 = vadd.f32 %v1375_v3, %v1190_v10  ;;  %v1192_v16 = vpop.f32.mrb[5].mxu1  ;;  %v803_v22 = vpop.permute.xlu0 %802  ;;  %v878_v41 = vsel %vm874_vm10, %v3341_v39, %v809_v21 }
 0x191   : > { %v1193_v17 = vpop.f32.mrb[6].mxu1  ;;  %v875_v23 = vsel %vm874_vm10, %v3335_v37, %v803_v22 }
 0x192   : > { %v3428_v18 = vadd.f32 %v1378_v8, %v1193_v17  ;;  %v1195_v19 = vpop.f32.mrb[7].mxu1  ;;  %v884_v29 = vsel %vm883_vm11, %v875_v23, %v827_v12 }
 0x193   : > { %v1383_v20 = vpop.f32.mrb[16].mxu0  ;;  %v857_v28 = vpop.permute.xlu1 %856 }
 0x194   : > { %v1385_v24 = vpop.f32.mrb[17].mxu0  ;;  %v851_v30 = vpop.permute.xlu0 %850 }
 0x195   : > { %v1386_v25 = vpop.f32.mrb[18].mxu0  ;;  %v917_v32 = vld [vmem:[#allocation3 + $0x31] sm:$0x1]  ;;  %v938_v34 = vld [vmem:[#allocation3 + $0x38] sm:$0x1]  ;;  %v893_v0 = vsel %vm892_vm12, %v884_v29, %v851_v30 }
 0x196   : > { %v1388_v27 = vpop.f32.mrb[19].mxu0  ;;  %928 = vst.msk [vmem:[#allocation3 + $0x30] sm:$0x1] %vm924_vm14, %v917_v32  ;;  %948 = vst.msk [vmem:[#allocation3 + $0x39] sm:$0x1] %vm924_vm14, %v938_v34 }
 0x197   : > { %v1198_v26 = vpop.f32.mrb[8].mxu1  ;;  %903 = vst.msk [vmem:[#allocation3 + $0x11] sm:$0xff] %vm902_vm13, %v893_v0  ;;  %911 = vst.msk [vmem:[#allocation3 + $0x1] sm:$0xff] %vm902_vm13, %v893_v0  ;;  %v805_v42 = vpop.permute.xlu1 %804  ;;  %v3484_v30 = vld [vmem:[%s3909_s4] ss:$0 sm:$0xff] }
 0x198   : > { %v3433_v31 = vadd.f32 %v1383_v20, %v1198_v26  ;;  %v1200_v35 = vpop.f32.mrb[9].mxu1  ;;  %v833_v44 = vpop.permute.xlu0 %832  ;;  %v876_v55 = vsel %vm874_vm10, %v3351_v45, %v805_v42 }
 0x199   : > { %v1201_v36 = vpop.f32.mrb[10].mxu1  ;;  %v887_v46 = vsel %vm883_vm11, %v878_v41, %v833_v44 }
 0x19a   : > { %v3440_v37 = vadd.f32 %v1386_v25, %v1201_v36  ;;  %v1203_v38 = vpop.f32.mrb[11].mxu1  ;;  %v896_v50 = vsel %vm892_vm12, %v887_v46, %v857_v28 }
 0x19b   : > { %v1391_v40 = vpop.f32.mrb[20].mxu0  ;;  %906 = vst.msk [vmem:[#allocation3 + $0x41] sm:$0xff] %vm902_vm13, %v896_v50  ;;  %v853_v43 = vpop.permute.xlu1 %852 }
 0x19c   : > { %v1393_v48 = vpop.f32.mrb[21].mxu0  ;;  %v829_v56 = vpop.permute.xlu0 %828 }
 0x19d   : > { %v1394_v52 = vpop.f32.mrb[22].mxu0  ;;  %v885_v60 = vsel %vm883_vm11, %v876_v55, %v829_v56 }
 0x19e   : > { %v1396_v54 = vpop.f32.mrb[23].mxu0  ;;  %v914_v39 = vld [vmem:[#allocation3 + $0x1] sm:$0x1]  ;;  %v915_v58 = vld [vmem:[#allocation3 + $0x11] sm:$0x1]  ;;  %v894_v63 = vsel %vm892_vm12, %v885_v60, %v853_v43 }
 0x19f   : > { %v1206_v53 = vpop.f32.mrb[12].mxu1  ;;  %v935_v59 = vld [vmem:[#allocation3 + $0x8] sm:$0x1]  ;;  %925 = vst.msk [vmem:[#allocation3] sm:$0x1] %vm924_vm14, %v914_v39  ;;  %v839_v3 = vpop.permute.xlu1 %838 }
 0x1a0   : > { %v3449_v57 = vadd.f32 %v1391_v40, %v1206_v53  ;;  %926 = vst.msk [vmem:[#allocation3 + $0x10] sm:$0x1] %vm924_vm14, %v915_v58  ;;  %v936_v62 = vld [vmem:[#allocation3 + $0x18] sm:$0x1]  ;;  %945 = vst.msk [vmem:[#allocation3 + $0x9] sm:$0x1] %vm924_vm14, %v935_v59  ;;  %v815_v4 = vpop.permute.xlu0 %814 }
 0x1a1   : > { %v1208_v2 = vpop.f32.mrb[13].mxu1  ;;  %946 = vst.msk [vmem:[#allocation3 + $0x19] sm:$0x1] %vm924_vm14, %v936_v62 }
 0x1a2   : > { %904 = vst.msk [vmem:[#allocation3 + $0x21] sm:$0xff] %vm902_vm13, %v894_v63  ;;  %v1209_v45 = vpop.f32.mrb[14].mxu1  ;;  %v918_v7 = vld [vmem:[#allocation3 + $0x41] sm:$0x1]  ;;  %v939_v8 = vld [vmem:[#allocation3 + $0x48] sm:$0x1] }
 0x1a3   : > { %v3458_v5 = vadd.f32 %v1394_v52, %v1209_v45  ;;  %v1211_v6 = vpop.f32.mrb[15].mxu1  ;;  %929 = vst.msk [vmem:[#allocation3 + $0x40] sm:$0x1] %vm924_vm14, %v918_v7  ;;  %949 = vst.msk [vmem:[#allocation3 + $0x49] sm:$0x1] %vm924_vm14, %v939_v8  ;;  %v835_v9 = vpop.permute.xlu1 %834 }
 0x1a4   : > { %v811_v10 = vpop.permute.xlu0 %810 }
 0x1a5   : > { %v879_v12 = vsel %vm874_vm10, %v3373_v49, %v811_v10  ;;  %v881_v49 = vsel %vm874_vm10, %v3364_v47, %v815_v4 }
 0x1a6   : > { %v888_v15 = vsel %vm883_vm11, %v879_v12, %v835_v9  ;;  %v890_v26 = vsel %vm883_vm11, %v881_v49, %v839_v3 }
 0x1a7   : > { %v813_v16 = vpop.permute.xlu1 %812 }
 0x1a8   : > { %v859_v17 = vpop.permute.xlu0 %858  ;;  %v880_v20 = vsel %vm874_vm10, %v3382_v51, %v813_v16 }
 0x1a9   : > { %v916_v13 = vld [vmem:[#allocation3 + $0x21] sm:$0x1]  ;;  %v937_v14 = vld [vmem:[#allocation3 + $0x28] sm:$0x1]  ;;  %v897_v19 = vsel %vm892_vm12, %v888_v15, %v859_v17 }
 0x1aa   : > { %927 = vst.msk [vmem:[#allocation3 + $0x20] sm:$0x1] %vm924_vm14, %v916_v13  ;;  %947 = vst.msk [vmem:[#allocation3 + $0x29] sm:$0x1] %vm924_vm14, %v937_v14 }
 0x1ab   : > { %907 = vst.msk [vmem:[#allocation3 + $0x51] sm:$0xff] %vm902_vm13, %v897_v19  ;;  %v861_v21 = vpop.permute.xlu1 %860 }
 0x1ac   : > { %v837_v22 = vpop.permute.xlu0 %836 }
 0x1ad   : > { %v889_v23 = vsel %vm883_vm11, %v880_v20, %v837_v22 }
 0x1ae   : > { %v898_v24 = vsel %vm892_vm12, %v889_v23, %v861_v21 }
 0x1af   : > { %908 = vst.msk [vmem:[#allocation3 + $0x61] sm:$0xff] %vm902_vm13, %v898_v24  ;;  %v817_v25 = vpop.permute.xlu1 %816 }
 0x1b0   : > { %v863_v27 = vpop.permute.xlu0 %862  ;;  %v882_v32 = vsel %vm874_vm10, %v3394_v33, %v817_v25 }
 0x1b1   : > { %v899_v51 = vsel %vm892_vm12, %v890_v26, %v863_v27 }
 0x1b2   : > { %v919_v28 = vld [vmem:[#allocation3 + $0x51] sm:$0x1]  ;;  %v940_v29 = vld [vmem:[#allocation3 + $0x58] sm:$0x1]  ;;  %909 = vst.msk [vmem:[#allocation3 + $0x71] sm:$0xff] %vm902_vm13, %v899_v51 }
 0x1b3   : > { %930 = vst.msk [vmem:[#allocation3 + $0x50] sm:$0x1] %vm924_vm14, %v919_v28  ;;  %950 = vst.msk [vmem:[#allocation3 + $0x59] sm:$0x1] %vm924_vm14, %v940_v29  ;;  %v865_v40 = vpop.permute.xlu1 %864 }
 0x1b4   : > { %v841_v35 = vpop.permute.xlu0 %840 }
 0x1b5   : > { %v891_v36 = vsel %vm883_vm11, %v882_v32, %v841_v35 }
 0x1b6   : > { %v920_v41 = vld [vmem:[#allocation3 + $0x61] sm:$0x1]  ;;  %v941_v42 = vld [vmem:[#allocation3 + $0x68] sm:$0x1]  ;;  %v900_v48 = vsel %vm892_vm12, %v891_v36, %v865_v40  ;;  %v3047_v36 = vmov 0.0  }
 0x1b7   : > { %v1588_v47 = vpop.f32.mrb[16].mxu1  ;;  %931 = vst.msk [vmem:[#allocation3 + $0x60] sm:$0x1] %vm924_vm14, %v920_v41  ;;  %951 = vst.msk [vmem:[#allocation3 + $0x69] sm:$0x1] %vm924_vm14, %v941_v42  ;;  %v3048_v42 = vmov 0.0625  }
 0x1b8   : > { %v1619_v34 = vadd.f32 %v1588_v47, %v3417_v61  ;;  %v1590_v0 = vpop.f32.mrb[17].mxu1  ;;  %910 = vst.msk [vmem:[#allocation3 + $0x81] sm:$0xff] %vm902_vm13, %v900_v48  ;;  %913 = vst.msk [vmem:[#allocation3 + $0x91] sm:$0xff] %vm902_vm13, %v900_v48  ;;  %v2063_v48 = vsel %vm874_vm10, 0.1875, %v3047_v36 }
 0x1b9   : > { %v1591_v38 = vpop.f32.mrb[18].mxu1  ;;  %v921_v52 = vld [vmem:[#allocation3 + $0x71] sm:$0x1]  ;;  %v942_v53 = vld [vmem:[#allocation3 + $0x78] sm:$0x1]  ;;  %v1866_v0 = vlaneseq }
 0x1ba   : > { %v1634_v44 = vadd.f32 %v3484_v30, %v1619_v34  ;;  %v1620_v46 = vadd.f32 %v1591_v38, %v3419_v1  ;;  %v1593_v50 = vpop.f32.mrb[19].mxu1  ;;  %932 = vst.msk [vmem:[#allocation3 + $0x70] sm:$0x1] %vm924_vm14, %v921_v52  ;;  %952 = vst.msk [vmem:[#allocation3 + $0x79] sm:$0x1] %vm924_vm14, %v942_v53  ;;  %v1886_v38 = vsel %vm883_vm11, 0.1875, %v3047_v36 }
 0x1bb   : > { %v1867_v35 = vshrl.u32 %v1866_v0, 7  ;;  %v1887_v41 = vsel %vm892_vm12, %v1886_v38, 0.0  ;;  %v3586_v0 = vld [vmem:[#allocation3 + $0x10] sm:$0xff] }
 0x1bc   : > { %v1650_v33 = vmul.f32 0.2, %v1634_v44  ;;  %v1635_v61 = vadd.f32 %v3484_v30, %v1620_v46  ;;  %vm1642_vm15 = vcmp.gt.f32.partialorder %v1634_v44, 0.0 }
 0x1bd   : > { %v1868_v40 = vsub.s32 0, %v1867_v35  ;;  %v2748_v35 = vld [vmem:[#allocation3 + $0x18] sm:$0x3] }
 0x1be   : > { %vm1643_vm0 = vcmp.gt.f32.partialorder %v1635_v61, 0.0  ;;  %v1651_v1 = vmul.f32 0.2, %v1635_v61  ;;  %v1658_v56 = vsel %vm1642_vm15, %v1634_v44, %v1650_v33  ;;  %v3049_v44 = vmov 0.1875   ;;  %v1844_v33 = vld [vmem:[#allocation3] sm:$0xff] }
 0x1bf   : > { %v1596_v54 = vpop.f32.mrb[20].mxu1  ;;  %v922_v60 = vld [vmem:[#allocation3 + $0x81] sm:$0x1]  ;;  %v923_v62 = vld [vmem:[#allocation3 + $0x91] sm:$0x1]  ;;  %v2161_v46 = vsel %vm874_vm10, 0.0, %v3049_v44  ;;  %v3534_v52 = vrot.slane %v1887_v41, %v1868_v40 }
 0x1c0   : > { %v1621_v55 = vadd.f32 %v1596_v54, %v3423_v11  ;;  %v1598_v43 = vpop.f32.mrb[21].mxu1  ;;  %v1659_v39 = vsel %vm1643_vm0, %v1635_v61, %v1651_v1  ;;  %v943_v63 = vld [vmem:[#allocation3 + $0x88] sm:$0x1]  ;;  %933 = vst.msk [vmem:[#allocation3 + $0x80] sm:$0x1] %vm924_vm14, %v922_v60  ;;  %v2162_v1 = vsel %vm883_vm11, %v2161_v46, 0.0 }
 0x1c1   : > { %v1599_v58 = vpop.f32.mrb[22].mxu1  ;;  %v1666_v59 = vpack.c.bf16 %v1659_v39, %v1658_v56  ;;  %934 = vst.msk [vmem:[#allocation3 + $0x90] sm:$0x1] %vm924_vm14, %v923_v62  ;;  %v944_v11 = vld [vmem:[#allocation3 + $0x98] sm:$0x1]  ;;  %v2064_v54 = vsel %vm883_vm11, %v2063_v48, 0.1875  ;;  %v1892_v56 = vmul.f32 %v3534_v52, %v1844_v33 }
 0x1c2   : > { %v1636_v2 = vadd.f32 %v3484_v30, %v1621_v55  ;;  %v1622_v45 = vadd.f32 %v1599_v58, %v3428_v18  ;;  %953 = vst.msk [vmem:[#allocation3 + $0x89] sm:$0x1] %vm924_vm14, %v943_v63  ;;  %v1601_v3 = vpop.f32.mrb[23].mxu1  ;;  %954 = vst.msk [vmem:[#allocation3 + $0x99] sm:$0x1] %vm924_vm14, %v944_v11  ;;  %v2258_v55 = vsel %vm883_vm11, 0.0, %v3048_v42 }
 0x1c3   : > { %2796 = vst [vmem:[%s3506_s13] sm:$0xff] %v1666_v59   ;;  %2867 = vmatprep.mubr.bf16.mxu0 %v1666_v59  ;;  %v1845_v61 = vld [vmem:[#allocation3 + $0x8] sm:$0x3]  ;;  %v2163_v59 = vsel %vm892_vm12, %v2162_v1, 0.1875  ;;  %v2065_v60 = vsel %vm892_vm12, %v2064_v54, 0.0  ;;  %v2259_v62 = vsel %vm892_vm12, %v2258_v55, 0.0  ;;  %v2280_v63 = vsel %vm883_vm11, 0.0, %v3049_v44 }
 0x1c4   : > { %v1652_v4 = vmul.f32 0.2, %v1636_v2  ;;  %v1637_v6 = vadd.f32 %v3484_v30, %v1622_v45  ;;  %vm1644_vm1 = vcmp.gt.f32.partialorder %v1636_v2, 0.0  ;;  %v1893_v39 = vmul.f32 %v3534_v52, %v1845_v61  ;;  %v1849_v45 = vld [vmem:[#allocation3 + $0x28] sm:$0x3] }
 0x1c6   : > { %vm1645_vm2 = vcmp.gt.f32.partialorder %v1637_v6, 0.0  ;;  %v1653_v7 = vmul.f32 0.2, %v1637_v6  ;;  %v1660_v8 = vsel %vm1644_vm1, %v1636_v2, %v1652_v4  ;;  %v3548_v2 = vld [vmem:[#allocation3 + $0x20] sm:$0xff]  ;;  %v3554_v4 = vld [vmem:[#allocation3 + $0x30] sm:$0xff] }
 0x1c7   : > { %v1604_v18 = vpop.f32.mrb[24].mxu1 }
 0x1c8   : > { %v1661_v9 = vsel %vm1645_vm2, %v1637_v6, %v1653_v7  ;;  %v1623_v10 = vadd.f32 %v1604_v18, %v3433_v31  ;;  %v1606_v12 = vpop.f32.mrb[25].mxu1  ;;  %v2752_v6 = vld [vmem:[#allocation3 + $0x38] sm:$0x3]  ;;  %v3556_v7 = vrot.slane %v2163_v59, %v1868_v40  ;;  %v1925_v18 = vrot.slane %v1892_v56, 1 }
 0x1c9   : > { %v1667_v13 = vpack.c.bf16 %v1661_v9, %v1660_v8  ;;  %v1607_v14 = vpop.f32.mrb[26].mxu1  ;;  %v1926_v8 = vrot.slane %v1893_v39, 1  ;;  %v3558_v9 = vrot.slane %v2065_v60, %v1868_v40  ;;  %v2281_v12 = vsel %vm892_vm12, %v2280_v63, 0.1875  ;;  %v3611_v60 = vld [vmem:[#allocation3 + $0x40] sm:$0xff] }
 0x1ca   : > { %v1638_v15 = vadd.f32 %v3484_v30, %v1623_v10  ;;  %v1624_v16 = vadd.f32 %v1607_v14, %v3440_v37  ;;  %v1609_v17 = vpop.f32.mrb[27].mxu1  ;;  %v3560_v10 = vrot.slane %v2259_v62, %v1868_v40  ;;  %v1896_v14 = vmul.f32 %v3534_v52, %v3548_v2  ;;  %v2768_v62 = vld [vmem:[#allocation3 + $0x48] sm:$0x3] }
 0x1cb   : > { %2812 = vst [vmem:[%s3506_s13 + $0x8] sm:$0xff] %v1667_v13   ;;  %2868 = vmatmul.mubr.bf16.vlgmr.msra.gmra.mrb[24].mxu0 %v1667_v13  ;;  %v2358_v13 = vsel %vm892_vm12, 0.0, %v3048_v42  ;;  %v2070_v63 = vmul.f32 %v3586_v0, %v3558_v9 }
 0x1cc   : > { %v1654_v19 = vmul.f32 0.2, %v1638_v15  ;;  %v1639_v20 = vadd.f32 %v3484_v30, %v1624_v16  ;;  %vm1646_vm3 = vcmp.gt.f32.partialorder %v1638_v15, 0.0 }
 0x1ce   : > { %vm1647_vm4 = vcmp.gt.f32.partialorder %v1639_v20, 0.0  ;;  %v1655_v21 = vmul.f32 0.2, %v1639_v20  ;;  %v1662_v23 = vsel %vm1646_vm3, %v1638_v15, %v1654_v19  ;;  %v1897_v15 = vmul.f32 %v3534_v52, %v1849_v45  ;;  %v1851_v19 = vld [vmem:[#allocation3 + $0x38] sm:$0x3] }
 0x1cf   : > { %v1612_v22 = vpop.f32.mrb[28].mxu1 }
 0x1d0   : > { %v1625_v31 = vadd.f32 %v1612_v22, %v3449_v57  ;;  %v1614_v49 = vpop.f32.mrb[29].mxu1  ;;  %v1663_v24 = vsel %vm1647_vm4, %v1639_v20, %v1655_v21  ;;  %v2093_v20 = vmul.f32 0.5625, %v3554_v4  ;;  %v2094_v21 = vmul.f32 0.5625, %v2752_v6 }
 0x1d1   : > { %v1615_v25 = vpop.f32.mrb[30].mxu1  ;;  %v1668_v26 = vpack.c.bf16 %v1663_v24, %v1662_v23  ;;  %v2172_v22 = vmul.f32 %v3554_v4, %v3556_v7  ;;  %v3573_v49 = vrot.slane %v2281_v12, %v1868_v40  ;;  %v1927_v23 = vsel %vm1924_vm7, %v1925_v18, %v1926_v8 }
 0x1d2   : > { %v1640_v37 = vadd.f32 %v3484_v30, %v1625_v31  ;;  %v1626_v27 = vadd.f32 %v1615_v25, %v3458_v5  ;;  %v1617_v28 = vpop.f32.mrb[31].mxu1  ;;  %v1861_v5 = vsel %vm874_vm10, 0.0625, %v3047_v36  ;;  %v2173_v31 = vmul.f32 %v2752_v6, %v3556_v7 }
 0x1d3   : > { %2813 = vst [vmem:[%s3506_s13 + $0x10] sm:$0xff] %v1668_v26   ;;  %2871 = vmatprep.mubr.bf16.mxu0 %v1668_v26  ;;  %v1863_v50 = vsel %vm883_vm11, %v1861_v5, 0.0  ;;  %v3576_v24 = vrot.slane %v2358_v13, %v1868_v40  ;;  %v1898_v26 = vmul.f32 %v3554_v4, %v3534_v52  ;;  %v1932_v28 = vrot.slane %v1897_v15, 1 }
 0x1d4   : > { %v1656_v29 = vmul.f32 0.2, %v1640_v37  ;;  %v1641_v51 = vadd.f32 %v3484_v30, %v1626_v27  ;;  %vm1648_vm5 = vcmp.gt.f32.partialorder %v1640_v37, 0.0  ;;  %v1965_v30 = vsel %vm874_vm10, 0.0, %v3048_v42 }
 0x1d5   : > { %v1966_v53 = vsel %vm883_vm11, %v1965_v30, 0.0  ;;  %v1865_v43 = vsel %vm892_vm12, %v1863_v50, 0.0  ;;  %v1931_v27 = vrot.slane %v1896_v14, 1  ;;  %v2206_v5 = vrot.slane %v2172_v22, 2 }
 0x1d6   : > { %vm1649_vm6 = vcmp.gt.f32.partialorder %v1641_v51, 0.0  ;;  %v1657_v47 = vmul.f32 0.2, %v1641_v51  ;;  %v1664_v57 = vsel %vm1648_vm5, %v1640_v37, %v1656_v29  ;;  %v1967_v58 = vsel %vm892_vm12, %v1966_v53, 0.0 }
 0x1d7   : > { %v3550_v11 = vrot.slane %v1865_v43, %v1868_v40  ;;  %v3552_v3 = vrot.slane %v1967_v58, %v1868_v40  ;;  %v1899_v37 = vmul.f32 %v3534_v52, %v1851_v19  ;;  %v2207_v40 = vrot.slane %v2173_v31, 2 }
 0x1d8   : > { %v1665_v32 = vsel %vm1649_vm6, %v1641_v51, %v1657_v47  ;;  %v3584_v47 = vmul.f32 %v3554_v4, %v3558_v9  ;;  %v1934_v42 = vrot.slane %v1898_v26, 1  ;;  %v1933_v46 = vsel %vm1924_vm7, %v1931_v27, %v1932_v28 }
 0x1d9   : > { %v1669_v34 = vpack.c.bf16 %v1665_v32, %v1664_v57  ;;  %v1972_v16 = vmul.f32 %v3552_v3, %v1844_v33  ;;  %v1973_v17 = vmul.f32 %v3552_v3, %v1845_v61  ;;  %v1870_v25 = vmul.f32 %v3550_v11, %v1844_v33  ;;  %v1847_v61 = vld [vmem:[#allocation3 + $0x18] sm:$0x3] }
 0x1da   : > { %v2127_v57 = vrot.slane %v2093_v20, 1  ;;  %v2128_v32 = vrot.slane %v2094_v21, 1  ;;  %v1976_v36 = vmul.f32 %v3552_v3, %v3548_v2  ;;  %v1977_v38 = vmul.f32 %v3552_v3, %v1849_v45 }
 0x1db   : > { %2814 = vst [vmem:[%s3506_s13 + $0x18] sm:$0xff] %v1669_v34   ;;  %2872 = vmatmul.mubr.bf16.gmra.mrb[28].mxu0 %v1669_v34  ;;  %v2005_v29 = vrot.slane %v1972_v16, 2  ;;  %v2006_v51 = vrot.slane %v1973_v17, 2  ;;  %v1957_v34 = vadd.f32 %v1927_v23, %v1870_v25  ;;  %v1873_v41 = vmul.f32 %v3554_v4, %v3550_v11  ;;  %v2764_v25 = vld [vmem:[#allocation3 + $0x28] sm:$0x3] }
 0x1dc   : > { %v1935_v30 = vrot.slane %v1899_v37, 1  ;;  %v1978_v44 = vmul.f32 %v3554_v4, %v3552_v3  ;;  %v2089_v50 = vmul.f32 0.5625, %v3586_v0  ;;  %v2090_v33 = vmul.f32 0.5625, %v2748_v35 }
 0x1dd   : > { %v2007_v48 = vsel %vm2004_vm8, %v2005_v29, %v2006_v51  ;;  %v1872_v53 = vmul.f32 %v3550_v11, %v3548_v2  ;;  %v3601_v1 = vsel %vm1924_vm7, %v2127_v57, %v2128_v32  ;;  %v1979_v55 = vmul.f32 %v3552_v3, %v1851_v19  ;;  %v2754_v19 = vld [vmem:[#allocation3 + $0x48] sm:$0x3] }
 0x1de   : > { %v2037_v54 = vadd.f32 %v2007_v48, %v1957_v34  ;;  %v2011_v43 = vrot.slane %v1976_v36, 2  ;;  %v2012_v56 = vrot.slane %v1977_v38, 2  ;;  %v3605_v39 = vsel %vm2004_vm8, %v2206_v5, %v2207_v40 }
 0x1df   : > { %v3609_v58 = vmul.f32 %v3554_v4, %v3573_v49  ;;  %v1959_v59 = vadd.f32 %v1933_v46, %v1872_v53  ;;  %v1894_v45 = vmul.f32 %v3586_v0, %v3534_v52  ;;  %v1895_v6 = vmul.f32 %v3534_v52, %v1847_v61 }
 0x1e0   : > { %v2121_v18 = vrot.slane %v2089_v50, 1  ;;  %v2122_v8 = vrot.slane %v2090_v33, 1  ;;  %v1936_v12 = vsel %vm1924_vm7, %v1934_v42, %v1935_v30  ;;  %v2014_v13 = vrot.slane %v1978_v44, 2  ;;  %v2750_v42 = vld [vmem:[#allocation3 + $0x28] sm:$0x3] }
 0x1e1   : > { %v2078_v14 = vadd.f32 %v2070_v63, %v2037_v54  ;;  %v2168_v15 = vmul.f32 %v3586_v0, %v3556_v7  ;;  %v2169_v16 = vmul.f32 %v2748_v35, %v3556_v7  ;;  %v2015_v17 = vrot.slane %v1979_v55, 2 }
 0x1e2   : > { %v2013_v20 = vsel %vm2004_vm8, %v2011_v43, %v2012_v56  ;;  %v3625_v21 = vmul.f32 %v3611_v60, %v3560_v10  ;;  %v3629_v22 = vmul.f32 %v3611_v60, %v3573_v49  ;;  %v3632_v31 = vmul.f32 %v2768_v62, %v3573_v49 }
 0x1e3   : > { %v2039_v23 = vadd.f32 %v2013_v20, %v1959_v59  ;;  %v1960_v26 = vadd.f32 %v1936_v12, %v1873_v41  ;;  %v1928_v37 = vrot.slane %v1894_v45, 1  ;;  %v1929_v27 = vrot.slane %v1895_v6, 1 }
 0x1e4   : > { %v3636_v28 = vmul.f32 %v3611_v60, %v3576_v24  ;;  %v2123_v29 = vsel %vm1924_vm7, %v2121_v18, %v2122_v8  ;;  %v2095_v51 = vmul.f32 0.5625, %v3611_v60  ;;  %v2096_v57 = vmul.f32 0.5625, %v2754_v19 }
 0x1e5   : > { %v2153_v32 = vadd.f32 %v2123_v29, %v2078_v14  ;;  %v2200_v34 = vrot.slane %v2168_v15, 2  ;;  %v1974_v35 = vmul.f32 %v3586_v0, %v3552_v3  ;;  %v1975_v36 = vmul.f32 %v3552_v3, %v1847_v61 }
 0x1e6   : > { %v2201_v38 = vrot.slane %v2169_v16, 2  ;;  %v2286_v5 = vmul.f32 %v3573_v49, %v3548_v2  ;;  %v2287_v40 = vmul.f32 %v2764_v25, %v3573_v49  ;;  %v2016_v41 = vsel %vm2004_vm8, %v2014_v13, %v2015_v17  ;;  %v2770_v13 = vld [vmem:[#allocation3 + $0x58] sm:$0x3] }
 0x1e7   : > { %v2080_v30 = vadd.f32 %v3584_v47, %v2039_v23  ;;  %v2040_v44 = vadd.f32 %v2016_v41, %v1960_v26  ;;  %v2073_v46 = vmul.f32 %v3611_v60, %v3558_v9  ;;  %v1930_v48 = vsel %vm1924_vm7, %v1928_v37, %v1929_v27 }
 0x1e8   : > { %v2130_v50 = vrot.slane %v2095_v51, 1  ;;  %v2131_v33 = vrot.slane %v2096_v57, 1  ;;  %v2174_v61 = vmul.f32 %v3611_v60, %v3556_v7  ;;  %v1871_v53 = vmul.f32 %v3586_v0, %v3550_v11  ;;  %v3663_v0 = vld [vmem:[#allocation3 + $0x50] sm:$0xff] }
 0x1e9   : > { %v2008_v54 = vrot.slane %v1974_v35, 2  ;;  %v2009_v55 = vrot.slane %v1975_v36, 2  ;;  %v2091_v43 = vmul.f32 0.5625, %v3548_v2  ;;  %v2092_v56 = vmul.f32 0.5625, %v2750_v42 }
 0x1ea   : > { %v3657_v47 = vmul.f32 %v2768_v62, %v3576_v24  ;;  %v2202_v59 = vsel %vm2004_vm8, %v2200_v34, %v2201_v38  ;;  %v2175_v63 = vmul.f32 %v2754_v19, %v3556_v7  ;;  %v1958_v45 = vadd.f32 %v1930_v48, %v1871_v53 }
 0x1eb   : > { %v2232_v6 = vadd.f32 %v2202_v59, %v2153_v32  ;;  %v2264_v18 = vmul.f32 %v3560_v10, %v3548_v2  ;;  %v2318_v8 = vrot.slane %v2286_v5, 1  ;;  %v2081_v12 = vadd.f32 %v2073_v46, %v2040_v44 }
 0x1ec   : > { %v2155_v14 = vadd.f32 %v3601_v1, %v2080_v30  ;;  %v2319_v15 = vrot.slane %v2287_v40, 1  ;;  %v2132_v62 = vsel %vm1924_vm7, %v2130_v50, %v2131_v33  ;;  %v2071_v16 = vmul.f32 %v3558_v9, %v3548_v2 }
 0x1ed   : > { %v2209_v17 = vrot.slane %v2174_v61, 2  ;;  %v2010_v19 = vsel %vm2004_vm8, %v2008_v54, %v2009_v55  ;;  %v2124_v20 = vrot.slane %v2091_v43, 1  ;;  %v2125_v23 = vrot.slane %v2092_v56, 1  ;;  %v2766_v55 = vld [vmem:[#allocation3 + $0x38] sm:$0x3] }
 0x1ee   : > { %v2210_v26 = vrot.slane %v2175_v63, 2  ;;  %v2292_v37 = vmul.f32 %v3663_v0, %v3573_v49  ;;  %v2293_v27 = vmul.f32 %v2770_v13, %v3573_v49  ;;  %v2038_v29 = vadd.f32 %v2010_v19, %v1958_v45 }
 0x1ef   : > { %v2363_v1 = vmul.f32 %v3576_v24, %v3548_v2  ;;  %v2156_v51 = vadd.f32 %v2132_v62, %v2081_v12  ;;  %v2170_v57 = vmul.f32 %v3556_v7, %v3548_v2  ;;  %v2171_v32 = vmul.f32 %v2750_v42, %v3556_v7 }
 0x1f0   : > { %v2324_v34 = vrot.slane %v3629_v22, 1  ;;  %v2325_v35 = vrot.slane %v3632_v31, 1  ;;  %v2364_v36 = vmul.f32 %v2764_v25, %v3576_v24  ;;  %v2079_v38 = vadd.f32 %v2071_v16, %v2038_v29  ;;  %v3687_v22 = vld [vmem:[#allocation3 + $0x60] sm:$0xff]  ;;  %v1857_v31 = vld [vmem:[#allocation3 + $0x68] sm:$0x3] }
 0x1f1   : > { %v2234_v5 = vadd.f32 %v3605_v39, %v2155_v14  ;;  %v2272_v40 = vadd.f32 %v2264_v18, %v2232_v6  ;;  %v2267_v41 = vmul.f32 %v3663_v0, %v3560_v10  ;;  %v2126_v30 = vsel %vm1924_vm7, %v2124_v20, %v2125_v23  ;;  %v3705_v23 = vld [vmem:[#allocation3 + $0x70] sm:$0xff] }
 0x1f2   : > { %v2320_v44 = vsel %vm1924_vm7, %v2318_v8, %v2319_v15  ;;  %v2211_v2 = vsel %vm2004_vm8, %v2209_v17, %v2210_v26  ;;  %v2327_v42 = vrot.slane %v2292_v37, 1  ;;  %v2328_v46 = vrot.slane %v2293_v27, 1  ;;  %v2760_v26 = vld [vmem:[#allocation3 + $0x78] sm:$0x3] }
 0x1f3   : > { %v2395_v48 = vrot.slane %v2363_v1, 2  ;;  %v2235_v25 = vadd.f32 %v2211_v2, %v2156_v51  ;;  %v2203_v50 = vrot.slane %v2170_v57, 2  ;;  %v2204_v33 = vrot.slane %v2171_v32, 2 }
 0x1f4   : > { %v2396_v39 = vrot.slane %v2364_v36, 2  ;;  %v2369_v61 = vmul.f32 %v3663_v0, %v3576_v24  ;;  %v2370_v53 = vmul.f32 %v2770_v13, %v3576_v24  ;;  %v2154_v54 = vadd.f32 %v2126_v30, %v2079_v38 }
 0x1f5   : > { %v2274_v43 = vadd.f32 %v3625_v21, %v2234_v5  ;;  %v2275_v56 = vadd.f32 %v2267_v41, %v2235_v25  ;;  %v1904_v59 = vmul.f32 %v3534_v52, %v3687_v22  ;;  %v1905_v63 = vmul.f32 %v3534_v52, %v1857_v31 }
 0x1f6   : > { %v2401_v45 = vrot.slane %v3636_v28, 2  ;;  %v2402_v6 = vrot.slane %v3657_v47, 2  ;;  %v2350_v18 = vadd.f32 %v2320_v44, %v2272_v40  ;;  %v2329_v8 = vsel %vm1924_vm7, %v2327_v42, %v2328_v46  ;;  %v1853_v46 = vld [vmem:[#allocation3 + $0x48] sm:$0x3] }
 0x1f7   : > { %v2326_v12 = vsel %vm1924_vm7, %v2324_v34, %v2325_v35  ;;  %v2205_v13 = vsel %vm2004_vm8, %v2203_v50, %v2204_v33  ;;  %v2289_v14 = vmul.f32 %v2766_v55, %v3573_v49  ;;  %v2365_v21 = vmul.f32 %v3554_v4, %v3576_v24 }
 0x1f8   : > { %v2397_v15 = vsel %vm2004_vm8, %v2395_v48, %v2396_v39  ;;  %v2404_v62 = vrot.slane %v2369_v61, 2  ;;  %v2405_v16 = vrot.slane %v2370_v53, 2  ;;  %v2233_v17 = vadd.f32 %v2205_v13, %v2154_v54  ;;  %v3732_v39 = vld [vmem:[#allocation3 + $0x80] sm:$0xff] }
 0x1f9   : > { %v2352_v28 = vadd.f32 %v2326_v12, %v2274_v43  ;;  %v2353_v19 = vadd.f32 %v2329_v8, %v2275_v56  ;;  %v1943_v47 = vrot.slane %v1904_v59, 1  ;;  %v1944_v20 = vrot.slane %v1905_v63, 1  ;;  %v1855_v43 = vld [vmem:[#allocation3 + $0x58] sm:$0x3]  ;;  %v3734_v56 = vld [vmem:[#allocation3 + $0x88] sm:$0x3] }
 0x1fa   : > { %v2403_v37 = vsel %vm2004_vm8, %v2401_v45, %v2402_v6  ;;  %v3708_v27 = vadd.f32 %v2397_v15, %v2350_v18  ;;  %v2265_v29 = vmul.f32 %v3554_v4, %v3560_v10  ;;  %v2366_v1 = vmul.f32 %v2766_v55, %v3576_v24 }
 0x1fb   : > { %v2321_v51 = vrot.slane %v3609_v58, 1  ;;  %v2322_v57 = vrot.slane %v2289_v14, 1  ;;  %v1984_v32 = vmul.f32 %v3552_v3, %v3687_v22  ;;  %v1985_v34 = vmul.f32 %v3552_v3, %v1857_v31  ;;  %v1859_v31 = vld [vmem:[#allocation3 + $0x78] sm:$0x3] }
 0x1fc   : > { %v2406_v35 = vsel %vm2004_vm8, %v2404_v62, %v2405_v16  ;;  %v2273_v36 = vadd.f32 %v2265_v29, %v2233_v17  ;;  %v2101_v38 = vmul.f32 0.5625, %v3705_v23  ;;  %v2102_v5 = vmul.f32 0.5625, %v2760_v26 }
 0x1fd   : > { %v3719_v40 = vadd.f32 %v2403_v37, %v2352_v28  ;;  %v3721_v41 = vadd.f32 %v2406_v35, %v2353_v19  ;;  %v2398_v4 = vrot.slane %v2365_v21, 2  ;;  %v1945_v30 = vsel %vm1924_vm7, %v1943_v47, %v1944_v20 }
 0x1fe   : > { %v2399_v58 = vrot.slane %v2366_v1, 2  ;;  %v1876_v44 = vmul.f32 %v3550_v11, %v3687_v22  ;;  %v2180_v2 = vmul.f32 %v3705_v23, %v3556_v7  ;;  %v2181_v42 = vmul.f32 %v2760_v26, %v3556_v7 }
 0x1ff   : > { %v2323_v48 = vsel %vm1924_vm7, %v2321_v51, %v2322_v57  ;;  %v2023_v25 = vrot.slane %v1984_v32, 2  ;;  %v2024_v50 = vrot.slane %v1985_v34, 2  ;;  %v2076_v33 = vmul.f32 %v3705_v23, %v3558_v9  ;;  %v2756_v57 = vld [vmem:[#allocation3 + $0x58] sm:$0x3] }
 0x200   : > { %v2351_v61 = vadd.f32 %v2323_v48, %v2273_v36  ;;  %v1963_v53 = vadd.f32 %v1945_v30, %v1876_v44  ;;  %v2139_v54 = vrot.slane %v2101_v38, 1  ;;  %v2140_v55 = vrot.slane %v2102_v5, 1 }
 0x201   : > { %v1900_v59 = vmul.f32 %v3611_v60, %v3534_v52  ;;  %v1901_v63 = vmul.f32 %v3534_v52, %v1853_v46  ;;  %v1906_v45 = vmul.f32 %v3705_v23, %v3534_v52  ;;  %v1907_v6 = vmul.f32 %v3534_v52, %v1859_v31 }
 0x202   : > { %v2400_v18 = vsel %vm2004_vm8, %v2398_v4, %v2399_v58  ;;  %v2218_v8 = vrot.slane %v2180_v2, 2  ;;  %v2219_v12 = vrot.slane %v2181_v42, 2  ;;  %v3745_v13 = vmul.f32 %v3732_v39, %v3560_v10 }
 0x203   : > { %v2025_v14 = vsel %vm2004_vm8, %v2023_v25, %v2024_v50  ;;  %v3750_v21 = vmul.f32 %v3732_v39, %v3573_v49  ;;  %v1902_v15 = vmul.f32 %v3663_v0, %v3534_v52  ;;  %v1903_v62 = vmul.f32 %v3534_v52, %v1855_v43  ;;  %v2762_v50 = vld [vmem:[#allocation3 + $0x88] sm:$0x3] }
 0x204   : > { %v3755_v16 = vadd.f32 %v2400_v18, %v2351_v61  ;;  %v2043_v17 = vadd.f32 %v2025_v14, %v1963_v53  ;;  %v2141_v28 = vsel %vm1924_vm7, %v2139_v54, %v2140_v55  ;;  %v3760_v19 = vmul.f32 %v3734_v56, %v3573_v49 }
 0x205   : > { %v1937_v47 = vrot.slane %v1900_v59, 1  ;;  %v1938_v20 = vrot.slane %v1901_v63, 1  ;;  %v1946_v26 = vrot.slane %v1906_v45, 1  ;;  %v1947_v37 = vrot.slane %v1907_v6, 1 }
 0x206   : > { %v3763_v29 = vsel %vm2004_vm8, %v2218_v8, %v2219_v12  ;;  %v3767_v1 = vmul.f32 %v3732_v39, %v3576_v24  ;;  %v1980_v52 = vmul.f32 %v3611_v60, %v3552_v3  ;;  %v1981_v51 = vmul.f32 %v3552_v3, %v1853_v46 }
 0x207   : > { %v1986_v32 = vmul.f32 %v3705_v23, %v3552_v3  ;;  %v1987_v34 = vmul.f32 %v3552_v3, %v1859_v31  ;;  %v1940_v35 = vrot.slane %v1902_v15, 1  ;;  %v1941_v36 = vrot.slane %v1903_v62, 1 }
 0x208   : > { %v2084_v38 = vadd.f32 %v2076_v33, %v2043_v17  ;;  %v2336_v5 = vrot.slane %v3750_v21, 1  ;;  %v2337_v4 = vrot.slane %v3760_v19, 1  ;;  %v1874_v30 = vmul.f32 %v3611_v60, %v3550_v11 }
 0x209   : > { %v1939_v58 = vsel %vm1924_vm7, %v1937_v47, %v1938_v20  ;;  %v1948_v44 = vsel %vm1924_vm7, %v1946_v26, %v1947_v37  ;;  %v1982_v2 = vmul.f32 %v3663_v0, %v3552_v3  ;;  %v1983_v42 = vmul.f32 %v3552_v3, %v1855_v43  ;;  %v2758_v43 = vld [vmem:[#allocation3 + $0x68] sm:$0x3] }
 0x20a   : > { %v2017_v46 = vrot.slane %v1980_v52, 2  ;;  %v2097_v31 = vmul.f32 0.5625, %v3663_v0  ;;  %v2098_v48 = vmul.f32 0.5625, %v2756_v57  ;;  %v1877_v25 = vmul.f32 %v3705_v23, %v3550_v11 }
 0x20b   : > { %v2018_v33 = vrot.slane %v1981_v51, 2  ;;  %v2026_v61 = vrot.slane %v1986_v32, 2  ;;  %v2027_v60 = vrot.slane %v1987_v34, 2  ;;  %v1942_v53 = vsel %vm1924_vm7, %v1940_v35, %v1941_v36 }
 0x20c   : > { %v1961_v54 = vadd.f32 %v1939_v58, %v1874_v30  ;;  %v2176_v55 = vmul.f32 %v3663_v0, %v3556_v7  ;;  %v1964_v59 = vadd.f32 %v1948_v44, %v1877_v25  ;;  %v1875_v3 = vmul.f32 %v3663_v0, %v3550_v11  ;;  %v2772_v44 = vld [vmem:[#allocation3 + $0x68] sm:$0x3] }
 0x20d   : > { %v2103_v63 = vmul.f32 0.5625, %v3732_v39  ;;  %v2104_v45 = vmul.f32 0.5625, %v2762_v50  ;;  %v2020_v6 = vrot.slane %v1982_v2, 2  ;;  %v2021_v18 = vrot.slane %v1983_v42, 2  ;;  %v3809_v42 = vld [vmem:[%s3911_s6] ss:$0 sm:$0xff] }
 0x20e   : > { %v2074_v8 = vmul.f32 %v3663_v0, %v3558_v9  ;;  %v2133_v12 = vrot.slane %v2097_v31, 1  ;;  %v2134_v14 = vrot.slane %v2098_v48, 1  ;;  %v1962_v15 = vadd.f32 %v1942_v53, %v1875_v3 }
 0x20f   : > { %v2019_v62 = vsel %vm2004_vm8, %v2017_v46, %v2018_v33  ;;  %v2028_v17 = vsel %vm2004_vm8, %v2026_v61, %v2027_v60  ;;  %v2099_v47 = vmul.f32 0.5625, %v3687_v22  ;;  %v2100_v20 = vmul.f32 0.5625, %v2758_v43 }
 0x210   : > { %v2159_v11 = vadd.f32 %v2141_v28, %v2084_v38  ;;  %v2041_v26 = vadd.f32 %v2019_v62, %v1961_v54  ;;  %v2177_v37 = vmul.f32 %v2756_v57, %v3556_v7  ;;  %v2044_v52 = vadd.f32 %v2028_v17, %v1964_v59  ;;  %v2778_v62 = vld [vmem:[#allocation3 + $0x98] sm:$0x3] }
 0x211   : > { %v2212_v51 = vrot.slane %v2176_v55, 2  ;;  %v2142_v32 = vrot.slane %v2103_v63, 1  ;;  %v2143_v34 = vrot.slane %v2104_v45, 1  ;;  %v2022_v0 = vsel %vm2004_vm8, %v2020_v6, %v2021_v18 }
 0x212   : > { %v2082_v35 = vadd.f32 %v2074_v8, %v2041_v26  ;;  %v2135_v36 = vsel %vm1924_vm7, %v2133_v12, %v2134_v14  ;;  %v2077_v30 = vmul.f32 %v3732_v39, %v3558_v9  ;;  %v2042_v58 = vadd.f32 %v2022_v0, %v1962_v15  ;;  %v2777_v8 = vld [vmem:[#allocation3 + $0x90] sm:$0xff] }
 0x213   : > { %v2182_v28 = vmul.f32 %v3732_v39, %v3556_v7  ;;  %v2183_v57 = vmul.f32 %v2762_v50, %v3556_v7  ;;  %v2136_v38 = vrot.slane %v2099_v47, 1  ;;  %v2137_v2 = vrot.slane %v2100_v20, 1 }
 0x214   : > { %v2213_v46 = vrot.slane %v2177_v37, 2  ;;  %v2294_v31 = vmul.f32 %v3573_v49, %v3687_v22  ;;  %v2085_v48 = vadd.f32 %v2077_v30, %v2044_v52  ;;  %v2075_v25 = vmul.f32 %v3558_v9, %v3687_v22  ;;  %v2774_v52 = vld [vmem:[#allocation3 + $0x78] sm:$0x3] }
 0x215   : > { %v3818_v39 = vmul.f32 %v3734_v56, %v3576_v24  ;;  %v2144_v50 = vsel %vm1924_vm7, %v2142_v32, %v2143_v34  ;;  %v2178_v33 = vmul.f32 %v3556_v7, %v3687_v22  ;;  %v2179_v61 = vmul.f32 %v2758_v43, %v3556_v7 }
 0x216   : > { %v2238_v53 = vadd.f32 %v3763_v29, %v2159_v11  ;;  %v2157_v54 = vadd.f32 %v2135_v36, %v2082_v35  ;;  %v2295_v55 = vmul.f32 %v2772_v44, %v3573_v49  ;;  %v2083_v59 = vadd.f32 %v2075_v25, %v2042_v58 }
 0x217   : > { %v2221_v63 = vrot.slane %v2182_v28, 2  ;;  %v2222_v56 = vrot.slane %v2183_v57, 2  ;;  %v2138_v45 = vsel %vm1924_vm7, %v2136_v38, %v2137_v2  ;;  %v2214_v29 = vsel %vm2004_vm8, %v2212_v51, %v2213_v46 }
 0x218   : > { %v2330_v6 = vrot.slane %v2294_v31, 1  ;;  %v2160_v18 = vadd.f32 %v2144_v50, %v2085_v48  ;;  %v2215_v17 = vrot.slane %v2178_v33, 2  ;;  %v2216_v47 = vrot.slane %v2179_v61, 2 }
 0x219   : > { %v2331_v26 = vrot.slane %v2295_v55, 1  ;;  %v2158_v37 = vadd.f32 %v2138_v45, %v2083_v59  ;;  %v2236_v51 = vadd.f32 %v2214_v29, %v2157_v54  ;;  %v2223_v32 = vsel %vm2004_vm8, %v2221_v63, %v2222_v56 }
 0x21a   : > { %v2300_v34 = vmul.f32 %v2777_v8, %v3573_v49  ;;  %v2239_v35 = vadd.f32 %v2223_v32, %v2160_v18  ;;  %v2301_v36 = vmul.f32 %v2778_v62, %v3573_v49  ;;  %v2278_v30 = vadd.f32 %v3745_v13, %v2238_v53 }
 0x21b   : > { %v2296_v58 = vmul.f32 %v3705_v23, %v3573_v49  ;;  %v2297_v28 = vmul.f32 %v2774_v52, %v3573_v49  ;;  %v2372_v57 = vmul.f32 %v2772_v44, %v3576_v24  ;;  %v2271_v38 = vmul.f32 %v2777_v8, %v3560_v10 }
 0x21c   : > { %v2332_v13 = vsel %vm1924_vm7, %v2330_v6, %v2331_v26  ;;  %v2339_v31 = vrot.slane %v2300_v34, 1  ;;  %v2377_v48 = vmul.f32 %v2777_v8, %v3576_v24  ;;  %v2340_v50 = vrot.slane %v2301_v36, 1 }
 0x21d   : > { %v2279_v25 = vadd.f32 %v2271_v38, %v2239_v35  ;;  %v2378_v49 = vmul.f32 %v2778_v62, %v3576_v24  ;;  %v2269_v33 = vmul.f32 %v3705_v23, %v3560_v10  ;;  %v2333_v61 = vrot.slane %v2296_v58, 1 }
 0x21e   : > { %v2373_v44 = vmul.f32 %v3705_v23, %v3576_v24  ;;  %v2338_v53 = vsel %vm1924_vm7, %v2336_v5, %v2337_v4  ;;  %v2413_v54 = vrot.slane %v3767_v1, 2  ;;  %v2414_v55 = vrot.slane %v3818_v39, 2 }
 0x21f   : > { %v2341_v56 = vsel %vm1924_vm7, %v2339_v31, %v2340_v50  ;;  %v2416_v23 = vrot.slane %v2377_v48, 2  ;;  %v2417_v45 = vrot.slane %v2378_v49, 2 }
 0x220   : > { %v2415_v5 = vsel %vm2004_vm8, %v2413_v54, %v2414_v55 }
 0x29e   : > { %v2869_v60 = vpop.f32.mrb[24].mxu0 }
 0x29f   : > { %v1820_v9 = vadd.f32 %v2869_v60, %v3809_v42  ;;  %v1811_v3 = vpop.f32.mrb[25].mxu0  ;;  %v2374_v60 = vmul.f32 %v2774_v52, %v3576_v24 }
 0x2a0   : > { %v1812_v7 = vadd.f32 %v3809_v42, %v1811_v3  ;;  %v2870_v43 = vpop.f32.mrb[26].mxu0  ;;  %v2408_v3 = vrot.slane %v2372_v57, 2 }
 0x2a1   : > { %v2437_v12 = vadd.f32 %v3719_v40, %v1820_v9  ;;  %v1823_v14 = vadd.f32 %v2870_v43, %v3809_v42  ;;  %v1814_v15 = vpop.f32.mrb[27].mxu0  ;;  %v2356_v9 = vadd.f32 %v2338_v53, %v2278_v30  ;;  %v2411_v21 = vrot.slane %v2374_v60, 2 }
 0x2a2   : > { %v2435_v20 = vadd.f32 %v3708_v27, %v1812_v7  ;;  %v1815_v11 = vadd.f32 %v3809_v42, %v1814_v15  ;;  %v2268_v27 = vmul.f32 %v3560_v10, %v3687_v22  ;;  %v2410_v7 = vrot.slane %v2373_v44, 2 }
 0x2a3   : > { %2446 = vst.msk [vmem:[%s3831_s17 + $0x10] sm:$0xff] %vm902_vm13, %v2437_v12  ;;  %v2438_v40 = vadd.f32 %v3721_v41, %v1823_v14  ;;  %v2217_v41 = vsel %vm2004_vm8, %v2215_v17, %v2216_v47  ;;  %v2433_v39 = vadd.f32 %v2415_v5, %v2356_v9  ;;  %v2418_v14 = vsel %vm2004_vm8, %v2416_v23, %v2417_v45 }
 0x2a4   : > { %2444 = vst.msk [vmem:[%s3831_s17] sm:$0xff] %vm902_vm13, %v2435_v20  ;;  %v2436_v0 = vadd.f32 %v3755_v16, %v1815_v11  ;;  %v2371_v16 = vmul.f32 %v3576_v24, %v3687_v22  ;;  %v2237_v2 = vadd.f32 %v2217_v41, %v2158_v37  ;;  %v2276_v46 = vadd.f32 %v2268_v27, %v2236_v51 }
 0x2a5   : > { %2447 = vst.msk [vmem:[%s3831_s17 + $0x18] sm:$0xff] %vm902_vm13, %v2438_v40  ;;  %v2334_v22 = vrot.slane %v2297_v28, 1  ;;  %v2357_v24 = vadd.f32 %v2341_v56, %v2279_v25  ;;  %v2412_v20 = vsel %vm2004_vm8, %v2410_v7, %v2411_v21 }
 0x2a6   : > { %2445 = vst.msk [vmem:[%s3831_s17 + $0x8] sm:$0xff] %vm902_vm13, %v2436_v0  ;;  %v2277_v59 = vadd.f32 %v2269_v33, %v2237_v2  ;;  %v2407_v10 = vrot.slane %v2371_v16, 2  ;;  %v2354_v63 = vadd.f32 %v2332_v13, %v2276_v46 }
 0x2a7   : > { %v2335_v19 = vsel %vm1924_vm7, %v2333_v61, %v2334_v22  ;;  %v2434_v17 = vadd.f32 %v2418_v14, %v2357_v24 }
 0x2a8   : > { %v2355_v1 = vadd.f32 %v2335_v19, %v2277_v59  ;;  %v2409_v6 = vsel %vm2004_vm8, %v2407_v10, %v2408_v3 }
 0x2a9   : > { %v2431_v8 = vadd.f32 %v2409_v6, %v2354_v63 }
 0x2aa   : > { %v2432_v37 = vadd.f32 %v2412_v20, %v2355_v1 }
 0x2ae   : > { %v2873_v43 = vpop.f32.mrb[28].mxu0 }
 0x2af   : > { %v1836_v4 = vadd.f32 %v2873_v43, %v3809_v42  ;;  %v1827_v29 = vpop.f32.mrb[29].mxu0 }
 0x2b0   : > { %v1828_v18 = vadd.f32 %v3809_v42, %v1827_v29  ;;  %v2874_v12 = vpop.f32.mrb[30].mxu0 }
 0x2b1   : > { %v2441_v15 = vadd.f32 %v2433_v39, %v1836_v4  ;;  %v1839_v62 = vadd.f32 %v2874_v12, %v3809_v42  ;;  %v1830_v47 = vpop.f32.mrb[31].mxu0 }
 0x2b2   : > { %v2439_v11 = vadd.f32 %v2431_v8, %v1828_v18  ;;  %v1831_v26 = vadd.f32 %v3809_v42, %v1830_v47 }
 0x2b3   : > { %2450 = vst.msk [vmem:[%s3831_s17 + $0x30] sm:$0xff] %vm902_vm13, %v2441_v15  ;;  %v2442_v52 = vadd.f32 %v2434_v17, %v1839_v62 }
 0x2b4   : > { %2448 = vst.msk [vmem:[%s3831_s17 + $0x20] sm:$0xff] %vm902_vm13, %v2439_v11  ;;  %v2440_v40 = vadd.f32 %v2432_v37, %v1831_v26 }
 0x2b5   : > { %2451 = vst.msk [vmem:[%s3831_s17 + $0x38] sm:$0xff] %vm902_vm13, %v2442_v52 }
 0x2b6   : > { %2449 = vst.msk [vmem:[%s3831_s17 + $0x28] sm:$0xff] %vm902_vm13, %v2440_v40 }
 0x2b7 PF: > { %s20_s29 = sadd.s32 1, %s3037_s29   ;;  %s3926_s27 = smov %s3033_s28 }
 0x2b8   : > { %p17_p4 = scmp.ge.s32.totalorder %s20_s29, 4   ;;  %s3927_s28 = smov %s3929_s9 }
 0x2ba   :  { %19 = sbr.rel (!%p17_p4) target bundleno = 2 (0x2), region = 108 }
 0x2c1   :  { %2507 = vsyncpa [#allocation5], 1 }
 0x2c2   :  { %2509 = vsyncpa [#allocation5 + $0x1], 1 }

// kernel: _lambda_.3
= control target key start
LH: loop header
LB: loop body
LE: loop exit
PB: predicated region body
PF: predicated region fallthrough
CT: control target
= control target key end

     0   :  { %13 = vsyncpa [#allocation5], 0  ;;  %s9527_s0 = inlined_call_operand.vmem [shape: bf16[2,16,16,32], index: 0, kind: input, shape index: {}]   ;;  %s9528_s1 = inlined_call_operand.vmem [shape: f32[2,16,16,4], index: 1, kind: input, shape index: {}]   ;;  %s9529_s2 = inlined_call_operand.vmem [shape: bf16[288,128], index: 2, kind: input, shape index: {}]   ;;  %s9530_s3 = inlined_call_operand.vmem [shape: f32[1,128], index: 3, kind: input, shape index: {}]   ;;  %s9531_s4 = inlined_call_operand.vmem [shape: bf16[128,16], index: 4, kind: input, shape index: {}]   ;;  %s9532_s5 = inlined_call_operand.vmem [shape: f32[1,16], index: 5, kind: input, shape index: {}]   ;;  %s9533_s6 = inlined_call_operand.hbm [shape: bf16[2,16,16,128], index: 6, kind: output, shape index: {0}]   ;;  %s9534_s7 = inlined_call_operand.vmem [shape: f32[2,16,16,16], index: 7, kind: output, shape index: {1}]  }
   0x1   :  { %15 = vsyncpa [#allocation5 + $0x1], 0  ;;  %s6226_s24 = smov 0   ;;  %s6228_s25 = smov 0  }
   0x2   :  { %s6230_s26 = smov 0   ;;  %s6232_s27 = smov 0  }
   0x3   :  { %s6234_s28 = smov 0   ;;  %s6236_s29 = smov 0  }
   0x4 LB: > { %s5189_s30 = sadd.s32 4294967295, %s6174_s29   ;;  %s5190_s8 = sadd.s32 4294967294, %s6174_s29   ;;  %s6174_s29 = sphi %s6236_s29, %s21_s29   ;;  %s6170_s28 = sphi %s6234_s28, %s9822_s28   ;;  %s6166_s27 = sphi %s6232_s27, %s9821_s27   ;;  %s6162_s26 = sphi %s6230_s26, %s9820_s26   ;;  %s6158_s25 = sphi %s6228_s25, %s9819_s25   ;;  %s6154_s24 = sphi %s6226_s24, %s9818_s24  }
   0x5   : > { %s33_s9 = sadd.s32 1, %s6170_s28  ;;  %s178_s10 = sadd.s32 1, %s6162_s26 }
   0x6   : > { %p35_p0 = scmp.ge.s32.totalorder %s33_s9, 2  ;;  %p188_p1 = scmp.ne.s32.totalorder %s6162_s26, %s6158_s25 }
   0x7   : > { %p189_p2 = scmp.eq.s32.totalorder %s5189_s30, 1  ;;  %p194_p3 = scmp.ne.s32.totalorder %s6158_s25, %s6154_s24 }
   0x8   : > { %s9824_s9 = smov (%p35_p0, %s33_s9), 0  ;;  %p195_p5 = scmp.eq.s32.totalorder %s5190_s8, 1 }
   0x9   : > { %p6266_p4 = por %p189_p2, %p188_p1  ;;  %s173_s12 = ssub.s32 %s6170_s28, %s9824_s9 }
   0xa   : > { %p5193_p6 = scmp.ge.s32.totalorder %s6174_s29, 1  ;;  %p176_p7 = scmp.eq.s32.totalorder %s173_s12, 0 }
   0xb   : > { %p6273_p8 = por %p195_p5, %p194_p3  ;;  %p269_p9 = scmp.lt.s32.totalorder %s6174_s29, 3 }
   0xc   : > { %s6279_s14 = scalar_select %p176_p7, %s6162_s26, %s178_s10  }
   0xd   : > { %p270_p10 = pnand %p5193_p6, %p269_p9 }
   0xf   : > { %273 = sbr.rel (%p270_p10) target bundleno = 764 (0x2fc), region = 44 }
  0x16   : > { %p316_p11 = scmp.lt.s32.totalorder %s6166_s27, 1  ;;  %v6049_v0 = vld [vmem:[%s9529_s2] sm:$0xff]   ;;  %v6050_v1 = vld [vmem:[%s9529_s2 + $0x8] sm:$0xff]   ;;  %v6051_v2 = vld [vmem:[%s9529_s2 + $0x30] sm:$0xff]   ;;  %vm343_vm0 = vcmask 785408   ;;  %v6176_v3 = vmov 0  }
  0x17   : > { %5755 = vmatprep.subr.bf16.mxu0 %v6049_v0  ;;  %345 = vst.msk [vmem:[#allocation2 + $0x8] sm:$0xff] %vm343_vm0, %v6176_v3  ;;  %344 = vst.msk [vmem:[#allocation2] sm:$0xff] %vm343_vm0, %v6176_v3  ;;  %5711 = vmatprep.subr.bf16.mxu1 %v6051_v2  ;;  %v6053_v4 = vld [vmem:[%s9529_s2 + $0x10] sm:$0xff]   ;;  %s6177_s15 = smov 32   ;;  %s6178_s16 = smov 64   ;;  %vm603_vm1 = vcmask 261120  }
  0x18   : > { %s6286_s17 = scalar_select %p316_p11, %s6166_s27, 1  ;;  %5756 = vmatpush3.bf16.msra.mxu0 %v6049_v0  ;;  %346 = vst.msk [vmem:[#allocation2 + $0x10] sm:$0xff] %vm343_vm0, %v6176_v3  ;;  %347 = vst.msk [vmem:[#allocation2 + $0x18] sm:$0xff] %vm343_vm0, %v6176_v3  ;;  %5712 = vmatpush3.bf16.msra.mxu1 %v6051_v2  ;;  %vm604_vm2 = vsmask.f32 7938  ;;  %v6054_v63 = vld [vmem:[%s9529_s2 + $0x38] sm:$0xff]  }
  0x19   : > { %348 = vst.msk [vmem:[#allocation2 + $0x20] sm:$0xff] %vm343_vm0, %v6176_v3  ;;  %349 = vst.msk [vmem:[#allocation2 + $0x28] sm:$0xff] %vm343_vm0, %v6176_v3  ;;  %5757 = vmatprep.subr.bf16.mxu0 %v6050_v1  ;;  %5713 = vmatprep.subr.bf16.mxu1 %v6054_v63  ;;  %s6179_s21 = smov 4   ;;  %vm814_vm4 = vcmask 523520   ;;  %vm1103_vm5 = vcmask 785920   ;;  %s6181_s23 = smov 12  }
  0x1a   : > { %s5490_s22 = sshll.u32 %s6286_s17, 7  ;;  %350 = vst.msk [vmem:[#allocation2 + $0x30] sm:$0xff] %vm343_vm0, %v6176_v3  ;;  %351 = vst.msk [vmem:[#allocation2 + $0x38] sm:$0xff] %vm343_vm0, %v6176_v3  ;;  %vm1104_vm6 = vsmask.f32 7424  ;;  %vm1506_vm8 = vcmask 31744  }
  0x1b   : > { %352 = vst.msk [vmem:[#allocation2 + $0x40] sm:$0xff] %vm343_vm0, %v6176_v3  ;;  %353 = vst.msk [vmem:[#allocation2 + $0x48] sm:$0xff] %vm343_vm0, %v6176_v3  ;;  %s6316_s8 = scalar_lea.vmem %s9527_s0, %s5490_s22  ;;  %vm1539_vm9 = vcmask 64512   ;;  %vm1572_vm10 = vcmask 97280   ;;  %vm1606_vm11 = vcmask 130048   ;;  %vm1662_vm12 = vcmask 122880  }
  0x1c   : > { %354 = vst.msk [vmem:[#allocation2 + $0x50] sm:$0xff] %vm343_vm0, %v6176_v3  ;;  %355 = vst.msk [vmem:[#allocation2 + $0x58] sm:$0xff] %vm343_vm0, %v6176_v3  ;;  %v6019_v5 = vld [vmem:[%s6316_s8] sm:$0xff]   ;;  %v6020_v6 = vld [vmem:[%s6316_s8 + $0x10] sm:$0xff]   ;;  %5758 = vmatpush3.bf16.msra.mxu0 %v6050_v1  ;;  %5714 = vmatpush3.bf16.msra.mxu1 %v6054_v63  ;;  %vm3331_vm13 = vcmask 1046528   ;;  %vm3579_vm14 = vcmask 1045504  }
  0x1d   : > { %356 = vst.msk [vmem:[#allocation2 + $0x60] sm:$0xff] %vm343_vm0, %v6176_v3  ;;  %357 = vst.msk [vmem:[#allocation2 + $0x68] sm:$0xff] %vm343_vm0, %v6176_v3  ;;  %766 = vrot.lane.b32.xlu0 %v6019_v5, %s6177_s15  ;;  %v6021_v7 = vld [vmem:[%s6316_s8 + $0x8] sm:$0xff]   ;;  %770 = vrot.lane.b32.xlu1 %v6020_v6, %s6177_s15  ;;  %v6022_v8 = vld [vmem:[%s6316_s8] sm:$0xff]   ;;  %s301_s12 = sand.u32 1, %s6158_s25  }
  0x1e   : > { %358 = vst.msk [vmem:[#allocation2 + $0x70] sm:$0xff] %vm343_vm0, %v6176_v3  ;;  %359 = vst.msk [vmem:[#allocation2 + $0x78] sm:$0xff] %vm343_vm0, %v6176_v3  ;;  %5759 = vmatprep.subr.bf16.mxu0 %v6053_v4  ;;  %v6023_v9 = vld [vmem:[%s6316_s8 + $0x8] sm:$0xff]   ;;  %v944_v10 = vshrl.u32 %v6022_v8, 16  ;;  %v946_v11 = vshll.u32 %v6022_v8, 16  ;;  %v6024_v13 = vld [vmem:[%s6316_s8 + $0x18] sm:$0xff]  }
  0x1f   : > { %360 = vst.msk [vmem:[#allocation2 + $0x80] sm:$0xff] %vm343_vm0, %v6176_v3  ;;  %361 = vst.msk [vmem:[#allocation2 + $0x88] sm:$0xff] %vm343_vm0, %v6176_v3  ;;  %v953_v12 = vshll.u32 %v6023_v9, 16  ;;  %v6025_v14 = vld [vmem:[%s6316_s8 + $0x10] sm:$0xff]   ;;  %v951_v16 = vshrl.u32 %v6023_v9, 16  ;;  %v6027_v19 = vld [vmem:[%s6316_s8 + $0x18] sm:$0xff]  }
  0x20   : > { %5760 = vmatpush3.bf16.msra.mxu0 %v6053_v4  ;;  %v948_v15 = vrot.slane %v946_v11, 1  ;;  %v960_v18 = vshll.u32 %v6025_v14, 16  ;;  %v958_v21 = vshrl.u32 %v6025_v14, 16  ;;  %v6026_v23 = vld [vmem:[%s6316_s8 + $0x20] sm:$0xff]   ;;  %v967_v25 = vshll.u32 %v6027_v19, 16  ;;  %v6028_v27 = vld [vmem:[%s6316_s8 + $0x28] sm:$0xff]   ;;  %vm6382_vm3 = vmand %vm603_vm1, %vm604_vm2 }
  0x21   : > { %768 = vrot.lane.b32.xlu0 %v6021_v7, %s6177_s15  ;;  %v955_v17 = vrot.slane %v953_v12, 1  ;;  %v6029_v26 = vld [vmem:[%s6316_s8 + $0x20] sm:$0xff]   ;;  %v965_v28 = vshrl.u32 %v6027_v19, 16  ;;  %v6031_v29 = vld [vmem:[%s6316_s8 + $0x28] sm:$0xff]   ;;  %v6030_v33 = vld [vmem:[%s6316_s8 + $0x30] sm:$0xff]   ;;  %s5194_s18 = sshll.u32 %s301_s12, 7 }
  0x22   : > { %v949_v20 = vor.u32 %v948_v15, %v944_v10  ;;  %v962_v22 = vrot.slane %v960_v18, 1  ;;  %v969_v31 = vrot.slane %v967_v25, 1  ;;  %v974_v32 = vshll.u32 %v6029_v26, 16  ;;  %v6033_v35 = vld [vmem:[%s6316_s8 + $0x30] sm:$0xff]   ;;  %v6032_v39 = vld [vmem:[%s6316_s8 + $0x38] sm:$0xff]   ;;  %v6034_v45 = vld [vmem:[%s6316_s8 + $0x40] sm:$0xff]  }
  0x23   : > { %v956_v24 = vor.u32 %v955_v17, %v951_v16  ;;  %v981_v34 = vshll.u32 %v6031_v29, 16  ;;  %v972_v37 = vshrl.u32 %v6029_v26, 16  ;;  %v979_v40 = vshrl.u32 %v6031_v29, 16  ;;  %v6035_v43 = vld [vmem:[%s6316_s8 + $0x38] sm:$0xff]   ;;  %v6037_v46 = vld [vmem:[%s6316_s8 + $0x40] sm:$0xff]   ;;  %v6039_v51 = vld [vmem:[%s6316_s8 + $0x48] sm:$0xff]  }
  0x24   : > { %1055 = vrot.lane.b32.xlu1 %v949_v20, %s6178_s16  ;;  %v963_v30 = vor.u32 %v962_v22, %v958_v21  ;;  %v970_v36 = vor.u32 %v969_v31, %v965_v28  ;;  %v976_v38 = vrot.slane %v974_v32, 1  ;;  %v988_v42 = vshll.u32 %v6033_v35, 16  ;;  %v6036_v52 = vld [vmem:[%s6316_s8 + $0x48] sm:$0xff]   ;;  %v6038_v59 = vld [vmem:[%s6316_s8 + $0x50] sm:$0xff]   ;;  %v6052_v61 = vld [vmem:[%s6316_s8] sm:$0xff]   ;;  %s7949_s19 = scalar_lea.vmem [#allocation4], %s5194_s18 }
  0x25   : > { %772 = vrot.lane.b32.xlu0 %v6024_v13, %s6177_s15  ;;  %v983_v41 = vrot.slane %v981_v34, 1  ;;  %v986_v48 = vshrl.u32 %v6033_v35, 16  ;;  %v995_v50 = vshll.u32 %v6035_v43, 16  ;;  %v1002_v53 = vshll.u32 %v6037_v46, 16  ;;  %v6358_v60 = vld [vmem:[%s6316_s8 + $0x50] sm:$0xff]   ;;  %v6368_v4 = vld [vmem:[%s6316_s8 + $0x58] sm:$0xff]   ;;  %vm6611_vm7 = vmand %vm1103_vm5, %vm1104_vm6 }
  0x26   : > { %v977_v44 = vor.u32 %v976_v38, %v972_v37  ;;  %v990_v49 = vrot.slane %v988_v42, 1  ;;  %v993_v55 = vshrl.u32 %v6035_v43, 16  ;;  %v1009_v57 = vshll.u32 %v6039_v51, 16  ;;  %v6040_v5 = vld [vmem:[%s6316_s8 + $0x58] sm:$0xff]   ;;  %v6372_v6 = vld [vmem:[%s6316_s8 + $0x60] sm:$0xff]   ;;  %v6055_v9 = vld [vmem:[%s6316_s8 + $0x10] sm:$0xff]  }
  0x27   : > { %v984_v47 = vor.u32 %v983_v41, %v979_v40  ;;  %v997_v56 = vrot.slane %v995_v50, 1  ;;  %v1000_v58 = vshrl.u32 %v6037_v46, 16  ;;  %v1004_v62 = vrot.slane %v1002_v53, 1  ;;  %v606_v11 = vld [vmem:[#allocation2 + $0x8] sm:$0xff]  ;;  %v612_v19 = vld [vmem:[#allocation2 + $0x18] sm:$0xff]  ;;  %v6042_v20 = vld [vmem:[%s6316_s8 + $0x60] sm:$0xff]  }
  0x28   : > { %1057 = vrot.lane.b32.xlu1 %v956_v24, %s6178_s16  ;;  %v991_v54 = vor.u32 %v990_v49, %v986_v48  ;;  %v1007_v1 = vshrl.u32 %v6039_v51, 16  ;;  %v1011_v2 = vrot.slane %v1009_v57, 1  ;;  %v1014_v3 = vshrl.u32 %v6358_v60, 16  ;;  %v6378_v12 = vld [vmem:[%s6316_s8 + $0x68] sm:$0xff]   ;;  %v6058_v25 = vld [vmem:[%s9529_s2 + $0x18] sm:$0xff]   ;;  %v6059_v28 = vld [vmem:[%s9529_s2 + $0x40] sm:$0xff]  }
  0x29   : > { %774 = vrot.lane.b32.xlu0 %v6026_v23, %s6177_s15  ;;  %v998_v0 = vor.u32 %v997_v56, %v993_v55  ;;  %v475_v7 = vshrl.u32 %v6052_v61, 16  ;;  %v478_v8 = vshll.u32 %v6052_v61, 16  ;;  %v1016_v10 = vshll.u32 %v6358_v60, 16  ;;  %v6057_v17 = vld [vmem:[%s6316_s8 + $0x8] sm:$0xff]   ;;  %v6060_v29 = vld [vmem:[%s9529_s2 + $0x20] sm:$0xff]   ;;  %v609_v32 = vld [vmem:[#allocation2 + $0x10] sm:$0xff]  ;;  %5761 = vmatprep.subr.bf16.mxu0 %v6058_v25 }
  0x2a   : > { %v489_v15 = vshrl.u32 %v6055_v9, 16  ;;  %v492_v16 = vshll.u32 %v6055_v9, 16  ;;  %v1005_v18 = vor.u32 %v1004_v62, %v1000_v58  ;;  %v482_v23 = vshrl.u32 %v6057_v17, 16  ;;  %5715 = vmatprep.subr.bf16.mxu1 %v6059_v28  ;;  %v6044_v38 = vld [vmem:[%s6316_s8 + $0x68] sm:$0xff]   ;;  %5762 = vmatpush3.bf16.msra.mxu0 %v6058_v25  ;;  %v6413_v43 = vld [vmem:[%s6316_s8 + $0x70] sm:$0xff]   ;;  %v6066_v56 = vld [vmem:[%s6316_s8 + $0x20] sm:$0xff]  }
  0x2b   : > { %v477_v14 = vrot.slane %v475_v7, 7  ;;  %v485_v24 = vshll.u32 %v6057_v17, 16  ;;  %v1023_v26 = vshll.u32 %v6368_v4, 16  ;;  %v1012_v34 = vor.u32 %v1011_v2, %v1007_v1  ;;  %5716 = vmatpush3.bf16.msra.mxu1 %v6059_v28  ;;  %5763 = vmatprep.subr.bf16.mxu0 %v6060_v29  ;;  %v6064_v48 = vld [vmem:[%s9529_s2 + $0x28] sm:$0xff]   ;;  %v6046_v50 = vld [vmem:[%s6316_s8 + $0x70] sm:$0xff]   ;;  %v6432_v58 = vld [vmem:[%s6316_s8 + $0x78] sm:$0xff]  }
  0x2c   : > { %1059 = vrot.lane.b32.xlu1 %v963_v30, %s6178_s16  ;;  %v491_v22 = vrot.slane %v489_v15, 7  ;;  %v1018_v35 = vrot.slane %v1016_v10, 1  ;;  %v1021_v37 = vshrl.u32 %v6368_v4, 16  ;;  %v1035_v51 = vshrl.u32 %v6378_v12, 16  ;;  %v6065_v55 = vld [vmem:[%s9529_s2 + $0x50] sm:$0xff]   ;;  %v1720_v60 = vld [vmem:[#allocation2] sm:$0xff] }
  0x2d   : > { %776 = vrot.lane.b32.xlu0 %v6028_v27, %s6177_s15  ;;  %v480_v21 = vor.u32 %v478_v8, %v477_v14  ;;  %v1030_v27 = vshll.u32 %v6372_v6, 16  ;;  %v1025_v42 = vrot.slane %v1023_v26, 1  ;;  %v1044_v57 = vshll.u32 %v6413_v43, 16  ;;  %5767 = vmatprep.mubr.msk.bf16.mxu0 %vm343_vm0, %v1720_v60  ;;  %v6068_v4 = vld [vmem:[%s9529_s2 + $0x58] sm:$0xff]   ;;  %v618_v7 = vld [vmem:[#allocation2 + $0x28] sm:$0xff]  ;;  %v6070_v14 = vld [vmem:[%s6316_s8 + $0x30] sm:$0xff]  }
  0x2e   : > { %v494_v31 = vor.u32 %v492_v16, %v491_v22  ;;  %v1019_v49 = vor.u32 %v1018_v35, %v1014_v3  ;;  %5764 = vmatpush3.bf16.msra.mxu0 %v6060_v29  ;;  %v503_v62 = vshrl.u32 %v6066_v56, 16  ;;  %v506_v63 = vshll.u32 %v6066_v56, 16  ;;  %v6069_v8 = vld [vmem:[%s6316_s8 + $0x28] sm:$0xff]   ;;  %v624_v28 = vld [vmem:[#allocation2 + $0x38] sm:$0xff]  ;;  %v6073_v35 = vld [vmem:[%s6316_s8 + $0x40] sm:$0xff]   ;;  %s5038_s22 = sshll.u32 %s7949_s19, 4  ;;  %s8798_s22 = int_to_ptr.vmem [resolvable:$true] %s5038_s22 }
  0x2f   : > { %v607_v30 = vsel %vm6382_vm3, %v480_v21, %v606_v11  ;;  %5765 = vmatprep.subr.bf16.mxu0 %v6064_v48  ;;  %v1026_v1 = vor.u32 %v1025_v42, %v1021_v37  ;;  %v1049_v10 = vshrl.u32 %v6432_v58, 16  ;;  %v1051_v16 = vshll.u32 %v6432_v58, 16  ;;  %v6074_v37 = vld [vmem:[%s6316_s8 + $0x48] sm:$0xff]   ;;  %s6096_s10 = scalar_lea.vmem %s8798_s22, 2048  ;;  %s6185_s18 = smov [#allocation4]  }
  0x30   : > { %1061 = vrot.lane.b32.xlu1 %v970_v36, %s6178_s16  ;;  %608 = vst [vmem:[#allocation2 + $0x8] sm:$0xff] %v607_v30  ;;  %v6061_v36 = vld [vmem:[%s9529_s2 + $0x48] sm:$0xff]   ;;  %v613_v40 = vsel %vm6382_vm3, %v494_v31, %v612_v19  ;;  %v505_v3 = vrot.slane %v503_v62, 7  ;;  %v510_v17 = vshrl.u32 %v6069_v8, 16  ;;  %v6071_v19 = vld [vmem:[%s6316_s8 + $0x38] sm:$0xff]   ;;  %v517_v22 = vshrl.u32 %v6070_v14, 16  ;;  %p6097_p12 = scmp.ne.s32.totalorder %s8798_s22, %s6096_s10 }
  0x31   : > { %778 = vrot.lane.b32.xlu0 %v6030_v33, %s6177_s15  ;;  %v484_v33 = vrot.slane %v482_v23, 7  ;;  %614 = vst [vmem:[#allocation2 + $0x18] sm:$0xff] %v613_v40  ;;  %5717 = vmatprep.subr.bf16.mxu1 %v6061_v36  ;;  %v520_v23 = vshll.u32 %v6070_v14, 16  ;;  %v524_v26 = vshrl.u32 %v6071_v19, 16  ;;  %v1053_v31 = vrot.slane %v1051_v16, 1  ;;  %v642_v14 = vld [vmem:[#allocation2 + $0x68] sm:$0xff] }
  0x32   : > { %5718 = vmatpush3.bf16.msra.mxu1 %v6061_v36  ;;  %5766 = vmatpush3.bf16.msra.mxu0 %v6064_v48  ;;  %v512_v25 = vrot.slane %v510_v17, 7  ;;  %v519_v29 = vrot.slane %v517_v22, 7  ;;  %v531_v40 = vshrl.u32 %v6073_v35, 16  ;;  %p6098_p13 = pnand %p6097_p12, %p6266_p4 }
  0x33   : > { %v487_v41 = vor.u32 %v485_v24, %v484_v33  ;;  %5719 = vmatprep.subr.bf16.mxu1 %v6065_v55  ;;  %v621_v24 = vld [vmem:[#allocation2 + $0x30] sm:$0xff]  ;;  %v627_v33 = vld [vmem:[#allocation2 + $0x40] sm:$0xff] }
  0x34   : > { %1063 = vrot.lane.b32.xlu1 %v977_v44, %s6178_s16  ;;  %v1028_v44 = vshrl.u32 %v6372_v6, 16  ;;  %v1046_v6 = vrot.slane %v1044_v57, 1  ;;  %v522_v36 = vor.u32 %v520_v23, %v519_v29  ;;  %v533_v48 = vrot.slane %v531_v40, 7  ;;  %v648_v23 = vld [vmem:[#allocation2 + $0x78] sm:$0xff]  ;;  %p6099_p0 = pneg %p6098_p13 }
  0x35   : > { %780 = vrot.lane.b32.xlu0 %v6032_v39, %s6177_s15  ;;  %v1037_v39 = vshll.u32 %v6378_v12, 16  ;;  %v610_v46 = vsel %vm6382_vm3, %v487_v41, %v609_v32  ;;  %v508_v12 = vor.u32 %v506_v63, %v505_v3  ;;  %v534_v41 = vshll.u32 %v6073_v35, 16 }
  0x36   : > { %611 = vst [vmem:[#allocation2 + $0x10] sm:$0xff] %v610_v46  ;;  %5720 = vmatpush3.bf16.msra.mxu1 %v6065_v55  ;;  %v625_v42 = vsel %vm6382_vm3, %v522_v36, %v624_v28  ;;  %v6084_v36 = vld [vmem:[%s6316_s8 + $0x78] sm:$0xff]  }
  0x37   : > { %5721 = vmatprep.subr.bf16.mxu1 %v6068_v4  ;;  %v619_v21 = vsel %vm6382_vm3, %v508_v12, %v618_v7  ;;  %626 = vst [vmem:[#allocation2 + $0x38] sm:$0xff] %v625_v42  ;;  %v583_v40 = vshll.u32 %v6084_v36, 16  ;;  %v651_v42 = vld [vmem:[#allocation2 + $0x80] sm:$0xff] }
  0x38   : > { %1065 = vrot.lane.b32.xlu1 %v984_v47, %s6178_s16  ;;  %v6063_v47 = vld [vmem:[%s6316_s8 + $0x18] sm:$0xff]   ;;  %620 = vst [vmem:[#allocation2 + $0x28] sm:$0xff] %v619_v21 }
  0x39   : > { %782 = vrot.lane.b32.xlu0 %v6034_v45, %s6177_s15  ;;  %v1032_v45 = vrot.slane %v1030_v27, 1  ;;  %v496_v53 = vshrl.u32 %v6063_v47, 16  ;;  %v527_v27 = vshll.u32 %v6071_v19, 16  ;;  %v645_v19 = vld [vmem:[#allocation2 + $0x70] sm:$0xff] }
  0x3a   : > { %5722 = vmatpush3.bf16.msra.mxu1 %v6068_v4  ;;  %v6080_v4 = vld [vmem:[%s6316_s8 + $0x68] sm:$0xff]  }
  0x3b   : > { %v498_v61 = vrot.slane %v496_v53, 7  ;;  %v1033_v15 = vor.u32 %v1032_v45, %v1028_v44  ;;  %v541_v44 = vshll.u32 %v6074_v37, 16  ;;  %v1054_v45 = vor.u32 %v1053_v31, %v1049_v10 }
  0x3c   : > { %1067 = vrot.lane.b32.xlu1 %v991_v54, %s6178_s16  ;;  %v499_v54 = vshll.u32 %v6063_v47, 16  ;;  %v630_v47 = vld [vmem:[#allocation2 + $0x48] sm:$0xff]  ;;  %v536_v53 = vor.u32 %v534_v41, %v533_v48  ;;  %v569_v10 = vshll.u32 %v6080_v4, 16 }
  0x3d   : > { %784 = vrot.lane.b32.xlu0 %v6036_v52, %s6177_s15  ;;  %v1039_v52 = vrot.slane %v1037_v39, 1 }
  0x3e   : > { %v501_v2 = vor.u32 %v499_v54, %v498_v61  ;;  %v631_v60 = vsel %vm6382_vm3, %v536_v53, %v630_v47  ;;  %v636_v61 = vld [vmem:[#allocation2 + $0x58] sm:$0xff] }
  0x3f   : > { %v1040_v9 = vor.u32 %v1039_v52, %v1035_v51  ;;  %v6077_v52 = vld [vmem:[%s6316_s8 + $0x58] sm:$0xff]   ;;  %632 = vst [vmem:[#allocation2 + $0x48] sm:$0xff] %v631_v60 }
  0x40   : > { %1069 = vrot.lane.b32.xlu1 %v998_v0, %s6178_s16  ;;  %v6438_v0 = vld [vmem:[%s9529_s2 + $0x60] sm:$0xff]   ;;  %v552_v57 = vshrl.u32 %v6077_v52, 16  ;;  %v555_v58 = vshll.u32 %v6077_v52, 16 }
  0x41   : > { %786 = vrot.lane.b32.xlu0 %v6038_v59, %s6177_s15  ;;  %v615_v59 = vld [vmem:[#allocation2 + $0x20] sm:$0xff]  ;;  %5799 = vmatprep.subr.bf16.mxu0 %v6438_v0 }
  0x42   : > { %v616_v11 = vsel %vm6382_vm3, %v501_v2, %v615_v59  ;;  %v6078_v59 = vld [vmem:[%s6316_s8 + $0x60] sm:$0xff]  }
  0x43   : > { %617 = vst [vmem:[#allocation2 + $0x20] sm:$0xff] %v616_v11  ;;  %v559_v2 = vshrl.u32 %v6078_v59, 16  ;;  %v562_v3 = vshll.u32 %v6078_v59, 16  ;;  %v6081_v11 = vld [vmem:[%s6316_s8 + $0x70] sm:$0xff]  }
  0x44   : > { %1071 = vrot.lane.b32.xlu1 %v1005_v18, %s6178_s16  ;;  %v513_v18 = vshll.u32 %v6069_v8, 16 }
  0x45   : > { %788 = vrot.lane.b32.xlu0 %v6040_v5, %s6177_s15  ;;  %v1042_v5 = vshrl.u32 %v6413_v43, 16  ;;  %v538_v43 = vshrl.u32 %v6074_v37, 16  ;;  %v561_v8 = vrot.slane %v559_v2, 7 }
  0x46   : > { %v515_v32 = vor.u32 %v513_v18, %v512_v25  ;;  %v573_v18 = vshrl.u32 %v6081_v11, 16 }
  0x47   : > { %v1047_v30 = vor.u32 %v1046_v6, %v1042_v5  ;;  %v540_v51 = vrot.slane %v538_v43, 7  ;;  %v639_v6 = vld [vmem:[#allocation2 + $0x60] sm:$0xff]  ;;  %v564_v16 = vor.u32 %v562_v3, %v561_v8 }
  0x48   : > { %1073 = vrot.lane.b32.xlu1 %v1012_v34, %s6178_s16  ;;  %v526_v34 = vrot.slane %v524_v26, 7 }
  0x49   : > { %790 = vrot.lane.b32.xlu0 %v6042_v20, %s6177_s15  ;;  %v6056_v20 = vld [vmem:[%s6316_s8 + $0x78] sm:$0xff]   ;;  %v543_v56 = vor.u32 %v541_v44, %v540_v51  ;;  %v643_v21 = vsel %vm6382_vm3, %v564_v16, %v642_v14 }
  0x4a   : > { %v529_v39 = vor.u32 %v527_v27, %v526_v34  ;;  %644 = vst [vmem:[#allocation2 + $0x68] sm:$0xff] %v643_v21  ;;  %v6079_v14 = vld [vmem:[%s9529_s2 + $0x78] sm:$0xff]   ;;  %v6082_v21 = vld [vmem:[%s9529_s2 + $0x80] sm:$0xff]  }
  0x4c   : > { %1075 = vrot.lane.b32.xlu1 %v1019_v49, %s6178_s16  ;;  %v628_v46 = vsel %vm6382_vm3, %v529_v39, %v627_v33  ;;  %v6076_v49 = vld [vmem:[%s6316_s8 + $0x50] sm:$0xff]   ;;  %v580_v39 = vshrl.u32 %v6084_v36, 16  ;;  %v6083_v36 = vld [vmem:[%s9529_s2 + $0x88] sm:$0xff]   ;;  %s5525_s8 = sshll.u32 %s6166_s27, 11  ;;  %s8807_s27 = scalar_lea.sflag [#allocation5], %s301_s12 }
  0x4d   : > { %792 = vrot.lane.b32.xlu0 %v6044_v38, %s6177_s15  ;;  %v622_v38 = vsel %vm6382_vm3, %v515_v32, %v621_v24  ;;  %629 = vst [vmem:[#allocation2 + $0x40] sm:$0xff] %v628_v46  ;;  %v545_v54 = vshrl.u32 %v6076_v49, 16  ;;  %v548_v55 = vshll.u32 %v6076_v49, 16  ;;  %v575_v24 = vrot.slane %v573_v18, 7 }
  0x4e   : > { %623 = vst [vmem:[#allocation2 + $0x30] sm:$0xff] %v622_v38  ;;  %v582_v41 = vrot.slane %v580_v39, 7 }
  0x4f   : > { %v547_v62 = vrot.slane %v545_v54, 7 }
  0x50   : > { %1077 = vrot.lane.b32.xlu1 %v1026_v1, %s6178_s16  ;;  %v554_v1 = vrot.slane %v552_v57, 7  ;;  %v585_v43 = vor.u32 %v583_v40, %v582_v41 }
  0x51   : > { %794 = vrot.lane.b32.xlu0 %v6046_v50, %s6177_s15  ;;  %v633_v50 = vld [vmem:[#allocation2 + $0x50] sm:$0xff]  ;;  %v550_v5 = vor.u32 %v548_v55, %v547_v62 }
  0x52   : > { %v634_v63 = vsel %vm6382_vm3, %v543_v56, %v633_v50  ;;  %v557_v7 = vor.u32 %v555_v58, %v554_v1  ;;  %v652_v46 = vsel %vm6382_vm3, %v585_v43, %v651_v42 }
  0x53   : > { %635 = vst [vmem:[#allocation2 + $0x50] sm:$0xff] %v634_v63  ;;  %v637_v12 = vsel %vm6382_vm3, %v550_v5, %v636_v61  ;;  %653 = vst [vmem:[#allocation2 + $0x80] sm:$0xff] %v652_v46  ;;  %v6072_v63 = vld [vmem:[%s9529_s2 + $0x68] sm:$0xff]  }
  0x54   : > { %1079 = vrot.lane.b32.xlu1 %v1033_v15, %s6178_s16  ;;  %638 = vst [vmem:[#allocation2 + $0x58] sm:$0xff] %v637_v12  ;;  %v640_v15 = vsel %vm6382_vm3, %v557_v7, %v639_v6  ;;  %v6075_v7 = vld [vmem:[%s9529_s2 + $0x70] sm:$0xff]  }
  0x55   : > { %1081 = vrot.lane.b32.xlu0 %v1040_v9, %s6178_s16  ;;  %v566_v9 = vshrl.u32 %v6080_v4, 16  ;;  %641 = vst [vmem:[#allocation2 + $0x60] sm:$0xff] %v640_v15 }
  0x57   : > { %v568_v17 = vrot.slane %v566_v9, 7 }
  0x58   : > { %1083 = vrot.lane.b32.xlu1 %v1047_v30, %s6178_s16 }
  0x59   : > { %796 = vrot.lane.b32.xlu0 %v6056_v20, %s6177_s15  ;;  %v576_v20 = vshll.u32 %v6081_v11, 16  ;;  %v571_v22 = vor.u32 %v569_v10, %v568_v17  ;;  %s9584_s15 = sshll.u32 %s6286_s17, 8 }
  0x5a   : > { %s6497_s20 = scalar_lea.vmem %s9528_s1, %s9584_s15 }
  0x5b   : > { %v646_v25 = vsel %vm6382_vm3, %v571_v22, %v645_v19  ;;  %v578_v26 = vor.u32 %v576_v20, %v575_v24  ;;  %v6500_v28 = vld [vmem:[%s6497_s20 + $0x8] sm:$0xff]  ;;  %v6503_v29 = vld [vmem:[%s6497_s20] sm:$0xff]  ;;  %v6510_v30 = vld [vmem:[%s6497_s20 + $0x18] sm:$0xff] }
  0x5c   : > { %1085 = vrot.lane.b32.xlu1 %v1054_v45, %s6178_s16  ;;  %647 = vst [vmem:[#allocation2 + $0x70] sm:$0xff] %v646_v25  ;;  %v6513_v31 = vld [vmem:[%s6497_s20 + $0x10] sm:$0xff]  ;;  %v6520_v32 = vld [vmem:[%s6497_s20 + $0x28] sm:$0xff]  ;;  %v6523_v33 = vld [vmem:[%s6497_s20 + $0x20] sm:$0xff] }
  0x5d   : > { %v649_v27 = vsel %vm6382_vm3, %v578_v26, %v648_v23  ;;  %1218 = vrot.lane.b32.xlu0 %v6503_v29, %s6179_s21  ;;  %v6530_v34 = vld [vmem:[%s6497_s20 + $0x38] sm:$0xff]  ;;  %v6533_v35 = vld [vmem:[%s6497_s20 + $0x30] sm:$0xff]  ;;  %v6541_v37 = vld [vmem:[%s6497_s20 + $0x48] sm:$0xff] }
  0x5e   : > { %650 = vst [vmem:[#allocation2 + $0x78] sm:$0xff] %v649_v27  ;;  %v6544_v38 = vld [vmem:[%s6497_s20 + $0x40] sm:$0xff]  ;;  %v6551_v44 = vld [vmem:[%s6497_s20 + $0x58] sm:$0xff]  ;;  %v6554_v45 = vld [vmem:[%s6497_s20 + $0x50] sm:$0xff] }
  0x5f   : > { %v6563_v47 = vld [vmem:[%s6497_s20 + $0x68] sm:$0xff]  ;;  %v6566_v48 = vld [vmem:[%s6497_s20 + $0x60] sm:$0xff]  ;;  %v6573_v13 = vld [vmem:[%s6497_s20 + $0x78] sm:$0xff] }
  0x60   : > { %1220 = vrot.lane.b32.xlu1 %v6500_v28, %s6179_s21  ;;  %v6576_v49 = vld [vmem:[%s6497_s20 + $0x70] sm:$0xff]  ;;  %v6583_v50 = vld [vmem:[%s6497_s20 + $0x88] sm:$0xff]  ;;  %v6586_v51 = vld [vmem:[%s6497_s20 + $0x80] sm:$0xff] }
  0x61   : > { %1222 = vrot.lane.b32.xlu0 %v6513_v31, %s6179_s21  ;;  %v6595_v54 = vld [vmem:[%s6497_s20 + $0x98] sm:$0xff]  ;;  %v6598_v55 = vld [vmem:[%s6497_s20 + $0x90] sm:$0xff]  ;;  %v6606_v57 = vld [vmem:[%s6497_s20 + $0xa8] sm:$0xff] }
  0x62   : > { %v6609_v58 = vld [vmem:[%s6497_s20 + $0xa0] sm:$0xff]  ;;  %v6624_v1 = vld [vmem:[%s6497_s20 + $0xb8] sm:$0xff]  ;;  %v6629_v3 = vld [vmem:[%s6497_s20 + $0xb0] sm:$0xff] }
  0x63   : > { %9616 = vst [vmem:[#allocation7_spill] sm:$0xff] %v6629_v3  ;;  %v6643_v8 = vld [vmem:[%s6497_s20 + $0xc8] sm:$0xff]  ;;  %v6650_v9 = vld [vmem:[%s6497_s20 + $0xc0] sm:$0xff]  ;;  %v6666_v15 = vld [vmem:[%s6497_s20 + $0xd8] sm:$0xff] }
  0x64   : > { %1224 = vrot.lane.b32.xlu1 %v6510_v30, %s6179_s21  ;;  %9617 = vst [vmem:[#allocation8_spill] sm:$0xff] %v6643_v8  ;;  %9618 = vst [vmem:[#allocation9_spill] sm:$0xff] %v6650_v9  ;;  %v6673_v17 = vld [vmem:[%s6497_s20 + $0xd0] sm:$0xff]  ;;  %v6689_v22 = vld [vmem:[%s6497_s20 + $0xe8] sm:$0xff] }
  0x65   : > { %1226 = vrot.lane.b32.xlu0 %v6523_v33, %s6179_s21  ;;  %9619 = vst [vmem:[#allocation10_spill] sm:$0xff] %v6666_v15  ;;  %9620 = vst [vmem:[#allocation11_spill] sm:$0xff] %v6673_v17  ;;  %v6696_v24 = vld [vmem:[%s6497_s20 + $0xe0] sm:$0xff]  ;;  %v6712_v39 = vld [vmem:[%s6497_s20 + $0xf8] sm:$0xff] }
  0x66   : > { %9621 = vst [vmem:[#allocation12_spill] sm:$0xff] %v6689_v22  ;;  %9622 = vst [vmem:[#allocation13_spill] sm:$0xff] %v6696_v24  ;;  %v6719_v41 = vld [vmem:[%s6497_s20 + $0xf0] sm:$0xff]  ;;  %s6180_s20 = smov 8  }
  0x67   : > { %9623 = vst [vmem:[#allocation14_spill] sm:$0xff] %v6712_v39  ;;  %9624 = vst [vmem:[#allocation15_spill] sm:$0xff] %v6719_v41 }
  0x68   : > { %1228 = vrot.lane.b32.xlu1 %v6520_v32, %s6179_s21 }
  0x69   : > { %1230 = vrot.lane.b32.xlu0 %v6533_v35, %s6179_s21 }
  0x6c   : > { %1232 = vrot.lane.b32.xlu1 %v6530_v34, %s6179_s21 }
  0x6d   : > { %1234 = vrot.lane.b32.xlu0 %v6544_v38, %s6179_s21 }
  0x70   : > { %1236 = vrot.lane.b32.xlu1 %v6541_v37, %s6179_s21 }
  0x71   : > { %1238 = vrot.lane.b32.xlu0 %v6554_v45, %s6179_s21 }
  0x74   : > { %1240 = vrot.lane.b32.xlu1 %v6551_v44, %s6179_s21 }
  0x75   : > { %1242 = vrot.lane.b32.xlu0 %v6566_v48, %s6179_s21 }
  0x78   : > { %1244 = vrot.lane.b32.xlu1 %v6563_v47, %s6179_s21 }
  0x79   : > { %1246 = vrot.lane.b32.xlu0 %v6576_v49, %s6179_s21 }
  0x7c   : > { %1248 = vrot.lane.b32.xlu1 %v6573_v13, %s6179_s21 }
  0x7d   : > { %1250 = vrot.lane.b32.xlu0 %v6586_v51, %s6179_s21 }
  0x80   : > { %1252 = vrot.lane.b32.xlu1 %v6583_v50, %s6179_s21 }
  0x81   : > { %1254 = vrot.lane.b32.xlu0 %v6598_v55, %s6179_s21 }
  0x84   : > { %1256 = vrot.lane.b32.xlu1 %v6595_v54, %s6179_s21 }
  0x85   : > { %1258 = vrot.lane.b32.xlu0 %v6609_v58, %s6179_s21 }
  0x88   : > { %1260 = vrot.lane.b32.xlu1 %v6606_v57, %s6179_s21 }
  0x89   : > { %1262 = vrot.lane.b32.xlu0 %v6629_v3, %s6179_s21 }
  0x8c   : > { %1264 = vrot.lane.b32.xlu1 %v6624_v1, %s6179_s21 }
  0x8d   : > { %1266 = vrot.lane.b32.xlu0 %v6650_v9, %s6179_s21 }
  0x8f   : > { %v767_v52 = vpop.permute.xlu0 %766  ;;  %v771_v53 = vpop.permute.xlu1 %770 }
  0x90   : > { %815 = vst.msk [vmem:[#allocation2 + $0x8] sm:$0xff] %vm814_vm4, %v767_v52  ;;  %817 = vst.msk [vmem:[#allocation2 + $0x18] sm:$0xff] %vm814_vm4, %v771_v53  ;;  %1268 = vrot.lane.b32.xlu1 %v6643_v8, %s6179_s21 }
  0x91   : > { %1270 = vrot.lane.b32.xlu0 %v6673_v17, %s6179_s21 }
  0x93   : > { %v769_v56 = vpop.permute.xlu0 %768 }
  0x94   : > { %816 = vst.msk [vmem:[#allocation2 + $0x10] sm:$0xff] %vm814_vm4, %v769_v56  ;;  %1272 = vrot.lane.b32.xlu1 %v6666_v15, %s6179_s21 }
  0x95   : > { %1274 = vrot.lane.b32.xlu0 %v6696_v24, %s6179_s21 }
  0x96   : > { %v1056_v62 = vpop.permute.xlu1 %1055 }
  0x97   : > { %v1106_v60 = vld [vmem:[#allocation2 + $0x8] sm:$0xff]  ;;  %v773_v61 = vpop.permute.xlu0 %772  ;;  %v1112_v12 = vld [vmem:[#allocation2 + $0x18] sm:$0xff] }
  0x98   : > { %818 = vst.msk [vmem:[#allocation2 + $0x20] sm:$0xff] %vm814_vm4, %v773_v61  ;;  %v1107_v2 = vsel %vm6611_vm7, %v1056_v62, %v1106_v60  ;;  %1276 = vrot.lane.b32.xlu1 %v6689_v22, %s6179_s21 }
  0x99   : > { %1108 = vst [vmem:[#allocation2 + $0x8] sm:$0xff] %v1107_v2  ;;  %5723 = vmatprep.mubr.msk.bf16.mxu1 %vm343_vm0, %v1107_v2  ;;  %5768 = vmatmul.mubr.msk.bf16.vlgmr.msra.gmra.mrb[0].mxu0 %vm343_vm0, %v1107_v2 }
  0x9a   : > { %5800 = vmatpush3.bf16.msra.mxu0 %v6438_v0  ;;  %v1058_v6 = vpop.permute.xlu1 %1057  ;;  %1278 = vrot.lane.b32.xlu0 %v6719_v41, %s6179_s21 }
  0x9b   : > { %v1109_v4 = vld [vmem:[#allocation2 + $0x10] sm:$0xff]  ;;  %v775_v5 = vpop.permute.xlu0 %774  ;;  %5801 = vmatprep.subr.bf16.mxu0 %v6072_v63 }
  0x9c   : > { %819 = vst.msk [vmem:[#allocation2 + $0x28] sm:$0xff] %vm814_vm4, %v775_v5  ;;  %v6647_v0 = vsel %vm6611_vm7, %v1058_v6, %v1109_v4  ;;  %1280 = vrot.lane.b32.xlu1 %v6712_v39, %s6179_s21 }
  0x9d   : > { %1111 = vst [vmem:[#allocation2 + $0x10] sm:$0xff] %v6647_v0  ;;  %5724 = vmatmul.mubr.msk.bf16.vlgmr.msra.gmra.mrb[0].mxu1 %vm343_vm0, %v6647_v0  ;;  %5771 = vmatprep.mubr.msk.bf16.mxu0 %vm343_vm0, %v6647_v0 }
  0x9e   : > { %5802 = vmatpush3.bf16.msra.mxu0 %v6072_v63  ;;  %v1060_v11 = vpop.permute.xlu1 %1059  ;;  %1314 = vrot.lane.b32.xlu0 %v6503_v29, %s6180_s20 }
  0x9f   : > { %v777_v10 = vpop.permute.xlu0 %776  ;;  %5803 = vmatprep.subr.bf16.mxu0 %v6075_v7  ;;  %v6670_v16 = vsel %vm6611_vm7, %v1060_v11, %v1112_v12  ;;  %v1115_v18 = vld [vmem:[#allocation2 + $0x20] sm:$0xff] }
  0xa0   : > { %820 = vst.msk [vmem:[#allocation2 + $0x30] sm:$0xff] %vm814_vm4, %v777_v10  ;;  %1114 = vst [vmem:[#allocation2 + $0x18] sm:$0xff] %v6670_v16  ;;  %5727 = vmatprep.mubr.msk.bf16.mxu1 %vm343_vm0, %v6670_v16  ;;  %1316 = vrot.lane.b32.xlu1 %v6500_v28, %s6180_s20 }
  0xa1   : > { %5772 = vmatmul.mubr.msk.bf16.gmra.mrb[4].mxu0 %vm343_vm0, %v6670_v16 }
  0xa2   : > { %5804 = vmatpush3.bf16.msra.mxu0 %v6075_v7  ;;  %v1062_v20 = vpop.permute.xlu1 %1061  ;;  %1318 = vrot.lane.b32.xlu0 %v6513_v31, %s6180_s20 }
  0xa3   : > { %v779_v19 = vpop.permute.xlu0 %778  ;;  %5805 = vmatprep.subr.bf16.mxu0 %v6079_v14  ;;  %v6693_v23 = vsel %vm6611_vm7, %v1062_v20, %v1115_v18  ;;  %v1118_v25 = vld [vmem:[#allocation2 + $0x28] sm:$0xff] }
  0xa4   : > { %821 = vst.msk [vmem:[#allocation2 + $0x38] sm:$0xff] %vm814_vm4, %v779_v19  ;;  %1117 = vst [vmem:[#allocation2 + $0x20] sm:$0xff] %v6693_v23  ;;  %5775 = vmatprep.mubr.msk.bf16.mxu0 %vm343_vm0, %v6693_v23  ;;  %1320 = vrot.lane.b32.xlu1 %v6510_v30, %s6180_s20 }
  0xa5   : > { %5728 = vmatmul.mubr.msk.bf16.gmra.mrb[4].mxu1 %vm343_vm0, %v6693_v23 }
  0xa6   : > { %5806 = vmatpush3.bf16.msra.mxu0 %v6079_v14  ;;  %v1064_v27 = vpop.permute.xlu1 %1063  ;;  %1322 = vrot.lane.b32.xlu0 %v6523_v33, %s6180_s20 }
  0xa7   : > { %v781_v26 = vpop.permute.xlu0 %780  ;;  %5807 = vmatprep.subr.bf16.mxu0 %v6082_v21  ;;  %v6716_v40 = vsel %vm6611_vm7, %v1064_v27, %v1118_v25  ;;  %v1121_v42 = vld [vmem:[#allocation2 + $0x30] sm:$0xff] }
  0xa8   : > { %822 = vst.msk [vmem:[#allocation2 + $0x40] sm:$0xff] %vm814_vm4, %v781_v26  ;;  %1120 = vst [vmem:[#allocation2 + $0x28] sm:$0xff] %v6716_v40  ;;  %5731 = vmatprep.mubr.msk.bf16.mxu1 %vm343_vm0, %v6716_v40  ;;  %1324 = vrot.lane.b32.xlu1 %v6520_v32, %s6180_s20 }
  0xa9   : > { %5776 = vmatmul.mubr.msk.bf16.gmra.mrb[8].mxu0 %vm343_vm0, %v6716_v40 }
  0xaa   : > { %5808 = vmatpush3.bf16.msra.mxu0 %v6082_v21  ;;  %v1066_v46 = vpop.permute.xlu1 %1065  ;;  %1326 = vrot.lane.b32.xlu0 %v6533_v35, %s6180_s20 }
  0xab   : > { %v783_v43 = vpop.permute.xlu0 %782  ;;  %5809 = vmatprep.subr.bf16.mxu0 %v6083_v36  ;;  %v6733_v52 = vsel %vm6611_vm7, %v1066_v46, %v1121_v42  ;;  %v1124_v53 = vld [vmem:[#allocation2 + $0x38] sm:$0xff] }
  0xac   : > { %823 = vst.msk [vmem:[#allocation2 + $0x48] sm:$0xff] %vm814_vm4, %v783_v43  ;;  %1123 = vst [vmem:[#allocation2 + $0x30] sm:$0xff] %v6733_v52  ;;  %5779 = vmatprep.mubr.msk.bf16.mxu0 %vm343_vm0, %v6733_v52  ;;  %1328 = vrot.lane.b32.xlu1 %v6530_v34, %s6180_s20 }
  0xad   : > { %5732 = vmatmul.mubr.msk.bf16.gmra.mrb[8].mxu1 %vm343_vm0, %v6733_v52 }
  0xae   : > { %5810 = vmatpush3.bf16.msra.mxu0 %v6083_v36  ;;  %v1068_v60 = vpop.permute.xlu1 %1067  ;;  %1330 = vrot.lane.b32.xlu0 %v6544_v38, %s6180_s20 }
  0xaf   : > { %v785_v56 = vpop.permute.xlu0 %784  ;;  %v6747_v61 = vsel %vm6611_vm7, %v1068_v60, %v1124_v53  ;;  %v1127_v62 = vld [vmem:[#allocation2 + $0x40] sm:$0xff] }
  0xb0   : > { %824 = vst.msk [vmem:[#allocation2 + $0x50] sm:$0xff] %vm814_vm4, %v785_v56  ;;  %1126 = vst [vmem:[#allocation2 + $0x38] sm:$0xff] %v6747_v61  ;;  %5735 = vmatprep.mubr.msk.bf16.mxu1 %vm343_vm0, %v6747_v61  ;;  %1332 = vrot.lane.b32.xlu1 %v6541_v37, %s6180_s20 }
  0xb1   : > { %5780 = vmatmul.mubr.msk.bf16.gmra.mrb[12].mxu0 %vm343_vm0, %v6747_v61 }
  0xb2   : > { %v1070_v2 = vpop.permute.xlu1 %1069  ;;  %1334 = vrot.lane.b32.xlu0 %v6554_v45, %s6180_s20 }
  0xb3   : > { %v787_v63 = vpop.permute.xlu0 %786  ;;  %v6761_v4 = vsel %vm6611_vm7, %v1070_v2, %v1127_v62  ;;  %v1130_v5 = vld [vmem:[#allocation2 + $0x48] sm:$0xff] }
  0xb4   : > { %825 = vst.msk [vmem:[#allocation2 + $0x58] sm:$0xff] %vm814_vm4, %v787_v63  ;;  %1129 = vst [vmem:[#allocation2 + $0x40] sm:$0xff] %v6761_v4  ;;  %5783 = vmatprep.mubr.msk.bf16.mxu0 %vm343_vm0, %v6761_v4  ;;  %1336 = vrot.lane.b32.xlu1 %v6551_v44, %s6180_s20 }
  0xb5   : > { %5736 = vmatmul.mubr.msk.bf16.gmra.mrb[12].mxu1 %vm343_vm0, %v6761_v4 }
  0xb6   : > { %v1072_v7 = vpop.permute.xlu1 %1071  ;;  %1338 = vrot.lane.b32.xlu0 %v6566_v48, %s6180_s20 }
  0xb7   : > { %v789_v6 = vpop.permute.xlu0 %788  ;;  %v6775_v10 = vsel %vm6611_vm7, %v1072_v7, %v1130_v5  ;;  %v1133_v11 = vld [vmem:[#allocation2 + $0x50] sm:$0xff] }
  0xb8   : > { %826 = vst.msk [vmem:[#allocation2 + $0x60] sm:$0xff] %vm814_vm4, %v789_v6  ;;  %1132 = vst [vmem:[#allocation2 + $0x48] sm:$0xff] %v6775_v10  ;;  %5739 = vmatprep.mubr.msk.bf16.mxu1 %vm343_vm0, %v6775_v10  ;;  %1340 = vrot.lane.b32.xlu1 %v6563_v47, %s6180_s20 }
  0xb9   : > { %5784 = vmatmul.mubr.msk.bf16.gmra.mrb[16].mxu0 %vm343_vm0, %v6775_v10 }
  0xba   : > { %v1074_v14 = vpop.permute.xlu1 %1073  ;;  %1342 = vrot.lane.b32.xlu0 %v6576_v49, %s6180_s20 }
  0xbb   : > { %v791_v12 = vpop.permute.xlu0 %790  ;;  %v6789_v18 = vsel %vm6611_vm7, %v1074_v14, %v1133_v11  ;;  %v1136_v19 = vld [vmem:[#allocation2 + $0x58] sm:$0xff] }
  0xbc   : > { %827 = vst.msk [vmem:[#allocation2 + $0x68] sm:$0xff] %vm814_vm4, %v791_v12  ;;  %1135 = vst [vmem:[#allocation2 + $0x50] sm:$0xff] %v6789_v18  ;;  %5787 = vmatprep.mubr.msk.bf16.mxu0 %vm343_vm0, %v6789_v18  ;;  %1344 = vrot.lane.b32.xlu1 %v6573_v13, %s6180_s20 }
  0xbd   : > { %5740 = vmatmul.mubr.msk.bf16.gmra.mrb[16].mxu1 %vm343_vm0, %v6789_v18 }
  0xbe   : > { %v1076_v21 = vpop.permute.xlu1 %1075  ;;  %1346 = vrot.lane.b32.xlu0 %v6586_v51, %s6180_s20 }
  0xbf   : > { %v793_v20 = vpop.permute.xlu0 %792  ;;  %v6803_v25 = vsel %vm6611_vm7, %v1076_v21, %v1136_v19  ;;  %v1139_v26 = vld [vmem:[#allocation2 + $0x60] sm:$0xff] }
  0xc0   : > { %828 = vst.msk [vmem:[#allocation2 + $0x70] sm:$0xff] %vm814_vm4, %v793_v20  ;;  %1138 = vst [vmem:[#allocation2 + $0x58] sm:$0xff] %v6803_v25  ;;  %5743 = vmatprep.mubr.msk.bf16.mxu1 %vm343_vm0, %v6803_v25  ;;  %1348 = vrot.lane.b32.xlu1 %v6583_v50, %s6180_s20 }
  0xc1   : > { %5788 = vmatmul.mubr.msk.bf16.gmra.mrb[20].mxu0 %vm343_vm0, %v6803_v25 }
  0xc2   : > { %v1078_v36 = vpop.permute.xlu1 %1077  ;;  %1350 = vrot.lane.b32.xlu0 %v6598_v55, %s6180_s20 }
  0xc3   : > { %v795_v27 = vpop.permute.xlu0 %794  ;;  %v6817_v42 = vsel %vm6611_vm7, %v1078_v36, %v1139_v26  ;;  %v1142_v43 = vld [vmem:[#allocation2 + $0x68] sm:$0xff] }
  0xc4   : > { %829 = vst.msk [vmem:[#allocation2 + $0x78] sm:$0xff] %vm814_vm4, %v795_v27  ;;  %1141 = vst [vmem:[#allocation2 + $0x60] sm:$0xff] %v6817_v42  ;;  %5791 = vmatprep.mubr.msk.bf16.mxu0 %vm343_vm0, %v6817_v42  ;;  %1352 = vrot.lane.b32.xlu1 %v6595_v54, %s6180_s20 }
  0xc5   : > { %5744 = vmatmul.mubr.msk.bf16.gmra.mrb[20].mxu1 %vm343_vm0, %v6817_v42 }
  0xc6   : > { %v1080_v56 = vpop.permute.xlu1 %1079  ;;  %1354 = vrot.lane.b32.xlu0 %v6609_v58, %s6180_s20 }
  0xc7   : > { %v1082_v46 = vpop.permute.xlu0 %1081  ;;  %v1145_v53 = vld [vmem:[#allocation2 + $0x70] sm:$0xff]  ;;  %v6834_v62 = vsel %vm6611_vm7, %v1080_v56, %v1142_v43  ;;  %v6086_v43 = vld [vmem:[%s9531_s4 + $0x8] sm:$0xff]  }
  0xc8   : > { %v6828_v60 = vsel %vm6611_vm7, %v1082_v46, %v1145_v53  ;;  %1144 = vst [vmem:[#allocation2 + $0x68] sm:$0xff] %v6834_v62  ;;  %5747 = vmatprep.mubr.msk.bf16.mxu1 %vm343_vm0, %v6834_v62  ;;  %1356 = vrot.lane.b32.xlu1 %v6606_v57, %s6180_s20 }
  0xc9   : > { %1147 = vst [vmem:[#allocation2 + $0x70] sm:$0xff] %v6828_v60  ;;  %5792 = vmatmul.mubr.msk.bf16.gmra.mrb[24].mxu0 %vm343_vm0, %v6834_v62 }
  0xca   : > { %5795 = vmatprep.mubr.msk.bf16.mxu0 %vm343_vm0, %v6828_v60  ;;  %v1084_v5 = vpop.permute.xlu1 %1083  ;;  %1358 = vrot.lane.b32.xlu0 %v6629_v3, %s6180_s20 }
  0xcb   : > { %v1148_v63 = vld [vmem:[#allocation2 + $0x78] sm:$0xff]  ;;  %v797_v2 = vpop.permute.xlu0 %796 }
  0xcc   : > { %830 = vst.msk [vmem:[#allocation2 + $0x80] sm:$0xff] %vm814_vm4, %v797_v2  ;;  %v6851_v6 = vsel %vm6611_vm7, %v1084_v5, %v1148_v63  ;;  %1360 = vrot.lane.b32.xlu1 %v6624_v1, %s6180_s20  ;;  %v5324_v5 = vld [vmem:[#allocation2 + $0x88] sm:$0xff] }
  0xcd   : > { %1150 = vst [vmem:[#allocation2 + $0x78] sm:$0xff] %v6851_v6  ;;  %5748 = vmatmul.mubr.msk.bf16.gmra.mrb[24].mxu1 %vm343_vm0, %v6828_v60 }
  0xce   : > { %5751 = vmatprep.mubr.msk.bf16.mxu1 %vm343_vm0, %v6851_v6  ;;  %v1086_v7 = vpop.permute.xlu1 %1085  ;;  %1362 = vrot.lane.b32.xlu0 %v6650_v9, %s6180_s20 }
  0xd0   : > { %1364 = vrot.lane.b32.xlu1 %v6643_v8, %s6180_s20 }
  0xd1   : > { %5796 = vmatmul.mubr.msk.bf16.gmra.mrb[28].mxu0 %vm343_vm0, %v6851_v6 }
  0xd2   : > { %5811 = vmatprep.mubr.msk.bf16.mxu0 %vm343_vm0, %v6647_v0  ;;  %v6893_v59 = vpop.permute.xlu1 %1220  ;;  %v6895_v0 = vpop.permute.xlu0 %1218  ;;  %1366 = vrot.lane.b32.xlu0 %v6673_v17, %s6180_s20 }
  0xd3   : > { %v1151_v11 = vld [vmem:[#allocation2 + $0x80] sm:$0xff] }
  0xd4   : > { %v6870_v12 = vsel %vm6611_vm7, %v1086_v7, %v1151_v11  ;;  %1368 = vrot.lane.b32.xlu1 %v6666_v15, %s6180_s20  ;;  %v6088_v11 = vld [vmem:[%s9531_s4 + $0x18] sm:$0xff]  }
  0xd5   : > { %1153 = vst [vmem:[#allocation2 + $0x80] sm:$0xff] %v6870_v12  ;;  %5752 = vmatmul.mubr.msk.bf16.gmra.mrb[28].mxu1 %vm343_vm0, %v6870_v12 }
  0xd6   : > { %1370 = vrot.lane.b32.xlu0 %v6696_v24, %s6180_s20 }
  0xd8   : > { %1372 = vrot.lane.b32.xlu1 %v6689_v22, %s6180_s20 }
  0xd9   : > { %5812 = vmatmul.mubr.msk.bf16.vlgmr.msra.gmra.mrb[0].mxu0 %vm343_vm0, %v6670_v16  ;;  %v6905_v16 = vpop.permute.xlu1 %1224 }
  0xda   : > { %5815 = vmatprep.mubr.msk.bf16.mxu0 %vm343_vm0, %v6693_v23  ;;  %v6907_v23 = vpop.permute.xlu0 %1222  ;;  %1410 = vrot.lane.b32.xlu0 %v6503_v29, %s6181_s23 }
  0xdc   : > { %1412 = vrot.lane.b32.xlu1 %v6500_v28, %s6181_s23 }
  0xde   : > { %v6915_v14 = vpop.permute.xlu0 %1226  ;;  %1414 = vrot.lane.b32.xlu0 %v6513_v31, %s6181_s23 }
  0xe0   : > { %1416 = vrot.lane.b32.xlu1 %v6510_v30, %s6181_s23 }
  0xe1   : > { %5816 = vmatmul.mubr.msk.bf16.gmra.mrb[4].mxu0 %vm343_vm0, %v6716_v40  ;;  %v6913_v40 = vpop.permute.xlu1 %1228 }
  0xe2   : > { %5819 = vmatprep.mubr.msk.bf16.mxu0 %vm343_vm0, %v6733_v52  ;;  %v6927_v19 = vpop.permute.xlu0 %1230  ;;  %1418 = vrot.lane.b32.xlu0 %v6523_v33, %s6181_s23 }
  0xe4   : > { %1420 = vrot.lane.b32.xlu1 %v6520_v32, %s6181_s23 }
  0xe5   : > { %v6925_v52 = vpop.permute.xlu1 %1232 }
  0xe6   : > { %1422 = vrot.lane.b32.xlu0 %v6533_v35, %s6181_s23 }
  0xe8   : > { %1424 = vrot.lane.b32.xlu1 %v6530_v34, %s6181_s23 }
  0xe9   : > { %5820 = vmatmul.mubr.msk.bf16.gmra.mrb[8].mxu0 %vm343_vm0, %v6747_v61  ;;  %v6933_v61 = vpop.permute.xlu1 %1236 }
  0xea   : > { %5823 = vmatprep.mubr.msk.bf16.mxu0 %vm343_vm0, %v6761_v4  ;;  %v6935_v4 = vpop.permute.xlu0 %1234  ;;  %1426 = vrot.lane.b32.xlu0 %v6544_v38, %s6181_s23 }
  0xec   : > { %1428 = vrot.lane.b32.xlu1 %v6541_v37, %s6181_s23 }
  0xed   : > { %v6945_v20 = vpop.permute.xlu1 %1240 }
  0xee   : > { %v6947_v21 = vpop.permute.xlu0 %1238  ;;  %1430 = vrot.lane.b32.xlu0 %v6554_v45, %s6181_s23 }
  0xf0   : > { %1432 = vrot.lane.b32.xlu1 %v6551_v44, %s6181_s23 }
  0xf1   : > { %5824 = vmatmul.mubr.msk.bf16.gmra.mrb[12].mxu0 %vm343_vm0, %v6775_v10  ;;  %v6953_v10 = vpop.permute.xlu1 %1244 }
  0xf2   : > { %5827 = vmatprep.mubr.msk.bf16.mxu0 %vm343_vm0, %v6789_v18  ;;  %v6955_v26 = vpop.permute.xlu0 %1242  ;;  %v6085_v18 = vld [vmem:[%s9531_s4] sm:$0xff]   ;;  %1434 = vrot.lane.b32.xlu0 %v6566_v48, %s6181_s23 }
  0xf3   : > { %5843 = vmatprep.subr.bf16.mxu1 %v6085_v18 }
  0xf4   : > { %5844 = vmatpush3.bf16.msra.mxu1 %v6085_v18  ;;  %1436 = vrot.lane.b32.xlu1 %v6563_v47, %s6181_s23 }
  0xf5   : > { %v6968_v27 = vpop.permute.xlu1 %1248  ;;  %5845 = vmatprep.subr.bf16.mxu1 %v6086_v43 }
  0xf6   : > { %v6970_v36 = vpop.permute.xlu0 %1246  ;;  %1438 = vrot.lane.b32.xlu0 %v6576_v49, %s6181_s23 }
  0xf8   : > { %5846 = vmatpush3.bf16.msra.mxu1 %v6086_v43  ;;  %1440 = vrot.lane.b32.xlu1 %v6573_v13, %s6181_s23 }
  0xf9   : > { %5828 = vmatmul.mubr.msk.bf16.gmra.mrb[16].mxu0 %vm343_vm0, %v6803_v25  ;;  %v6976_v25 = vpop.permute.xlu1 %1252 }
  0xfa   : > { %5831 = vmatprep.mubr.msk.bf16.mxu0 %vm343_vm0, %v6817_v42  ;;  %v6978_v42 = vpop.permute.xlu0 %1250  ;;  %1442 = vrot.lane.b32.xlu0 %v6586_v51, %s6181_s23 }
  0xfc   : > { %1444 = vrot.lane.b32.xlu1 %v6583_v50, %s6181_s23 }
  0xfd   : > { %v6991_v46 = vpop.permute.xlu1 %1256 }
  0xfe   : > { %v6993_v53 = vpop.permute.xlu0 %1254  ;;  %1446 = vrot.lane.b32.xlu0 %v6598_v55, %s6181_s23 }
 0x100   : > { %1448 = vrot.lane.b32.xlu1 %v6595_v54, %s6181_s23 }
 0x101   : > { %5832 = vmatmul.mubr.msk.bf16.gmra.mrb[20].mxu0 %vm343_vm0, %v6834_v62  ;;  %v6999_v56 = vpop.permute.xlu1 %1260  ;;  %v6087_v62 = vld [vmem:[%s9531_s4 + $0x10] sm:$0xff]  }
 0x102   : > { %5835 = vmatprep.mubr.msk.bf16.mxu0 %vm343_vm0, %v6828_v60  ;;  %v7001_v60 = vpop.permute.xlu0 %1258  ;;  %5847 = vmatprep.subr.bf16.mxu1 %v6087_v62 }
 0x103   : > { %5848 = vmatpush3.bf16.msra.mxu1 %v6087_v62  ;;  %1450 = vrot.lane.b32.xlu0 %v6609_v58, %s6181_s23 }
 0x104   : > { %1452 = vrot.lane.b32.xlu1 %v6606_v57, %s6181_s23  ;;  %5849 = vmatprep.subr.bf16.mxu1 %v6088_v11 }
 0x105   : > { %v7014_v63 = vpop.permute.xlu1 %1264 }
 0x106   : > { %v7016_v2 = vpop.permute.xlu0 %1262 }
 0x107   : > { %5850 = vmatpush3.bf16.msra.mxu1 %v6088_v11  ;;  %1454 = vrot.lane.b32.xlu0 %v6629_v3, %s6181_s23 }
 0x108   : > { %1456 = vrot.lane.b32.xlu1 %v6624_v1, %s6181_s23 }
 0x109   : > { %5836 = vmatmul.mubr.msk.bf16.gmra.mrb[24].mxu0 %vm343_vm0, %v6851_v6  ;;  %v7022_v6 = vpop.permute.xlu1 %1268 }
 0x10a   : > { %5839 = vmatprep.mubr.msk.bf16.mxu0 %vm343_vm0, %v6870_v12  ;;  %9625 = vst [vmem:[#allocation16_spill] sm:$0xff] %v7022_v6  ;;  %v7025_v7 = vpop.permute.xlu0 %1266 }
 0x10b   : > { %9626 = vst [vmem:[#allocation17_spill] sm:$0xff] %v7025_v7  ;;  %1458 = vrot.lane.b32.xlu0 %v6650_v9, %s6181_s23 }
 0x10c   : > { %1460 = vrot.lane.b32.xlu1 %v6643_v8, %s6181_s23 }
 0x10d   : > { %v7034_v12 = vpop.permute.xlu1 %1272 }
 0x10e   : > { %9627 = vst [vmem:[#allocation18_spill] sm:$0xff] %v7034_v12  ;;  %v7036_v18 = vpop.permute.xlu0 %1270  ;;  %v6090_v12 = vld [vmem:[%s9531_s4 + $0x28] sm:$0xff]  }
 0x10f   : > { %9628 = vst [vmem:[#allocation19_spill] sm:$0xff] %v7036_v18  ;;  %1462 = vrot.lane.b32.xlu0 %v6673_v17, %s6181_s23 }
 0x110   : > { %1464 = vrot.lane.b32.xlu1 %v6666_v15, %s6181_s23 }
 0x111   : > { %5840 = vmatmul.mubr.msk.bf16.gmra.mrb[28].mxu0 %vm343_vm0, %v5324_v5  ;;  %v7042_v43 = vpop.permute.xlu1 %1276  ;;  %v6089_v5 = vld [vmem:[%s9531_s4 + $0x20] sm:$0xff]  }
 0x112   : > { %9629 = vst [vmem:[#allocation20_spill] sm:$0xff] %v7042_v43  ;;  %v7044_v62 = vpop.permute.xlu0 %1274  ;;  %5851 = vmatprep.subr.bf16.mxu1 %v6089_v5 }
 0x113   : > { %9630 = vst [vmem:[#allocation21_spill] sm:$0xff] %v7044_v62  ;;  %5852 = vmatpush3.bf16.msra.mxu1 %v6089_v5  ;;  %1466 = vrot.lane.b32.xlu0 %v6696_v24, %s6181_s23  ;;  %v6091_v5 = vld [vmem:[%s9531_s4 + $0x30] sm:$0xff]  }
 0x114   : > { %1468 = vrot.lane.b32.xlu1 %v6689_v22, %s6181_s23  ;;  %5853 = vmatprep.subr.bf16.mxu1 %v6090_v12 }
 0x115   : > { %v7053_v11 = vpop.permute.xlu1 %1280 }
 0x116   : > { %9631 = vst [vmem:[#allocation22_spill] sm:$0xff] %v7053_v11  ;;  %v7055_v18 = vpop.permute.xlu0 %1278 }
 0x117   : > { %9632 = vst [vmem:[#allocation23_spill] sm:$0xff] %v7055_v18  ;;  %5854 = vmatpush3.bf16.msra.mxu1 %v6090_v12  ;;  %1374 = vrot.lane.b32.xlu0 %v6719_v41, %s6180_s20 }
 0x118   : > { %5855 = vmatprep.subr.bf16.mxu1 %v6091_v5  ;;  %1376 = vrot.lane.b32.xlu1 %v6712_v39, %s6180_s20 }
 0x119   : > { %v1317_v62 = vpop.permute.xlu1 %1316 }
 0x11a   : > { %v1315_v43 = vpop.permute.xlu0 %1314 }
 0x11b   : > { %5856 = vmatpush3.bf16.msra.mxu1 %v6091_v5  ;;  %1470 = vrot.lane.b32.xlu0 %v6719_v41, %s6181_s23  ;;  %v6092_v5 = vld [vmem:[%s9531_s4 + $0x38] sm:$0xff]  }
 0x11c   : > { %1472 = vrot.lane.b32.xlu1 %v6712_v39, %s6181_s23  ;;  %5857 = vmatprep.subr.bf16.mxu1 %v6092_v5  ;;  %s8796_s23 = scalar_lea.hbm %s9533_s6, %s5525_s8 }
 0x11d   : > { %v7071_v18 = vpop.permute.xlu1 %1320 }
 0x11e   : > { %v7073_v11 = vpop.permute.xlu0 %1318 }
 0x11f   : > { %5858 = vmatpush3.bf16.msra.mxu1 %v6092_v5 }
 0x121   : > { %v7079_v22 = vpop.permute.xlu1 %1324 }
 0x122   : > { %v7081_v24 = vpop.permute.xlu0 %1322 }
 0x125   : > { %v7087_v12 = vpop.permute.xlu1 %1328 }
 0x126   : > { %9633 = vst [vmem:[#allocation24_spill] sm:$0xff] %v7087_v12  ;;  %v7089_v17 = vpop.permute.xlu0 %1326 }
 0x127   : > { %9634 = vst [vmem:[#allocation25_spill] sm:$0xff] %v7089_v17 }
 0x129   : > { %v7091_v15 = vpop.permute.xlu1 %1332 }
 0x12a   : > { %9635 = vst [vmem:[#allocation26_spill] sm:$0xff] %v7091_v15  ;;  %v7093_v9 = vpop.permute.xlu0 %1330 }
 0x12b   : > { %9636 = vst [vmem:[#allocation27_spill] sm:$0xff] %v7093_v9 }
 0x12d   : > { %v7098_v7 = vpop.permute.xlu1 %1336 }
 0x12e   : > { %9637 = vst [vmem:[#allocation28_spill] sm:$0xff] %v7098_v7  ;;  %v7100_v8 = vpop.permute.xlu0 %1334 }
 0x12f   : > { %9638 = vst [vmem:[#allocation29_spill] sm:$0xff] %v7100_v8 }
 0x131   : > { %v7102_v39 = vpop.permute.xlu1 %1340 }
 0x132   : > { %9639 = vst [vmem:[#allocation30_spill] sm:$0xff] %v7102_v39  ;;  %v7104_v41 = vpop.permute.xlu0 %1338 }
 0x133   : > { %9640 = vst [vmem:[#allocation31_spill] sm:$0xff] %v7104_v41 }
 0x135   : > { %v7106_v12 = vpop.permute.xlu1 %1344 }
 0x136   : > { %9641 = vst [vmem:[#allocation32_spill] sm:$0xff] %v7106_v12  ;;  %v7108_v17 = vpop.permute.xlu0 %1342 }
 0x139   : > { %v7110_v15 = vpop.permute.xlu1 %1348 }
 0x13a   : > { %9642 = vst [vmem:[#allocation33_spill] sm:$0xff] %v7110_v15  ;;  %v7112_v9 = vpop.permute.xlu0 %1346 }
 0x13b   : > { %9643 = vst [vmem:[#allocation34_spill] sm:$0xff] %v7112_v9 }
 0x13d   : > { %v7114_v6 = vpop.permute.xlu1 %1352 }
 0x13e   : > { %v7116_v3 = vpop.permute.xlu0 %1350 }
 0x13f   : > { %9644 = vst [vmem:[#allocation35_spill] sm:$0xff] %v7116_v3  ;;  %v1508_v3 = vsel %vm1506_vm8, %v6500_v28, %v6893_v59  ;;  %v1509_v28 = vsel %vm1506_vm8, %v6513_v31, %v6907_v23  ;;  %v1521_v23 = vsel %vm1506_vm8, %v6576_v49, %v6970_v36  ;;  %v1528_v49 = vsel %vm1506_vm8, %v6606_v57, %v6999_v56  ;;  %v9651_v57 = vld [vmem:[#allocation7_spill] sm:$0xff] }
 0x140   : > { %v9659_v36 = vld [vmem:[#allocation11_spill] sm:$0xff] }
 0x141   : > { %v7118_v7 = vpop.permute.xlu1 %1356 }
 0x142   : > { %v7120_v8 = vpop.permute.xlu0 %1354 }
 0x143   : > { %9645 = vst [vmem:[#allocation36_spill] sm:$0xff] %v7120_v8  ;;  %v1507_v8 = vsel %vm1506_vm8, %v6503_v29, %v6895_v0  ;;  %v1512_v29 = vsel %vm1506_vm8, %v6520_v32, %v6913_v40  ;;  %v1514_v0 = vsel %vm1506_vm8, %v6530_v34, %v6925_v52  ;;  %v1516_v32 = vsel %vm1506_vm8, %v6541_v37, %v6933_v61 }
 0x144   : > { %v1518_v34 = vsel %vm1506_vm8, %v6551_v44, %v6945_v20  ;;  %v1520_v37 = vsel %vm1506_vm8, %v6563_v47, %v6953_v10  ;;  %v1524_v47 = vsel %vm1506_vm8, %v6583_v50, %v6976_v25  ;;  %v1527_v50 = vsel %vm1506_vm8, %v6609_v58, %v7001_v60  ;;  %v9653_v58 = vld [vmem:[#allocation8_spill] sm:$0xff]  ;;  %v9656_v10 = vld [vmem:[#allocation18_spill] sm:$0xff] }
 0x145   : > { %v7122_v5 = vpop.permute.xlu1 %1360  ;;  %v1529_v61 = vsel %vm1506_vm8, %v9651_v57, %v7016_v2  ;;  %v9663_v2 = vld [vmem:[#allocation13_spill] sm:$0xff]  ;;  %v9672_v57 = vld [vmem:[#allocation28_spill] sm:$0xff] }
 0x146   : > { %9646 = vst [vmem:[#allocation37_spill] sm:$0xff] %v7122_v5  ;;  %v7124_v39 = vpop.permute.xlu0 %1358 }
 0x147   : > { %9647 = vst [vmem:[#allocation38_spill] sm:$0xff] %v7124_v39 }
 0x149   : > { %v7126_v41 = vpop.permute.xlu1 %1364 }
 0x14a   : > { %9648 = vst [vmem:[#allocation39_spill] sm:$0xff] %v7126_v41  ;;  %v7128_v12 = vpop.permute.xlu0 %1362  ;;  %v1540_v41 = vsel %vm1539_vm9, %v1507_v8, %v1315_v43  ;;  %v9664_v43 = vld [vmem:[#allocation22_spill] sm:$0xff] }
 0x14b   : > { %9649 = vst [vmem:[#allocation40_spill] sm:$0xff] %v7128_v12  ;;  %v1541_v12 = vsel %vm1539_vm9, %v1508_v3, %v1317_v62  ;;  %v1511_v3 = vsel %vm1506_vm8, %v6523_v33, %v6915_v14  ;;  %v1515_v33 = vsel %vm1506_vm8, %v6544_v38, %v6935_v4  ;;  %v1519_v38 = vsel %vm1506_vm8, %v6566_v48, %v6955_v26  ;;  %v9652_v4 = vld [vmem:[#allocation16_spill] sm:$0xff]  ;;  %v9665_v62 = vld [vmem:[#allocation14_spill] sm:$0xff] }
 0x14c   : > { %v1523_v48 = vsel %vm1506_vm8, %v6586_v51, %v6978_v42  ;;  %v1526_v14 = vsel %vm1506_vm8, %v6595_v54, %v6991_v46  ;;  %v1545_v51 = vsel %vm1539_vm9, %v1512_v29, %v7079_v22  ;;  %v1544_v52 = vsel %vm1539_vm9, %v1511_v3, %v7081_v24  ;;  %v9654_v22 = vld [vmem:[#allocation17_spill] sm:$0xff]  ;;  %v9660_v42 = vld [vmem:[#allocation20_spill] sm:$0xff] }
 0x14d   : > { %v7130_v15 = vpop.permute.xlu1 %1368  ;;  %v1532_v20 = vsel %vm1506_vm8, %v9653_v58, %v9652_v4  ;;  %v9655_v24 = vld [vmem:[#allocation9_spill] sm:$0xff]  ;;  %v9661_v46 = vld [vmem:[#allocation12_spill] sm:$0xff]  ;;  %v9674_v58 = vld [vmem:[#allocation30_spill] sm:$0xff] }
 0x14e   : > { %v7132_v9 = vpop.permute.xlu0 %1366  ;;  %v9673_v4 = vld [vmem:[#allocation29_spill] sm:$0xff] }
 0x14f   : > { %9650 = vst [vmem:[#allocation41_spill] sm:$0xff] %v7132_v9  ;;  %v1510_v9 = vsel %vm1506_vm8, %v6510_v30, %v6905_v16  ;;  %v1513_v30 = vsel %vm1506_vm8, %v6533_v35, %v6927_v19  ;;  %v1517_v35 = vsel %vm1506_vm8, %v6554_v45, %v6947_v21  ;;  %v1542_v45 = vsel %vm1539_vm9, %v1509_v28, %v7073_v11 }
 0x150   : > { %v1543_v44 = vsel %vm1539_vm9, %v1510_v9, %v7071_v18  ;;  %v7236_v21 = vsel %vm1506_vm8, %v9655_v24, %v9654_v22  ;;  %v7261_v11 = vsel %vm1506_vm8, %v9665_v62, %v9664_v43  ;;  %v7293_v22 = vsel %vm1539_vm9, %v1520_v37, %v9674_v58  ;;  %v9675_v24 = vld [vmem:[#allocation31_spill] sm:$0xff]  ;;  %v9680_v43 = vld [vmem:[#allocation36_spill] sm:$0xff] }
 0x151   : > { %v7140_v5 = vpop.permute.xlu1 %1372  ;;  %v7332_v62 = vsel %vm1539_vm9, %v1527_v50, %v9680_v43 }
 0x152   : > { %v7142_v39 = vpop.permute.xlu0 %1370 }
 0x155   : > { %v1413_v59 = vpop.permute.xlu1 %1412 }
 0x156   : > { %v1411_v8 = vpop.permute.xlu0 %1410  ;;  %v1574_v31 = vsel %vm1572_vm10, %v1541_v12, %v1413_v59 }
 0x157   : > { %v1573_v16 = vsel %vm1572_vm10, %v1540_v41, %v1411_v8  ;;  %1608 = vst.msk [vmem:[#allocation3 + $0x21] sm:$0xff] %vm1606_vm11, %v1574_v31  ;;  %1640 = vst.msk [vmem:[#allocation3 + $0x9] sm:$0xff] %vm1606_vm11, %v1574_v31  ;;  %v1522_v41 = vsel %vm1506_vm8, %v6573_v13, %v6968_v27  ;;  %v1525_v13 = vsel %vm1506_vm8, %v6598_v55, %v6993_v53  ;;  %v9658_v27 = vld [vmem:[#allocation19_spill] sm:$0xff] }
 0x158   : > { %1607 = vst.msk [vmem:[#allocation3 + $0x19] sm:$0xff] %vm1606_vm11, %v1573_v16  ;;  %1639 = vst.msk [vmem:[#allocation3 + $0x1] sm:$0xff] %vm1606_vm11, %v1573_v16  ;;  %v1530_v55 = vsel %vm1506_vm8, %v6624_v1, %v7014_v63  ;;  %v9657_v1 = vld [vmem:[#allocation10_spill] sm:$0xff]  ;;  %v7246_v25 = vsel %vm1506_vm8, %v9659_v36, %v9658_v27  ;;  %v7251_v53 = vsel %vm1506_vm8, %v9661_v46, %v9660_v42  ;;  %v9662_v63 = vld [vmem:[#allocation21_spill] sm:$0xff]  ;;  %v3161_v36 = vlaneseq }
 0x159   : > { %v1417_v9 = vpop.permute.xlu1 %1416  ;;  %v7241_v26 = vsel %vm1506_vm8, %v9657_v1, %v9656_v10  ;;  %v7256_v18 = vsel %vm1506_vm8, %v9663_v2, %v9662_v63  ;;  %v9666_v8 = vld [vmem:[#allocation23_spill] sm:$0xff]  ;;  %v7298_v10 = vsel %vm1539_vm9, %v1519_v38, %v9675_v24  ;;  %v9676_v1 = vld [vmem:[#allocation32_spill] sm:$0xff]  ;;  %v9677_v42 = vld [vmem:[#allocation33_spill] sm:$0xff]  ;;  %v7318_v38 = vsel %vm1539_vm9, %v1526_v14, %v7114_v6 }
 0x15a   : > { %v1415_v40 = vpop.permute.xlu0 %1414  ;;  %v1576_v54 = vsel %vm1572_vm10, %v1543_v44, %v1417_v9  ;;  %v9667_v31 = vld [vmem:[#allocation15_spill] sm:$0xff]  ;;  %v9668_v44 = vld [vmem:[#allocation24_spill] sm:$0xff]  ;;  %v9669_v9 = vld [vmem:[#allocation25_spill] sm:$0xff]  ;;  %v7310_v37 = vsel %vm1539_vm9, %v1524_v47, %v9677_v42 }
 0x15b   : > { %v1575_v19 = vsel %vm1572_vm10, %v1542_v45, %v1415_v40  ;;  %1610 = vst.msk [vmem:[#allocation3 + $0x39] sm:$0xff] %vm1606_vm11, %v1576_v54  ;;  %v7268_v16 = vsel %vm1506_vm8, %v9667_v31, %v9666_v8  ;;  %v1547_v45 = vsel %vm1539_vm9, %v1514_v0, %v9668_v44  ;;  %v1546_v40 = vsel %vm1539_vm9, %v1513_v30, %v9669_v9  ;;  %v9670_v54 = vld [vmem:[#allocation26_spill] sm:$0xff]  ;;  %v9681_v6 = vld [vmem:[#allocation37_spill] sm:$0xff] }
 0x15c   : > { %1609 = vst.msk [vmem:[#allocation3 + $0x31] sm:$0xff] %vm1606_vm11, %v1575_v19  ;;  %v1549_v19 = vsel %vm1539_vm9, %v1516_v32, %v9670_v54  ;;  %v7285_v30 = vsel %vm1539_vm9, %v1518_v34, %v9672_v57  ;;  %v7289_v32 = vsel %vm1539_vm9, %v1517_v35, %v9673_v4  ;;  %v7306_v34 = vsel %vm1539_vm9, %v1521_v23, %v7108_v17  ;;  %v9678_v46 = vld [vmem:[#allocation34_spill] sm:$0xff]  ;;  %v9685_v57 = vld [vmem:[#allocation41_spill] sm:$0xff] }
 0x15d   : > { %v1421_v56 = vpop.permute.xlu1 %1420  ;;  %v7326_v17 = vsel %vm1539_vm9, %v1528_v49, %v7118_v7  ;;  %v7336_v14 = vsel %vm1539_vm9, %v1530_v55, %v9681_v6  ;;  %v9683_v7 = vld [vmem:[#allocation39_spill] sm:$0xff]  ;;  %v7384_v4 = vsel %vm1539_vm9, %v7246_v25, %v9685_v57 }
 0x15e   : > { %v1419_v60 = vpop.permute.xlu0 %1418  ;;  %v1681_v12 = vld [vmem:[#allocation3 + $0x10] sm:$0x1]  ;;  %v1682_v28 = vld [vmem:[#allocation3 + $0x28] sm:$0x1]  ;;  %v1578_v3 = vsel %vm1572_vm10, %v1545_v51, %v1421_v56  ;;  %v7314_v56 = vsel %vm1539_vm9, %v1523_v48, %v9678_v46  ;;  %v3162_v48 = vshrl.u32 %v3161_v36, 7  ;;  %v7348_v49 = vsel %vm1539_vm9, %v1532_v20, %v9683_v7 }
 0x15f   : > { %v1644_v29 = vld [vmem:[#allocation3 + $0x1] sm:$0x1]  ;;  %v1577_v59 = vsel %vm1572_vm10, %v1544_v52, %v1419_v60  ;;  %1699 = vst.msk [vmem:[#allocation3 + $0x11] sm:$0x1] %vm1662_vm12, %v1681_v12  ;;  %1700 = vst.msk [vmem:[#allocation3 + $0x29] sm:$0x1] %vm1662_vm12, %v1682_v28  ;;  %v7395_v36 = vsel %vm1539_vm9, %v7251_v53, %v7140_v5 }
 0x160   : > { %v1645_v51 = vld [vmem:[#allocation3 + $0x19] sm:$0x1]  ;;  %1663 = vst.msk [vmem:[#allocation3] sm:$0x1] %vm1662_vm12, %v1644_v29  ;;  %v9671_v52 = vld [vmem:[#allocation27_spill] sm:$0xff]  ;;  %v7350_v55 = vsub.s32 0, %v3162_v48 }
 0x161   : > { %1612 = vst.msk [vmem:[#allocation3 + $0x51] sm:$0xff] %vm1606_vm11, %v1578_v3  ;;  %1611 = vst.msk [vmem:[#allocation3 + $0x49] sm:$0xff] %vm1606_vm11, %v1577_v59  ;;  %v1548_v0 = vsel %vm1539_vm9, %v1515_v33, %v9671_v52  ;;  %v7302_v33 = vsel %vm1539_vm9, %v1522_v41, %v9676_v1  ;;  %v1425_v35 = vpop.permute.xlu1 %1424  ;;  %v9679_v41 = vld [vmem:[#allocation35_spill] sm:$0xff]  ;;  %v6182_v29 = vmov 0.0   ;;  %v7432_v43 = vld [vmem:[#allocation3 + $0x20] sm:$0xff] }
 0x162   : > { %1664 = vst.msk [vmem:[#allocation3 + $0x18] sm:$0x1] %vm1662_vm12, %v1645_v51  ;;  %v1423_v27 = vpop.permute.xlu0 %1422  ;;  %v7322_v60 = vsel %vm1539_vm9, %v1525_v13, %v9679_v41  ;;  %v1683_v23 = vld [vmem:[#allocation3 + $0x40] sm:$0x1]  ;;  %v1580_v47 = vsel %vm1572_vm10, %v1547_v45, %v1425_v35  ;;  %v9682_v13 = vld [vmem:[#allocation38_spill] sm:$0xff]  ;;  %v6183_v45 = vmov 0.0625  }
 0x163   : > { %v1646_v63 = vld [vmem:[#allocation3 + $0x31] sm:$0x1]  ;;  %v1579_v2 = vsel %vm1572_vm10, %v1546_v40, %v1423_v27  ;;  %v7340_v12 = vsel %vm1539_vm9, %v1529_v61, %v9682_v13  ;;  %1701 = vst.msk [vmem:[#allocation3 + $0x41] sm:$0x1] %vm1662_vm12, %v1683_v23  ;;  %v3229_v61 = vsel %vm1539_vm9, 0.1875, %v6182_v29  ;;  %v3476_v20 = vsel %vm1506_vm8, 0.0, %v6183_v45 }
 0x164   : > { %1665 = vst.msk [vmem:[#allocation3 + $0x30] sm:$0x1] %vm1662_vm12, %v1646_v63  ;;  %v3230_v44 = vsel %vm1572_vm10, %v3229_v61, 0.0  ;;  %v9684_v40 = vld [vmem:[#allocation40_spill] sm:$0xff]  ;;  %v3477_v52 = vsel %vm1539_vm9, %v3476_v20, 0.0  ;;  %v7388_v35 = vld [vmem:[#allocation3 + $0x8] sm:$0xff] }
 0x165   : > { %1614 = vst.msk [vmem:[#allocation3 + $0x69] sm:$0xff] %vm1606_vm11, %v1580_v47  ;;  %1613 = vst.msk [vmem:[#allocation3 + $0x61] sm:$0xff] %vm1606_vm11, %v1579_v2  ;;  %v1429_v50 = vpop.permute.xlu1 %1428  ;;  %v7363_v54 = vsel %vm1539_vm9, %v7236_v21, %v9684_v40  ;;  %v7371_v51 = vrot.slane %v3230_v44, %v7350_v55  ;;  %v7379_v21 = vsel %vm1539_vm9, %v7241_v26, %v7130_v15  ;;  %v3478_v24 = vsel %vm1572_vm10, %v3477_v52, 0.0 }
 0x166   : > { %v1427_v28 = vpop.permute.xlu0 %1426  ;;  %v1582_v8 = vsel %vm1572_vm10, %v1549_v19, %v1429_v50  ;;  %v3156_v19 = vsel %vm1506_vm8, 0.0625, %v6182_v29  ;;  %v7400_v15 = vsel %vm1539_vm9, %v7256_v18, %v7142_v39  ;;  %v7404_v42 = vrot.slane %v3478_v24, %v7350_v55 }
 0x167   : > { %v1581_v31 = vsel %vm1572_vm10, %v1548_v0, %v1427_v28  ;;  %1616 = vst.msk [vmem:[#allocation3 + $0x81] sm:$0xff] %vm1606_vm11, %v1582_v8  ;;  %v3158_v58 = vsel %vm1539_vm9, %v3156_v19, 0.0  ;;  %v3107_v1 = vld [vmem:[#allocation3] sm:$0xff]  ;;  %v7418_v39 = vmul.f32 %v7371_v51, %v7388_v35  ;;  %v6184_v13 = vmov 0.1875  }
 0x168   : > { %v1684_v3 = vld [vmem:[#allocation3 + $0x58] sm:$0x1]  ;;  %v1647_v59 = vld [vmem:[#allocation3 + $0x49] sm:$0x1]  ;;  %1615 = vst.msk [vmem:[#allocation3 + $0x79] sm:$0xff] %vm1606_vm11, %v1581_v31  ;;  %v3160_v25 = vsel %vm1572_vm10, %v3158_v58, 0.0  ;;  %v7414_v53 = vmul.f32 %v7371_v51, %v3107_v1  ;;  %v7425_v2 = vmul.f32 %v7404_v42, %v3107_v1 }
 0x169   : > { %1702 = vst.msk [vmem:[#allocation3 + $0x59] sm:$0x1] %vm1662_vm12, %v1684_v3  ;;  %1666 = vst.msk [vmem:[#allocation3 + $0x48] sm:$0x1] %vm1662_vm12, %v1647_v59  ;;  %v1433_v26 = vpop.permute.xlu1 %1432  ;;  %v7411_v5 = vrot.slane %v3160_v25, %v7350_v55  ;;  %v7430_v48 = vld [vmem:[#allocation3 + $0x18] sm:$0xff] }
 0x16a   : > { %v1584_v41 = vsel %vm1572_vm10, %v7285_v30, %v1433_v26  ;;  %v1431_v23 = vpop.permute.xlu0 %1430  ;;  %v3774_v30 = vsel %vm1506_vm8, 0.1875, %v6182_v29  ;;  %v3238_v28 = vmul.f32 %v7371_v51, %v7430_v48  ;;  %v7443_v29 = vmul.f32 %v7371_v51, %v7432_v43 }
 0x16b   : > { %1618 = vst.msk [vmem:[#allocation3 + $0x99] sm:$0xff] %vm1606_vm11, %v1584_v41  ;;  %v1583_v47 = vsel %vm1572_vm10, %v7289_v32, %v1431_v23  ;;  %v3775_v6 = vsel %vm1539_vm9, %v3774_v30, 0.1875  ;;  %v4088_v32 = vsel %vm1506_vm8, 0.0, %v6184_v13  ;;  %v7437_v7 = vmul.f32 %v7411_v5, %v3107_v1 }
 0x16c   : > { %v1685_v18 = vld [vmem:[#allocation3 + $0x70] sm:$0x1]  ;;  %v1648_v63 = vld [vmem:[#allocation3 + $0x61] sm:$0x1]  ;;  %1617 = vst.msk [vmem:[#allocation3 + $0x91] sm:$0xff] %vm1606_vm11, %v1583_v47  ;;  %v3776_v61 = vsel %vm1572_vm10, %v3775_v6, 0.0  ;;  %v3486_v58 = vmul.f32 %v7404_v42, %v7430_v48  ;;  %v3167_v1 = vmul.f32 %v7411_v5, %v7430_v48  ;;  %v7470_v26 = vmul.f32 %v7404_v42, %v7432_v43 }
 0x16d   : > { %1703 = vst.msk [vmem:[#allocation3 + $0x71] sm:$0x1] %vm1662_vm12, %v1685_v18  ;;  %1667 = vst.msk [vmem:[#allocation3 + $0x60] sm:$0x1] %vm1662_vm12, %v1648_v63  ;;  %v1437_v50 = vpop.permute.xlu1 %1436  ;;  %v4089_v3 = vsel %vm1539_vm9, %v4088_v32, 0.0  ;;  %v7450_v20 = vrot.slane %v3776_v61, %v7350_v55  ;;  %v3337_v57 = vrot.slane %v3238_v28, 1 }
 0x16e   : > { %v1686_v59 = vld [vmem:[#allocation3 + $0x88] sm:$0x1]  ;;  %v1586_v31 = vsel %vm1572_vm10, %v7293_v22, %v1437_v50  ;;  %v1435_v44 = vpop.permute.xlu0 %1434  ;;  %v4090_v40 = vsel %vm1572_vm10, %v4089_v3, 0.1875  ;;  %v9547_v22 = vrot.slane %v7443_v29, 1  ;;  %v3585_v63 = vrot.slane %v3486_v58, 2  ;;  %v7481_v47 = vld [vmem:[#allocation3 + $0x30] sm:$0xff] }
 0x16f   : > { %v1649_v8 = vld [vmem:[#allocation3 + $0x79] sm:$0x1]  ;;  %1704 = vst.msk [vmem:[#allocation3 + $0x89] sm:$0x1] %vm1662_vm12, %v1686_v59  ;;  %v1585_v52 = vsel %vm1572_vm10, %v7298_v10, %v1435_v44  ;;  %v7473_v25 = vrot.slane %v4090_v40, %v7350_v55  ;;  %v3332_v10 = vrot.slane %v7414_v53, 1  ;;  %v4455_v30 = vsel %vm1539_vm9, 0.0, %v6184_v13 }
 0x170   : > { %v7358_v9 = vpop.f32.mrb[0].mxu1  ;;  %1668 = vst.msk [vmem:[#allocation3 + $0x78] sm:$0x1] %vm1662_vm12, %v1649_v8  ;;  %v3339_v18 = vsel %vm3331_vm13, %v3337_v57, %v9547_v22  ;;  %v9544_v6 = vrot.slane %v7418_v39, 1  ;;  %v9546_v3 = vrot.slane %v7470_v26, 2  ;;  %v7490_v59 = vld [vmem:[#allocation3 + $0x38] sm:$0xff]  ;;  %v3783_v57 = vmul.f32 %v7481_v47, %v7450_v20 }
 0x171   : > { %v7374_v0 = vpop.f32.mrb[1].mxu1  ;;  %1620 = vst.msk [vmem:[#allocation3 + $0xb1] sm:$0xff] %vm1606_vm11, %v1586_v31  ;;  %1619 = vst.msk [vmem:[#allocation3 + $0xa9] sm:$0xff] %vm1606_vm11, %v1585_v52  ;;  %v1441_v23 = vpop.permute.xlu1 %1440  ;;  %v3446_v61 = vadd.f32 %v3339_v18, %v3167_v1  ;;  %v4385_v8 = vsel %vm1539_vm9, 0.0, %v6183_v45  ;;  %v3851_v44 = vmul.f32 0.5625, %v7481_v47  ;;  %v4456_v58 = vsel %vm1572_vm10, %v4455_v30, 0.1875 }
 0x172   : > { %v7390_v27 = vpop.f32.mrb[2].mxu1  ;;  %v1687_v50 = vld [vmem:[#allocation3 + $0xa0] sm:$0x1]  ;;  %v1588_v53 = vsel %vm1572_vm10, %v7302_v33, %v1441_v23  ;;  %v1439_v28 = vpop.permute.xlu0 %1438  ;;  %v7500_v33 = vmul.f32 0.5625, %v7490_v59  ;;  %v4386_v40 = vsel %vm1572_vm10, %v4385_v8, 0.0  ;;  %v3587_v52 = vsel %vm3579_vm14, %v3585_v63, %v9546_v3 }
 0x173   : > { %v7406_v46 = vpop.f32.mrb[3].mxu1  ;;  %1705 = vst.msk [vmem:[#allocation3 + $0xa1] sm:$0x1] %vm1662_vm12, %v1687_v50  ;;  %v1650_v13 = vld [vmem:[#allocation3 + $0x91] sm:$0x1]  ;;  %v1587_v31 = vsel %vm1572_vm10, %v7306_v34, %v1439_v28  ;;  %v7511_v34 = vrot.slane %v4386_v40, %v7350_v55  ;;  %v3694_v23 = vadd.f32 %v3587_v52, %v3446_v61  ;;  %v3949_v18 = vrot.slane %v3851_v44, 1 }
 0x174   : > { %1622 = vst.msk [vmem:[#allocation3 + $0xc9] sm:$0xff] %vm1606_vm11, %v1588_v53  ;;  %1621 = vst.msk [vmem:[#allocation3 + $0xc1] sm:$0xff] %vm1606_vm11, %v1587_v31  ;;  %v9545_v50 = vrot.slane %v7500_v33, 1  ;;  %v4098_v53 = vmul.f32 %v7481_v47, %v7473_v25  ;;  %v7524_v31 = vrot.slane %v4456_v58, %v7350_v55  ;;  %v4701_v30 = vsel %vm1572_vm10, 0.0, %v6183_v45 }
 0x175   : > { %1669 = vst.msk [vmem:[#allocation3 + $0x90] sm:$0x1] %vm1662_vm12, %v1650_v13  ;;  %v1445_v1 = vpop.permute.xlu1 %1444  ;;  %v7521_v13 = vmul.f32 %v7490_v59, %v7473_v25  ;;  %v3815_v40 = vadd.f32 %v3783_v57, %v3694_v23  ;;  %v3334_v57 = vsel %vm3331_vm13, %v3332_v10, %v9544_v6  ;;  %v7554_v23 = vmul.f32 %v7404_v42, %v7388_v35 }
 0x176   : > { %v1590_v63 = vsel %vm1572_vm10, %v7310_v37, %v1445_v1  ;;  %v1443_v8 = vpop.permute.xlu0 %1442  ;;  %v3951_v52 = vsel %vm3331_vm13, %v3949_v18, %v9545_v50  ;;  %v4196_v58 = vrot.slane %v4098_v53, 2  ;;  %v3580_v3 = vrot.slane %v7425_v2, 2 }
 0x177   : > { %1624 = vst.msk [vmem:[#allocation3 + $0xe1] sm:$0xff] %vm1606_vm11, %v1590_v63  ;;  %v1589_v37 = vsel %vm1572_vm10, %v7314_v56, %v1443_v8  ;;  %v9548_v45 = vrot.slane %v7521_v13, 2  ;;  %v7544_v63 = vld [vmem:[#allocation3 + $0x50] sm:$0xff]  ;;  %v7547_v56 = vrot.slane %v4701_v30, %v7350_v55  ;;  %v4058_v8 = vadd.f32 %v3951_v52, %v3815_v40 }
 0x178   : > { %v7453_v19 = vpop.f32.mrb[4].mxu1  ;;  %v1688_v28 = vld [vmem:[#allocation3 + $0xb8] sm:$0x1]  ;;  %v1651_v44 = vld [vmem:[#allocation3 + $0xa9] sm:$0x1]  ;;  %1623 = vst.msk [vmem:[#allocation3 + $0xd9] sm:$0xff] %vm1606_vm11, %v1589_v37  ;;  %v7562_v37 = vmul.f32 %v7544_v63, %v7524_v31  ;;  %v3444_v55 = vadd.f32 %v3334_v57, %v7437_v7 }
 0x179   : > { %v7463_v24 = vpop.f32.mrb[5].mxu1  ;;  %1706 = vst.msk [vmem:[#allocation3 + $0xb9] sm:$0x1] %vm1662_vm12, %v1688_v28  ;;  %1670 = vst.msk [vmem:[#allocation3 + $0xa8] sm:$0x1] %vm1662_vm12, %v1651_v44  ;;  %v7542_v28 = vld [vmem:[#allocation3 + $0x48] sm:$0xff]  ;;  %v1449_v53 = vpop.permute.xlu1 %1448  ;;  %v4198_v40 = vsel %vm3579_vm14, %v4196_v58, %v9548_v45  ;;  %v7586_v2 = vmul.f32 %v7544_v63, %v7547_v56 }
 0x17a   : > { %v7476_v41 = vpop.f32.mrb[6].mxu1  ;;  %v4464_v44 = vmul.f32 %v7542_v28, %v7524_v31  ;;  %v1592_v6 = vsel %vm1572_vm10, %v7318_v38, %v1449_v53  ;;  %v1447_v50 = vpop.permute.xlu0 %1446  ;;  %v4393_v52 = vmul.f32 %v7542_v28, %v7511_v34  ;;  %v4305_v57 = vadd.f32 %v4198_v40, %v4058_v8 }
 0x17b   : > { %v7485_v32 = vpop.f32.mrb[7].mxu1  ;;  %v1689_v10 = vld [vmem:[#allocation3 + $0xd0] sm:$0x1]  ;;  %v1652_v22 = vld [vmem:[#allocation3 + $0xc1] sm:$0x1]  ;;  %1626 = vst.msk [vmem:[#allocation3 + $0xf9] sm:$0xff] %vm1606_vm11, %v1592_v6  ;;  %v1591_v7 = vsel %vm1572_vm10, %v7322_v60, %v1447_v50  ;;  %v4709_v58 = vmul.f32 %v7542_v28, %v7547_v56  ;;  %v3781_v60 = vmul.f32 %v7450_v20, %v7430_v48 }
 0x17c   : > { %9686 = vst [vmem:[#allocation7_spill] sm:$0xff] %v7485_v32  ;;  %1707 = vst.msk [vmem:[#allocation3 + $0xd1] sm:$0x1] %vm1662_vm12, %v1689_v10  ;;  %v4562_v38 = vrot.slane %v4464_v44, 1  ;;  %v9549_v53 = vrot.slane %v7562_v37, 1  ;;  %v4425_v44 = vadd.f32 %v4393_v52, %v4305_v57  ;;  %v3848_v10 = vmul.f32 0.5625, %v7430_v48 }
 0x17d   : > { %1671 = vst.msk [vmem:[#allocation3 + $0xc0] sm:$0x1] %vm1662_vm12, %v1652_v22  ;;  %v7591_v50 = vld [vmem:[#allocation3 + $0x10] sm:$0x3]  ;;  %v1453_v8 = vpop.permute.xlu1 %1452  ;;  %v7598_v40 = vmul.f32 0.5625, %v7432_v43 }
 0x17e   : > { %1625 = vst.msk [vmem:[#allocation3 + $0xf1] sm:$0xff] %vm1606_vm11, %v1591_v7  ;;  %v4564_v22 = vsel %vm3331_vm13, %v4562_v38, %v9549_v53  ;;  %v1690_v7 = vld [vmem:[#allocation3 + $0xe8] sm:$0x1]  ;;  %v1594_v45 = vsel %vm1572_vm10, %v7326_v17, %v1453_v8  ;;  %v1451_v6 = vpop.permute.xlu0 %1450  ;;  %v3944_v17 = vrot.slane %v3848_v10, 1 }
 0x17f   : > { %1708 = vst.msk [vmem:[#allocation3 + $0xe9] sm:$0x1] %vm1662_vm12, %v1690_v7  ;;  %v1653_v38 = vld [vmem:[#allocation3 + $0xd9] sm:$0x1]  ;;  %v1593_v53 = vsel %vm1572_vm10, %v7332_v62, %v1451_v6  ;;  %v7625_v62 = vmul.f32 %v7473_v25, %v7432_v43 }
 0x180   : > { %v7528_v61 = vpop.f32.mrb[8].mxu1  ;;  %1628 = vst.msk [vmem:[#allocation3 + $0x111] sm:$0xff] %vm1606_vm11, %v1594_v45  ;;  %1627 = vst.msk [vmem:[#allocation3 + $0x109] sm:$0xff] %vm1606_vm11, %v1593_v53  ;;  %v4095_v45 = vmul.f32 %v7473_v25, %v7430_v48  ;;  %v4391_v53 = vmul.f32 %v7481_v47, %v7511_v34 }
 0x181   : > { %9687 = vst [vmem:[#allocation16_spill] sm:$0xff] %v7528_v61  ;;  %v7537_v1 = vpop.f32.mrb[9].mxu1  ;;  %1672 = vst.msk [vmem:[#allocation3 + $0xd8] sm:$0x1] %vm1662_vm12, %v1653_v38  ;;  %v1457_v6 = vpop.permute.xlu1 %1456 }
 0x182   : > { %9688 = vst [vmem:[#allocation8_spill] sm:$0xff] %v7537_v1  ;;  %v7556_v18 = vpop.f32.mrb[10].mxu1  ;;  %v9691_v1 = vrot.slane %v7554_v23, 2  ;;  %v1596_v38 = vsel %vm1572_vm10, %v7336_v14, %v1457_v6  ;;  %v7650_v14 = vmul.f32 %v7490_v59, %v7524_v31 }
 0x183   : > { %9689 = vst [vmem:[#allocation17_spill] sm:$0xff] %v7556_v18  ;;  %v7565_v30 = vpop.f32.mrb[11].mxu1  ;;  %v9550_v18 = vrot.slane %v7586_v2, 2  ;;  %1630 = vst.msk [vmem:[#allocation3 + $0x129] sm:$0xff] %vm1606_vm11, %v1596_v38 }
 0x184   : > { %9690 = vst [vmem:[#allocation9_spill] sm:$0xff] %v7565_v30  ;;  %v4807_v30 = vrot.slane %v4709_v58, 2  ;;  %v3582_v52 = vsel %vm3579_vm14, %v3580_v3, %v9691_v1  ;;  %v7614_v58 = vmul.f32 %v7371_v51, %v7591_v50  ;;  %v4671_v3 = vadd.f32 %v4564_v22, %v4425_v44  ;;  %v3112_v22 = vld [vmem:[#allocation3 + $0x28] sm:$0x3]  ;;  %v1455_v1 = vpop.permute.xlu0 %1454 }
 0x185   : > { %v3692_v61 = vadd.f32 %v3582_v52, %v3444_v55  ;;  %v4461_v44 = vmul.f32 %v7481_v47, %v7524_v31  ;;  %v1691_v52 = vld [vmem:[#allocation3 + $0x100] sm:$0x1] }
 0x186   : > { %v4809_v10 = vsel %vm3579_vm14, %v4807_v30, %v9550_v18  ;;  %v4191_v30 = vrot.slane %v4095_v45, 2  ;;  %1709 = vst.msk [vmem:[#allocation3 + $0x101] sm:$0x1] %vm1662_vm12, %v1691_v52  ;;  %v1595_v18 = vsel %vm1572_vm10, %v7340_v12, %v1455_v1  ;;  %v7663_v12 = vmul.f32 %v7490_v59, %v7547_v56 }
 0x187   : > { %v3813_v7 = vadd.f32 %v3781_v60, %v3692_v61  ;;  %v9551_v61 = vrot.slane %v7625_v62, 2  ;;  %v1654_v60 = vld [vmem:[#allocation3 + $0xf1] sm:$0x1]  ;;  %v4557_v6 = vrot.slane %v4461_v44, 1  ;;  %1629 = vst.msk [vmem:[#allocation3 + $0x121] sm:$0xff] %vm1606_vm11, %v1595_v18  ;;  %v3240_v44 = vmul.f32 %v7371_v51, %v3112_v22 }
 0x188   : > { %v7606_v57 = vpop.f32.mrb[12].mxu1  ;;  %1673 = vst.msk [vmem:[#allocation3 + $0xf0] sm:$0x1] %vm1662_vm12, %v1654_v60  ;;  %v3488_v18 = vmul.f32 %v7404_v42, %v3112_v22  ;;  %v1459_v38 = vpop.permute.xlu0 %1458 }
 0x189   : > { %9692 = vst [vmem:[#allocation18_spill] sm:$0xff] %v7606_v57  ;;  %v7616_v8 = vpop.f32.mrb[13].mxu1  ;;  %v4193_v45 = vsel %vm3579_vm14, %v4191_v30, %v9551_v61  ;;  %v3168_v61 = vmul.f32 %v7411_v5, %v7432_v43  ;;  %v1597_v22 = vsel %vm1572_vm10, %v7363_v54, %v1459_v38  ;;  %v9703_v38 = vrot.slane %v7443_v29, 1 }
 0x18a   : > { %9693 = vst [vmem:[#allocation10_spill] sm:$0xff] %v7616_v8  ;;  %v7627_v55 = vpop.f32.mrb[14].mxu1  ;;  %1631 = vst.msk [vmem:[#allocation3 + $0x139] sm:$0xff] %vm1606_vm11, %v1597_v22 }
 0x18b   : > { %9694 = vst [vmem:[#allocation19_spill] sm:$0xff] %v7627_v55  ;;  %v7636_v48 = vpop.f32.mrb[15].mxu1  ;;  %v9696_v55 = vrot.slane %v7598_v40, 1 }
 0x18c   : > { %9695 = vst [vmem:[#allocation11_spill] sm:$0xff] %v7636_v48 }
 0x18d   : > { %v3946_v8 = vsel %vm3331_vm13, %v3944_v17, %v9696_v55  ;;  %v7654_v17 = vadd.f32 %v4809_v10, %v4671_v3  ;;  %v4706_v55 = vmul.f32 %v7481_v47, %v7547_v56  ;;  %v5394_v3 = vld [vmem:[#allocation3 + $0x40] sm:$0x3]  ;;  %v1692_v10 = vld [vmem:[#allocation3 + $0x118] sm:$0x1] }
 0x18e   : > { %v4056_v48 = vadd.f32 %v3946_v8, %v3813_v7  ;;  %v1461_v8 = vpop.permute.xlu1 %1460  ;;  %1710 = vst.msk [vmem:[#allocation3 + $0x119] sm:$0x1] %vm1662_vm12, %v1692_v10  ;;  %v3784_v10 = vmul.f32 %v7490_v59, %v7450_v20  ;;  %v4100_v57 = vmul.f32 %v5394_v3, %v7473_v25  ;;  %v1656_v29 = vld [vmem:[#allocation3 + $0x121] sm:$0x1] }
 0x18f   : > { %9697 = vst [vmem:[#allocation20_spill] sm:$0xff] %v7654_v17  ;;  %v1598_v52 = vsel %vm1572_vm10, %v7348_v49, %v1461_v8  ;;  %v4802_v30 = vrot.slane %v4706_v55, 2  ;;  %v5442_v17 = vld [vmem:[#allocation3 + $0x58] sm:$0x3]  ;;  %v9699_v49 = vrot.slane %v7650_v14, 1  ;;  %v3340_v8 = vrot.slane %v3240_v44, 1 }
 0x190   : > { %v4303_v1 = vadd.f32 %v4193_v45, %v4056_v48  ;;  %v7673_v48 = vpop.f32.mrb[16].mxu1  ;;  %v1655_v45 = vld [vmem:[#allocation3 + $0x109] sm:$0x1]  ;;  %1632 = vst.msk [vmem:[#allocation3 + $0x141] sm:$0xff] %vm1606_vm11, %v1598_v52  ;;  %v3853_v52 = vmul.f32 0.5625, %v5394_v3 }
 0x191   : > { %9698 = vst [vmem:[#allocation12_spill] sm:$0xff] %v7673_v48  ;;  %v4559_v55 = vsel %vm3331_vm13, %v4557_v6, %v9699_v49  ;;  %v7682_v60 = vpop.f32.mrb[17].mxu1  ;;  %1674 = vst.msk [vmem:[#allocation3 + $0x108] sm:$0x1] %vm1662_vm12, %v1655_v45  ;;  %v3588_v48 = vrot.slane %v3488_v18, 2  ;;  %v9702_v6 = vrot.slane %v7663_v12, 2  ;;  %v3341_v45 = vsel %vm3331_vm13, %v9703_v38, %v3340_v8 }
 0x192   : > { %v4423_v7 = vadd.f32 %v4391_v53, %v4303_v1  ;;  %9700 = vst [vmem:[#allocation21_spill] sm:$0xff] %v7682_v60  ;;  %v7689_v54 = vpop.f32.mrb[18].mxu1  ;;  %v1465_v53 = vpop.permute.xlu1 %1464  ;;  %v4466_v18 = vmul.f32 %v5442_v17, %v7524_v31  ;;  %v1693_v49 = vld [vmem:[#allocation3 + $0x130] sm:$0x1]  ;;  %v3952_v32 = vrot.slane %v3853_v52, 1  ;;  %v4199_v8 = vrot.slane %v4100_v57, 2 }
 0x193   : > { %9701 = vst [vmem:[#allocation13_spill] sm:$0xff] %v7689_v54  ;;  %v4804_v44 = vsel %vm3579_vm14, %v4802_v30, %v9702_v6  ;;  %v7698_v22 = vpop.f32.mrb[19].mxu1  ;;  %v1600_v3 = vsel %vm1572_vm10, %v7379_v21, %v1465_v53  ;;  %v1463_v60 = vpop.permute.xlu0 %1462  ;;  %v3447_v54 = vadd.f32 %v3341_v45, %v3168_v61  ;;  %1711 = vst.msk [vmem:[#allocation3 + $0x131] sm:$0x1] %vm1662_vm12, %v1693_v49  ;;  %v5391_v53 = vld [vmem:[#allocation3 + $0x28] sm:$0x3] }
 0x194   : > { %v4669_v1 = vadd.f32 %v4559_v55, %v4423_v7  ;;  %v9704_v7 = vrot.slane %v7470_v26, 2  ;;  %1634 = vst.msk [vmem:[#allocation3 + $0x159] sm:$0xff] %vm1606_vm11, %v1600_v3  ;;  %v1599_v30 = vsel %vm1572_vm10, %v7384_v4, %v1463_v60  ;;  %v4394_v6 = vmul.f32 %v7544_v63, %v7511_v34  ;;  %v5439_v3 = vld [vmem:[#allocation3 + $0x40] sm:$0x3] }
 0x195   : > { %v4565_v21 = vrot.slane %v4466_v18, 1  ;;  %1675 = vst.msk [vmem:[#allocation3 + $0x120] sm:$0x1] %vm1662_vm12, %v1656_v29  ;;  %v3166_v52 = vmul.f32 %v7411_v5, %v7388_v35  ;;  %v9706_v4 = vrot.slane %v7500_v33, 1  ;;  %v9707_v60 = vrot.slane %v7521_v13, 2 }
 0x196   : > { %v3589_v55 = vsel %vm3579_vm14, %v9704_v7, %v3588_v48  ;;  %1633 = vst.msk [vmem:[#allocation3 + $0x151] sm:$0xff] %vm1606_vm11, %v1599_v30  ;;  %v7713_v26 = vadd.f32 %v4804_v44, %v4669_v1  ;;  %v4711_v48 = vmul.f32 %v5442_v17, %v7547_v56  ;;  %v1469_v38 = vpop.permute.xlu1 %1468  ;;  %v3335_v18 = vrot.slane %v7614_v58, 1  ;;  %v1657_v58 = vld [vmem:[#allocation3 + $0x139] sm:$0x1] }
 0x197   : > { %v3695_v61 = vadd.f32 %v3589_v55, %v3447_v54  ;;  %v3953_v57 = vsel %vm3331_vm13, %v9706_v4, %v3952_v32  ;;  %v4200_v45 = vsel %vm3579_vm14, %v9707_v60, %v4199_v8  ;;  %v3485_v54 = vmul.f32 %v7404_v42, %v7591_v50  ;;  %v1694_v1 = vld [vmem:[#allocation3 + $0x148] sm:$0x1]  ;;  %v1467_v35 = vpop.permute.xlu0 %1466  ;;  %1676 = vst.msk [vmem:[#allocation3 + $0x138] sm:$0x1] %vm1662_vm12, %v1657_v58 }
 0x198   : > { %9705 = vst [vmem:[#allocation22_spill] sm:$0xff] %v7713_v26  ;;  %v1602_v17 = vsel %vm1572_vm10, %v7395_v36, %v1469_v38  ;;  %v9708_v49 = vrot.slane %v7562_v37, 1  ;;  %v4810_v32 = vrot.slane %v4711_v48, 2  ;;  %v7732_v13 = vpop.f32.mrb[20].mxu1  ;;  %1712 = vst.msk [vmem:[#allocation3 + $0x149] sm:$0x1] %vm1662_vm12, %v1694_v1  ;;  %v1601_v50 = vsel %vm1572_vm10, %v7400_v15, %v1467_v35 }
 0x199   : > { %v3816_v44 = vadd.f32 %v3784_v10, %v3695_v61  ;;  %1636 = vst.msk [vmem:[#allocation3 + $0x171] sm:$0xff] %vm1606_vm11, %v1602_v17  ;;  %v9709_v36 = vrot.slane %v7418_v39, 1  ;;  %v3583_v7 = vrot.slane %v3485_v54, 2  ;;  %v3850_v37 = vmul.f32 0.5625, %v5391_v53  ;;  %v7741_v55 = vpop.f32.mrb[21].mxu1  ;;  %1635 = vst.msk [vmem:[#allocation3 + $0x169] sm:$0xff] %vm1606_vm11, %v1601_v50 }
 0x19a   : > { %v4566_v33 = vsel %vm3331_vm13, %v9708_v49, %v4565_v21  ;;  %v3782_v8 = vmul.f32 %v7450_v20, %v7432_v43  ;;  %v4097_v21 = vmul.f32 %v5391_v53, %v7473_v25  ;;  %v7748_v15 = vpop.f32.mrb[22].mxu1  ;;  %v1377_v39 = vpop.permute.xlu1 %1376  ;;  %v9710_v61 = vrot.slane %v7586_v2, 2 }
 0x19b   : > { %v3336_v10 = vsel %vm3331_vm13, %v9709_v36, %v3335_v18  ;;  %v4059_v29 = vadd.f32 %v3953_v57, %v3816_v44  ;;  %v9711_v38 = vrot.slane %v7554_v23, 2  ;;  %v3947_v60 = vrot.slane %v3850_v37, 1  ;;  %v1695_v18 = vld [vmem:[#allocation3 + $0x160] sm:$0x1]  ;;  %v1375_v43 = vpop.permute.xlu0 %1374 }
 0x19c   : > { %v3445_v30 = vadd.f32 %v3336_v10, %v3166_v52  ;;  %v4811_v48 = vsel %vm3579_vm14, %v9710_v61, %v4810_v32  ;;  %v4463_v57 = vmul.f32 %v5439_v3, %v7524_v31  ;;  %v7757_v52 = vpop.f32.mrb[23].mxu1  ;;  %v4194_v1 = vrot.slane %v4097_v21, 2  ;;  %1713 = vst.msk [vmem:[#allocation3 + $0x161] sm:$0x1] %vm1662_vm12, %v1695_v18 }
 0x19d   : > { %v3584_v4 = vsel %vm3579_vm14, %v9711_v38, %v3583_v7  ;;  %v4306_v54 = vadd.f32 %v4200_v45, %v4059_v29  ;;  %v4392_v17 = vmul.f32 %v7490_v59, %v7511_v34  ;;  %v1658_v2 = vld [vmem:[#allocation3 + $0x151] sm:$0x1]  ;;  %v1571_v23 = vsel %vm1539_vm9, %v7261_v11, %v1377_v39 }
 0x19e   : > { %v3693_v53 = vadd.f32 %v3584_v4, %v3445_v30  ;;  %v9712_v35 = vrot.slane %v7598_v40, 1  ;;  %v4560_v49 = vrot.slane %v4463_v57, 1  ;;  %v4708_v32 = vmul.f32 %v5439_v3, %v7547_v56  ;;  %1677 = vst.msk [vmem:[#allocation3 + $0x150] sm:$0x1] %vm1662_vm12, %v1658_v2  ;;  %v1473_v7 = vpop.permute.xlu1 %1472  ;;  %v7809_v2 = vld [vmem:[#allocation3 + $0x68] sm:$0xff] }
 0x19f   : > { %v1570_v45 = vsel %vm1539_vm9, %v7268_v16, %v1375_v43  ;;  %v4426_v58 = vadd.f32 %v4394_v6, %v4306_v54  ;;  %v9713_v36 = vrot.slane %v7625_v62, 2  ;;  %v3171_v40 = vmul.f32 %v7542_v28, %v7411_v5  ;;  %v1471_v6 = vpop.permute.xlu0 %1470 }
 0x1a0   : > { %v3948_v44 = vsel %vm3331_vm13, %v9712_v35, %v3947_v60  ;;  %v3814_v50 = vadd.f32 %v3782_v8, %v3693_v53  ;;  %v4805_v11 = vrot.slane %v4708_v32, 2  ;;  %v3244_v37 = vmul.f32 %v7542_v28, %v7371_v51  ;;  %v1696_v29 = vld [vmem:[#allocation3 + $0x178] sm:$0x1]  ;;  %v7785_v21 = vpop.f32.mrb[24].mxu1  ;;  %v1659_v39 = vld [vmem:[#allocation3 + $0x169] sm:$0x1] }
 0x1a1   : > { %v4195_v10 = vsel %vm3579_vm14, %v9713_v36, %v4194_v1  ;;  %v7780_v3 = vmul.f32 %v7544_v63, %v7371_v51  ;;  %v1604_v16 = vsel %vm1572_vm10, %v1571_v23, %v1473_v7  ;;  %v4672_v30 = vadd.f32 %v4566_v33, %v4426_v58  ;;  %1714 = vst.msk [vmem:[#allocation3 + $0x179] sm:$0x1] %vm1662_vm12, %v1696_v29  ;;  %v7795_v57 = vpop.f32.mrb[25].mxu1  ;;  %v7807_v1 = vld [vmem:[#allocation3 + $0x60] sm:$0xff] }
 0x1a2   : > { %v4057_v62 = vadd.f32 %v3948_v44, %v3814_v50  ;;  %v3492_v8 = vmul.f32 %v7542_v28, %v7404_v42  ;;  %1638 = vst.msk [vmem:[#allocation3 + $0x189] sm:$0xff] %vm1606_vm11, %v1604_v16  ;;  %1643 = vst.msk [vmem:[#allocation3 + $0x1a1] sm:$0xff] %vm1606_vm11, %v1604_v16  ;;  %v1603_v61 = vsel %vm1572_vm10, %v1570_v45, %v1471_v6  ;;  %v9714_v38 = vrot.slane %v7650_v14, 1  ;;  %v7811_v23 = vpop.f32.mrb[26].mxu1  ;;  %v7839_v16 = vld [vmem:[#allocation3 + $0x80] sm:$0xff] }
 0x1a3   : > { %v3347_v33 = vrot.slane %v3244_v37, 1  ;;  %v9555_v60 = vrot.slane %v7780_v3, 1  ;;  %1678 = vst.msk [vmem:[#allocation3 + $0x168] sm:$0x1] %vm1662_vm12, %v1659_v39  ;;  %v9715_v43 = vrot.slane %v7663_v12, 2  ;;  %v7805_v14 = vmul.f32 %v7544_v63, %v7404_v42  ;;  %9716 = vst [vmem:[#allocation14_spill] sm:$0xff] %v7807_v1 }
 0x1a4   : > { %v4561_v4 = vsel %vm3331_vm13, %v9714_v38, %v4560_v49  ;;  %1637 = vst.msk [vmem:[#allocation3 + $0x181] sm:$0xff] %vm1606_vm11, %v1603_v61  ;;  %1642 = vst.msk [vmem:[#allocation3 + $0x199] sm:$0xff] %vm1606_vm11, %v1603_v61  ;;  %v4304_v18 = vadd.f32 %v4195_v10, %v4057_v62  ;;  %v3595_v53 = vrot.slane %v3492_v8, 2  ;;  %v7813_v35 = vadd.f32 %v4811_v48, %v4672_v30  ;;  %v7822_v32 = vpop.f32.mrb[27].mxu1  ;;  %v7834_v37 = vld [vmem:[#allocation3 + $0x78] sm:$0xff] }
 0x1a5   : > { %v4806_v54 = vsel %vm3579_vm14, %v9715_v43, %v4805_v11  ;;  %v3349_v44 = vsel %vm3331_vm13, %v3347_v33, %v9555_v60  ;;  %v3857_v12 = vmul.f32 0.5625, %v7807_v1  ;;  %v7820_v49 = vmul.f32 0.5625, %v7809_v2  ;;  %9718 = vst [vmem:[#allocation15_spill] sm:$0xff] %v7834_v37 }
 0x1a6   : > { %9717 = vst [vmem:[#allocation23_spill] sm:$0xff] %v7813_v35  ;;  %v4424_v45 = vadd.f32 %v4392_v17, %v4304_v18  ;;  %v3450_v58 = vadd.f32 %v3349_v44, %v3171_v40  ;;  %v9554_v50 = vrot.slane %v7805_v14, 2  ;;  %v4104_v36 = vmul.f32 %v7807_v1, %v7473_v25 }
 0x1a7   : > { %v3787_v48 = vmul.f32 %v7807_v1, %v7450_v20  ;;  %v3959_v10 = vrot.slane %v3857_v12, 1  ;;  %v9553_v7 = vrot.slane %v7820_v49, 1  ;;  %v7832_v11 = vmul.f32 %v7809_v2, %v7473_v25 }
 0x1a8   : > { %v4670_v29 = vadd.f32 %v4561_v4, %v4424_v45  ;;  %v3597_v17 = vsel %vm3579_vm14, %v3595_v53, %v9554_v50  ;;  %v4206_v40 = vrot.slane %v4104_v36, 2  ;;  %v4470_v6 = vmul.f32 %v7834_v37, %v7524_v31  ;;  %v7859_v53 = vpop.f32.mrb[28].mxu1 }
 0x1a9   : > { %v3698_v30 = vadd.f32 %v3597_v17, %v3450_v58  ;;  %v9552_v62 = vrot.slane %v7832_v11, 2  ;;  %v4397_v8 = vmul.f32 %v7834_v37, %v7511_v34  ;;  %v7848_v39 = vmul.f32 %v7839_v16, %v7524_v31  ;;  %v1697_v61 = vld [vmem:[#allocation3 + $0x190] sm:$0x1]  ;;  %v1698_v38 = vld [vmem:[#allocation3 + $0x1a8] sm:$0x1]  ;;  %v7869_v17 = vpop.f32.mrb[29].mxu1 }
 0x1aa   : > { %v3961_v4 = vsel %vm3331_vm13, %v3959_v10, %v9553_v7  ;;  %v4572_v33 = vrot.slane %v4470_v6, 1  ;;  %v4715_v18 = vmul.f32 %v7834_v37, %v7547_v56  ;;  %v7857_v43 = vmul.f32 %v7839_v16, %v7547_v56  ;;  %1715 = vst.msk [vmem:[#allocation3 + $0x191] sm:$0x1] %vm1662_vm12, %v1697_v61  ;;  %1716 = vst.msk [vmem:[#allocation3 + $0x1a9] sm:$0x1] %vm1662_vm12, %v1698_v38 }
 0x1ab   : > { %v1660_v44 = vld [vmem:[#allocation3 + $0x181] sm:$0x1]  ;;  %v1661_v12 = vld [vmem:[#allocation3 + $0x199] sm:$0x1]  ;;  %v7863_v45 = vadd.f32 %v4806_v54, %v4670_v29  ;;  %v3819_v58 = vadd.f32 %v3787_v48, %v3698_v30  ;;  %v4208_v36 = vsel %vm3579_vm14, %v4206_v40, %v9552_v62  ;;  %v9556_v10 = vrot.slane %v7848_v39, 1  ;;  %v7880_v29 = vpop.f32.mrb[30].mxu1 }
 0x1ac   : > { %1679 = vst.msk [vmem:[#allocation3 + $0x180] sm:$0x1] %vm1662_vm12, %v1660_v44  ;;  %1680 = vst.msk [vmem:[#allocation3 + $0x198] sm:$0x1] %vm1662_vm12, %v1661_v12  ;;  %v4817_v6 = vrot.slane %v4715_v18, 2  ;;  %v9557_v61 = vrot.slane %v7857_v43, 2  ;;  %v3241_v54 = vmul.f32 %v7481_v47, %v7371_v51  ;;  %v7878_v48 = vmul.f32 %v7490_v59, %v7371_v51 }
 0x1ad   : > { %9719 = vst [vmem:[#allocation24_spill] sm:$0xff] %v7863_v45  ;;  %v4062_v40 = vadd.f32 %v3961_v4, %v3819_v58  ;;  %v3169_v30 = vmul.f32 %v7481_v47, %v7411_v5  ;;  %v3489_v38 = vmul.f32 %v7481_v47, %v7404_v42  ;;  %v7888_v18 = vmul.f32 %v7490_v59, %v7404_v42  ;;  %v7890_v44 = vpop.f32.mrb[31].mxu1  ;;  %v5813_v7 = vpop.f32.mrb[0].mxu0  ;;  %v7904_v47 = vld [vmem:[%s9530_s3] ss:$0 sm:$0xff] }
 0x1ae   : > { %9720 = vst [vmem:[#allocation25_spill] sm:$0xff] %v7890_v44  ;;  %v4574_v12 = vsel %vm3331_vm13, %v4572_v33, %v9556_v10  ;;  %v7898_v4 = vsel %vm3579_vm14, %v4817_v6, %v9557_v61  ;;  %v3342_v58 = vrot.slane %v3241_v54, 1  ;;  %v9558_v62 = vrot.slane %v7878_v48, 1  ;;  %v2419_v6 = vpop.f32.mrb[1].mxu0 }
 0x1af   : > { %v4309_v59 = vadd.f32 %v4208_v36, %v4062_v40  ;;  %v3590_v50 = vrot.slane %v3489_v38, 2  ;;  %v3854_v33 = vmul.f32 0.5625, %v7542_v28  ;;  %v5891_v10 = vadd.f32 %v5813_v7, %v7358_v9  ;;  %v5814_v40 = vpop.f32.mrb[2].mxu0 }
 0x1b0   : > { %v3344_v54 = vsel %vm3331_vm13, %v3342_v58, %v9558_v62  ;;  %v3785_v61 = vmul.f32 %v7542_v28, %v7450_v20  ;;  %v7915_v45 = vmul.f32 0.5625, %v7544_v63  ;;  %v5892_v36 = vadd.f32 %v2419_v6, %v7374_v0  ;;  %v2422_v62 = vpop.f32.mrb[3].mxu0 }
 0x1b1   : > { %v4429_v38 = vadd.f32 %v4397_v8, %v4309_v59  ;;  %v3448_v60 = vadd.f32 %v3344_v54, %v3169_v30  ;;  %v9721_v35 = vrot.slane %v7888_v18, 2  ;;  %v2587_v7 = vadd.f32 %v5891_v10, %v7904_v47 }
 0x1b2   : > { %v5893_v58 = vadd.f32 %v5814_v40, %v7390_v27  ;;  %v3954_v26 = vrot.slane %v3854_v33, 1  ;;  %v9561_v37 = vrot.slane %v7915_v45, 1  ;;  %v2585_v44 = vadd.f32 %v5892_v36, %v7904_v47 }
 0x1b3   : > { %v3592_v9 = vsel %vm3579_vm14, %v3590_v50, %v9721_v35  ;;  %v5894_v0 = vadd.f32 %v2422_v62, %v7406_v46  ;;  %v4101_v30 = vmul.f32 %v7542_v28, %v7473_v25  ;;  %vm2619_vm15 = vcmp.gt.f32.partialorder %v2587_v7, 0.0 }
 0x1b4   : > { %v3696_v8 = vadd.f32 %v3592_v9, %v3448_v60  ;;  %v2651_v35 = vmul.f32 0.2, %v2587_v7  ;;  %v2588_v50 = vadd.f32 %v5893_v58, %v7904_v47  ;;  %v7930_v10 = vadd.f32 %v4574_v12, %v4429_v38  ;;  %v5817_v6 = vpop.f32.mrb[4].mxu0 }
 0x1b5   : > { %vm2617_vm0 = vcmp.gt.f32.partialorder %v2585_v44, 0.0  ;;  %v2649_v27 = vmul.f32 0.2, %v2585_v44  ;;  %v2586_v59 = vadd.f32 %v5894_v0, %v7904_v47  ;;  %v3956_v46 = vsel %vm3331_vm13, %v3954_v26, %v9561_v37  ;;  %v2435_v38 = vpop.f32.mrb[5].mxu0 }
 0x1b6   : > { %v2683_v60 = vsel %vm2619_vm15, %v2587_v7, %v2651_v35  ;;  %vm2620_vm1 = vcmp.gt.f32.partialorder %v2588_v50, 0.0  ;;  %v2652_v62 = vmul.f32 0.2, %v2588_v50  ;;  %v3817_v28 = vadd.f32 %v3785_v61, %v3696_v8  ;;  %v5818_v7 = vpop.f32.mrb[6].mxu0 }
 0x1b7   : > { %vm2618_vm2 = vcmp.gt.f32.partialorder %v2586_v59, 0.0  ;;  %v2650_v33 = vmul.f32 0.2, %v2586_v59  ;;  %v2681_v54 = vsel %vm2617_vm0, %v2585_v44, %v2649_v27  ;;  %v7940_v12 = vmul.f32 %v7544_v63, %v7473_v25  ;;  %v2438_v27 = vpop.f32.mrb[7].mxu0 }
 0x1b8   : > { %v2684_v36 = vsel %vm2620_vm1, %v2588_v50, %v2652_v62  ;;  %v5895_v40 = vadd.f32 %v5817_v6, %v7453_v19  ;;  %v4060_v9 = vadd.f32 %v3956_v46, %v3817_v28  ;;  %v4201_v58 = vrot.slane %v4101_v30, 2 }
 0x1b9   : > { %v2714_v0 = vpack.c.bf16 %v2684_v36, %v2683_v60  ;;  %v5896_v26 = vadd.f32 %v2435_v38, %v7463_v24  ;;  %v2682_v35 = vsel %vm2618_vm2, %v2586_v59, %v2650_v33  ;;  %v9564_v61 = vrot.slane %v7940_v12, 2  ;;  %v9722_v24 = vld [vmem:[#allocation7_spill] sm:$0xff] }
 0x1ba   : > { %v2591_v8 = vadd.f32 %v5895_v40, %v7904_v47  ;;  %v5897_v44 = vadd.f32 %v5818_v7, %v7476_v41  ;;  %v2713_v37 = vpack.c.bf16 %v2682_v35, %v2681_v54  ;;  %v4395_v50 = vmul.f32 %v7807_v1, %v7511_v34 }
 0x1bb   : > { %5606 = vst [vmem:[%s7949_s19 + $0x8] sm:$0xff] %v2714_v0   ;;  %v2589_v19 = vadd.f32 %v5896_v26, %v7904_v47  ;;  %v5898_v30 = vadd.f32 %v2438_v27, %v9722_v24  ;;  %v4203_v59 = vsel %vm3579_vm14, %v4201_v58, %v9564_v61  ;;  %v4467_v41 = vmul.f32 %v7807_v1, %v7524_v31  ;;  %v9724_v24 = vld [vmem:[#allocation8_spill] sm:$0xff] }
 0x1bc   : > { %vm2623_vm3 = vcmp.gt.f32.partialorder %v2591_v8, 0.0  ;;  %v2655_v46 = vmul.f32 0.2, %v2591_v8  ;;  %v2592_v60 = vadd.f32 %v5897_v44, %v7904_v47  ;;  %5530 = vst [vmem:[%s7949_s19] sm:$0xff] %v2713_v37   ;;  %5859 = vmatprep.mubr.bf16.mxu1 %v2713_v37  ;;  %v4307_v62 = vadd.f32 %v4203_v59, %v4060_v9  ;;  %v5821_v58 = vpop.f32.mrb[8].mxu0  ;;  %v9723_v37 = vld [vmem:[#allocation16_spill] sm:$0xff] }
 0x1bd   : > { %vm2621_vm4 = vcmp.gt.f32.partialorder %v2589_v19, 0.0  ;;  %v2653_v28 = vmul.f32 0.2, %v2589_v19  ;;  %v2590_v33 = vadd.f32 %v5898_v30, %v7904_v47  ;;  %5860 = vmatmul.mubr.bf16.vlgmr.msra.gmra.mrb[32].mxu1 %v2714_v0  ;;  %v7964_v6 = vmul.f32 %v7809_v2, %v7524_v31  ;;  %v2451_v35 = vpop.f32.mrb[9].mxu0 }
 0x1be   : > { %vm2624_vm5 = vcmp.gt.f32.partialorder %v2592_v60, 0.0  ;;  %v2656_v54 = vmul.f32 0.2, %v2592_v60  ;;  %v2687_v36 = vsel %vm2623_vm3, %v2591_v8, %v2655_v46  ;;  %v4427_v40 = vadd.f32 %v4395_v50, %v4307_v62  ;;  %v5822_v59 = vpop.f32.mrb[10].mxu0  ;;  %v9725_v46 = vld [vmem:[#allocation17_spill] sm:$0xff] }
 0x1bf   : > { %vm2622_vm6 = vcmp.gt.f32.partialorder %v2590_v33, 0.0  ;;  %v2654_v38 = vmul.f32 0.2, %v2590_v33  ;;  %v2685_v26 = vsel %vm2621_vm4, %v2589_v19, %v2653_v28  ;;  %v4567_v7 = vrot.slane %v4467_v41, 1 }
 0x1c0   : > { %v5899_v9 = vadd.f32 %v5821_v58, %v9723_v37  ;;  %v2688_v44 = vsel %vm2624_vm5, %v2592_v60, %v2656_v54  ;;  %v9562_v0 = vrot.slane %v7964_v6, 1  ;;  %v4712_v27 = vmul.f32 %v7807_v1, %v7547_v56  ;;  %v2454_v60 = vpop.f32.mrb[11].mxu0  ;;  %v9726_v37 = vld [vmem:[#allocation9_spill] sm:$0xff] }
 0x1c1   : > { %v5900_v30 = vadd.f32 %v2451_v35, %v9724_v24  ;;  %v2686_v8 = vsel %vm2622_vm6, %v2590_v33, %v2654_v38  ;;  %v2716_v50 = vpack.c.bf16 %v2688_v44, %v2687_v36  ;;  %v7973_v19 = vmul.f32 %v7809_v2, %v7547_v56  ;;  %v9736_v1 = vld [vmem:[#allocation13_spill] sm:$0xff] }
 0x1c2   : > { %v2595_v41 = vadd.f32 %v5899_v9, %v7904_v47  ;;  %v5901_v62 = vadd.f32 %v5822_v59, %v9725_v46  ;;  %v2715_v28 = vpack.c.bf16 %v2686_v8, %v2685_v26  ;;  %v4569_v54 = vsel %vm3331_vm13, %v4567_v7, %v9562_v0 }
 0x1c3   : > { %v2593_v58 = vadd.f32 %v5900_v30, %v7904_v47  ;;  %v5902_v33 = vadd.f32 %v2454_v60, %v9726_v37  ;;  %5608 = vst [vmem:[%s7949_s19 + $0x18] sm:$0xff] %v2716_v50   ;;  %v7985_v36 = vadd.f32 %v7898_v4, %v7930_v10  ;;  %v4812_v38 = vrot.slane %v4712_v27, 2  ;;  %v3118_v30 = vld [vmem:[#allocation3 + $0x58] sm:$0x3]  ;;  %v9728_v60 = vld [vmem:[#allocation18_spill] sm:$0xff] }
 0x1c4   : > { %vm2627_vm7 = vcmp.gt.f32.partialorder %v2595_v41, 0.0  ;;  %v2659_v9 = vmul.f32 0.2, %v2595_v41  ;;  %v2596_v35 = vadd.f32 %v5901_v62, %v7904_v47  ;;  %5607 = vst [vmem:[%s7949_s19 + $0x10] sm:$0xff] %v2715_v28   ;;  %5863 = vmatprep.mubr.bf16.mxu1 %v2715_v28  ;;  %v9563_v26 = vrot.slane %v7973_v19, 2  ;;  %v5825_v8 = vpop.f32.mrb[12].mxu0 }
 0x1c5   : > { %9727 = vst [vmem:[#allocation26_spill] sm:$0xff] %v7985_v36  ;;  %vm2625_vm8 = vcmp.gt.f32.partialorder %v2593_v58, 0.0  ;;  %v2657_v7 = vmul.f32 0.2, %v2593_v58  ;;  %v2594_v44 = vadd.f32 %v5902_v33, %v7904_v47  ;;  %5864 = vmatmul.mubr.bf16.gmra.mrb[36].mxu1 %v2716_v50  ;;  %v7991_v24 = vadd.f32 %v4569_v54, %v4427_v40  ;;  %v2467_v40 = vpop.f32.mrb[13].mxu0 }
 0x1c6   : > { %vm2628_vm9 = vcmp.gt.f32.partialorder %v2596_v35, 0.0  ;;  %v2660_v4 = vmul.f32 0.2, %v2596_v35  ;;  %v2691_v10 = vsel %vm2627_vm7, %v2595_v41, %v2659_v9  ;;  %v3172_v27 = vmul.f32 %v7544_v63, %v7411_v5  ;;  %v5400_v37 = vld [vmem:[#allocation3 + $0x70] sm:$0x3]  ;;  %v9729_v63 = vld [vmem:[#allocation10_spill] sm:$0xff] }
 0x1c7   : > { %vm2626_vm10 = vcmp.gt.f32.partialorder %v2594_v44, 0.0  ;;  %v2658_v59 = vmul.f32 0.2, %v2594_v44  ;;  %v2689_v46 = vsel %vm2625_vm8, %v2593_v58, %v2657_v7  ;;  %v7998_v62 = vsel %vm3579_vm14, %v4812_v38, %v9563_v26  ;;  %v5826_v9 = vpop.f32.mrb[14].mxu0 }
 0x1c8   : > { %v5903_v50 = vadd.f32 %v5825_v8, %v9728_v60  ;;  %v2692_v28 = vsel %vm2628_vm9, %v2596_v35, %v2660_v4  ;;  %v3246_v54 = vmul.f32 %v7371_v51, %v3118_v30  ;;  %v3494_v41 = vmul.f32 %v7404_v42, %v3118_v30  ;;  %v9730_v8 = vld [vmem:[#allocation19_spill] sm:$0xff]  ;;  %v2470_v35 = vpop.f32.mrb[15].mxu0 }
 0x1c9   : > { %v5904_v33 = vadd.f32 %v2467_v40, %v9729_v63  ;;  %v2690_v0 = vsel %vm2626_vm10, %v2594_v44, %v2658_v59  ;;  %v2718_v58 = vpack.c.bf16 %v2692_v28, %v2691_v10  ;;  %v3788_v38 = vmul.f32 %v7809_v2, %v7450_v20  ;;  %v9731_v30 = vld [vmem:[#allocation11_spill] sm:$0xff] }
 0x1ca   : > { %v2599_v7 = vadd.f32 %v5903_v50, %v7904_v47  ;;  %v5905_v60 = vadd.f32 %v5826_v9, %v9730_v8  ;;  %v2717_v4 = vpack.c.bf16 %v2690_v0, %v2689_v46  ;;  %v3350_v26 = vrot.slane %v3246_v54, 1 }
 0x1cb   : > { %v2597_v61 = vadd.f32 %v5904_v33, %v7904_v47  ;;  %v5906_v36 = vadd.f32 %v2470_v35, %v9731_v30  ;;  %5610 = vst [vmem:[%s7949_s19 + $0x28] sm:$0xff] %v2718_v58   ;;  %v3598_v40 = vrot.slane %v3494_v41, 2  ;;  %v3859_v63 = vmul.f32 0.5625, %v5400_v37 }
 0x1cc   : > { %vm2631_vm12 = vcmp.gt.f32.partialorder %v2599_v7, 0.0  ;;  %v2663_v44 = vmul.f32 0.2, %v2599_v7  ;;  %v2600_v10 = vadd.f32 %v5905_v60, %v7904_v47  ;;  %5609 = vst [vmem:[%s7949_s19 + $0x20] sm:$0xff] %v2717_v4   ;;  %5867 = vmatprep.mubr.bf16.mxu1 %v2717_v4  ;;  %v9732_v59 = vrot.slane %v7780_v3, 1  ;;  %v5829_v60 = vpop.f32.mrb[16].mxu0 }
 0x1cd   : > { %vm2629_vm15 = vcmp.gt.f32.partialorder %v2597_v61, 0.0  ;;  %v2661_v0 = vmul.f32 0.2, %v2597_v61  ;;  %v2598_v46 = vadd.f32 %v5906_v36, %v7904_v47  ;;  %5868 = vmatmul.mubr.bf16.gmra.mrb[40].mxu1 %v2718_v58  ;;  %v9733_v33 = vrot.slane %v7805_v14, 2  ;;  %v9734_v4 = vld [vmem:[#allocation12_spill] sm:$0xff]  ;;  %v2483_v30 = vpop.f32.mrb[17].mxu0 }
 0x1ce   : > { %v3351_v50 = vsel %vm3331_vm13, %v9732_v59, %v3350_v26  ;;  %vm2632_vm0 = vcmp.gt.f32.partialorder %v2600_v10, 0.0  ;;  %v2664_v54 = vmul.f32 0.2, %v2600_v10  ;;  %v2695_v41 = vsel %vm2631_vm12, %v2599_v7, %v2663_v44  ;;  %v9735_v58 = vld [vmem:[#allocation21_spill] sm:$0xff]  ;;  %v5830_v7 = vpop.f32.mrb[18].mxu0 }
 0x1cf   : > { %v3451_v28 = vadd.f32 %v3351_v50, %v3172_v27  ;;  %v3599_v9 = vsel %vm3579_vm14, %v9733_v33, %v3598_v40  ;;  %vm2630_vm1 = vcmp.gt.f32.partialorder %v2598_v46, 0.0  ;;  %v2662_v8 = vmul.f32 0.2, %v2598_v46 }
 0x1d0   : > { %v2693_v35 = vsel %vm2629_vm15, %v2597_v61, %v2661_v0  ;;  %v5907_v26 = vadd.f32 %v5829_v60, %v9734_v4  ;;  %v2696_v59 = vsel %vm2632_vm0, %v2600_v10, %v2664_v54  ;;  %v3962_v36 = vrot.slane %v3859_v63, 1  ;;  %v2486_v0 = vpop.f32.mrb[19].mxu0 }
 0x1d1   : > { %v3699_v3 = vadd.f32 %v3599_v9, %v3451_v28  ;;  %v4106_v27 = vmul.f32 %v5400_v37, %v7473_v25  ;;  %v5908_v50 = vadd.f32 %v2483_v30, %v9735_v58  ;;  %v2694_v44 = vsel %vm2630_vm1, %v2598_v46, %v2662_v8 }
 0x1d2   : > { %v2720_v14 = vpack.c.bf16 %v2696_v59, %v2695_v41  ;;  %v2603_v33 = vadd.f32 %v5907_v26, %v7904_v47  ;;  %v5909_v61 = vadd.f32 %v5830_v7, %v9736_v1  ;;  %v2719_v28 = vpack.c.bf16 %v2694_v44, %v2693_v35  ;;  %v5448_v1 = vld [vmem:[#allocation3 + $0x88] sm:$0x3] }
 0x1d3   : > { %v3820_v40 = vadd.f32 %v3788_v38, %v3699_v3  ;;  %v9737_v9 = vrot.slane %v7820_v49, 1  ;;  %v2601_v63 = vadd.f32 %v5908_v50, %v7904_v47  ;;  %v5910_v37 = vadd.f32 %v2486_v0, %v7698_v22 }
 0x1d4   : > { %5612 = vst [vmem:[%s7949_s19 + $0x38] sm:$0xff] %v2720_v14   ;;  %v4209_v46 = vrot.slane %v4106_v27, 2  ;;  %vm2635_vm2 = vcmp.gt.f32.partialorder %v2603_v33, 0.0  ;;  %v2667_v41 = vmul.f32 0.2, %v2603_v33  ;;  %v2604_v38 = vadd.f32 %v5909_v61, %v7904_v47  ;;  %5611 = vst [vmem:[%s7949_s19 + $0x30] sm:$0xff] %v2719_v28   ;;  %5871 = vmatprep.mubr.bf16.mxu1 %v2719_v28 }
 0x1d5   : > { %v3963_v10 = vsel %vm3331_vm13, %v9737_v9, %v3962_v36  ;;  %v4398_v8 = vmul.f32 %v7839_v16, %v7511_v34  ;;  %vm2633_vm3 = vcmp.gt.f32.partialorder %v2601_v63, 0.0  ;;  %v2665_v49 = vmul.f32 0.2, %v2601_v63  ;;  %5872 = vmatmul.mubr.bf16.gmra.mrb[44].mxu1 %v2720_v14  ;;  %v5833_v59 = vpop.f32.mrb[20].mxu0 }
 0x1d6   : > { %v4063_v54 = vadd.f32 %v3963_v10, %v3820_v40  ;;  %v2602_v60 = vadd.f32 %v5910_v37, %v7904_v47  ;;  %v9738_v22 = vrot.slane %v7832_v11, 2  ;;  %vm2636_vm4 = vcmp.gt.f32.partialorder %v2604_v38, 0.0  ;;  %v2499_v50 = vpop.f32.mrb[21].mxu0 }
 0x1d7   : > { %v2668_v3 = vmul.f32 0.2, %v2604_v38  ;;  %v2699_v4 = vsel %vm2635_vm2, %v2603_v33, %v2667_v41  ;;  %v2697_v36 = vsel %vm2633_vm3, %v2601_v63, %v2665_v49  ;;  %v4472_v27 = vmul.f32 %v5448_v1, %v7524_v31  ;;  %v5834_v40 = vpop.f32.mrb[22].mxu0 }
 0x1d8   : > { %v4210_v35 = vsel %vm3579_vm14, %v9738_v22, %v4209_v46  ;;  %vm2634_vm5 = vcmp.gt.f32.partialorder %v2602_v60, 0.0  ;;  %v2666_v30 = vmul.f32 0.2, %v2602_v60  ;;  %v5911_v58 = vadd.f32 %v5833_v59, %v7732_v13  ;;  %v2502_v10 = vpop.f32.mrb[23].mxu0 }
 0x1d9   : > { %v4310_v26 = vadd.f32 %v4210_v35, %v4063_v54  ;;  %v2700_v7 = vsel %vm2636_vm4, %v2604_v38, %v2668_v3  ;;  %v4717_v11 = vmul.f32 %v5448_v1, %v7547_v56  ;;  %v5912_v14 = vadd.f32 %v2499_v50, %v7741_v55  ;;  %v3115_v1 = vld [vmem:[#allocation3 + $0x40] sm:$0x3]  ;;  %v5397_v50 = vld [vmem:[#allocation3 + $0x58] sm:$0x3] }
 0x1da   : > { %v2698_v61 = vsel %vm2634_vm5, %v2602_v60, %v2666_v30  ;;  %v2722_v33 = vpack.c.bf16 %v2700_v7, %v2699_v4  ;;  %v4575_v0 = vrot.slane %v4472_v27, 1  ;;  %v2607_v28 = vadd.f32 %v5911_v58, %v7904_v47  ;;  %v6094_v7 = vld [vmem:[#allocation3 + $0x50] sm:$0xff] }
 0x1db   : > { %v4430_v44 = vadd.f32 %v4398_v8, %v4310_v26  ;;  %v5913_v9 = vadd.f32 %v5834_v40, %v7748_v15  ;;  %v2721_v63 = vpack.c.bf16 %v2698_v61, %v2697_v36  ;;  %v4820_v13 = vrot.slane %v4717_v11, 2  ;;  %v6093_v8 = vld [vmem:[#allocation3 + $0x38] sm:$0xff] }
 0x1dc   : > { %v2605_v37 = vadd.f32 %v5912_v14, %v7904_v47  ;;  %v5914_v54 = vadd.f32 %v2502_v10, %v7757_v52  ;;  %5614 = vst [vmem:[%s7949_s19 + $0x48] sm:$0xff] %v2722_v33   ;;  %v8050_v55 = vadd.f32 %v7998_v62, %v7991_v24  ;;  %v9739_v46 = vrot.slane %v7848_v39, 1  ;;  %v5837_v4 = vpop.f32.mrb[24].mxu0 }
 0x1dd   : > { %vm2639_vm6 = vcmp.gt.f32.partialorder %v2607_v28, 0.0  ;;  %v2671_v38 = vmul.f32 0.2, %v2607_v28  ;;  %v2608_v15 = vadd.f32 %v5913_v9, %v7904_v47  ;;  %5613 = vst [vmem:[%s7949_s19 + $0x40] sm:$0xff] %v2721_v63   ;;  %5875 = vmatprep.mubr.bf16.mxu1 %v2721_v63  ;;  %v3170_v49 = vmul.f32 %v6093_v8, %v7411_v5  ;;  %v2515_v36 = vpop.f32.mrb[25].mxu0 }
 0x1de   : > { %v4576_v41 = vsel %vm3331_vm13, %v9739_v46, %v4575_v0  ;;  %vm2637_vm7 = vcmp.gt.f32.partialorder %v2605_v37, 0.0  ;;  %v2669_v52 = vmul.f32 0.2, %v2605_v37  ;;  %v2606_v60 = vadd.f32 %v5914_v54, %v7904_v47  ;;  %5876 = vmatmul.mubr.bf16.gmra.mrb[48].mxu1 %v2722_v33  ;;  %v5838_v11 = vpop.f32.mrb[26].mxu0 }
 0x1df   : > { %v8059_v24 = vadd.f32 %v4576_v41, %v4430_v44  ;;  %vm2640_vm8 = vcmp.gt.f32.partialorder %v2608_v15, 0.0  ;;  %v2672_v39 = vmul.f32 0.2, %v2608_v15  ;;  %v2703_v62 = vsel %vm2639_vm6, %v2607_v28, %v2671_v38  ;;  %v2518_v0 = vpop.f32.mrb[27].mxu0 }
 0x1e0   : > { %v9740_v22 = vrot.slane %v7857_v43, 2  ;;  %vm2638_vm9 = vcmp.gt.f32.partialorder %v2606_v60, 0.0  ;;  %v2670_v3 = vmul.f32 0.2, %v2606_v60  ;;  %v2701_v26 = vsel %vm2637_vm7, %v2605_v37, %v2669_v52 }
 0x1e1   : > { %v3243_v30 = vmul.f32 %v7371_v51, %v3115_v1  ;;  %v5915_v59 = vadd.f32 %v5837_v4, %v7785_v21  ;;  %v2704_v27 = vsel %vm2640_vm8, %v2608_v15, %v2672_v39  ;;  %v3491_v58 = vmul.f32 %v7404_v42, %v3115_v1 }
 0x1e2   : > { %v8064_v35 = vsel %vm3579_vm14, %v9740_v22, %v4820_v13  ;;  %v3786_v43 = vmul.f32 %v6094_v7, %v7450_v20  ;;  %v5916_v44 = vadd.f32 %v2515_v36, %v7795_v57  ;;  %v2702_v14 = vsel %vm2638_vm9, %v2606_v60, %v2670_v3  ;;  %v5445_v7 = vld [vmem:[#allocation3 + $0x70] sm:$0x3] }
 0x1e3   : > { %v2724_v40 = vpack.c.bf16 %v2704_v27, %v2703_v62  ;;  %v3345_v61 = vrot.slane %v3243_v30, 1  ;;  %v2611_v33 = vadd.f32 %v5915_v59, %v7904_v47  ;;  %v5917_v21 = vadd.f32 %v5838_v11, %v7811_v23 }
 0x1e4   : > { %v2723_v28 = vpack.c.bf16 %v2702_v14, %v2701_v26  ;;  %v3593_v9 = vrot.slane %v3491_v58, 2  ;;  %v2609_v10 = vadd.f32 %v5916_v44, %v7904_v47  ;;  %v5918_v63 = vadd.f32 %v2518_v0, %v7822_v32  ;;  %v5841_v60 = vpop.f32.mrb[28].mxu0 }
 0x1e5   : > { %5616 = vst [vmem:[%s7949_s19 + $0x58] sm:$0xff] %v2724_v40   ;;  %v9741_v13 = vrot.slane %v7878_v48, 1  ;;  %v3856_v37 = vmul.f32 0.5625, %v5397_v50  ;;  %vm2643_vm10 = vcmp.gt.f32.partialorder %v2611_v33, 0.0  ;;  %v2675_v54 = vmul.f32 0.2, %v2611_v33 }
 0x1e6   : > { %v2612_v46 = vadd.f32 %v5917_v21, %v7904_v47  ;;  %5615 = vst [vmem:[%s7949_s19 + $0x50] sm:$0xff] %v2723_v28   ;;  %5879 = vmatprep.mubr.bf16.mxu1 %v2723_v28  ;;  %vm2641_vm12 = vcmp.gt.f32.partialorder %v2609_v10, 0.0  ;;  %v2673_v41 = vmul.f32 0.2, %v2609_v10  ;;  %v2610_v38 = vadd.f32 %v5918_v63, %v7904_v47  ;;  %v2531_v22 = vpop.f32.mrb[29].mxu0 }
 0x1e7   : > { %v3346_v57 = vsel %vm3331_vm13, %v9741_v13, %v3345_v61  ;;  %5880 = vmatmul.mubr.bf16.gmra.mrb[52].mxu1 %v2724_v40  ;;  %v9742_v32 = vrot.slane %v7888_v18, 2  ;;  %v2707_v1 = vsel %vm2643_vm10, %v2611_v33, %v2675_v54  ;;  %v3957_v62 = vrot.slane %v3856_v37, 1  ;;  %v5842_v30 = vpop.f32.mrb[30].mxu0  ;;  %v9744_v40 = vld [vmem:[#allocation25_spill] sm:$0xff] }
 0x1e8   : > { %v3449_v23 = vadd.f32 %v3346_v57, %v3170_v49  ;;  %vm2644_vm15 = vcmp.gt.f32.partialorder %v2612_v46, 0.0  ;;  %v2676_v48 = vmul.f32 0.2, %v2612_v46  ;;  %vm2642_vm0 = vcmp.gt.f32.partialorder %v2610_v38, 0.0  ;;  %v2534_v11 = vpop.f32.mrb[31].mxu0 }
 0x1e9   : > { %v3594_v15 = vsel %vm3579_vm14, %v9742_v32, %v3593_v9  ;;  %v2674_v52 = vmul.f32 0.2, %v2610_v38  ;;  %v2705_v39 = vsel %vm2641_vm12, %v2609_v10, %v2673_v41  ;;  %v5919_v49 = vadd.f32 %v5841_v60, %v7859_v53 }
 0x1ea   : > { %v3697_v8 = vadd.f32 %v3594_v15, %v3449_v23  ;;  %v2708_v3 = vsel %vm2644_vm15, %v2612_v46, %v2676_v48  ;;  %v4103_v26 = vmul.f32 %v5397_v50, %v7473_v25  ;;  %v5920_v18 = vadd.f32 %v2531_v22, %v7869_v17  ;;  %v8129_v22 = vld [vmem:[#allocation3 + $0x90] sm:$0xff] }
 0x1eb   : > { %v2706_v59 = vsel %vm2642_vm0, %v2610_v38, %v2674_v52  ;;  %v2726_v36 = vpack.c.bf16 %v2708_v3, %v2707_v1  ;;  %v9743_v27 = vrot.slane %v7915_v45, 1  ;;  %v2615_v44 = vadd.f32 %v5919_v49, %v7904_v47  ;;  %v8131_v3 = vld [vmem:[#allocation3 + $0x98] sm:$0xff] }
 0x1ec   : > { %v3818_v4 = vadd.f32 %v3786_v43, %v3697_v8  ;;  %v5921_v53 = vadd.f32 %v5842_v30, %v7880_v29  ;;  %v2725_v14 = vpack.c.bf16 %v2706_v59, %v2705_v39  ;;  %v2613_v50 = vadd.f32 %v5920_v18, %v7904_v47 }
 0x1ed   : > { %v3958_v58 = vsel %vm3331_vm13, %v9743_v27, %v3957_v62  ;;  %v5922_v17 = vadd.f32 %v2534_v11, %v9744_v40  ;;  %5618 = vst [vmem:[%s7949_s19 + $0x68] sm:$0xff] %v2726_v36   ;;  %v4204_v61 = vrot.slane %v4103_v26, 2  ;;  %v4396_v45 = vmul.f32 %v7809_v2, %v7511_v34 }
 0x1ee   : > { %v4061_v43 = vadd.f32 %v3958_v58, %v3818_v4  ;;  %vm2647_vm1 = vcmp.gt.f32.partialorder %v2615_v44, 0.0  ;;  %v2679_v33 = vmul.f32 0.2, %v2615_v44  ;;  %v2616_v21 = vadd.f32 %v5921_v53, %v7904_v47  ;;  %5617 = vst [vmem:[%s7949_s19 + $0x60] sm:$0xff] %v2725_v14   ;;  %5883 = vmatprep.mubr.bf16.mxu1 %v2725_v14 }
 0x1ef   : > { %v4469_v29 = vmul.f32 %v5445_v7, %v7524_v31  ;;  %vm2645_vm2 = vcmp.gt.f32.partialorder %v2613_v50, 0.0  ;;  %v2677_v0 = vmul.f32 0.2, %v2613_v50  ;;  %v2614_v28 = vadd.f32 %v5922_v17, %v7904_v47  ;;  %5884 = vmatmul.mubr.bf16.gmra.mrb[56].mxu1 %v2726_v36  ;;  %v8160_v17 = vld [vmem:[#allocation3 + $0xa8] sm:$0xff] }
 0x1f0   : > { %v9745_v9 = vrot.slane %v7940_v12, 2  ;;  %vm2648_vm3 = vcmp.gt.f32.partialorder %v2616_v21, 0.0  ;;  %v2680_v63 = vmul.f32 0.2, %v2616_v21  ;;  %v8107_v13 = vadd.f32 %v8064_v35, %v8059_v24  ;;  %v9747_v35 = vld [vmem:[#allocation15_spill] sm:$0xff] }
 0x1f1   : > { %vm2646_vm4 = vcmp.gt.f32.partialorder %v2614_v28, 0.0  ;;  %v2678_v37 = vmul.f32 0.2, %v2614_v28  ;;  %v2711_v54 = vsel %vm2647_vm1, %v2615_v44, %v2679_v33  ;;  %v4570_v46 = vrot.slane %v4469_v29, 1 }
 0x1f2   : > { %v4205_v10 = vsel %vm3579_vm14, %v9745_v9, %v4204_v61  ;;  %v2709_v23 = vsel %vm2645_vm2, %v2613_v50, %v2677_v0  ;;  %v2712_v47 = vsel %vm2648_vm3, %v2616_v21, %v2680_v63  ;;  %v4714_v12 = vmul.f32 %v5445_v7, %v7547_v56  ;;  %v8162_v61 = vld [vmem:[#allocation3 + $0xb0] sm:$0xff] }
 0x1f3   : > { %v4308_v57 = vadd.f32 %v4205_v10, %v4061_v43  ;;  %v2710_v38 = vsel %vm2646_vm4, %v2614_v28, %v2678_v37  ;;  %v2728_v32 = vpack.c.bf16 %v2712_v47, %v2711_v54  ;;  %v9746_v15 = vrot.slane %v7964_v6, 1  ;;  %v9749_v37 = vld [vmem:[#allocation14_spill] sm:$0xff] }
 0x1f4   : > { %v3250_v48 = vmul.f32 %v9747_v35, %v7371_v51  ;;  %v2727_v1 = vpack.c.bf16 %v2710_v38, %v2709_v23  ;;  %v4815_v8 = vrot.slane %v4714_v12, 2  ;;  %v3175_v52 = vmul.f32 %v9747_v35, %v7411_v5 }
 0x1f5   : > { %v4428_v41 = vadd.f32 %v4396_v45, %v4308_v57  ;;  %v4571_v24 = vsel %vm3331_vm13, %v9746_v15, %v4570_v46  ;;  %v8120_v60 = vmul.f32 %v7839_v16, %v7371_v51  ;;  %5620 = vst [vmem:[%s7949_s19 + $0x78] sm:$0xff] %v2728_v32   ;;  %v3498_v6 = vmul.f32 %v9747_v35, %v7404_v42 }
 0x1f6   : > { %v3357_v62 = vrot.slane %v3250_v48, 1  ;;  %v8127_v49 = vmul.f32 %v7839_v16, %v7404_v42  ;;  %5619 = vst [vmem:[%s7949_s19 + $0x70] sm:$0xff] %v2727_v1   ;;  %5887 = vmatprep.mubr.bf16.mxu1 %v2727_v1  ;;  %v9748_v4 = vrot.slane %v7973_v19, 2  ;;  %v3863_v30 = vmul.f32 0.5625, %v8129_v22  ;;  %s6100_s19 = sshll.u32 %s6185_s18, 4  ;;  %s6101_s19 = int_to_ptr.vmem [resolvable:$false] %s6100_s19 }
 0x1f7   : > { %v4674_v39 = vadd.f32 %v4571_v24, %v4428_v41  ;;  %v3358_v18 = vrot.slane %v8120_v60, 1  ;;  %v8140_v59 = vmul.f32 0.5625, %v8131_v3  ;;  %5888 = vmatmul.mubr.bf16.gmra.mrb[60].mxu1 %v2728_v32  ;;  %v3605_v36 = vrot.slane %v3498_v6, 2  ;;  %s6102_s8 = scalar_lea.vmem %s6101_s19, 4096  ;;  %p6103_p1 = scmp.lt.s32.totalorder %s8798_s22, %s6101_s19 }
 0x1f8   : > { %v4816_v26 = vsel %vm3579_vm14, %v9748_v4, %v4815_v8  ;;  %v3606_v27 = vrot.slane %v8127_v49, 2  ;;  %v3791_v58 = vmul.f32 %v8129_v22, %v7450_v20  ;;  %v4110_v7 = vmul.f32 %v8129_v22, %v7473_v25  ;;  %p6104_p2 = scmp.lt.s32.totalorder %s6102_s8, %s6096_s10 }
 0x1f9   : > { %v3359_v19 = vsel %vm3331_vm13, %v3357_v62, %v3358_v18  ;;  %v3969_v44 = vrot.slane %v3863_v30, 1  ;;  %v3970_v53 = vrot.slane %v8140_v59, 1  ;;  %v8153_v11 = vmul.f32 %v8131_v3, %v7473_v25 }
 0x1fa   : > { %v8155_v14 = vadd.f32 %v4816_v26, %v4674_v39  ;;  %v3454_v43 = vadd.f32 %v3359_v19, %v3175_v52  ;;  %v3607_v50 = vsel %vm3579_vm14, %v3605_v36, %v3606_v27  ;;  %v4216_v40 = vrot.slane %v4110_v7, 2  ;;  %p6105_p3 = por %p6104_p2, %p6103_p1 }
 0x1fb   : > { %v4217_v45 = vrot.slane %v8153_v11, 2  ;;  %v4401_v33 = vmul.f32 %v8160_v17, %v7511_v34  ;;  %v4476_v21 = vmul.f32 %v8160_v17, %v7524_v31  ;;  %v8171_v29 = vmul.f32 %v8162_v61, %v7524_v31 }
 0x1fc   : > { %v3702_v0 = vadd.f32 %v3607_v50, %v3454_v43  ;;  %v3971_v28 = vsel %vm3331_vm13, %v3969_v44, %v3970_v53  ;;  %v4721_v9 = vmul.f32 %v8160_v17, %v7547_v56  ;;  %v8180_v10 = vmul.f32 %v8162_v61, %v7547_v56  ;;  %p6106_p5 = pnand %p6105_p3, %p6099_p0 }
 0x1fd   : > { %v4582_v63 = vrot.slane %v4476_v21, 1  ;;  %v4583_v57 = vrot.slane %v8171_v29, 1  ;;  %v3173_v54 = vmul.f32 %v9749_v37, %v7411_v5  ;;  %v3247_v46 = vmul.f32 %v9749_v37, %v7371_v51 }
 0x1fe   : > { %v3823_v23 = vadd.f32 %v3791_v58, %v3702_v0  ;;  %v4218_v47 = vsel %vm3579_vm14, %v4216_v40, %v4217_v45  ;;  %v4827_v41 = vrot.slane %v4721_v9, 2  ;;  %v8192_v12 = vmul.f32 %v7809_v2, %v7371_v51 }
 0x1ff   : > { %v4828_v38 = vrot.slane %v8180_v10, 2  ;;  %v3352_v32 = vrot.slane %v3247_v46, 1  ;;  %v3495_v15 = vmul.f32 %v9749_v37, %v7404_v42  ;;  %v8199_v24 = vmul.f32 %v7809_v2, %v7404_v42 }
 0x200   : > { %v4066_v48 = vadd.f32 %v3971_v28, %v3823_v23  ;;  %v4584_v1 = vsel %vm3331_vm13, %v4582_v63, %v4583_v57  ;;  %v3353_v8 = vrot.slane %v8192_v12, 1  ;;  %v3789_v52 = vmul.f32 %v9747_v35, %v7450_v20  ;;  %v3124_v63 = vld [vmem:[#allocation3 + $0x88] sm:$0x3] }
 0x201   : > { %v3600_v39 = vrot.slane %v3495_v15, 2  ;;  %v3601_v62 = vrot.slane %v8199_v24, 2  ;;  %v3860_v6 = vmul.f32 0.5625, %v9747_v35  ;;  %v8210_v4 = vmul.f32 0.5625, %v7839_v16  ;;  %v5406_v15 = vld [vmem:[#allocation3 + $0xa0] sm:$0x3] }
 0x202   : > { %v4313_v2 = vadd.f32 %v4218_v47, %v4066_v48  ;;  %v3354_v26 = vsel %vm3331_vm13, %v3352_v32, %v3353_v8  ;;  %v4107_v30 = vmul.f32 %v9747_v35, %v7473_v25  ;;  %v8219_v36 = vmul.f32 %v7839_v16, %v7473_v25 }
 0x203   : > { %v3452_v58 = vadd.f32 %v3354_v26, %v3173_v54  ;;  %v3602_v7 = vsel %vm3579_vm14, %v3600_v39, %v3601_v62  ;;  %v3964_v19 = vrot.slane %v3860_v6, 1  ;;  %v3965_v44 = vrot.slane %v8210_v4, 1 }
 0x204   : > { %v4433_v43 = vadd.f32 %v4401_v33, %v4313_v2  ;;  %v4829_v50 = vsel %vm3579_vm14, %v4827_v41, %v4828_v38  ;;  %v4211_v40 = vrot.slane %v4107_v30, 2  ;;  %v4212_v35 = vrot.slane %v8219_v36, 2  ;;  %v5454_v2 = vld [vmem:[#allocation3 + $0xb8] sm:$0x3] }
 0x205   : > { %v3700_v21 = vadd.f32 %v3602_v7, %v3452_v58  ;;  %v4399_v0 = vmul.f32 %v8129_v22, %v7511_v34  ;;  %v4473_v28 = vmul.f32 %v8129_v22, %v7524_v31  ;;  %v8235_v9 = vmul.f32 %v8131_v3, %v7524_v31 }
 0x206   : > { %v4679_v33 = vadd.f32 %v4584_v1, %v4433_v43  ;;  %v3966_v37 = vsel %vm3331_vm13, %v3964_v19, %v3965_v44  ;;  %v4718_v54 = vmul.f32 %v8129_v22, %v7547_v56  ;;  %v8244_v46 = vmul.f32 %v8131_v3, %v7547_v56 }
 0x207   : > { %v3821_v23 = vadd.f32 %v3789_v52, %v3700_v21  ;;  %v4213_v47 = vsel %vm3579_vm14, %v4211_v40, %v4212_v35  ;;  %v4577_v41 = vrot.slane %v4473_v28, 1  ;;  %v9567_v32 = vrot.slane %v8235_v9, 1 }
 0x208   : > { %v4822_v48 = vrot.slane %v4718_v54, 2  ;;  %v4823_v1 = vrot.slane %v8244_v46, 2  ;;  %v3176_v39 = vmul.f32 %v7839_v16, %v7411_v5  ;;  %v3252_v6 = vmul.f32 %v7371_v51, %v3124_v63 }
 0x209   : > { %v8254_v26 = vadd.f32 %v4829_v50, %v4679_v33  ;;  %v4064_v52 = vadd.f32 %v3966_v37, %v3821_v23  ;;  %v4579_v30 = vsel %vm3331_vm13, %v4577_v41, %v9567_v32  ;;  %v3500_v58 = vmul.f32 %v7404_v42, %v3124_v63  ;;  %v3121_v41 = vld [vmem:[#allocation3 + $0x70] sm:$0x3] }
 0x20a   : > { %v3360_v7 = vrot.slane %v3252_v6, 1  ;;  %v3792_v19 = vmul.f32 %v8131_v3, %v7450_v20  ;;  %v3865_v43 = vmul.f32 0.5625, %v5406_v15  ;;  %v4112_v40 = vmul.f32 %v5406_v15, %v7473_v25 }
 0x20b   : > { %v4311_v21 = vadd.f32 %v4213_v47, %v4064_v52  ;;  %v4824_v50 = vsel %vm3579_vm14, %v4822_v48, %v4823_v1  ;;  %v3608_v28 = vrot.slane %v3500_v58, 2  ;;  %v4478_v33 = vmul.f32 %v5454_v2, %v7524_v31  ;;  %v5403_v48 = vld [vmem:[#allocation3 + $0x88] sm:$0x3] }
 0x20c   : > { %v3361_v37 = vsel %vm3331_vm13, %v3358_v18, %v3360_v7  ;;  %v3972_v63 = vrot.slane %v3865_v43, 1  ;;  %v4219_v54 = vrot.slane %v4112_v40, 2  ;;  %v4723_v23 = vmul.f32 %v5454_v2, %v7547_v56  ;;  %v6095_v58 = vld [vmem:[#allocation3 + $0x68] sm:$0xff]  ;;  %v5451_v7 = vld [vmem:[#allocation3 + $0xa0] sm:$0x3] }
 0x20d   : > { %v4431_v6 = vadd.f32 %v4399_v0, %v4311_v21  ;;  %v3455_v32 = vadd.f32 %v3361_v37, %v3176_v39  ;;  %v3609_v47 = vsel %vm3579_vm14, %v3606_v27, %v3608_v28  ;;  %v4585_v15 = vrot.slane %v4478_v33, 1 }
 0x20e   : > { %v3973_v52 = vsel %vm3331_vm13, %v3970_v53, %v3972_v63  ;;  %v4220_v60 = vsel %vm3579_vm14, %v4217_v45, %v4219_v54  ;;  %v4402_v18 = vmul.f32 %v8162_v61, %v7511_v34  ;;  %v4830_v2 = vrot.slane %v4723_v23, 2 }
 0x20f   : > { %v4677_v0 = vadd.f32 %v4579_v30, %v4431_v6  ;;  %v3703_v39 = vadd.f32 %v3609_v47, %v3455_v32  ;;  %v3174_v49 = vmul.f32 %v6095_v58, %v7411_v5  ;;  %v3249_v27 = vmul.f32 %v7371_v51, %v3121_v41 }
 0x210   : > { %v4586_v59 = vsel %vm3331_vm13, %v4583_v57, %v4585_v15  ;;  %v4831_v53 = vsel %vm3579_vm14, %v4828_v38, %v4830_v2  ;;  %v3497_v11 = vmul.f32 %v7404_v42, %v3121_v41  ;;  %v3862_v45 = vmul.f32 0.5625, %v5403_v48 }
 0x211   : > { %v3824_v43 = vadd.f32 %v3792_v19, %v3703_v39  ;;  %v3355_v30 = vrot.slane %v3249_v27, 1  ;;  %v3790_v32 = vmul.f32 %v7839_v16, %v7450_v20  ;;  %v4109_v40 = vmul.f32 %v5403_v48, %v7473_v25  ;;  %v8336_v39 = vld [vmem:[#allocation3 + $0xc8] sm:$0xff] }
 0x212   : > { %v8294_v21 = vadd.f32 %v4824_v50, %v4677_v0  ;;  %v3603_v28 = vrot.slane %v3497_v11, 2  ;;  %v3967_v29 = vrot.slane %v3862_v45, 1  ;;  %v4475_v57 = vmul.f32 %v5451_v7, %v7524_v31 }
 0x213   : > { %v4067_v33 = vadd.f32 %v3973_v52, %v3824_v43  ;;  %v3356_v10 = vsel %vm3331_vm13, %v3353_v8, %v3355_v30  ;;  %v4214_v38 = vrot.slane %v4109_v40, 2  ;;  %v4720_v19 = vmul.f32 %v5451_v7, %v7547_v56 }
 0x214   : > { %v3453_v37 = vadd.f32 %v3356_v10, %v3174_v49  ;;  %v3604_v16 = vsel %vm3579_vm14, %v3601_v62, %v3603_v28  ;;  %v4400_v50 = vmul.f32 %v8131_v3, %v7511_v34  ;;  %v4580_v63 = vrot.slane %v4475_v57, 1  ;;  %v8357_v28 = vld [vmem:[#allocation3 + $0xd8] sm:$0xff] }
 0x215   : > { %v4314_v54 = vadd.f32 %v4220_v60, %v4067_v33  ;;  %v3968_v23 = vsel %vm3331_vm13, %v3965_v44, %v3967_v29  ;;  %v4215_v12 = vsel %vm3579_vm14, %v4212_v35, %v4214_v38  ;;  %v4825_v8 = vrot.slane %v4720_v19, 2  ;;  %v8359_v29 = vld [vmem:[#allocation3 + $0xe0] sm:$0xff] }
 0x216   : > { %v3701_v41 = vadd.f32 %v3604_v16, %v3453_v37  ;;  %v3179_v24 = vmul.f32 %v8160_v17, %v7411_v5  ;;  %v3256_v62 = vmul.f32 %v8160_v17, %v7371_v51  ;;  %v8318_v6 = vmul.f32 %v8162_v61, %v7371_v51 }
 0x217   : > { %v4434_v47 = vadd.f32 %v4402_v18, %v4314_v54  ;;  %v9750_v4 = vrot.slane %v8235_v9, 1  ;;  %v3504_v36 = vmul.f32 %v8160_v17, %v7404_v42  ;;  %v8327_v35 = vmul.f32 %v8162_v61, %v7404_v42  ;;  %v8333_v18 = vld [vmem:[#allocation3 + $0xc0] sm:$0xff] }
 0x218   : > { %v3822_v15 = vadd.f32 %v3790_v32, %v3701_v41  ;;  %v4826_v48 = vsel %vm3579_vm14, %v4823_v1, %v4825_v8  ;;  %v3367_v52 = vrot.slane %v3256_v62, 1  ;;  %v3368_v60 = vrot.slane %v8318_v6, 1 }
 0x219   : > { %v4581_v44 = vsel %vm3331_vm13, %v9750_v4, %v4580_v63  ;;  %v4680_v9 = vadd.f32 %v4586_v59, %v4434_v47  ;;  %v3615_v2 = vrot.slane %v3504_v36, 2  ;;  %v3616_v0 = vrot.slane %v8327_v35, 2 }
 0x21a   : > { %v3869_v58 = vmul.f32 0.5625, %v8333_v18  ;;  %v4065_v49 = vadd.f32 %v3968_v23, %v3822_v15  ;;  %v3369_v46 = vsel %vm3331_vm13, %v3367_v52, %v3368_v60  ;;  %v8343_v1 = vmul.f32 0.5625, %v8336_v39 }
 0x21b   : > { %v4116_v27 = vmul.f32 %v8333_v18, %v7473_v25  ;;  %v3458_v7 = vadd.f32 %v3369_v46, %v3179_v24  ;;  %v3617_v59 = vsel %vm3579_vm14, %v3615_v2, %v3616_v0  ;;  %v3795_v11 = vmul.f32 %v8333_v18, %v7450_v20 }
 0x21c   : > { %v3979_v45 = vrot.slane %v3869_v58, 1  ;;  %v4312_v43 = vadd.f32 %v4215_v12, %v4065_v49  ;;  %v3980_v30 = vrot.slane %v8343_v1, 1  ;;  %v8355_v32 = vmul.f32 %v8336_v39, %v7473_v25 }
 0x21d   : > { %v4226_v40 = vrot.slane %v4116_v27, 2  ;;  %v8361_v57 = vadd.f32 %v4831_v53, %v4680_v9  ;;  %v3706_v33 = vadd.f32 %v3617_v59, %v3458_v7  ;;  %v4482_v10 = vmul.f32 %v8357_v28, %v7524_v31 }
 0x21e   : > { %v8367_v38 = vmul.f32 %v8359_v29, %v7524_v31  ;;  %v4432_v19 = vadd.f32 %v4400_v50, %v4312_v43  ;;  %v3981_v37 = vsel %vm3331_vm13, %v3979_v45, %v3980_v30  ;;  %v4227_v16 = vrot.slane %v8355_v32, 2 }
 0x21f   : > { %v4727_v63 = vmul.f32 %v8357_v28, %v7547_v56  ;;  %v3827_v53 = vadd.f32 %v3795_v11, %v3706_v33  ;;  %v4592_v54 = vrot.slane %v4482_v10, 1  ;;  %v8378_v12 = vmul.f32 %v8359_v29, %v7547_v56 }
 0x220   : > { %v4593_v23 = vrot.slane %v8367_v38, 1  ;;  %v4678_v8 = vadd.f32 %v4581_v44, %v4432_v19  ;;  %v4228_v50 = vsel %vm3579_vm14, %v4226_v40, %v4227_v16  ;;  %v4405_v41 = vmul.f32 %v8357_v28, %v7511_v34 }
 0x221   : > { %v4837_v24 = vrot.slane %v4727_v63, 2  ;;  %v4070_v62 = vadd.f32 %v3981_v37, %v3827_v53  ;;  %v4838_v47 = vrot.slane %v8378_v12, 2  ;;  %v3177_v4 = vmul.f32 %v8129_v22, %v7411_v5 }
 0x222   : > { %v3253_v36 = vmul.f32 %v8129_v22, %v7371_v51  ;;  %v4594_v44 = vsel %vm3331_vm13, %v4592_v54, %v4593_v23  ;;  %v8395_v15 = vmul.f32 %v8131_v3, %v7371_v51  ;;  %v3501_v52 = vmul.f32 %v8129_v22, %v7404_v42 }
 0x223   : > { %v8401_v9 = vmul.f32 %v8131_v3, %v7404_v42  ;;  %v8403_v2 = vadd.f32 %v4826_v48, %v4678_v8  ;;  %v4317_v58 = vadd.f32 %v4228_v50, %v4070_v62  ;;  %v4839_v49 = vsel %vm3579_vm14, %v4837_v24, %v4838_v47  ;;  %v3130_v62 = vld [vmem:[#allocation3 + $0xb8] sm:$0x3] }
 0x224   : > { %v3362_v46 = vrot.slane %v3253_v36, 1  ;;  %v9572_v27 = vrot.slane %v8395_v15, 1  ;;  %v3610_v7 = vrot.slane %v3501_v52, 2  ;;  %v3866_v11 = vmul.f32 0.5625, %v8160_v17  ;;  %v5412_v52 = vld [vmem:[#allocation3 + $0xd0] sm:$0x3] }
 0x225   : > { %v9570_v59 = vrot.slane %v8401_v9, 2  ;;  %v4437_v22 = vadd.f32 %v4405_v41, %v4317_v58  ;;  %v8412_v45 = vmul.f32 0.5625, %v8162_v61  ;;  %v4113_v48 = vmul.f32 %v8160_v17, %v7473_v25 }
 0x226   : > { %v8418_v43 = vmul.f32 %v8162_v61, %v7473_v25  ;;  %v3364_v40 = vsel %vm3331_vm13, %v3362_v46, %v9572_v27  ;;  %v3793_v10 = vmul.f32 %v8160_v17, %v7450_v20  ;;  %v3974_v19 = vrot.slane %v3866_v11, 1 }
 0x227   : > { %v3612_v33 = vsel %vm3579_vm14, %v3610_v7, %v9570_v59  ;;  %v4683_v37 = vadd.f32 %v4594_v44, %v4437_v22  ;;  %v3456_v63 = vadd.f32 %v3364_v40, %v3177_v4  ;;  %v9569_v53 = vrot.slane %v8412_v45, 1 }
 0x228   : > { %v4221_v54 = vrot.slane %v4113_v48, 2  ;;  %v9568_v8 = vrot.slane %v8418_v43, 2  ;;  %v4479_v50 = vmul.f32 %v8333_v18, %v7524_v31  ;;  %v8434_v41 = vmul.f32 %v8336_v39, %v7524_v31 }
 0x229   : > { %v4724_v24 = vmul.f32 %v8333_v18, %v7547_v56  ;;  %v8438_v17 = vadd.f32 %v4839_v49, %v4683_v37  ;;  %v3704_v36 = vadd.f32 %v3612_v33, %v3456_v63  ;;  %v4403_v4 = vmul.f32 %v8333_v18, %v7511_v34  ;;  %v5460_v33 = vld [vmem:[#allocation3 + $0xe8] sm:$0x3] }
 0x22a   : > { %v8444_v44 = vmul.f32 %v8336_v39, %v7547_v56  ;;  %v3976_v58 = vsel %vm3331_vm13, %v3974_v19, %v9569_v53  ;;  %v4587_v46 = vrot.slane %v4479_v50, 1  ;;  %v9571_v7 = vrot.slane %v8434_v41, 1 }
 0x22b   : > { %v4832_v11 = vrot.slane %v4724_v24, 2  ;;  %v3825_v22 = vadd.f32 %v3793_v10, %v3704_v36  ;;  %v4223_v49 = vsel %vm3579_vm14, %v4221_v54, %v9568_v8  ;;  %v3258_v40 = vmul.f32 %v7371_v51, %v3130_v62 }
 0x22c   : > { %v9573_v48 = vrot.slane %v8444_v44, 2  ;;  %v4589_v37 = vsel %vm3331_vm13, %v4587_v46, %v9571_v7  ;;  %v3180_v19 = vmul.f32 %v8162_v61, %v7411_v5  ;;  %v3506_v63 = vmul.f32 %v7404_v42, %v3130_v62 }
 0x22d   : > { %v3871_v50 = vmul.f32 0.5625, %v5412_v52  ;;  %v4068_v10 = vadd.f32 %v3976_v58, %v3825_v22  ;;  %v3370_v24 = vrot.slane %v3258_v40, 1  ;;  %v3796_v54 = vmul.f32 %v8336_v39, %v7450_v20  ;;  %v3127_v40 = vld [vmem:[#allocation3 + $0xa0] sm:$0x3] }
 0x22e   : > { %v4118_v36 = vmul.f32 %v5412_v52, %v7473_v25  ;;  %v4834_v8 = vsel %vm3579_vm14, %v4832_v11, %v9573_v48  ;;  %v3618_v53 = vrot.slane %v3506_v63, 2  ;;  %v4484_v46 = vmul.f32 %v5460_v33, %v7524_v31 }
 0x22f   : > { %v3982_v59 = vrot.slane %v3871_v50, 1  ;;  %v4315_v7 = vadd.f32 %v4223_v49, %v4068_v10  ;;  %v3371_v62 = vsel %vm3331_vm13, %v3368_v60, %v3370_v24  ;;  %v4729_v22 = vmul.f32 %v5460_v33, %v7547_v56  ;;  %v5409_v50 = vld [vmem:[#allocation3 + $0xb8] sm:$0x3] }
 0x230   : > { %v4229_v58 = vrot.slane %v4118_v36, 2  ;;  %v3459_v27 = vadd.f32 %v3371_v62, %v3180_v19  ;;  %v3619_v52 = vsel %vm3579_vm14, %v3616_v0, %v3618_v53  ;;  %v4406_v11 = vmul.f32 %v8359_v29, %v7511_v34  ;;  %v5457_v19 = vld [vmem:[#allocation3 + $0xd0] sm:$0x3] }
 0x231   : > { %v4595_v63 = vrot.slane %v4484_v46, 1  ;;  %v4435_v48 = vadd.f32 %v4403_v4, %v4315_v7  ;;  %v3983_v6 = vsel %vm3331_vm13, %v3980_v30, %v3982_v59  ;;  %v4840_v49 = vrot.slane %v4729_v22, 2 }
 0x232   : > { %v4230_v60 = vsel %vm3579_vm14, %v4227_v16, %v4229_v58  ;;  %v3707_v33 = vadd.f32 %v3619_v52, %v3459_v27  ;;  %v3178_v35 = vmul.f32 %v8131_v3, %v7411_v5  ;;  %v3255_v0 = vmul.f32 %v7371_v51, %v3127_v40 }
 0x233   : > { %v3503_v53 = vmul.f32 %v7404_v42, %v3127_v40  ;;  %v4681_v10 = vadd.f32 %v4589_v37, %v4435_v48  ;;  %v4596_v1 = vsel %vm3331_vm13, %v4593_v23, %v4595_v63  ;;  %v4841_v30 = vsel %vm3579_vm14, %v4838_v47, %v4840_v49 }
 0x234   : > { %v3868_v32 = vmul.f32 0.5625, %v5409_v50  ;;  %v3828_v16 = vadd.f32 %v3796_v54, %v3707_v33  ;;  %v3365_v27 = vrot.slane %v3255_v0, 1  ;;  %v4115_v3 = vmul.f32 %v5409_v50, %v7473_v25 }
 0x235   : > { %v3613_v59 = vrot.slane %v3503_v53, 2  ;;  %v8494_v4 = vadd.f32 %v4834_v8, %v4681_v10  ;;  %v3794_v7 = vmul.f32 %v8162_v61, %v7450_v20  ;;  %v4481_v38 = vmul.f32 %v5457_v19, %v7524_v31 }
 0x236   : > { %v3977_v48 = vrot.slane %v3868_v32, 1  ;;  %v4071_v37 = vadd.f32 %v3983_v6, %v3828_v16  ;;  %v9751_v23 = vrot.slane %v8395_v15, 1  ;;  %v9752_v47 = vrot.slane %v8401_v9, 2 }
 0x237   : > { %v4224_v54 = vrot.slane %v4115_v3, 2  ;;  %v4404_v8 = vmul.f32 %v8336_v39, %v7511_v34  ;;  %v4590_v46 = vrot.slane %v4481_v38, 1  ;;  %v4726_v61 = vmul.f32 %v5457_v19, %v7547_v56 }
 0x238   : > { %v3366_v12 = vsel %vm3331_vm13, %v9751_v23, %v3365_v27  ;;  %v3614_v24 = vsel %vm3579_vm14, %v9752_v47, %v3613_v59  ;;  %v4318_v62 = vadd.f32 %v4230_v60, %v4071_v37  ;;  %v9753_v58 = vrot.slane %v8412_v45, 1  ;;  %v8538_v59 = vld [vmem:[#allocation3 + $0xf8] sm:$0xff] }
 0x239   : > { %v3457_v36 = vadd.f32 %v3366_v12, %v3178_v35  ;;  %v9754_v15 = vrot.slane %v8418_v43, 2  ;;  %v3262_v9 = vmul.f32 %v8357_v28, %v7371_v51  ;;  %v4835_v63 = vrot.slane %v4726_v61, 2 }
 0x23a   : > { %v3978_v22 = vsel %vm3331_vm13, %v9753_v58, %v3977_v48  ;;  %v3183_v50 = vmul.f32 %v8357_v28, %v7411_v5  ;;  %v8520_v6 = vmul.f32 %v8359_v29, %v7371_v51  ;;  %v4438_v60 = vadd.f32 %v4406_v11, %v4318_v62  ;;  %v8535_v11 = vld [vmem:[#allocation3 + $0xf0] sm:$0xff] }
 0x23b   : > { %v4225_v40 = vsel %vm3579_vm14, %v9754_v15, %v4224_v54  ;;  %v3705_v52 = vadd.f32 %v3614_v24, %v3457_v36  ;;  %v3377_v45 = vrot.slane %v3262_v9, 1  ;;  %v3510_v49 = vmul.f32 %v8357_v28, %v7404_v42  ;;  %v8559_v36 = vld [vmem:[#allocation3 + $0x108] sm:$0xff] }
 0x23c   : > { %v8526_v43 = vmul.f32 %v8359_v29, %v7404_v42  ;;  %v9755_v35 = vrot.slane %v8434_v41, 1  ;;  %v9756_v53 = vrot.slane %v8444_v44, 2  ;;  %v3378_v10 = vrot.slane %v8520_v6, 1 }
 0x23d   : > { %v3826_v33 = vadd.f32 %v3794_v7, %v3705_v52  ;;  %v4684_v32 = vadd.f32 %v4596_v1, %v4438_v60  ;;  %v3625_v16 = vrot.slane %v3510_v49, 2  ;;  %v3875_v3 = vmul.f32 0.5625, %v8535_v11 }
 0x23e   : > { %v4591_v0 = vsel %vm3331_vm13, %v9755_v35, %v4590_v46  ;;  %v4836_v19 = vsel %vm3579_vm14, %v9756_v53, %v4835_v63  ;;  %v3626_v27 = vrot.slane %v8526_v43, 2  ;;  %v3379_v41 = vsel %vm3331_vm13, %v3377_v45, %v3378_v10  ;;  %v8561_v46 = vld [vmem:[#allocation3 + $0x110] sm:$0xff] }
 0x23f   : > { %v4069_v7 = vadd.f32 %v3978_v22, %v3826_v33  ;;  %v8545_v44 = vmul.f32 0.5625, %v8538_v59  ;;  %v4122_v48 = vmul.f32 %v8535_v11, %v7473_v25  ;;  %v3462_v38 = vadd.f32 %v3379_v41, %v3183_v50 }
 0x240   : > { %v3627_v1 = vsel %vm3579_vm14, %v3625_v16, %v3626_v27  ;;  %v3799_v37 = vmul.f32 %v8535_v11, %v7450_v20  ;;  %v3989_v23 = vrot.slane %v3875_v3, 1  ;;  %v8557_v24 = vmul.f32 %v8538_v59, %v7473_v25 }
 0x241   : > { %v4316_v12 = vadd.f32 %v4225_v40, %v4069_v7  ;;  %v9582_v47 = vrot.slane %v8545_v44, 1  ;;  %v4236_v54 = vrot.slane %v4122_v48, 2  ;;  %v8563_v61 = vadd.f32 %v4841_v30, %v4684_v32 }
 0x242   : > { %v3710_v62 = vadd.f32 %v3627_v1, %v3462_v38  ;;  %v4488_v58 = vmul.f32 %v8559_v36, %v7524_v31  ;;  %v8569_v22 = vmul.f32 %v8561_v46, %v7524_v31  ;;  %v9580_v9 = vrot.slane %v8557_v24, 2 }
 0x243   : > { %v4436_v15 = vadd.f32 %v4404_v8, %v4316_v12  ;;  %v3991_v40 = vsel %vm3331_vm13, %v3989_v23, %v9582_v47  ;;  %v4733_v52 = vmul.f32 %v8559_v36, %v7547_v56  ;;  %v8580_v60 = vmul.f32 %v8561_v46, %v7547_v56 }
 0x244   : > { %v3831_v30 = vadd.f32 %v3799_v37, %v3710_v62  ;;  %v4602_v63 = vrot.slane %v4488_v58, 1  ;;  %v9579_v50 = vrot.slane %v8569_v22, 1  ;;  %v4238_v8 = vsel %vm3579_vm14, %v4236_v54, %v9580_v9 }
 0x245   : > { %v4682_v45 = vadd.f32 %v4591_v0, %v4436_v15  ;;  %v4409_v49 = vmul.f32 %v8559_v36, %v7511_v34  ;;  %v4847_v33 = vrot.slane %v4733_v52, 2  ;;  %v9576_v53 = vrot.slane %v8580_v60, 2 }
 0x246   : > { %v4074_v35 = vadd.f32 %v3991_v40, %v3831_v30  ;;  %v3181_v32 = vmul.f32 %v8333_v18, %v7411_v5  ;;  %v3259_v16 = vmul.f32 %v8333_v18, %v7371_v51  ;;  %v4604_v0 = vsel %vm3331_vm13, %v4602_v63, %v9579_v50 }
 0x247   : > { %v8597_v3 = vmul.f32 %v8336_v39, %v7371_v51  ;;  %v3507_v7 = vmul.f32 %v8333_v18, %v7404_v42  ;;  %v8603_v41 = vmul.f32 %v8336_v39, %v7404_v42  ;;  %v8605_v48 = vadd.f32 %v4836_v19, %v4682_v45 }
 0x248   : > { %v4321_v38 = vadd.f32 %v4238_v8, %v4074_v35  ;;  %v4849_v1 = vsel %vm3579_vm14, %v4847_v33, %v9576_v53  ;;  %v3372_v37 = vrot.slane %v3259_v16, 1  ;;  %v3872_v62 = vmul.f32 0.5625, %v8357_v28 }
 0x249   : > { %v9575_v23 = vrot.slane %v8597_v3, 1  ;;  %v3620_v12 = vrot.slane %v3507_v7, 2  ;;  %v9574_v54 = vrot.slane %v8603_v41, 2  ;;  %v8614_v58 = vmul.f32 0.5625, %v8359_v29 }
 0x24a   : > { %v4441_v18 = vadd.f32 %v4409_v49, %v4321_v38  ;;  %v4119_v19 = vmul.f32 %v8357_v28, %v7473_v25  ;;  %v8620_v15 = vmul.f32 %v8359_v29, %v7473_v25  ;;  %v3797_v30 = vmul.f32 %v8357_v28, %v7450_v20 }
 0x24b   : > { %v3374_v40 = vsel %vm3331_vm13, %v3372_v37, %v9575_v23  ;;  %v3622_v52 = vsel %vm3579_vm14, %v3620_v12, %v9574_v54  ;;  %v3984_v63 = vrot.slane %v3872_v62, 1  ;;  %v9578_v49 = vrot.slane %v8614_v58, 1  ;;  %v3136_v37 = vld [vmem:[#allocation3 + $0xe8] sm:$0x3]  ;;  %v5418_v62 = vld [vmem:[#allocation3 + $0x100] sm:$0x3] }
 0x24c   : > { %v4687_v45 = vadd.f32 %v4604_v0, %v4441_v18  ;;  %v3460_v8 = vadd.f32 %v3374_v40, %v3181_v32  ;;  %v4231_v33 = vrot.slane %v4119_v19, 2  ;;  %v9577_v35 = vrot.slane %v8620_v15, 2 }
 0x24d   : > { %v4485_v16 = vmul.f32 %v8535_v11, %v7524_v31  ;;  %v8636_v7 = vmul.f32 %v8538_v59, %v7524_v31  ;;  %v4730_v38 = vmul.f32 %v8535_v11, %v7547_v56  ;;  %v4407_v32 = vmul.f32 %v8535_v11, %v7511_v34 }
 0x24e   : > { %v8640_v28 = vadd.f32 %v4849_v1, %v4687_v45  ;;  %v3708_v0 = vadd.f32 %v3622_v52, %v3460_v8  ;;  %v8646_v12 = vmul.f32 %v8538_v59, %v7547_v56  ;;  %v3986_v18 = vsel %vm3331_vm13, %v3984_v63, %v9578_v49  ;;  %v5466_v8 = vld [vmem:[#allocation3 + $0x118] sm:$0x3] }
 0x24f   : > { %v4597_v19 = vrot.slane %v4485_v16, 1  ;;  %v9581_v40 = vrot.slane %v8636_v7, 1  ;;  %v4842_v54 = vrot.slane %v4730_v38, 2  ;;  %v4233_v1 = vsel %vm3579_vm14, %v4231_v33, %v9577_v35 }
 0x250   : > { %9757 = vst [vmem:[#allocation27_spill] sm:$0xff] %v8640_v28  ;;  %v3829_v23 = vadd.f32 %v3797_v30, %v3708_v0  ;;  %v9583_v52 = vrot.slane %v8646_v12, 2  ;;  %v3264_v45 = vmul.f32 %v7371_v51, %v3136_v37  ;;  %v3184_v63 = vmul.f32 %v8359_v29, %v7411_v5 }
 0x251   : > { %v4599_v53 = vsel %vm3331_vm13, %v4597_v19, %v9581_v40  ;;  %v3512_v16 = vmul.f32 %v7404_v42, %v3136_v37  ;;  %v3877_v38 = vmul.f32 0.5625, %v5418_v62  ;;  %v3800_v33 = vmul.f32 %v8538_v59, %v7450_v20 }
 0x252   : > { %v4072_v30 = vadd.f32 %v3986_v18, %v3829_v23  ;;  %v3380_v0 = vrot.slane %v3264_v45, 1  ;;  %v4124_v35 = vmul.f32 %v5418_v62, %v7473_v25  ;;  %v4844_v49 = vsel %vm3579_vm14, %v4842_v54, %v9583_v52  ;;  %v3133_v45 = vld [vmem:[#allocation3 + $0xd0] sm:$0x3] }
 0x253   : > { %v3628_v50 = vrot.slane %v3512_v16, 2  ;;  %v3992_v9 = vrot.slane %v3877_v38, 1  ;;  %v4490_v19 = vmul.f32 %v5466_v8, %v7524_v31  ;;  %v4735_v18 = vmul.f32 %v5466_v8, %v7547_v56  ;;  %v5415_v38 = vld [vmem:[#allocation3 + $0xe8] sm:$0x3] }
 0x254   : > { %v4319_v40 = vadd.f32 %v4233_v1, %v4072_v30  ;;  %v3381_v37 = vsel %vm3331_vm13, %v3378_v10, %v3380_v0  ;;  %v4239_v23 = vrot.slane %v4124_v35, 2  ;;  %v4410_v54 = vmul.f32 %v8561_v46, %v7511_v34  ;;  %v5463_v30 = vld [vmem:[#allocation3 + $0x100] sm:$0x3] }
 0x255   : > { %v3463_v47 = vadd.f32 %v3381_v37, %v3184_v63  ;;  %v3629_v62 = vsel %vm3579_vm14, %v3626_v27, %v3628_v50  ;;  %v4605_v16 = vrot.slane %v4490_v19, 1  ;;  %v9758_v1 = vrot.slane %v8545_v44, 1 }
 0x256   : > { %v4439_v52 = vadd.f32 %v4407_v32, %v4319_v40  ;;  %v9759_v10 = vrot.slane %v8557_v24, 2  ;;  %v4850_v8 = vrot.slane %v4735_v18, 2  ;;  %v3182_v43 = vmul.f32 %v8336_v39, %v7411_v5 }
 0x257   : > { %v3993_v6 = vsel %vm3331_vm13, %v9758_v1, %v3992_v9  ;;  %v3711_v63 = vadd.f32 %v3629_v62, %v3463_v47  ;;  %v3261_v27 = vmul.f32 %v7371_v51, %v3133_v45  ;;  %v3509_v50 = vmul.f32 %v7404_v42, %v3133_v45 }
 0x258   : > { %v4240_v35 = vsel %vm3579_vm14, %v9759_v10, %v4239_v23  ;;  %v4685_v0 = vadd.f32 %v4599_v53, %v4439_v52  ;;  %v9760_v32 = vrot.slane %v8569_v22, 1  ;;  %v9761_v9 = vrot.slane %v8580_v60, 2 }
 0x259   : > { %v3874_v40 = vmul.f32 0.5625, %v5415_v38  ;;  %v3832_v19 = vadd.f32 %v3800_v33, %v3711_v63  ;;  %v3375_v47 = vrot.slane %v3261_v27, 1  ;;  %v3623_v37 = vrot.slane %v3509_v50, 2 }
 0x25a   : > { %v4606_v44 = vsel %vm3331_vm13, %v9760_v32, %v4605_v16  ;;  %v4851_v24 = vsel %vm3579_vm14, %v9761_v9, %v4850_v8  ;;  %v4121_v39 = vmul.f32 %v5415_v38, %v7473_v25  ;;  %v8696_v23 = vadd.f32 %v4844_v49, %v4685_v0 }
 0x25b   : > { %v3798_v18 = vmul.f32 %v8359_v29, %v7450_v20  ;;  %v3987_v53 = vrot.slane %v3874_v40, 1  ;;  %v4487_v22 = vmul.f32 %v5463_v30, %v7524_v31  ;;  %v4075_v52 = vadd.f32 %v3993_v6, %v3832_v19 }
 0x25c   : > { %9762 = vst [vmem:[#allocation28_spill] sm:$0xff] %v8696_v23  ;;  %v9763_v45 = vrot.slane %v8597_v3, 1  ;;  %v9764_v62 = vrot.slane %v8603_v41, 2  ;;  %v4234_v16 = vrot.slane %v4121_v39, 2  ;;  %v4408_v49 = vmul.f32 %v8538_v59, %v7511_v34 }
 0x25d   : > { %v4600_v38 = vrot.slane %v4487_v22, 1  ;;  %v4732_v29 = vmul.f32 %v5463_v30, %v7547_v56  ;;  %v4322_v10 = vadd.f32 %v4240_v35, %v4075_v52  ;;  %v9765_v8 = vrot.slane %v8614_v58, 1  ;;  %v8742_v52 = vld [vmem:[#allocation3 + $0x128] sm:$0xff] }
 0x25e   : > { %v3376_v60 = vsel %vm3331_vm13, %v9763_v45, %v3375_v47  ;;  %v3624_v33 = vsel %vm3579_vm14, %v9764_v62, %v3623_v37  ;;  %v9766_v3 = vrot.slane %v8620_v15, 2  ;;  %v3268_v41 = vmul.f32 %v8559_v36, %v7371_v51  ;;  %v8739_v37 = vld [vmem:[#allocation3 + $0x120] sm:$0xff] }
 0x25f   : > { %v3461_v1 = vadd.f32 %v3376_v60, %v3182_v43  ;;  %v3988_v6 = vsel %vm3331_vm13, %v9765_v8, %v3987_v53  ;;  %v4845_v43 = vrot.slane %v4732_v29, 2  ;;  %v3187_v50 = vmul.f32 %v8559_v36, %v7411_v5  ;;  %v8763_v8 = vld [vmem:[#allocation3 + $0x138] sm:$0xff] }
 0x260   : > { %v4235_v63 = vsel %vm3579_vm14, %v9766_v3, %v4234_v16  ;;  %v8722_v30 = vmul.f32 %v8561_v46, %v7371_v51  ;;  %v4442_v35 = vadd.f32 %v4410_v54, %v4322_v10  ;;  %v3387_v58 = vrot.slane %v3268_v41, 1 }
 0x261   : > { %v3709_v27 = vadd.f32 %v3624_v33, %v3461_v1  ;;  %v3516_v0 = vmul.f32 %v8559_v36, %v7404_v42  ;;  %v8728_v15 = vmul.f32 %v8561_v46, %v7404_v42  ;;  %v9767_v9 = vrot.slane %v8636_v7, 1 }
 0x262   : > { %v9768_v19 = vrot.slane %v8646_v12, 2  ;;  %v9594_v54 = vrot.slane %v8722_v30, 1  ;;  %v4688_v39 = vadd.f32 %v4606_v44, %v4442_v35  ;;  %v8749_v45 = vmul.f32 0.5625, %v8742_v52 }
 0x263   : > { %v3830_v32 = vadd.f32 %v3798_v18, %v3709_v27  ;;  %v4601_v40 = vsel %vm3331_vm13, %v9767_v9, %v4600_v38  ;;  %v3635_v53 = vrot.slane %v3516_v0, 2  ;;  %v9591_v22 = vrot.slane %v8728_v15, 2 }
 0x264   : > { %v8736_v47 = vsel %vm3579_vm14, %v9768_v19, %v4845_v43  ;;  %v3881_v18 = vmul.f32 0.5625, %v8739_v37  ;;  %v3389_v12 = vsel %vm3331_vm13, %v3387_v58, %v9594_v54  ;;  %v4128_v60 = vmul.f32 %v8739_v37, %v7473_v25 }
 0x265   : > { %v4073_v7 = vadd.f32 %v3988_v6, %v3830_v32  ;;  %v3466_v62 = vadd.f32 %v3389_v12, %v3187_v50  ;;  %v3637_v44 = vsel %vm3579_vm14, %v3635_v53, %v9591_v22  ;;  %v3803_v33 = vmul.f32 %v8739_v37, %v7450_v20  ;;  %v8765_v6 = vld [vmem:[#allocation3 + $0x140] sm:$0xff] }
 0x266   : > { %v3999_v16 = vrot.slane %v3881_v18, 1  ;;  %v9590_v38 = vrot.slane %v8749_v45, 1  ;;  %v8761_v29 = vmul.f32 %v8742_v52, %v7473_v25  ;;  %v4246_v10 = vrot.slane %v4128_v60, 2 }
 0x267   : > { %v4320_v1 = vadd.f32 %v4235_v63, %v4073_v7  ;;  %v8767_v3 = vadd.f32 %v4851_v24, %v4688_v39  ;;  %v3714_v41 = vadd.f32 %v3637_v44, %v3466_v62  ;;  %v4494_v27 = vmul.f32 %v8763_v8, %v7524_v31 }
 0x268   : > { %v8773_v63 = vmul.f32 %v8765_v6, %v7524_v31  ;;  %v4001_v50 = vsel %vm3331_vm13, %v3999_v16, %v9590_v38  ;;  %v9589_v35 = vrot.slane %v8761_v29, 2  ;;  %v4739_v58 = vmul.f32 %v8763_v8, %v7547_v56 }
 0x269   : > { %9769 = vst [vmem:[#allocation29_spill] sm:$0xff] %v8767_v3  ;;  %v4440_v43 = vadd.f32 %v4408_v49, %v4320_v1  ;;  %v3835_v24 = vadd.f32 %v3803_v33, %v3714_v41  ;;  %v4612_v0 = vrot.slane %v4494_v27, 1  ;;  %v8784_v9 = vmul.f32 %v8765_v6, %v7547_v56 }
 0x26a   : > { %v9586_v32 = vrot.slane %v8773_v63, 1  ;;  %v4248_v19 = vsel %vm3579_vm14, %v4246_v10, %v9589_v35  ;;  %v4413_v39 = vmul.f32 %v8763_v8, %v7511_v34  ;;  %v4857_v53 = vrot.slane %v4739_v58, 2 }
 0x26b   : > { %v4686_v49 = vadd.f32 %v4601_v40, %v4440_v43  ;;  %v4078_v18 = vadd.f32 %v4001_v50, %v3835_v24  ;;  %v9585_v40 = vrot.slane %v8784_v9, 2  ;;  %v3185_v7 = vmul.f32 %v8535_v11, %v7411_v5 }
 0x26c   : > { %v3265_v12 = vmul.f32 %v8535_v11, %v7371_v51 }
 0x26d   : > { %6109 = shalt.err (!%p6106_p5)
}
 0x26e   : > { %s6110_s12 = scalar_lea.hbm %s8796_s23, 2048  ;;  %s6114_s18 = scalar_lea.hbm %s9533_s6, 4096 }
 0x26f   : > { %p6111_p6 = scmp.ne.s32.totalorder %s8796_s23, %s6110_s12  ;;  %p6115_p10 = scmp.lt.u32.totalorder %s8796_s23, %s9533_s6 }
 0x270   : > { %p6116_p11 = scmp.lt.u32.totalorder %s6114_s18, %s6110_s12  ;;  %p6118_p13 = scmp.lt.u32.totalorder %s6110_s12, %s8796_s23 }
 0x271   : > { %p6112_p7 = pnand %p6111_p6, %p6266_p4 }
 0x272   : > { %p6117_p12 = por %p6116_p11, %p6115_p10 }
 0x273   : > { %p6113_p9 = pneg %p6112_p7 }
 0x274   : > { %p6119_p0 = por %p6118_p13, %p6117_p12 }
 0x276   : > { %p6120_p1 = pnand %p6119_p0, %p6113_p9 }
 0x278   : > { %6123 = shalt.err (!%p6120_p1)
}
 0x279   : > { %5955 = dma.vmem_to_hbm [thread:$0]  (%p6266_p4), %s8798_s22, 2048, %s8796_s23, %s8807_s27, %s6178_s16, %s6178_s16, %s6179_s21   ;;  %v4614_v60 = vsel %vm3331_vm13, %v4612_v0, %v9586_v32  ;;  %v8839_v62 = vmul.f32 %v8538_v59, %v7371_v51  ;;  %v3513_v44 = vmul.f32 %v8535_v11, %v7404_v42  ;;  %v8845_v33 = vmul.f32 %v8538_v59, %v7404_v42  ;;  %v5478_v28 = vld [vmem:[#allocation3 + $0x178] sm:$0x3] }
 0x27a   : > { %v8848_v16 = vadd.f32 %v8736_v47, %v4686_v49  ;;  %v4325_v1 = vadd.f32 %v4248_v19, %v4078_v18  ;;  %v4859_v10 = vsel %vm3579_vm14, %v4857_v53, %v9585_v40  ;;  %v3382_v41 = vrot.slane %v3265_v12, 1  ;;  %s9789_s15 = sshll.u32 %s6286_s17, 8 }
 0x27b   : > { %v9588_v27 = vrot.slane %v8839_v62, 1  ;;  %v3630_v43 = vrot.slane %v3513_v44, 2  ;;  %v9587_v50 = vrot.slane %v8845_v33, 2  ;;  %v3878_v11 = vmul.f32 0.5625, %v8559_v36  ;;  %s9112_s23 = scalar_lea.vmem %s9534_s7, %s9789_s15 }
 0x27c   : > { %9770 = vst [vmem:[#allocation30_spill] sm:$0xff] %v8848_v16  ;;  %v4445_v58 = vadd.f32 %v4413_v39, %v4325_v1  ;;  %v8857_v24 = vmul.f32 0.5625, %v8561_v46  ;;  %v4125_v47 = vmul.f32 %v8559_v36, %v7473_v25  ;;  %v8863_v0 = vmul.f32 %v8561_v46, %v7473_v25 }
 0x27d   : > { %v3384_v49 = vsel %vm3331_vm13, %v3382_v41, %v9588_v27  ;;  %v3632_v19 = vsel %vm3579_vm14, %v3630_v43, %v9587_v50  ;;  %v3801_v39 = vmul.f32 %v8559_v36, %v7450_v20  ;;  %v3994_v53 = vrot.slane %v3878_v11, 1  ;;  %v3142_v50 = vld [vmem:[#allocation3 + $0x118] sm:$0x3] }
 0x27e   : > { %v4691_v18 = vadd.f32 %v4614_v60, %v4445_v58  ;;  %v3464_v12 = vadd.f32 %v3384_v49, %v3185_v7  ;;  %v9593_v44 = vrot.slane %v8857_v24, 1  ;;  %v4241_v1 = vrot.slane %v4125_v47, 2  ;;  %v5424_v58 = vld [vmem:[#allocation3 + $0x130] sm:$0x3] }
 0x27f   : > { %v9592_v40 = vrot.slane %v8863_v0, 2  ;;  %v4491_v32 = vmul.f32 %v8739_v37, %v7524_v31  ;;  %v8879_v41 = vmul.f32 %v8742_v52, %v7524_v31  ;;  %v4736_v43 = vmul.f32 %v8739_v37, %v7547_v56 }
 0x280   : > { %v8883_v36 = vadd.f32 %v4859_v10, %v4691_v18  ;;  %v3712_v60 = vadd.f32 %v3632_v19, %v3464_v12  ;;  %v4411_v7 = vmul.f32 %v8739_v37, %v7511_v34  ;;  %v8889_v11 = vmul.f32 %v8742_v52, %v7547_v56  ;;  %v5472_v12 = vld [vmem:[#allocation3 + $0x148] sm:$0x3] }
 0x281   : > { %v3996_v47 = vsel %vm3331_vm13, %v3994_v53, %v9593_v44  ;;  %v4607_v49 = vrot.slane %v4491_v32, 1  ;;  %v9595_v27 = vrot.slane %v8879_v41, 1  ;;  %v4852_v35 = vrot.slane %v4736_v43, 2 }
 0x282   : > { %9771 = vst [vmem:[#allocation31_spill] sm:$0xff] %v8883_v36  ;;  %v3833_v38 = vadd.f32 %v3801_v39, %v3712_v60  ;;  %v4243_v10 = vsel %vm3579_vm14, %v4241_v1, %v9592_v40  ;;  %v9596_v19 = vrot.slane %v8889_v11, 2  ;;  %v3270_v18 = vmul.f32 %v7371_v51, %v3142_v50 }
 0x283   : > { %v4609_v22 = vsel %vm3331_vm13, %v4607_v49, %v9595_v27  ;;  %v3188_v32 = vmul.f32 %v8561_v46, %v7411_v5  ;;  %v3518_v53 = vmul.f32 %v7404_v42, %v3142_v50  ;;  %v3883_v43 = vmul.f32 0.5625, %v5424_v58 }
 0x284   : > { %v4076_v39 = vadd.f32 %v3996_v47, %v3833_v38  ;;  %v3390_v60 = vrot.slane %v3270_v18, 1  ;;  %v3804_v1 = vmul.f32 %v8742_v52, %v7450_v20  ;;  %v4130_v40 = vmul.f32 %v5424_v58, %v7473_v25  ;;  %v3139_v18 = vld [vmem:[#allocation3 + $0x100] sm:$0x3] }
 0x285   : > { %v4854_v44 = vsel %vm3579_vm14, %v4852_v35, %v9596_v19  ;;  %v3638_v54 = vrot.slane %v3518_v53, 2  ;;  %v4002_v36 = vrot.slane %v3883_v43, 1  ;;  %v4496_v49 = vmul.f32 %v5472_v12, %v7524_v31  ;;  %v5421_v43 = vld [vmem:[#allocation3 + $0x118] sm:$0x3] }
 0x286   : > { %v4323_v27 = vadd.f32 %v4243_v10, %v4076_v39  ;;  %v9772_v16 = vrot.slane %v8722_v30, 1  ;;  %v4249_v38 = vrot.slane %v4130_v40, 2  ;;  %v4741_v47 = vmul.f32 %v5472_v12, %v7547_v56 }
 0x287   : > { %v9773_v58 = vrot.slane %v8728_v15, 2  ;;  %v4414_v35 = vmul.f32 %v8765_v6, %v7511_v34  ;;  %v4615_v53 = vrot.slane %v4496_v49, 1  ;;  %v9774_v10 = vrot.slane %v8749_v45, 1 }
 0x288   : > { %v3391_v50 = vsel %vm3331_vm13, %v9772_v16, %v3390_v60  ;;  %v4443_v19 = vadd.f32 %v4411_v7, %v4323_v27  ;;  %v9775_v40 = vrot.slane %v8761_v29, 2  ;;  %v4860_v12 = vrot.slane %v4741_v47, 2  ;;  %v5469_v60 = vld [vmem:[#allocation3 + $0x130] sm:$0x3] }
 0x289   : > { %v3467_v3 = vadd.f32 %v3391_v50, %v3188_v32  ;;  %v3639_v23 = vsel %vm3579_vm14, %v9773_v58, %v3638_v54  ;;  %v4003_v30 = vsel %vm3331_vm13, %v9774_v10, %v4002_v36  ;;  %v3186_v15 = vmul.f32 %v8538_v59, %v7411_v5 }
 0x28a   : > { %v4250_v16 = vsel %vm3579_vm14, %v9775_v40, %v4249_v38  ;;  %v3267_v54 = vmul.f32 %v7371_v51, %v3139_v18  ;;  %v3515_v39 = vmul.f32 %v7404_v42, %v3139_v18  ;;  %v4689_v49 = vadd.f32 %v4609_v22, %v4443_v19 }
 0x28b   : > { %v3715_v32 = vadd.f32 %v3639_v23, %v3467_v3  ;;  %v9776_v27 = vrot.slane %v8773_v63, 1  ;;  %v9777_v36 = vrot.slane %v8784_v9, 2  ;;  %v3880_v7 = vmul.f32 0.5625, %v5421_v43 }
 0x28c   : > { %v3385_v23 = vrot.slane %v3267_v54, 1  ;;  %v3633_v3 = vrot.slane %v3515_v39, 2  ;;  %v4127_v59 = vmul.f32 %v5421_v43, %v7473_v25  ;;  %v8939_v38 = vadd.f32 %v4854_v44, %v4689_v49 }
 0x28d   : > { %v4616_v45 = vsel %vm3331_vm13, %v9776_v27, %v4615_v53  ;;  %v4861_v29 = vsel %vm3579_vm14, %v9777_v36, %v4860_v12  ;;  %v3836_v50 = vadd.f32 %v3804_v1, %v3715_v32  ;;  %v3802_v47 = vmul.f32 %v8561_v46, %v7450_v20 }
 0x28e   : > { %9778 = vst [vmem:[#allocation32_spill] sm:$0xff] %v8939_v38  ;;  %v3997_v22 = vrot.slane %v3880_v7, 1  ;;  %v4493_v63 = vmul.f32 %v5469_v60, %v7524_v31  ;;  %v9779_v18 = vrot.slane %v8839_v62, 1  ;;  %v9780_v58 = vrot.slane %v8845_v33, 2 }
 0x28f   : > { %v4079_v19 = vadd.f32 %v4003_v30, %v3836_v50  ;;  %v4244_v53 = vrot.slane %v4127_v59, 2  ;;  %v4412_v44 = vmul.f32 %v8742_v52, %v7511_v34  ;;  %v4738_v46 = vmul.f32 %v5469_v60, %v7547_v56 }
 0x290   : > { %v3386_v9 = vsel %vm3331_vm13, %v9779_v18, %v3385_v23  ;;  %v3634_v1 = vsel %vm3579_vm14, %v9780_v58, %v3633_v3  ;;  %v4610_v43 = vrot.slane %v4493_v63, 1  ;;  %v9781_v12 = vrot.slane %v8857_v24, 1 }
 0x291   : > { %v3465_v10 = vadd.f32 %v3386_v9, %v3186_v15  ;;  %v4326_v40 = vadd.f32 %v4250_v16, %v4079_v19  ;;  %v9782_v62 = vrot.slane %v8863_v0, 2  ;;  %v3274_v33 = vmul.f32 %v8763_v8, %v7371_v51  ;;  %v8983_v19 = vld [vmem:[#allocation3 + $0x158] sm:$0xff] }
 0x292   : > { %v3998_v30 = vsel %vm3331_vm13, %v9781_v12, %v3997_v22  ;;  %v4855_v15 = vrot.slane %v4738_v46, 2  ;;  %v3191_v39 = vmul.f32 %v8763_v8, %v7411_v5  ;;  %v8965_v60 = vmul.f32 %v8765_v6, %v7371_v51  ;;  %v9004_v12 = vld [vmem:[#allocation3 + $0x168] sm:$0xff] }
 0x293   : > { %v4245_v32 = vsel %vm3579_vm14, %v9782_v62, %v4244_v53  ;;  %v3713_v54 = vadd.f32 %v3634_v1, %v3465_v10  ;;  %v4446_v16 = vadd.f32 %v4414_v35, %v4326_v40  ;;  %v3397_v24 = vrot.slane %v3274_v33, 1  ;;  %v8980_v35 = vld [vmem:[#allocation3 + $0x150] sm:$0xff] }
 0x294   : > { %v3522_v49 = vmul.f32 %v8763_v8, %v7404_v42  ;;  %v8971_v0 = vmul.f32 %v8765_v6, %v7404_v42  ;;  %v9783_v36 = vrot.slane %v8879_v41, 1  ;;  %v9784_v50 = vrot.slane %v8889_v11, 2  ;;  %9785 = vst [vmem:[#allocation33_spill] sm:$0xff] %v8980_v35 }
 0x295   : > { %v3834_v27 = vadd.f32 %v3802_v47, %v3713_v54  ;;  %v9606_v3 = vrot.slane %v8965_v60, 1  ;;  %v4692_v59 = vadd.f32 %v4616_v45, %v4446_v16  ;;  %v3887_v47 = vmul.f32 0.5625, %v8980_v35 }
 0x296   : > { %v4611_v7 = vsel %vm3331_vm13, %v9783_v36, %v4610_v43  ;;  %v4856_v23 = vsel %vm3579_vm14, %v9784_v50, %v4855_v15  ;;  %v3645_v22 = vrot.slane %v3522_v49, 2  ;;  %v9603_v63 = vrot.slane %v8971_v0, 2 }
 0x297   : > { %v4077_v18 = vadd.f32 %v3998_v30, %v3834_v27  ;;  %v3399_v41 = vsel %vm3331_vm13, %v3397_v24, %v9606_v3  ;;  %v8990_v11 = vmul.f32 0.5625, %v8983_v19  ;;  %v4134_v9 = vmul.f32 %v8980_v35, %v7473_v25  ;;  %v9006_v30 = vld [vmem:[#allocation3 + $0x170] sm:$0xff] }
 0x298   : > { %v3470_v58 = vadd.f32 %v3399_v41, %v3191_v39  ;;  %v3647_v45 = vsel %vm3579_vm14, %v3645_v22, %v9603_v63  ;;  %v3807_v1 = vmul.f32 %v8980_v35, %v7450_v20  ;;  %v4009_v53 = vrot.slane %v3887_v47, 1 }
 0x299   : > { %v4324_v10 = vadd.f32 %v4245_v32, %v4077_v18  ;;  %v9602_v43 = vrot.slane %v8990_v11, 1  ;;  %v9002_v46 = vmul.f32 %v8983_v19, %v7473_v25  ;;  %v4256_v40 = vrot.slane %v4134_v9, 2 }
 0x29a   : > { %v9008_v62 = vadd.f32 %v4861_v29, %v4692_v59  ;;  %v3718_v33 = vadd.f32 %v3647_v45, %v3470_v58  ;;  %v4500_v54 = vmul.f32 %v9004_v12, %v7524_v31  ;;  %v9014_v32 = vmul.f32 %v9006_v30, %v7524_v31 }
 0x29b   : > { %v4444_v15 = vadd.f32 %v4412_v44, %v4324_v10  ;;  %v4011_v39 = vsel %vm3331_vm13, %v4009_v53, %v9602_v43  ;;  %v9601_v16 = vrot.slane %v9002_v46, 2  ;;  %v4745_v24 = vmul.f32 %v9004_v12, %v7547_v56 }
 0x29c   : > { %9786 = vst [vmem:[#allocation34_spill] sm:$0xff] %v9008_v62  ;;  %v3839_v29 = vadd.f32 %v3807_v1, %v3718_v33  ;;  %v4622_v49 = vrot.slane %v4500_v54, 1  ;;  %v9600_v27 = vrot.slane %v9014_v32, 1  ;;  %v9025_v36 = vmul.f32 %v9006_v30, %v7547_v56 }
 0x29d   : > { %v4690_v50 = vadd.f32 %v4611_v7, %v4444_v15  ;;  %v4258_v44 = vsel %vm3579_vm14, %v4256_v40, %v9601_v16  ;;  %v4417_v59 = vmul.f32 %v9004_v12, %v7511_v34  ;;  %v4867_v22 = vrot.slane %v4745_v24, 2 }
 0x29e   : > { %v4082_v47 = vadd.f32 %v4011_v39, %v3839_v29  ;;  %v9597_v18 = vrot.slane %v9025_v36, 2  ;;  %v3189_v41 = vmul.f32 %v8739_v37, %v7411_v5  ;;  %v3271_v9 = vmul.f32 %v8739_v37, %v7371_v51 }
 0x29f   : > { %v4624_v7 = vsel %vm3331_vm13, %v4622_v49, %v9600_v27  ;;  %v9042_v58 = vmul.f32 %v8742_v52, %v7371_v51  ;;  %v3519_v45 = vmul.f32 %v8739_v37, %v7404_v42  ;;  %v9048_v1 = vmul.f32 %v8742_v52, %v7404_v42 }
 0x2a0   : > { %v9050_v53 = vadd.f32 %v4856_v23, %v4690_v50  ;;  %v4329_v10 = vadd.f32 %v4258_v44, %v4082_v47  ;;  %v4869_v40 = vsel %vm3579_vm14, %v4867_v22, %v9597_v18  ;;  %v3392_v33 = vrot.slane %v3271_v9, 1  ;;  %v9079_v18 = vld [vmem:[%s9532_s5] ss:$0 sm:$0xff] }
 0x2a1   : > { %v9598_v54 = vrot.slane %v9042_v58, 1  ;;  %v3640_v15 = vrot.slane %v3519_v45, 2  ;;  %v9599_v39 = vrot.slane %v9048_v1, 2  ;;  %v3884_v24 = vmul.f32 0.5625, %v8763_v8 }
 0x2a2   : > { %9787 = vst [vmem:[#allocation35_spill] sm:$0xff] %v9050_v53  ;;  %v4449_v37 = vadd.f32 %v4417_v59, %v4329_v10  ;;  %v9059_v29 = vmul.f32 0.5625, %v8765_v6  ;;  %v4131_v23 = vmul.f32 %v8763_v8, %v7473_v25  ;;  %v9065_v49 = vmul.f32 %v8765_v6, %v7473_v25 }
 0x2a3   : > { %v3394_v50 = vsel %vm3331_vm13, %v3392_v33, %v9598_v54  ;;  %v3642_v44 = vsel %vm3579_vm14, %v3640_v15, %v9599_v39  ;;  %v3805_v59 = vmul.f32 %v8763_v8, %v7450_v20  ;;  %v4004_v22 = vrot.slane %v3884_v24, 1 }
 0x2a4   : > { %v4695_v47 = vadd.f32 %v4624_v7, %v4449_v37  ;;  %v3468_v9 = vadd.f32 %v3394_v50, %v3189_v41  ;;  %v9605_v45 = vrot.slane %v9059_v29, 1  ;;  %v4251_v10 = vrot.slane %v4131_v23, 2  ;;  %v3148_v23 = vld [vmem:[#allocation3 + $0x148] sm:$0x3]  ;;  %v5861_v50 = vpop.f32.mrb[32].mxu1 }
 0x2a5   : > { %v9604_v33 = vrot.slane %v9065_v49, 2  ;;  %v4497_v54 = vmul.f32 %v8980_v35, %v7524_v31  ;;  %v9086_v15 = vmul.f32 %v8983_v19, %v7524_v31  ;;  %v4742_v8 = vmul.f32 %v8980_v35, %v7547_v56 }
 0x2a6   : > { %v9090_v41 = vadd.f32 %v4869_v40, %v4695_v47  ;;  %v3716_v7 = vadd.f32 %v3642_v44, %v3468_v9  ;;  %v4415_v24 = vmul.f32 %v8980_v35, %v7511_v34  ;;  %v9096_v37 = vmul.f32 %v8983_v19, %v7547_v56  ;;  %v2978_v9 = vpop.f32.mrb[33].mxu1 }
 0x2a7   : > { %v4006_v39 = vsel %vm3331_vm13, %v4004_v22, %v9605_v45  ;;  %v4253_v27 = vsel %vm3579_vm14, %v4251_v10, %v9604_v33  ;;  %v4617_v40 = vrot.slane %v4497_v54, 1  ;;  %v4618_v44 = vrot.slane %v9086_v15, 1  ;;  %v5862_v10 = vpop.f32.mrb[34].mxu1 }
 0x2a8   : > { %9788 = vst [vmem:[#allocation36_spill] sm:$0xff] %v9090_v41  ;;  %v2987_v47 = vadd.f32 %v5861_v50, %v9079_v18  ;;  %v3837_v16 = vadd.f32 %v3805_v59, %v3716_v7  ;;  %v4862_v43 = vrot.slane %v4742_v8, 2  ;;  %v2979_v22 = vadd.f32 %v9079_v18, %v2978_v9  ;;  %v5430_v8 = vld [vmem:[#allocation3 + $0x160] sm:$0x3]  ;;  %v9790_v7 = vld [vmem:[#allocation20_spill] sm:$0xff]  ;;  %v2981_v3 = vpop.f32.mrb[35].mxu1 }
 0x2a9   : > { %v3192_v54 = vmul.f32 %v8765_v6, %v7411_v5  ;;  %v3276_v50 = vmul.f32 %v7371_v51, %v3148_v23  ;;  %v3524_v59 = vmul.f32 %v7404_v42, %v3148_v23  ;;  %v2990_v45 = vadd.f32 %v5862_v10, %v9079_v18  ;;  %v9791_v41 = vld [vmem:[#allocation22_spill] sm:$0xff]  ;;  %v9792_v23 = vld [vmem:[#allocation23_spill] sm:$0xff] }
 0x2aa   : > { %v4948_v33 = vadd.f32 %v9790_v7, %v2987_v47  ;;  %v4080_v63 = vadd.f32 %v4006_v39, %v3837_v16  ;;  %v4619_v9 = vsel %vm3331_vm13, %v4617_v40, %v4618_v44  ;;  %v4946_v53 = vadd.f32 %v9791_v41, %v2979_v22  ;;  %v9794_v40 = vld [vmem:[#allocation24_spill] sm:$0xff] }
 0x2ab   : > { %v2982_v62 = vadd.f32 %v9079_v18, %v2981_v3  ;;  %v3400_v38 = vrot.slane %v3276_v50, 1  ;;  %v3648_v35 = vrot.slane %v3524_v59, 2  ;;  %v4949_v47 = vadd.f32 %v9792_v23, %v2990_v45 }
 0x2ac   : > { %4981 = vst.msk [vmem:[%s9112_s23 + $0x10] sm:$0xff] %vm1606_vm11, %v4948_v33  ;;  %v4327_v7 = vadd.f32 %v4253_v27, %v4080_v63  ;;  %v9793_v10 = vrot.slane %v9096_v37, 2  ;;  %v3889_v39 = vmul.f32 0.5625, %v5430_v8  ;;  %4979 = vst.msk [vmem:[%s9112_s23] sm:$0xff] %vm1606_vm11, %v4946_v53  ;;  %v9795_v3 = vrot.slane %v8965_v60, 1 }
 0x2ad   : > { %v4947_v41 = vadd.f32 %v9794_v40, %v2982_v62  ;;  %v9796_v33 = vrot.slane %v8971_v0, 2  ;;  %v4136_v63 = vmul.f32 %v5430_v8, %v7473_v25  ;;  %4982 = vst.msk [vmem:[%s9112_s23 + $0x18] sm:$0xff] %vm1606_vm11, %v4949_v47  ;;  %v3808_v45 = vmul.f32 %v8983_v19, %v7450_v20  ;;  %v5865_v62 = vpop.f32.mrb[36].mxu1 }
 0x2ae   : > { %v4864_v16 = vsel %vm3579_vm14, %v4862_v43, %v9793_v10  ;;  %v3401_v22 = vsel %vm3331_vm13, %v9795_v3, %v3400_v38  ;;  %v4447_v27 = vadd.f32 %v4415_v24, %v4327_v7  ;;  %v4012_v53 = vrot.slane %v3889_v39, 1  ;;  %v2994_v8 = vpop.f32.mrb[37].mxu1  ;;  %v3145_v3 = vld [vmem:[#allocation3 + $0x130] sm:$0x3] }
 0x2af   : > { %v3649_v50 = vsel %vm3579_vm14, %v9796_v33, %v3648_v35  ;;  %v3471_v43 = vadd.f32 %v3401_v22, %v3192_v54  ;;  %4980 = vst.msk [vmem:[%s9112_s23 + $0x8] sm:$0xff] %vm1606_vm11, %v4947_v41  ;;  %v4259_v60 = vrot.slane %v4136_v63, 2  ;;  %v4418_v38 = vmul.f32 %v9006_v30, %v7511_v34  ;;  %v5866_v7 = vpop.f32.mrb[38].mxu1 }
 0x2b0   : > { %v4502_v0 = vmul.f32 %v5478_v28, %v7524_v31  ;;  %v4747_v35 = vmul.f32 %v5478_v28, %v7547_v56  ;;  %v3003_v59 = vadd.f32 %v5865_v62, %v9079_v18  ;;  %v4693_v24 = vadd.f32 %v4619_v9, %v4447_v27  ;;  %v9798_v28 = vld [vmem:[#allocation26_spill] sm:$0xff]  ;;  %v2997_v33 = vpop.f32.mrb[39].mxu1 }
 0x2b1   : > { %v3719_v54 = vadd.f32 %v3649_v50, %v3471_v43  ;;  %v3190_v23 = vmul.f32 %v8742_v52, %v7411_v5  ;;  %v2995_v47 = vadd.f32 %v9079_v18, %v2994_v8  ;;  %v9797_v10 = vrot.slane %v8990_v11, 1  ;;  %v5427_v27 = vld [vmem:[#allocation3 + $0x148] sm:$0x3] }
 0x2b2   : > { %v4625_v40 = vrot.slane %v4502_v0, 1  ;;  %v4870_v41 = vrot.slane %v4747_v35, 2  ;;  %v4952_v22 = vadd.f32 %v9798_v28, %v3003_v59  ;;  %v3006_v9 = vadd.f32 %v5866_v7, %v9079_v18  ;;  %v5475_v59 = vld [vmem:[#allocation3 + $0x160] sm:$0x3] }
 0x2b3   : > { %v4013_v39 = vsel %vm3331_vm13, %v9797_v10, %v4012_v53  ;;  %v3840_v50 = vadd.f32 %v3808_v45, %v3719_v54  ;;  %v9799_v52 = vrot.slane %v9002_v46, 2  ;;  %v4950_v11 = vadd.f32 %v8050_v55, %v2995_v47  ;;  %v5869_v10 = vpop.f32.mrb[40].mxu1 }
 0x2b4   : > { %v2998_v43 = vadd.f32 %v9079_v18, %v2997_v33  ;;  %v9166_v53 = vadd.f32 %v4864_v16, %v4693_v24  ;;  %v9800_v62 = vrot.slane %v9014_v32, 1  ;;  %4985 = vst.msk [vmem:[%s9112_s23 + $0x30] sm:$0xff] %vm1606_vm11, %v4952_v22  ;;  %v4953_v45 = vadd.f32 %v8107_v13, %v3006_v9 }
 0x2b5   : > { %v4260_v63 = vsel %vm3579_vm14, %v9799_v52, %v4259_v60  ;;  %v4083_v46 = vadd.f32 %v4013_v39, %v3840_v50  ;;  %v3273_v60 = vmul.f32 %v7371_v51, %v3145_v3  ;;  %v3521_v35 = vmul.f32 %v7404_v42, %v3145_v3  ;;  %4983 = vst.msk [vmem:[%s9112_s23 + $0x20] sm:$0xff] %vm1606_vm11, %v4950_v11  ;;  %v3010_v3 = vpop.f32.mrb[41].mxu1 }
 0x2b6   : > { %v4626_v0 = vsel %vm3331_vm13, %v9800_v62, %v4625_v40  ;;  %v4951_v55 = vadd.f32 %v8155_v14, %v2998_v43  ;;  %v9801_v16 = vrot.slane %v9025_v36, 2  ;;  %v3886_v8 = vmul.f32 0.5625, %v5427_v27  ;;  %4986 = vst.msk [vmem:[%s9112_s23 + $0x38] sm:$0xff] %vm1606_vm11, %v4953_v45  ;;  %v5870_v52 = vpop.f32.mrb[42].mxu1 }
 0x2b7   : > { %v4133_v24 = vmul.f32 %v5427_v27, %v7473_v25  ;;  %v4330_v13 = vadd.f32 %v4260_v63, %v4083_v46  ;;  %v3395_v54 = vrot.slane %v3273_v60, 1  ;;  %v3643_v47 = vrot.slane %v3521_v35, 2 }
 0x2b8   : > { %v4871_v32 = vsel %vm3579_vm14, %v9801_v16, %v4870_v41  ;;  %v3806_v7 = vmul.f32 %v8765_v6, %v7450_v20  ;;  %4984 = vst.msk [vmem:[%s9112_s23 + $0x28] sm:$0xff] %vm1606_vm11, %v4951_v55  ;;  %v4007_v39 = vrot.slane %v3886_v8, 1  ;;  %v4499_v36 = vmul.f32 %v5475_v59, %v7524_v31  ;;  %v9224_v16 = vld [vmem:[#allocation3 + $0x188] sm:$0xff] }
 0x2b9   : > { %v4254_v14 = vrot.slane %v4133_v24, 2  ;;  %v9191_v40 = vmul.f32 %v5475_v59, %v7547_v56  ;;  %v3019_v41 = vadd.f32 %v5869_v10, %v9079_v18  ;;  %v4450_v28 = vadd.f32 %v4418_v38, %v4330_v13  ;;  %v9213_v59 = vld [vmem:[#allocation3 + $0x180] sm:$0xff] }
 0x2ba   : > { %v9802_v22 = vrot.slane %v9042_v58, 1  ;;  %v9803_v6 = vrot.slane %v9048_v1, 2  ;;  %v3011_v50 = vadd.f32 %v9079_v18, %v3010_v3  ;;  %v9804_v27 = vrot.slane %v9059_v29, 1  ;;  %v3013_v1 = vpop.f32.mrb[43].mxu1 }
 0x2bb   : > { %v4416_v38 = vmul.f32 %v8983_v19, %v7511_v34  ;;  %v4956_v58 = vadd.f32 %v8254_v26, %v3019_v41  ;;  %v3022_v43 = vadd.f32 %v5870_v52, %v9079_v18  ;;  %v4696_v62 = vadd.f32 %v4626_v0, %v4450_v28  ;;  %v5873_v13 = vpop.f32.mrb[44].mxu1 }
 0x2bc   : > { %v3396_v9 = vsel %vm3331_vm13, %v9802_v22, %v3395_v54  ;;  %v3644_v33 = vsel %vm3579_vm14, %v9803_v6, %v3643_v47  ;;  %v4008_v11 = vsel %vm3331_vm13, %v9804_v27, %v4007_v39  ;;  %v4620_v45 = vrot.slane %v4499_v36, 1 }
 0x2bd   : > { %v3469_v63 = vadd.f32 %v3396_v9, %v3190_v23  ;;  %v4954_v46 = vadd.f32 %v8294_v21, %v3011_v50  ;;  %v3014_v23 = vadd.f32 %v9079_v18, %v3013_v1  ;;  %v9805_v29 = vrot.slane %v9065_v49, 2  ;;  %4989 = vst.msk [vmem:[%s9112_s23 + $0x50] sm:$0xff] %vm1606_vm11, %v4956_v58 }
 0x2be   : > { %v4957_v26 = vadd.f32 %v8361_v57, %v3022_v43  ;;  %v9218_v55 = vadd.f32 %v4871_v32, %v4696_v62  ;;  %v4621_v21 = vsel %vm3331_vm13, %v4618_v44, %v4620_v45  ;;  %v4865_v0 = vrot.slane %v9191_v40, 2  ;;  %v9268_v62 = vld [vmem:[#allocation3 + $0x1a0] sm:$0xff] }
 0x2bf   : > { %v3717_v60 = vadd.f32 %v3644_v33, %v3469_v63  ;;  %v4255_v35 = vsel %vm3579_vm14, %v9805_v29, %v4254_v14  ;;  %4987 = vst.msk [vmem:[%s9112_s23 + $0x40] sm:$0xff] %vm1606_vm11, %v4954_v46  ;;  %v4955_v49 = vadd.f32 %v8403_v2, %v3014_v23  ;;  %v3195_v24 = vmul.f32 %v9004_v12, %v7411_v5  ;;  %v3026_v14 = vpop.f32.mrb[45].mxu1 }
 0x2c0   : > { %v3280_v57 = vmul.f32 %v9004_v12, %v7371_v51  ;;  %4990 = vst.msk [vmem:[%s9112_s23 + $0x58] sm:$0xff] %vm1606_vm11, %v4957_v26  ;;  %v9237_v15 = vmul.f32 %v9006_v30, %v7371_v51  ;;  %v3528_v44 = vmul.f32 %v9004_v12, %v7404_v42  ;;  %v9243_v32 = vmul.f32 %v9006_v30, %v7404_v42  ;;  %v5874_v28 = vpop.f32.mrb[46].mxu1 }
 0x2c1   : > { %v3838_v8 = vadd.f32 %v3806_v7, %v3717_v60  ;;  %v3811_v2 = vmul.f32 %v9213_v59, %v7450_v20  ;;  %4988 = vst.msk [vmem:[%s9112_s23 + $0x48] sm:$0xff] %vm1606_vm11, %v4955_v49  ;;  %v3893_v7 = vmul.f32 0.5625, %v9213_v59  ;;  %v9251_v10 = vmul.f32 0.5625, %v9224_v16  ;;  %v3029_v52 = vpop.f32.mrb[47].mxu1 }
 0x2c2   : > { %v3407_v47 = vrot.slane %v3280_v57, 1  ;;  %v3035_v39 = vadd.f32 %v5873_v13, %v9079_v18  ;;  %v3408_v36 = vrot.slane %v9237_v15, 1  ;;  %v3655_v40 = vrot.slane %v3528_v44, 2 }
 0x2c3   : > { %v4081_v54 = vadd.f32 %v4008_v11, %v3838_v8  ;;  %v3656_v41 = vrot.slane %v9243_v32, 2  ;;  %v3027_v3 = vadd.f32 %v9079_v18, %v3026_v14  ;;  %v4019_v9 = vrot.slane %v3893_v7, 1 }
 0x2c4   : > { %v4020_v6 = vrot.slane %v9251_v10, 1  ;;  %v4960_v33 = vadd.f32 %v8438_v17, %v3035_v39  ;;  %v3038_v50 = vadd.f32 %v5874_v28, %v9079_v18  ;;  %v3409_v63 = vsel %vm3331_vm13, %v3407_v47, %v3408_v36  ;;  %v5482_v17 = vld [vmem:[#allocation3 + $0x198] sm:$0xff]  ;;  %v9807_v28 = vld [vmem:[#allocation27_spill] sm:$0xff] }
 0x2c5   : > { %v4328_v22 = vadd.f32 %v4255_v35, %v4081_v54  ;;  %v3657_v27 = vsel %vm3579_vm14, %v3655_v40, %v3656_v41  ;;  %v4958_v11 = vadd.f32 %v8494_v4, %v3027_v3  ;;  %v3030_v58 = vadd.f32 %v9079_v18, %v3029_v52 }
 0x2c6   : > { %v3474_v1 = vadd.f32 %v3409_v63, %v3195_v24  ;;  %4993 = vst.msk [vmem:[%s9112_s23 + $0x70] sm:$0xff] %vm1606_vm11, %v4960_v33  ;;  %v4961_v45 = vadd.f32 %v8563_v61, %v3038_v50  ;;  %v9806_v46 = vrot.slane %v9096_v37, 2  ;;  %v4140_v4 = vmul.f32 %v9213_v59, %v7473_v25  ;;  %v9808_v63 = vld [vmem:[#allocation28_spill] sm:$0xff] }
 0x2c7   : > { %v4448_v43 = vadd.f32 %v4416_v38, %v4328_v22  ;;  %v9280_v60 = vmul.f32 %v9224_v16, %v7473_v25  ;;  %4991 = vst.msk [vmem:[%s9112_s23 + $0x60] sm:$0xff] %vm1606_vm11, %v4958_v11  ;;  %v4959_v38 = vadd.f32 %v8605_v48, %v3030_v58  ;;  %v4021_v61 = vsel %vm3331_vm13, %v4019_v9, %v4020_v6  ;;  %v5877_v48 = vpop.f32.mrb[48].mxu1 }
 0x2c8   : > { %v4866_v23 = vsel %vm3579_vm14, %v9806_v46, %v4865_v0  ;;  %v3722_v35 = vadd.f32 %v3657_v27, %v3474_v1  ;;  %4994 = vst.msk [vmem:[%s9112_s23 + $0x78] sm:$0xff] %vm1606_vm11, %v4961_v45  ;;  %v4266_v37 = vrot.slane %v4140_v4, 2  ;;  %v4506_v0 = vmul.f32 %v5482_v17, %v7524_v31  ;;  %v3042_v13 = vpop.f32.mrb[49].mxu1 }
 0x2c9   : > { %v4694_v29 = vadd.f32 %v4621_v21, %v4448_v43  ;;  %v4267_v26 = vrot.slane %v9280_v60, 2  ;;  %v9294_v49 = vmul.f32 %v9268_v62, %v7524_v31  ;;  %4992 = vst.msk [vmem:[%s9112_s23 + $0x68] sm:$0xff] %vm1606_vm11, %v4959_v38  ;;  %v4421_v8 = vmul.f32 %v5482_v17, %v7511_v34  ;;  %v5878_v39 = vpop.f32.mrb[50].mxu1  ;;  %v9809_v43 = vld [vmem:[#allocation33_spill] sm:$0xff]  ;;  %v9811_v38 = vld [vmem:[#allocation30_spill] sm:$0xff] }
 0x2ca   : > { %v3843_v21 = vadd.f32 %v3811_v2, %v3722_v35  ;;  %v4751_v24 = vmul.f32 %v5482_v17, %v7547_v56  ;;  %v9302_v57 = vmul.f32 %v9268_v62, %v7547_v56  ;;  %v3051_v44 = vadd.f32 %v5877_v48, %v9079_v18  ;;  %v3045_v33 = vpop.f32.mrb[51].mxu1  ;;  %v9810_v17 = vld [vmem:[#allocation29_spill] sm:$0xff] }
 0x2cb   : > { %v4268_v54 = vsel %vm3579_vm14, %v4266_v37, %v4267_v26  ;;  %v4632_v47 = vrot.slane %v4506_v0, 1  ;;  %v4633_v7 = vrot.slane %v9294_v49, 1  ;;  %v3043_v2 = vadd.f32 %v9079_v18, %v3042_v13 }
 0x2cc   : > { %v4086_v14 = vadd.f32 %v4021_v61, %v3843_v21  ;;  %v4877_v40 = vrot.slane %v4751_v24, 2  ;;  %v4878_v3 = vrot.slane %v9302_v57, 2  ;;  %v4964_v22 = vadd.f32 %v9807_v28, %v3051_v44 }
 0x2cd   : > { %v3054_v9 = vadd.f32 %v5878_v39, %v9079_v18  ;;  %v9313_v50 = vadd.f32 %v4866_v23, %v4694_v29  ;;  %v4634_v52 = vsel %vm3331_vm13, %v4632_v47, %v4633_v7  ;;  %v4962_v27 = vadd.f32 %v9808_v63, %v3043_v2 }
 0x2ce   : > { %v3046_v11 = vadd.f32 %v9079_v18, %v3045_v33  ;;  %v4333_v58 = vadd.f32 %v4268_v54, %v4086_v14  ;;  %v3193_v1 = vmul.f32 %v9809_v43, %v7411_v5  ;;  %4997 = vst.msk [vmem:[%s9112_s23 + $0x90] sm:$0xff] %vm1606_vm11, %v4964_v22  ;;  %v3277_v46 = vmul.f32 %v9809_v43, %v7371_v51 }
 0x2cf   : > { %v4965_v45 = vadd.f32 %v9810_v17, %v3054_v9  ;;  %v9329_v23 = vmul.f32 %v8983_v19, %v7371_v51  ;;  %v3525_v4 = vmul.f32 %v9809_v43, %v7404_v42  ;;  %4995 = vst.msk [vmem:[%s9112_s23 + $0x80] sm:$0xff] %vm1606_vm11, %v4962_v27  ;;  %v9339_v61 = vsel %vm3579_vm14, %v4877_v40, %v4878_v3  ;;  %v9812_v27 = vld [vmem:[#allocation31_spill] sm:$0xff] }
 0x2d0   : > { %v4963_v29 = vadd.f32 %v9811_v38, %v3046_v11  ;;  %v4453_v35 = vadd.f32 %v4421_v8, %v4333_v58  ;;  %v9343_v37 = vmul.f32 %v8983_v19, %v7404_v42  ;;  %v3402_v0 = vrot.slane %v3277_v46, 1  ;;  %v5881_v8 = vpop.f32.mrb[52].mxu1  ;;  %v9813_v46 = vld [vmem:[#allocation32_spill] sm:$0xff] }
 0x2d1   : > { %4998 = vst.msk [vmem:[%s9112_s23 + $0x98] sm:$0xff] %vm1606_vm11, %v4965_v45  ;;  %v3403_v48 = vrot.slane %v9329_v23, 1  ;;  %v3650_v21 = vrot.slane %v3525_v4, 2  ;;  %v3890_v24 = vmul.f32 0.5625, %v9004_v12  ;;  %v3809_v13 = vmul.f32 %v9004_v12, %v7450_v20  ;;  %v3058_v39 = vpop.f32.mrb[53].mxu1 }
 0x2d2   : > { %4996 = vst.msk [vmem:[%s9112_s23 + $0x88] sm:$0xff] %vm1606_vm11, %v4963_v29  ;;  %v3651_v44 = vrot.slane %v9343_v37, 2  ;;  %v9355_v54 = vmul.f32 0.5625, %v9006_v30  ;;  %v4137_v47 = vmul.f32 %v9004_v12, %v7473_v25  ;;  %v3067_v2 = vadd.f32 %v5881_v8, %v9079_v18  ;;  %v5882_v9 = vpop.f32.mrb[54].mxu1  ;;  %v9814_v29 = vld [vmem:[#allocation34_spill] sm:$0xff] }
 0x2d3   : > { %v3404_v14 = vsel %vm3331_vm13, %v3402_v0, %v3403_v48  ;;  %v4014_v40 = vrot.slane %v3890_v24, 1  ;;  %v9365_v28 = vmul.f32 %v9006_v30, %v7473_v25  ;;  %v3059_v22 = vadd.f32 %v9079_v18, %v3058_v39  ;;  %v3061_v43 = vpop.f32.mrb[55].mxu1  ;;  %v3154_v8 = vld [vmem:[#allocation3 + $0x178] sm:$0x3] }
 0x2d4   : > { %v9368_v33 = vadd.f32 %v4634_v52, %v4453_v35  ;;  %v3472_v63 = vadd.f32 %v3404_v14, %v3193_v1  ;;  %v3652_v12 = vsel %vm3579_vm14, %v3650_v21, %v3651_v44  ;;  %v4968_v11 = vadd.f32 %v9812_v27, %v3067_v2 }
 0x2d5   : > { %v3070_v58 = vadd.f32 %v5882_v9, %v9079_v18  ;;  %v4015_v17 = vrot.slane %v9355_v54, 1  ;;  %v4261_v45 = vrot.slane %v4137_v47, 2  ;;  %v4966_v4 = vadd.f32 %v9813_v46, %v3059_v22  ;;  %v9815_v47 = vld [vmem:[#allocation35_spill] sm:$0xff] }
 0x2d6   : > { %v3062_v52 = vadd.f32 %v9079_v18, %v3061_v43  ;;  %v3720_v38 = vadd.f32 %v3652_v12, %v3472_v63  ;;  %v9609_v1 = vrot.slane %v9365_v28, 2  ;;  %5001 = vst.msk [vmem:[%s9112_s23 + $0xb0] sm:$0xff] %vm1606_vm11, %v4968_v11  ;;  %v4419_v21 = vmul.f32 %v9213_v59, %v7511_v34  ;;  %v5885_v12 = vpop.f32.mrb[56].mxu1 }
 0x2d7   : > { %v4969_v35 = vadd.f32 %v9814_v29, %v3070_v58  ;;  %v4016_v0 = vsel %vm3331_vm13, %v4014_v40, %v4015_v17  ;;  %v4503_v24 = vmul.f32 %v9213_v59, %v7524_v31  ;;  %4999 = vst.msk [vmem:[%s9112_s23 + $0xa0] sm:$0xff] %vm1606_vm11, %v4966_v4  ;;  %v9397_v22 = vmul.f32 %v9224_v16, %v7524_v31 }
 0x2d8   : > { %v4967_v2 = vadd.f32 %v9815_v47, %v3062_v52  ;;  %v3841_v39 = vadd.f32 %v3809_v13, %v3720_v38  ;;  %v4263_v14 = vsel %vm3579_vm14, %v4261_v45, %v9609_v1  ;;  %v4748_v9 = vmul.f32 %v9213_v59, %v7547_v56  ;;  %v3074_v59 = vpop.f32.mrb[57].mxu1  ;;  %v9816_v47 = vld [vmem:[#allocation36_spill] sm:$0xff] }
 0x2d9   : > { %5002 = vst.msk [vmem:[%s9112_s23 + $0xb8] sm:$0xff] %vm1606_vm11, %v4969_v35  ;;  %v4627_v40 = vrot.slane %v4503_v24, 1  ;;  %v9405_v63 = vmul.f32 %v9224_v16, %v7547_v56  ;;  %v3196_v13 = vmul.f32 %v9006_v30, %v7411_v5  ;;  %v4628_v11 = vrot.slane %v9397_v22, 1  ;;  %v5886_v29 = vpop.f32.mrb[58].mxu1 }
 0x2da   : > { %5000 = vst.msk [vmem:[%s9112_s23 + $0xa8] sm:$0xff] %vm1606_vm11, %v4967_v2  ;;  %v4084_v27 = vadd.f32 %v4016_v0, %v3841_v39  ;;  %v3282_v58 = vmul.f32 %v7371_v51, %v3154_v8  ;;  %v3530_v43 = vmul.f32 %v7404_v42, %v3154_v8  ;;  %v3083_v45 = vadd.f32 %v5885_v12, %v9079_v18  ;;  %v5436_v8 = vld [vmem:[#allocation3 + $0x190] sm:$0x3] }
 0x2db   : > { %v4872_v46 = vrot.slane %v4748_v9, 2  ;;  %v4873_v4 = vrot.slane %v9405_v63, 2  ;;  %v3812_v52 = vmul.f32 %v9224_v16, %v7450_v20  ;;  %v3075_v38 = vadd.f32 %v9079_v18, %v3074_v59  ;;  %v3077_v9 = vpop.f32.mrb[59].mxu1 }
 0x2dc   : > { %v4331_v35 = vadd.f32 %v4263_v14, %v4084_v27  ;;  %v4629_v0 = vsel %vm3331_vm13, %v4627_v40, %v4628_v11  ;;  %v3410_v24 = vrot.slane %v3282_v58, 1  ;;  %v4972_v2 = vadd.f32 %v9816_v47, %v3083_v45  ;;  %v5484_v58 = vld [vmem:[#allocation3 + $0x1a8] sm:$0x3] }
 0x2dd   : > { %v3086_v39 = vadd.f32 %v5886_v29, %v9079_v18  ;;  %v4874_v12 = vsel %vm3579_vm14, %v4872_v46, %v4873_v4  ;;  %v3658_v59 = vrot.slane %v3530_v43, 2  ;;  %v4970_v14 = vadd.f32 %v9166_v53, %v3075_v38  ;;  %v3151_v53 = vld [vmem:[#allocation3 + $0x160] sm:$0x3] }
 0x2de   : > { %v3078_v27 = vadd.f32 %v9079_v18, %v3077_v9  ;;  %v4451_v1 = vadd.f32 %v4419_v21, %v4331_v35  ;;  %v3411_v40 = vsel %vm3331_vm13, %v3408_v36, %v3410_v24  ;;  %5005 = vst.msk [vmem:[%s9112_s23 + $0xd0] sm:$0xff] %vm1606_vm11, %v4972_v2  ;;  %v3895_v46 = vmul.f32 0.5625, %v5436_v8 }
 0x2df   : > { %v4973_v45 = vadd.f32 %v9218_v55, %v3086_v39  ;;  %v3475_v29 = vadd.f32 %v3411_v40, %v3196_v13  ;;  %v3659_v43 = vsel %vm3579_vm14, %v3656_v41, %v3658_v59  ;;  %5003 = vst.msk [vmem:[%s9112_s23 + $0xc0] sm:$0xff] %vm1606_vm11, %v4970_v14  ;;  %v4142_v36 = vmul.f32 %v5436_v8, %v7473_v25  ;;  %v5889_v41 = vpop.f32.mrb[60].mxu1 }
 0x2e0   : > { %v4971_v21 = vadd.f32 %v9313_v50, %v3078_v27  ;;  %v4697_v15 = vadd.f32 %v4629_v0, %v4451_v1  ;;  %v4944_v38 = vadd.f32 %v9339_v61, %v9368_v33  ;;  %v4022_v13 = vrot.slane %v3895_v46, 1  ;;  %v3090_v0 = vpop.f32.mrb[61].mxu1 }
 0x2e1   : > { %5006 = vst.msk [vmem:[%s9112_s23 + $0xd8] sm:$0xff] %vm1606_vm11, %v4973_v45  ;;  %v3723_v55 = vadd.f32 %v3659_v43, %v3475_v29  ;;  %v4508_v32 = vmul.f32 %v5484_v58, %v7524_v31  ;;  %v4269_v24 = vrot.slane %v4142_v36, 2  ;;  %v4753_v47 = vmul.f32 %v5484_v58, %v7547_v56  ;;  %v5890_v39 = vpop.f32.mrb[62].mxu1 }
 0x2e2   : > { %5004 = vst.msk [vmem:[%s9112_s23 + $0xc8] sm:$0xff] %vm1606_vm11, %v4971_v21  ;;  %v4942_v35 = vadd.f32 %v4874_v12, %v4697_v15  ;;  %v3279_v50 = vmul.f32 %v7371_v51, %v3151_v53  ;;  %v3099_v1 = vadd.f32 %v5889_v41, %v9079_v18  ;;  %v4023_v61 = vsel %vm3331_vm13, %v4020_v6, %v4022_v13  ;;  %v3093_v14 = vpop.f32.mrb[63].mxu1 }
 0x2e3   : > { %v3844_v8 = vadd.f32 %v3812_v52, %v3723_v55  ;;  %v3194_v33 = vmul.f32 %v8983_v19, %v7411_v5  ;;  %v3091_v2 = vadd.f32 %v9079_v18, %v3090_v0  ;;  %v4270_v9 = vsel %vm3579_vm14, %v4267_v26, %v4269_v24  ;;  %v5433_v5 = vld [vmem:[#allocation3 + $0x178] sm:$0x3] }
 0x2e4   : > { %v4635_v51 = vrot.slane %v4508_v32, 1  ;;  %v3405_v12 = vrot.slane %v3279_v50, 1  ;;  %v4976_v59 = vadd.f32 %v4944_v38, %v3099_v1  ;;  %v3102_v52 = vadd.f32 %v5890_v39, %v9079_v18 }
 0x2e5   : > { %v4087_v10 = vadd.f32 %v4023_v61, %v3844_v8  ;;  %v4422_v6 = vmul.f32 %v9268_v62, %v7511_v34  ;;  %v4974_v19 = vadd.f32 %v4942_v35, %v3091_v2  ;;  %v4880_v27 = vrot.slane %v4753_v47, 2 }
 0x2e6   : > { %v3094_v40 = vadd.f32 %v9079_v18, %v3093_v14  ;;  %v3406_v60 = vsel %vm3331_vm13, %v3403_v48, %v3405_v12  ;;  %5009 = vst.msk [vmem:[%s9112_s23 + $0xf0] sm:$0xff] %vm1606_vm11, %v4976_v59  ;;  %v3527_v58 = vmul.f32 %v7404_v42, %v3151_v53  ;;  %v4636_v62 = vsel %vm3331_vm13, %v4633_v7, %v4635_v51  ;;  %v5481_v18 = vld [vmem:[#allocation3 + $0x190] sm:$0x3] }
 0x2e7   : > { %v4334_v26 = vadd.f32 %v4270_v9, %v4087_v10  ;;  %5007 = vst.msk [vmem:[%s9112_s23 + $0xe0] sm:$0xff] %vm1606_vm11, %v4974_v19  ;;  %v3473_v45 = vadd.f32 %v3406_v60, %v3194_v33  ;;  %v3892_v29 = vmul.f32 0.5625, %v5433_v5  ;;  %v4139_v43 = vmul.f32 %v5433_v5, %v7473_v25 }
 0x2e8   : > { %v3653_v23 = vrot.slane %v3527_v58, 2  ;;  %v4881_v48 = vsel %vm3579_vm14, %v4878_v3, %v4880_v27  ;;  %v3810_v42 = vmul.f32 %v9006_v30, %v7450_v20  ;;  %v4505_v25 = vmul.f32 %v5481_v18, %v7524_v31 }
 0x2e9   : > { %v4454_v46 = vadd.f32 %v4422_v6, %v4334_v26  ;;  %v4017_v53 = vrot.slane %v3892_v29, 1  ;;  %v4264_v7 = vrot.slane %v4139_v43, 2  ;;  %v4750_v3 = vmul.f32 %v5481_v18, %v7547_v56 }
 0x2ea   : > { %v3654_v49 = vsel %vm3579_vm14, %v3651_v44, %v3653_v23  ;;  %v9817_v38 = vrot.slane %v9365_v28, 2  ;;  %v4630_v55 = vrot.slane %v4505_v25, 1  ;;  %v4420_v31 = vmul.f32 %v9224_v16, %v7511_v34 }
 0x2eb   : > { %v4700_v21 = vadd.f32 %v4636_v62, %v4454_v46  ;;  %v3721_v15 = vadd.f32 %v3654_v49, %v3473_v45  ;;  %v4018_v57 = vsel %vm3331_vm13, %v4015_v17, %v4017_v53  ;;  %v4875_v13 = vrot.slane %v4750_v3, 2 }
 0x2ec   : > { %v4265_v37 = vsel %vm3579_vm14, %v9817_v38, %v4264_v7  ;;  %v4631_v56 = vsel %vm3331_vm13, %v4628_v11, %v4630_v55 }
 0x2ed   : > { %v4945_v36 = vadd.f32 %v4881_v48, %v4700_v21  ;;  %v3842_v20 = vadd.f32 %v3810_v42, %v3721_v15  ;;  %v4876_v28 = vsel %vm3579_vm14, %v4873_v4, %v4875_v13 }
 0x2ef   : > { %v4977_v30 = vadd.f32 %v4945_v36, %v3102_v52  ;;  %v4085_v44 = vadd.f32 %v4018_v57, %v3842_v20 }
 0x2f1   : > { %5010 = vst.msk [vmem:[%s9112_s23 + $0xf8] sm:$0xff] %vm1606_vm11, %v4977_v30  ;;  %v4332_v54 = vadd.f32 %v4265_v37, %v4085_v44 }
 0x2f3   : > { %v4452_v17 = vadd.f32 %v4420_v31, %v4332_v54 }
 0x2f5   : > { %v4698_v32 = vadd.f32 %v4631_v56, %v4452_v17 }
 0x2f7   : > { %v4943_v41 = vadd.f32 %v4876_v28, %v4698_v32 }
 0x2f9   : > { %v4975_v35 = vadd.f32 %v4943_v41, %v3094_v40 }
 0x2fb   : > { %5008 = vst.msk [vmem:[%s9112_s23 + $0xe8] sm:$0xff] %vm1606_vm11, %v4975_v35 }
 0x2fc PF: > { %p5961_p4 = scmp.ge.s32.totalorder %s6174_s29, 2  ;;  %s5057_s17 = sand.u32 1, %s6154_s24  }
 0x2fd   : > { %s5058_s27 = scalar_lea.sflag [#allocation5], %s5057_s17 }
 0x2fe   : > { %p5958_p2 = pnand %p5961_p4, %p6273_p8 }
 0x300   : > { %6149 = dma.done.wait (!%p5958_p2), %s5058_s27, 2048  }
 0x301   : > { %6151 = vsyncadd (!%p5958_p2), %s5058_s27, 4294965248  ;;  %s21_s29 = sadd.s32 1, %s6174_s29   ;;  %s9818_s24 = smov %s6158_s25 }
 0x302   : > { %p18_p3 = scmp.ge.s32.totalorder %s21_s29, 4   ;;  %s9819_s25 = smov %s6162_s26 }
 0x303   : > { %s9820_s26 = smov %s6279_s14  ;;  %s9821_s27 = smov %s6170_s28 }
 0x304   : > { %s9822_s28 = smov %s9824_s9  ;;  %20 = sbr.rel (!%p18_p3) target bundleno = 4 (0x4), region = 107 }
 0x30b   :  { %5076 = vsyncpa [#allocation5], 1 }
 0x30c   :  { %5078 = vsyncpa [#allocation5 + $0x1], 1 }

</bundles_post_ra>
